<compile_context>
chip_gen: v5e
topology: v5e:2x2
jax: 0.10.0
libtpu: 0.0.40
codegen_flags: <defaults>
</compile_context>

<pallas_src>
import functools

import jax
import jax.numpy as jnp
from jax.experimental import pallas as pl
from jax.experimental.pallas import tpu as pltpu


# ----------------------------------------------------------------------------
# helpers
# ----------------------------------------------------------------------------

_SQRT_HALF = 0.7071067811865476


def _erf_f32(x):
    """float32-accurate erf (A&S 7.1.26, |err| <= 1.5e-7) from Mosaic-safe ops."""
    p = 0.3275911
    a1, a2, a3, a4, a5 = (0.254829592, -0.284496736, 1.421413741,
                          -1.453152027, 1.061405429)
    sgn = jnp.where(x >= 0.0, 1.0, -1.0)
    z = jnp.abs(x)
    # EUP approx reciprocal: the divide would otherwise be VALU-heavy.
    t = pl.reciprocal(1.0 + p * z, approx=True)
    poly = ((((a5 * t + a4) * t + a3) * t + a2) * t + a1) * t
    return sgn * (1.0 - poly * jnp.exp(-z * z))


def _gelu_exact(x):
    """nn.GELU() default (erf-based), evaluated in float32."""
    return 0.5 * x * (1.0 + _erf_f32(x * _SQRT_HALF))


def _pick_tm(m):
    # Large sublane-aligned row tile; tail rows handled by pl.cdiv + masking.
    return m if m <= 512 else 512


def _pick_tn(n):
    # Lane-dense output tile (multiple of 128) or the full (small) dimension.
    return n if n <= 1024 else 1024


def _pick_tk(k, cap=2560):
    """Largest multiple of 128 that divides K exactly and is <= cap."""
    if k <= cap:
        return k
    best = k  # fallback: single K block (real Qwen sizes never hit this)
    t = 128
    while t <= cap:
        if k % t == 0:
            best = t
        t += 128
    return best


def _vmem_limit_bytes(tm, tn, tk, x_it, w_it, o_it):
    work = 2 * tm * tk * x_it          # double-buffered activation tiles
    work += 2 * tk * tn * w_it         # double-buffered weight tiles
    work += 2 * tn * 4                 # bias
    work += 2 * tm * tn * o_it         # double-buffered output tiles
    work += tm * tn * 4                # f32 accumulator
    # 1.5x headroom, clamp to 48 MiB (v7x has only 64 MiB physical per TC).
    return int(min(max(int(1.5 * work), 16 * 1024 * 1024), 48 * 1024 * 1024))


# ----------------------------------------------------------------------------
# kernels
# ----------------------------------------------------------------------------

def _rmsnorm_kernel(x_ref, g_ref, o_ref, *, eps):
    """Row-wise RMSNorm over the last axis (context_dim), gamma-scaled."""
    x = x_ref[...].astype(jnp.float32)
    var = jnp.mean(x * x, axis=-1, keepdims=True)
    y = x * jax.lax.rsqrt(var + eps) * g_ref[...].astype(jnp.float32)
    o_ref[...] = y.astype(o_ref.dtype)


def _linear_kernel(x_ref, w_ref, b_ref, o_ref, acc_ref, *, act):
    """One (tm, tn) output tile; K-step = pl.program_id(2).
    matmul -> +bias -> optional exact GELU, f32 accumulation."""
    k_step = pl.program_id(2)

    @pl.when(k_step == 0)
    def _init():
        acc_ref[...] = jnp.zeros_like(acc_ref)

    acc_ref[...] += jnp.dot(x_ref[...], w_ref[...],
                            preferred_element_type=jnp.float32)

    @pl.when(k_step == pl.num_programs(2) - 1)
    def _finalize():
        y = acc_ref[...] + b_ref[...].astype(jnp.float32)
        if act == "gelu":
            y = _gelu_exact(y)
        # Note: padded tail rows/cols of partial blocks may hold garbage in
        # the accumulator; the store below is masked to the valid region.
        o_ref[...] = y.astype(o_ref.dtype)


# ----------------------------------------------------------------------------
# pallas_call wrappers
# ----------------------------------------------------------------------------

def rmsnorm(x, gamma, *, eps=1e-6, out_dtype=jnp.bfloat16, block_rows=1024):
    """Row-wise RMSNorm(x) * gamma, emitted in `out_dtype` (bf16 by default)."""
    s, d = x.shape
    tr = s if s <= block_rows else block_rows
    return pl.pallas_call(
        functools.partial(_rmsnorm_kernel, eps=eps),
        out_shape=jax.ShapeDtypeStruct((s, d), out_dtype),
        grid=(pl.cdiv(s, tr),),
        in_specs=[
            pl.BlockSpec((tr, d), lambda i: (i, 0)),
            pl.BlockSpec((1, d), lambda i: (0, 0)),
        ],
        out_specs=pl.BlockSpec((tr, d), lambda i: (i, 0)),
        compiler_params=pltpu.CompilerParams(
            dimension_semantics=("parallel",)),
    )(x, gamma.reshape(1, d))


def tiled_linear(x, w, b, *, act=None, out_dtype=None):
    """act(x @ w + b) with M/N/K tiling and a float32 VMEM accumulator."""
    m, k = x.shape
    k_w, n = w.shape
    assert k_w == k, (x.shape, w.shape)
    out_dtype = out_dtype if out_dtype is not None else x.dtype
    tm, tn, tk = _pick_tm(m), _pick_tn(n), _pick_tk(k)
    assert k % tk == 0, (k, tk)

    grid = (pl.cdiv(m, tm), pl.cdiv(n, tn), k // tk)
    kernel = functools.partial(_linear_kernel, act=act)
    vmem = _vmem_limit_bytes(
        tm, tn, tk,
        jnp.dtype(x.dtype).itemsize,
        jnp.dtype(w.dtype).itemsize,
        jnp.dtype(out_dtype).itemsize)
    return pl.pallas_call(
        kernel,
        out_shape=jax.ShapeDtypeStruct((m, n), out_dtype),
        grid=grid,
        in_specs=[
            pl.BlockSpec((tm, tk), lambda i, j, kk: (i, kk)),
            pl.BlockSpec((tk, tn), lambda i, j, kk: (kk, j)),
            pl.BlockSpec((1, tn), lambda i, j, kk: (0, j)),
        ],
        out_specs=pl.BlockSpec((tm, tn), lambda i, j, kk: (i, j)),
        scratch_shapes=[pltpu.VMEM((tm, tn), jnp.float32)],
        compiler_params=pltpu.CompilerParams(
            dimension_semantics=("parallel", "parallel", "arbitrary"),
            vmem_limit_bytes=vmem,
        ),
    )(x, w, b.reshape(1, n))


# ----------------------------------------------------------------------------
# Qwen2_5_VisionPatchMerger forward
# ----------------------------------------------------------------------------

def patch_merger_forward(params, x, *, spatial_merge_size=2, eps=1e-6,
                         compute_dtype=jnp.bfloat16):
    """x: (seq, context_dim)  ->  (seq // spatial_merge_size**2, dim)."""
    s, d = x.shape
    m2 = spatial_merge_size ** 2
    assert s % m2 == 0, (s, m2)
    hidden = d * m2

    # bf16 weights in HBM: halves the dominant weight stream and hits the
    # native bf16 MXU rate.  Accumulation stays f32 inside the kernels.
    fc1_w = params["fc1_w"].astype(compute_dtype)
    fc2_w = params["fc2_w"].astype(compute_dtype)

    # Kernel 1: RMSNorm over context_dim, once per token, emitted in bf16.
    xn = rmsnorm(x, params["ln_q_w"], eps=eps, out_dtype=compute_dtype)
    # view(-1, hidden): free row-major reshape outside the kernel.
    xn2 = xn.reshape(s // m2, hidden)

    # Kernel 2: fc1 + bias + exact GELU; intermediate h kept in bf16 to halve
    # the HBM round trip between the two matmul kernels.
    h = tiled_linear(xn2, fc1_w, params["fc1_b"], act="gelu",
                     out_dtype=compute_dtype)
    # Kernel 3: fc2 + bias, final output in the input dtype.
    return tiled_linear(h, fc2_w, params["fc2_b"], act=None, out_dtype=x.dtype)


def _reference_forward(params, x, *, spatial_merge_size=2, eps=1e-6):
    """Pure-JAX (f32, HIGHEST precision) mirror of the PyTorch module."""
    s, d = x.shape
    m2 = spatial_merge_size ** 2
    xf = x.astype(jnp.float32)
    var = jnp.mean(xf * xf, axis=-1, keepdims=True)
    xn = xf * jax.lax.rsqrt(var + eps) * params["ln_q_w"]
    x2 = xn.reshape(s // m2, d * m2)
    h = jnp.dot(x2, params["fc1_w"], precision=jax.lax.Precision.HIGHEST)
    h = jax.nn.gelu(h + params["fc1_b"], approximate=False)
    out = jnp.dot(h, params["fc2_w"], precision=jax.lax.Precision.HIGHEST)
    return out + params["fc2_b"]


# ----------------------------------------------------------------------------
# main
# ----------------------------------------------------------------------------

if __name__ == "__main__":
    # Small but tiling-exercising shapes (real Qwen2.5-VL: context_dim=1280,
    # hidden=5120, dim>=2048 — identical code path, just more tiles).
    context_dim = 64            # merger "context_dim"
    spatial_merge_size = 2
    out_dim = 128               # merger output "dim"
    seq = 1224                  # pre-merge patch tokens (M tail = 306 rows)
    hidden = context_dim * spatial_merge_size ** 2

    key = jax.random.PRNGKey(0)
    kx, k0, k1, k2, k3, k4 = jax.random.split(key, 6)
    x = jax.random.normal(kx, (seq, context_dim), jnp.float32)
    params = dict(
        ln_q_w=1.0 + 0.05 * jax.random.normal(k0, (context_dim,), jnp.float32),
        fc1_w=0.05 * jax.random.normal(k1, (hidden, hidden), jnp.float32),
        fc1_b=0.05 * jax.random.normal(k2, (hidden,), jnp.float32),
        fc2_w=0.05 * jax.random.normal(k3, (hidden, out_dim), jnp.float32),
        fc2_b=0.05 * jax.random.normal(k4, (out_dim,), jnp.float32),
    )

    fwd = jax.jit(functools.partial(
        patch_merger_forward, spatial_merge_size=spatial_merge_size))
    out = jax.block_until_ready(fwd(params, x))

    expected_shape = (seq // spatial_merge_size ** 2, out_dim)
    assert out.shape == expected_shape, (out.shape, expected_shape)
    assert bool(jnp.all(jnp.isfinite(out)))

    ref = jax.block_until_ready(
        _reference_forward(params, x, spatial_merge_size=spatial_merge_size))
    max_err = float(jnp.max(jnp.abs(out.astype(jnp.float32) - ref)))
    # bf16 matmul operands (f32 accumulation) vs HIGHEST-precision f32 ref.
    assert max_err < 5e-2, f"max abs err vs reference: {max_err}"

    print("KERNEL_OK")
</pallas_src>

<mosaic_0001>
module attributes {stable_mosaic.version = 11 : i64} {
  func.func @_rmsnorm_kernel(%arg0: i32, %arg1: memref<1024x64xf32, #tpu.memory_space<vmem>>, %arg2: memref<1x64xf32, #tpu.memory_space<vmem>>, %arg3: memref<1024x64xbf16, #tpu.memory_space<vmem>>) attributes {dimension_semantics = [#tpu.dimension_semantics<parallel>], iteration_bounds = array<i64: 2>, scalar_prefetch = 0 : i64, scratch_operands = 0 : i64, tpu.core_type = #tpu.core_type<tc>, window_params = [{transform_indices = @transform_0, window_bounds = array<i64: 1024, 64>}, {pipeline_mode = #tpu.pipeline_mode<synchronous>, transform_indices = @transform_1, window_bounds = array<i64: 1, 64>}, {transform_indices = @transform_2, window_bounds = array<i64: 1024, 64>}]} {
    %c0 = arith.constant 0 : index
    %c0_0 = arith.constant 0 : index
    %0 = vector.load %arg1[%c0, %c0_0] : memref<1024x64xf32, #tpu.memory_space<vmem>>, vector<1024x64xf32>
    %1 = arith.mulf %0, %0 : vector<1024x64xf32>
    %cst = arith.constant dense<0.000000e+00> : vector<1024xf32>
    %2 = vector.multi_reduction <add>, %1, %cst [1] : vector<1024x64xf32> to vector<1024xf32>
    %3 = vector.shape_cast %2 : vector<1024xf32> to vector<1024x1xf32>
    %cst_1 = arith.constant 6.400000e+01 : f32
    %4 = vector.broadcast %cst_1 : f32 to vector<1024x1xf32>
    %5 = arith.divf %3, %4 : vector<1024x1xf32>
    %cst_2 = arith.constant 9.99999997E-7 : f32
    %6 = vector.broadcast %cst_2 : f32 to vector<1024x1xf32>
    %7 = arith.addf %5, %6 : vector<1024x1xf32>
    %8 = math.rsqrt %7 : vector<1024x1xf32>
    %9 = vector.broadcast %8 : vector<1024x1xf32> to vector<1024x64xf32>
    %10 = arith.mulf %0, %9 : vector<1024x64xf32>
    %c0_3 = arith.constant 0 : index
    %c0_4 = arith.constant 0 : index
    %11 = vector.load %arg2[%c0_3, %c0_4] : memref<1x64xf32, #tpu.memory_space<vmem>>, vector<1x64xf32>
    %12 = vector.broadcast %11 : vector<1x64xf32> to vector<1024x64xf32>
    %13 = arith.mulf %10, %12 : vector<1024x64xf32>
    %14 = arith.truncf %13 : vector<1024x64xf32> to vector<1024x64xbf16>
    %c0_5 = arith.constant 0 : index
    %c0_6 = arith.constant 0 : index
    %15 = vector.load %arg3[%c0_5, %c0_6] : memref<1024x64xbf16, #tpu.memory_space<vmem>>, vector<1024x64xbf16>
    tpu.vector_store %arg3[%c0_5, %c0_6], %14 {strides = array<i32>} : memref<1024x64xbf16, #tpu.memory_space<vmem>>, vector<1024x64xbf16>,
    return
  }
  func.func @transform_0(%arg0: i32) -> (i32, i32) {
    %c0_i32 = arith.constant 0 : i32
    %c0_i32_0 = arith.constant 0 : i32
    return %arg0, %c0_i32 : i32, i32
  }
  func.func @transform_1(%arg0: i32) -> (i32, i32) {
    %c0_i32 = arith.constant 0 : i32
    %c0_i32_0 = arith.constant 0 : i32
    %c0_i32_1 = arith.constant 0 : i32
    return %c0_i32, %c0_i32_0 : i32, i32
  }
  func.func @transform_2(%arg0: i32) -> (i32, i32) {
    %c0_i32 = arith.constant 0 : i32
    %c0_i32_0 = arith.constant 0 : i32
    return %arg0, %c0_i32 : i32, i32
  }
}

module attributes {stable_mosaic.version = 11 : i64} {
  func.func @_linear_kernel(%arg0: i32, %arg1: i32, %arg2: i32, %arg3: memref<306x256xbf16, #tpu.memory_space<vmem>>, %arg4: memref<256x256xbf16, #tpu.memory_space<vmem>>, %arg5: memref<1x256xf32, #tpu.memory_space<vmem>>, %arg6: memref<306x256xbf16, #tpu.memory_space<vmem>>, %arg7: memref<306x256xf32, #tpu.memory_space<vmem>>) attributes {dimension_semantics = [#tpu.dimension_semantics<parallel>, #tpu.dimension_semantics<parallel>, #tpu.dimension_semantics<arbitrary>], iteration_bounds = array<i64: 1, 1, 1>, scalar_prefetch = 0 : i64, scratch_operands = 1 : i64, tpu.core_type = #tpu.core_type<tc>, window_params = [{transform_indices = @transform_0, window_bounds = array<i64: 306, 256>}, {transform_indices = @transform_1, window_bounds = array<i64: 256, 256>}, {transform_indices = @transform_2, window_bounds = array<i64: 1, 256>}, {transform_indices = @transform_3, window_bounds = array<i64: 306, 256>}]} {
    %c0_i32 = arith.constant 0 : i32
    %0 = arith.cmpi eq, %arg2, %c0_i32 : i32
    %1 = arith.extui %0 : i1 to i32
    %c0_i32_0 = arith.constant 0 : i32
    %2 = arith.cmpi ne, %1, %c0_i32_0 : i32
    scf.if %2 {
      %cst_10 = arith.constant 0.000000e+00 : f32
      %12 = vector.broadcast %cst_10 : f32 to vector<306x256xf32>
      %c0_11 = arith.constant 0 : index
      %c0_12 = arith.constant 0 : index
      %13 = vector.load %arg7[%c0_11, %c0_12] : memref<306x256xf32, #tpu.memory_space<vmem>>, vector<306x256xf32>
      tpu.vector_store %arg7[%c0_11, %c0_12], %12 {strides = array<i32>} : memref<306x256xf32, #tpu.memory_space<vmem>>, vector<306x256xf32>,
    } else {
    }
    %c0 = arith.constant 0 : index
    %c0_1 = arith.constant 0 : index
    %3 = vector.load %arg7[%c0, %c0_1] : memref<306x256xf32, #tpu.memory_space<vmem>>, vector<306x256xf32>
    %c0_2 = arith.constant 0 : index
    %c0_3 = arith.constant 0 : index
    %4 = vector.load %arg3[%c0_2, %c0_3] : memref<306x256xbf16, #tpu.memory_space<vmem>>, vector<306x256xbf16>
    %c0_4 = arith.constant 0 : index
    %c0_5 = arith.constant 0 : index
    %5 = vector.load %arg4[%c0_4, %c0_5] : memref<256x256xbf16, #tpu.memory_space<vmem>>, vector<256x256xbf16>
    %cst = arith.constant dense<0.000000e+00> : vector<306x256xf32>
    %6 = tpu.matmul %4, %5, %cst {dimension_numbers = #tpu.dot_dimension_numbers<[1], [0], [0], [1], [0, 0, 1, 1], [], []>} : vector<306x256xbf16>, vector<256x256xbf16>, vector<306x256xf32> -> vector<306x256xf32>
    %7 = arith.addf %3, %6 : vector<306x256xf32>
    %c0_6 = arith.constant 0 : index
    %c0_7 = arith.constant 0 : index
    %8 = vector.load %arg7[%c0_6, %c0_7] : memref<306x256xf32, #tpu.memory_space<vmem>>, vector<306x256xf32>
    tpu.vector_store %arg7[%c0_6, %c0_7], %7 {strides = array<i32>} : memref<306x256xf32, #tpu.memory_space<vmem>>, vector<306x256xf32>,
    %c0_i32_8 = arith.constant 0 : i32
    %9 = arith.cmpi eq, %arg2, %c0_i32_8 : i32
    %10 = arith.extui %9 : i1 to i32
    %c0_i32_9 = arith.constant 0 : i32
    %11 = arith.cmpi ne, %10, %c0_i32_9 : i32
    scf.if %11 {
      %c0_10 = arith.constant 0 : index
      %c0_11 = arith.constant 0 : index
      %12 = vector.load %arg7[%c0_10, %c0_11] : memref<306x256xf32, #tpu.memory_space<vmem>>, vector<306x256xf32>
      %c0_12 = arith.constant 0 : index
      %c0_13 = arith.constant 0 : index
      %13 = vector.load %arg5[%c0_12, %c0_13] : memref<1x256xf32, #tpu.memory_space<vmem>>, vector<1x256xf32>
      %14 = vector.broadcast %13 : vector<1x256xf32> to vector<306x256xf32>
      %15 = arith.addf %12, %14 : vector<306x256xf32>
      %cst_14 = arith.constant 5.000000e-01 : f32
      %16 = vector.broadcast %cst_14 : f32 to vector<306x256xf32>
      %17 = arith.mulf %16, %15 : vector<306x256xf32>
      %cst_15 = arith.constant 0.707106769 : f32
      %18 = vector.broadcast %cst_15 : f32 to vector<306x256xf32>
      %19 = arith.mulf %15, %18 : vector<306x256xf32>
      %cst_16 = arith.constant 0.000000e+00 : f32
      %20 = vector.broadcast %cst_16 : f32 to vector<306x256xf32>
      %21 = arith.cmpf oge, %19, %20 : vector<306x256xf32>
      %cst_17 = arith.constant 1.000000e+00 : f32
      %cst_18 = arith.constant -1.000000e+00 : f32
      %22 = vector.broadcast %cst_17 : f32 to vector<306x256xf32>
      %23 = vector.broadcast %cst_18 : f32 to vector<306x256xf32>
      %24 = arith.select %21, %22, %23 : vector<306x256xi1>, vector<306x256xf32>
      %25 = math.absf %19 : vector<306x256xf32>
      %cst_19 = arith.constant 0.327591091 : f32
      %26 = vector.broadcast %cst_19 : f32 to vector<306x256xf32>
      %27 = arith.mulf %26, %25 : vector<306x256xf32>
      %cst_20 = arith.constant 1.000000e+00 : f32
      %28 = vector.broadcast %cst_20 : f32 to vector<306x256xf32>
      %29 = arith.addf %28, %27 : vector<306x256xf32>
      %30 = tpu.reciprocal %29 {approx = true} : vector<306x256xf32> -> vector<306x256xf32>
      %cst_21 = arith.constant 1.06140542 : f32
      %31 = vector.broadcast %cst_21 : f32 to vector<306x256xf32>
      %32 = arith.mulf %31, %30 : vector<306x256xf32>
      %cst_22 = arith.constant -1.45315206 : f32
      %33 = vector.broadcast %cst_22 : f32 to vector<306x256xf32>
      %34 = arith.addf %32, %33 : vector<306x256xf32>
      %35 = arith.mulf %34, %30 : vector<306x256xf32>
      %cst_23 = arith.constant 1.42141378 : f32
      %36 = vector.broadcast %cst_23 : f32 to vector<306x256xf32>
      %37 = arith.addf %35, %36 : vector<306x256xf32>
      %38 = arith.mulf %37, %30 : vector<306x256xf32>
      %cst_24 = arith.constant -0.284496725 : f32
      %39 = vector.broadcast %cst_24 : f32 to vector<306x256xf32>
      %40 = arith.addf %38, %39 : vector<306x256xf32>
      %41 = arith.mulf %40, %30 : vector<306x256xf32>
      %cst_25 = arith.constant 0.254829586 : f32
      %42 = vector.broadcast %cst_25 : f32 to vector<306x256xf32>
      %43 = arith.addf %41, %42 : vector<306x256xf32>
      %44 = arith.mulf %43, %30 : vector<306x256xf32>
      %cst_26 = arith.constant 0.000000e+00 : f32
      %45 = vector.broadcast %cst_26 : f32 to vector<306x256xf32>
      %46 = arith.subf %45, %25 : vector<306x256xf32>
      %47 = arith.mulf %46, %25 : vector<306x256xf32>
      %48 = math.exp %47 : vector<306x256xf32>
      %49 = arith.mulf %44, %48 : vector<306x256xf32>
      %cst_27 = arith.constant 1.000000e+00 : f32
      %50 = vector.broadcast %cst_27 : f32 to vector<306x256xf32>
      %51 = arith.subf %50, %49 : vector<306x256xf32>
      %52 = arith.mulf %24, %51 : vector<306x256xf32>
      %cst_28 = arith.constant 1.000000e+00 : f32
      %53 = vector.broadcast %cst_28 : f32 to vector<306x256xf32>
      %54 = arith.addf %53, %52 : vector<306x256xf32>
      %55 = arith.mulf %17, %54 : vector<306x256xf32>
      %56 = arith.truncf %55 : vector<306x256xf32> to vector<306x256xbf16>
      %c0_29 = arith.constant 0 : index
      %c0_30 = arith.constant 0 : index
      %57 = vector.load %arg6[%c0_29, %c0_30] : memref<306x256xbf16, #tpu.memory_space<vmem>>, vector<306x256xbf16>
      tpu.vector_store %arg6[%c0_29, %c0_30], %56 {strides = array<i32>} : memref<306x256xbf16, #tpu.memory_space<vmem>>, vector<306x256xbf16>,
    } else {
    }
    return
  }
  func.func @transform_0(%arg0: i32, %arg1: i32, %arg2: i32) -> (i32, i32) {
    %c0_i32 = arith.constant 0 : i32
    return %arg0, %arg2 : i32, i32
  }
  func.func @transform_1(%arg0: i32, %arg1: i32, %arg2: i32) -> (i32, i32) {
    %c0_i32 = arith.constant 0 : i32
    return %arg2, %arg1 : i32, i32
  }
  func.func @transform_2(%arg0: i32, %arg1: i32, %arg2: i32) -> (i32, i32) {
    %c0_i32 = arith.constant 0 : i32
    %c0_i32_0 = arith.constant 0 : i32
    return %c0_i32, %arg1 : i32, i32
  }
  func.func @transform_3(%arg0: i32, %arg1: i32, %arg2: i32) -> (i32, i32) {
    %c0_i32 = arith.constant 0 : i32
    return %arg0, %arg1 : i32, i32
  }
}

module attributes {stable_mosaic.version = 11 : i64} {
  func.func @_linear_kernel(%arg0: i32, %arg1: i32, %arg2: i32, %arg3: memref<306x256xbf16, #tpu.memory_space<vmem>>, %arg4: memref<256x128xbf16, #tpu.memory_space<vmem>>, %arg5: memref<1x128xf32, #tpu.memory_space<vmem>>, %arg6: memref<306x128xf32, #tpu.memory_space<vmem>>, %arg7: memref<306x128xf32, #tpu.memory_space<vmem>>) attributes {dimension_semantics = [#tpu.dimension_semantics<parallel>, #tpu.dimension_semantics<parallel>, #tpu.dimension_semantics<arbitrary>], iteration_bounds = array<i64: 1, 1, 1>, scalar_prefetch = 0 : i64, scratch_operands = 1 : i64, tpu.core_type = #tpu.core_type<tc>, window_params = [{transform_indices = @transform_0, window_bounds = array<i64: 306, 256>}, {transform_indices = @transform_1, window_bounds = array<i64: 256, 128>}, {transform_indices = @transform_2, window_bounds = array<i64: 1, 128>}, {transform_indices = @transform_3, window_bounds = array<i64: 306, 128>}]} {
    %c0_i32 = arith.constant 0 : i32
    %0 = arith.cmpi eq, %arg2, %c0_i32 : i32
    %1 = arith.extui %0 : i1 to i32
    %c0_i32_0 = arith.constant 0 : i32
    %2 = arith.cmpi ne, %1, %c0_i32_0 : i32
    scf.if %2 {
      %cst_10 = arith.constant 0.000000e+00 : f32
      %12 = vector.broadcast %cst_10 : f32 to vector<306x128xf32>
      %c0_11 = arith.constant 0 : index
      %c0_12 = arith.constant 0 : index
      %13 = vector.load %arg7[%c0_11, %c0_12] : memref<306x128xf32, #tpu.memory_space<vmem>>, vector<306x128xf32>
      tpu.vector_store %arg7[%c0_11, %c0_12], %12 {strides = array<i32>} : memref<306x128xf32, #tpu.memory_space<vmem>>, vector<306x128xf32>,
    } else {
    }
    %c0 = arith.constant 0 : index
    %c0_1 = arith.constant 0 : index
    %3 = vector.load %arg7[%c0, %c0_1] : memref<306x128xf32, #tpu.memory_space<vmem>>, vector<306x128xf32>
    %c0_2 = arith.constant 0 : index
    %c0_3 = arith.constant 0 : index
    %4 = vector.load %arg3[%c0_2, %c0_3] : memref<306x256xbf16, #tpu.memory_space<vmem>>, vector<306x256xbf16>
    %c0_4 = arith.constant 0 : index
    %c0_5 = arith.constant 0 : index
    %5 = vector.load %arg4[%c0_4, %c0_5] : memref<256x128xbf16, #tpu.memory_space<vmem>>, vector<256x128xbf16>
    %cst = arith.constant dense<0.000000e+00> : vector<306x128xf32>
    %6 = tpu.matmul %4, %5, %cst {dimension_numbers = #tpu.dot_dimension_numbers<[1], [0], [0], [1], [0, 0, 1, 1], [], []>} : vector<306x256xbf16>, vector<256x128xbf16>, vector<306x128xf32> -> vector<306x128xf32>
    %7 = arith.addf %3, %6 : vector<306x128xf32>
    %c0_6 = arith.constant 0 : index
    %c0_7 = arith.constant 0 : index
    %8 = vector.load %arg7[%c0_6, %c0_7] : memref<306x128xf32, #tpu.memory_space<vmem>>, vector<306x128xf32>
    tpu.vector_store %arg7[%c0_6, %c0_7], %7 {strides = array<i32>} : memref<306x128xf32, #tpu.memory_space<vmem>>, vector<306x128xf32>,
    %c0_i32_8 = arith.constant 0 : i32
    %9 = arith.cmpi eq, %arg2, %c0_i32_8 : i32
    %10 = arith.extui %9 : i1 to i32
    %c0_i32_9 = arith.constant 0 : i32
    %11 = arith.cmpi ne, %10, %c0_i32_9 : i32
    scf.if %11 {
      %c0_10 = arith.constant 0 : index
      %c0_11 = arith.constant 0 : index
      %12 = vector.load %arg7[%c0_10, %c0_11] : memref<306x128xf32, #tpu.memory_space<vmem>>, vector<306x128xf32>
      %c0_12 = arith.constant 0 : index
      %c0_13 = arith.constant 0 : index
      %13 = vector.load %arg5[%c0_12, %c0_13] : memref<1x128xf32, #tpu.memory_space<vmem>>, vector<1x128xf32>
      %14 = vector.broadcast %13 : vector<1x128xf32> to vector<306x128xf32>
      %15 = arith.addf %12, %14 : vector<306x128xf32>
      %c0_14 = arith.constant 0 : index
      %c0_15 = arith.constant 0 : index
      %16 = vector.load %arg6[%c0_14, %c0_15] : memref<306x128xf32, #tpu.memory_space<vmem>>, vector<306x128xf32>
      tpu.vector_store %arg6[%c0_14, %c0_15], %15 {strides = array<i32>} : memref<306x128xf32, #tpu.memory_space<vmem>>, vector<306x128xf32>,
    } else {
    }
    return
  }
  func.func @transform_0(%arg0: i32, %arg1: i32, %arg2: i32) -> (i32, i32) {
    %c0_i32 = arith.constant 0 : i32
    return %arg0, %arg2 : i32, i32
  }
  func.func @transform_1(%arg0: i32, %arg1: i32, %arg2: i32) -> (i32, i32) {
    %c0_i32 = arith.constant 0 : i32
    return %arg2, %arg1 : i32, i32
  }
  func.func @transform_2(%arg0: i32, %arg1: i32, %arg2: i32) -> (i32, i32) {
    %c0_i32 = arith.constant 0 : i32
    %c0_i32_0 = arith.constant 0 : i32
    return %c0_i32, %arg1 : i32, i32
  }
  func.func @transform_3(%arg0: i32, %arg1: i32, %arg2: i32) -> (i32, i32) {
    %c0_i32 = arith.constant 0 : i32
    return %arg0, %arg1 : i32, i32
  }
}

</mosaic_0001>

<bundles_post_ra>
// kernel: patch_merger_forward.5
= control target key start
LH: loop header
LB: loop body
LE: loop exit
PB: predicated region body
PF: predicated region fallthrough
CT: control target
= control target key end

     0   :  { %s1564_s0 = inlined_call_operand.vmem [shape: bf16[306,256], index: 0, kind: input, shape index: {}]   ;;  %s1565_s1 = inlined_call_operand.vmem [shape: bf16[256,128], index: 1, kind: input, shape index: {}]   ;;  %s1566_s2 = inlined_call_operand.vmem [shape: f32[1,128], index: 2, kind: input, shape index: {}]   ;;  %s1567_s3 = inlined_call_operand.hbm [shape: f32[306,128], index: 3, kind: output, shape index: {}]  }
   0x1   :  { %v1158_v0 = vld [vmem:[%s1565_s1 + $0x38] sm:$0xff]  ;;  %v1157_v2 = vld [vmem:[%s1565_s1 + $0x30] sm:$0xff]  ;;  %v1156_v4 = vld [vmem:[%s1565_s1 + $0x28] sm:$0xff] }
   0x2   :  { %v1166_v1 = vld [vmem:[%s1565_s1 + $0x78] sm:$0xff]  ;;  %461 = vmatpush.bf16.msra.mxu0 %v1158_v0  ;;  %1167 = vmatpush.bf16.msra.mxu2 %v1158_v0  ;;  %v1165_v3 = vld [vmem:[%s1565_s1 + $0x70] sm:$0xff]  ;;  %v1164_v5 = vld [vmem:[%s1565_s1 + $0x68] sm:$0xff] }
   0x3   :  { %569 = vmatpush.bf16.msra.mxu1 %v1166_v1  ;;  %1175 = vmatpush.bf16.msra.mxu3 %v1166_v1 }
   0x6   :  { %462 = vmatpush.bf16.msra.mxu0 %v1157_v2  ;;  %1168 = vmatpush.bf16.msra.mxu2 %v1157_v2 }
   0x7   :  { %570 = vmatpush.bf16.msra.mxu1 %v1165_v3  ;;  %1176 = vmatpush.bf16.msra.mxu3 %v1165_v3 }
   0x8   :  { %8 = vsyncpa [#allocation4], 0  ;;  %v1155_v6 = vld [vmem:[%s1565_s1 + $0x20] sm:$0xff]  ;;  %v1154_v8 = vld [vmem:[%s1565_s1 + $0x18] sm:$0xff]  ;;  %s885_s7 = sshll.u32 %s1567_s3, 4  ;;  %s1216_s8 = smov 128   ;;  %s886_s7 = int_to_ptr.hbm [resolvable:$true] %s885_s7 }
   0x9   :  { %v1163_v7 = vld [vmem:[%s1565_s1 + $0x60] sm:$0xff]  ;;  %v1162_v9 = vld [vmem:[%s1565_s1 + $0x58] sm:$0xff]  ;;  %v1153_v10 = vld [vmem:[%s1565_s1 + $0x10] sm:$0xff]  ;;  %s1217_s9 = smov 8  }
   0xa   :  { %463 = vmatpush.bf16.msra.mxu0 %v1156_v4  ;;  %1169 = vmatpush.bf16.msra.mxu2 %v1156_v4  ;;  %v1161_v11 = vld [vmem:[%s1565_s1 + $0x50] sm:$0xff]  ;;  %v1152_v12 = vld [vmem:[%s1565_s1 + $0x8] sm:$0xff]  ;;  %v1151_v14 = vld [vmem:[%s1565_s1] sm:$0xff] }
   0xb   :  { %571 = vmatpush.bf16.msra.mxu1 %v1164_v5  ;;  %1177 = vmatpush.bf16.msra.mxu3 %v1164_v5  ;;  %v1160_v13 = vld [vmem:[%s1565_s1 + $0x48] sm:$0xff]  ;;  %v1159_v15 = vld [vmem:[%s1565_s1 + $0x40] sm:$0xff]  ;;  %v907_v28 = vld [vmem:[%s1564_s0 + $0x10] sm:$0xf] }
   0xc   :  { %v899_v16 = vld [vmem:[%s1564_s0] sm:$0xf]  ;;  %v1114_v17 = vld [vmem:[%s1564_s0 + $0x4] sm:$0xf0]  ;;  %v1113_v20 = vld [vmem:[%s1564_s0 + $0x4] sm:$0xf] }
   0xd   :  { %v979_v18 = vld [vmem:[%s1564_s0 + $0xa0] sm:$0xf]  ;;  %v1134_v19 = vld [vmem:[%s1564_s0 + $0xa4] sm:$0xf0]  ;;  %v901_v21 = vld [vmem:[%s1564_s0 + $0x8] sm:$0xf0]  ;;  %v900_v24 = vor.u32 %v1114_v17, %v899_v16 }
   0xe   :  { %464 = vmatpush.bf16.msra.mxu0 %v1155_v6  ;;  %1170 = vmatpush.bf16.msra.mxu2 %v1155_v6  ;;  %v1133_v22 = vld [vmem:[%s1564_s0 + $0xa4] sm:$0xf]  ;;  %v981_v23 = vld [vmem:[%s1564_s0 + $0xa8] sm:$0xf0]  ;;  %v980_v25 = vor.u32 %v1134_v19, %v979_v18  ;;  %v904_v26 = vor.u32 %v1113_v20, %v901_v21  ;;  %v1116_v29 = vld [vmem:[%s1564_s0 + $0x14] sm:$0xf0] }
   0xf   :  { %572 = vmatpush.bf16.msra.mxu1 %v1163_v7  ;;  %1178 = vmatpush.bf16.msra.mxu3 %v1163_v7  ;;  %v984_v27 = vor.u32 %v1133_v22, %v981_v23  ;;  %v987_v30 = vld [vmem:[%s1564_s0 + $0xb0] sm:$0xf]  ;;  %v1136_v31 = vld [vmem:[%s1564_s0 + $0xb4] sm:$0xf0]  ;;  %v1115_v32 = vld [vmem:[%s1564_s0 + $0x14] sm:$0xf]  ;;  %v908_v36 = vor.u32 %v1116_v29, %v907_v28 }
  0x10   :  { %v909_v33 = vld [vmem:[%s1564_s0 + $0x18] sm:$0xf0]  ;;  %v1135_v34 = vld [vmem:[%s1564_s0 + $0xb4] sm:$0xf]  ;;  %v988_v37 = vor.u32 %v1136_v31, %v987_v30  ;;  %v915_v40 = vld [vmem:[%s1564_s0 + $0x20] sm:$0xf] }
  0x11   :  { %v989_v35 = vld [vmem:[%s1564_s0 + $0xb8] sm:$0xf0]  ;;  %v912_v38 = vor.u32 %v1115_v32, %v909_v33  ;;  %v1118_v41 = vld [vmem:[%s1564_s0 + $0x24] sm:$0xf0]  ;;  %v995_v42 = vld [vmem:[%s1564_s0 + $0xc0] sm:$0xf] }
  0x12   :  { %465 = vmatpush.bf16.msra.mxu0 %v1154_v8  ;;  %1171 = vmatpush.bf16.msra.mxu2 %v1154_v8  ;;  %v992_v39 = vor.u32 %v1135_v34, %v989_v35  ;;  %v1138_v43 = vld [vmem:[%s1564_s0 + $0xc4] sm:$0xf0]  ;;  %v1117_v44 = vld [vmem:[%s1564_s0 + $0x24] sm:$0xf]  ;;  %v917_v45 = vld [vmem:[%s1564_s0 + $0x28] sm:$0xf0]  ;;  %v916_v48 = vor.u32 %v1118_v41, %v915_v40 }
  0x13   :  { %573 = vmatpush.bf16.msra.mxu1 %v1162_v9  ;;  %1179 = vmatpush.bf16.msra.mxu3 %v1162_v9  ;;  %v1137_v46 = vld [vmem:[%s1564_s0 + $0xc4] sm:$0xf]  ;;  %v997_v47 = vld [vmem:[%s1564_s0 + $0xc8] sm:$0xf0]  ;;  %v996_v49 = vor.u32 %v1138_v43, %v995_v42  ;;  %v920_v50 = vor.u32 %v1117_v44, %v917_v45  ;;  %v923_v52 = vld [vmem:[%s1564_s0 + $0x30] sm:$0xf] }
  0x14   :  { %v1000_v51 = vor.u32 %v1137_v46, %v997_v47  ;;  %v1120_v53 = vld [vmem:[%s1564_s0 + $0x34] sm:$0xf0]  ;;  %v1003_v54 = vld [vmem:[%s1564_s0 + $0xd0] sm:$0xf]  ;;  %v1119_v56 = vld [vmem:[%s1564_s0 + $0x34] sm:$0xf] }
  0x15   :  { %v1140_v55 = vld [vmem:[%s1564_s0 + $0xd4] sm:$0xf0]  ;;  %v925_v57 = vld [vmem:[%s1564_s0 + $0x38] sm:$0xf0]  ;;  %v1139_v58 = vld [vmem:[%s1564_s0 + $0xd4] sm:$0xf]  ;;  %v924_v60 = vor.u32 %v1120_v53, %v923_v52 }
  0x16   :  { %466 = vmatpush.bf16.msra.mxu0 %v1153_v10  ;;  %1172 = vmatpush.bf16.msra.mxu2 %v1153_v10  ;;  %v1005_v59 = vld [vmem:[%s1564_s0 + $0xd8] sm:$0xf0]  ;;  %v1004_v61 = vor.u32 %v1140_v55, %v1003_v54  ;;  %v928_v62 = vor.u32 %v1119_v56, %v925_v57  ;;  %v931_v0 = vld [vmem:[%s1564_s0 + $0x40] sm:$0xf]  ;;  %v1122_v1 = vld [vmem:[%s1564_s0 + $0x44] sm:$0xf0] }
  0x17   :  { %574 = vmatpush.bf16.msra.mxu1 %v1161_v11  ;;  %1180 = vmatpush.bf16.msra.mxu3 %v1161_v11  ;;  %v1008_v63 = vor.u32 %v1139_v58, %v1005_v59  ;;  %v1011_v2 = vld [vmem:[%s1564_s0 + $0xe0] sm:$0xf]  ;;  %v1142_v3 = vld [vmem:[%s1564_s0 + $0xe4] sm:$0xf0]  ;;  %v1121_v4 = vld [vmem:[%s1564_s0 + $0x44] sm:$0xf]  ;;  %v932_v8 = vor.u32 %v1122_v1, %v931_v0 }
  0x18   :  { %v933_v5 = vld [vmem:[%s1564_s0 + $0x48] sm:$0xf0]  ;;  %v1141_v6 = vld [vmem:[%s1564_s0 + $0xe4] sm:$0xf]  ;;  %v1012_v9 = vor.u32 %v1142_v3, %v1011_v2  ;;  %v1123_v16 = vld [vmem:[%s1564_s0 + $0x54] sm:$0xf] }
  0x19   :  { %v1013_v7 = vld [vmem:[%s1564_s0 + $0xe8] sm:$0xf0]  ;;  %v936_v10 = vor.u32 %v1121_v4, %v933_v5  ;;  %v941_v17 = vld [vmem:[%s1564_s0 + $0x58] sm:$0xf0]  ;;  %v1143_v18 = vld [vmem:[%s1564_s0 + $0xf4] sm:$0xf] }
  0x1a   :  { %467 = vmatpush.bf16.msra.mxu0 %v1152_v12  ;;  %1173 = vmatpush.bf16.msra.mxu2 %v1152_v12  ;;  %v1016_v11 = vor.u32 %v1141_v6, %v1013_v7  ;;  %v939_v12 = vld [vmem:[%s1564_s0 + $0x50] sm:$0xf]  ;;  %v1021_v19 = vld [vmem:[%s1564_s0 + $0xf8] sm:$0xf0]  ;;  %v944_v22 = vor.u32 %v1123_v16, %v941_v17  ;;  %v1125_v28 = vld [vmem:[%s1564_s0 + $0x64] sm:$0xf] }
  0x1b   :  { %575 = vmatpush.bf16.msra.mxu1 %v1160_v13  ;;  %1181 = vmatpush.bf16.msra.mxu3 %v1160_v13  ;;  %v1124_v13 = vld [vmem:[%s1564_s0 + $0x54] sm:$0xf0]  ;;  %v1024_v23 = vor.u32 %v1143_v18, %v1021_v19  ;;  %v949_v29 = vld [vmem:[%s1564_s0 + $0x68] sm:$0xf0]  ;;  %v1145_v30 = vld [vmem:[%s1564_s0 + $0x104] sm:$0xf] }
  0x1c   :  { %v940_v20 = vor.u32 %v1124_v13, %v939_v12  ;;  %v1029_v31 = vld [vmem:[%s1564_s0 + $0x108] sm:$0xf0]  ;;  %v952_v34 = vor.u32 %v1125_v28, %v949_v29  ;;  %v1148_v40 = vld [vmem:[%s1564_s0 + $0x114] sm:$0xf0]  ;;  %v1127_v41 = vld [vmem:[%s1564_s0 + $0x74] sm:$0xf] }
  0x1d   :  { %v1032_v35 = vor.u32 %v1145_v30, %v1029_v31  ;;  %v957_v42 = vld [vmem:[%s1564_s0 + $0x78] sm:$0xf0]  ;;  %v1147_v43 = vld [vmem:[%s1564_s0 + $0x114] sm:$0xf]  ;;  %v1150_v52 = vld [vmem:[%s1564_s0 + $0x124] sm:$0xf0] }
  0x1e   :  { %468 = vmatpush.bf16.msra.mxu0 %v1151_v14  ;;  %1174 = vmatpush.bf16.msra.mxu2 %v1151_v14  ;;  %v1019_v14 = vld [vmem:[%s1564_s0 + $0xf0] sm:$0xf]  ;;  %v1037_v44 = vld [vmem:[%s1564_s0 + $0x118] sm:$0xf0]  ;;  %v960_v47 = vor.u32 %v1127_v41, %v957_v42  ;;  %v1129_v53 = vld [vmem:[%s1564_s0 + $0x84] sm:$0xf] }
  0x1f   :  { %576 = vmatpush.bf16.msra.mxu1 %v1159_v15  ;;  %1182 = vmatpush.bf16.msra.mxu3 %v1159_v15  ;;  %v1144_v15 = vld [vmem:[%s1564_s0 + $0xf4] sm:$0xf0]  ;;  %v965_v54 = vld [vmem:[%s1564_s0 + $0x88] sm:$0xf0]  ;;  %v1149_v55 = vld [vmem:[%s1564_s0 + $0x124] sm:$0xf] }
  0x20   :  { %v1020_v21 = vor.u32 %v1144_v15, %v1019_v14  ;;  %v1045_v56 = vld [vmem:[%s1564_s0 + $0x128] sm:$0xf0]  ;;  %v1505_v0 = vld [vmem:[%s1566_s2] ss:$0 sm:$0xff]  ;;  %v135_v6 = vld [vmem:[%s1564_s0 + $0x130] sm:$0x11] }
  0x21   :  { %469 = vmatmul.bf16.vlgmr.msra.gmra.mxu0 %v900_v24  ;;  %519 = vmatmul.bf16.vlgmr.msra.gmra.mxu2 %v980_v25  ;;  %v947_v24 = vld [vmem:[%s1564_s0 + $0x60] sm:$0xf]  ;;  %v1126_v25 = vld [vmem:[%s1564_s0 + $0x64] sm:$0xf0]  ;;  %v1132_v12 = vld [vmem:[%s1564_s0 + $0x94] sm:$0xf0]  ;;  %v284_v13 = vunpack.c.h.b16 %v135_v6 }
  0x22   :  { %577 = vmatmul.bf16.vlgmr.msra.gmra.mxu1 %v904_v26  ;;  %627 = vmatmul.bf16.vlgmr.msra.gmra.mxu3 %v984_v27  ;;  %v1027_v26 = vld [vmem:[%s1564_s0 + $0x100] sm:$0xf]  ;;  %v1146_v27 = vld [vmem:[%s1564_s0 + $0x104] sm:$0xf0]  ;;  %v948_v32 = vor.u32 %v1126_v25, %v947_v24  ;;  %v1131_v14 = vld [vmem:[%s1564_s0 + $0x94] sm:$0xf] }
  0x23   :  { %v1028_v33 = vor.u32 %v1146_v27, %v1027_v26  ;;  %v973_v15 = vld [vmem:[%s1564_s0 + $0x98] sm:$0xf0]  ;;  %v324_v24 = vpack.c.b16 %v284_v13, %v284_v13 }
  0x31   :  { %474 = vmatmul.bf16.gmra.mxu0 %v908_v36  ;;  %524 = vmatmul.bf16.gmra.mxu2 %v988_v37  ;;  %v1214_v36 = vmov 0.0   ;;  %v955_v37 = vld [vmem:[%s1564_s0 + $0x70] sm:$0xf] }
  0x32   :  { %582 = vmatmul.bf16.gmra.mxu1 %v912_v38  ;;  %632 = vmatmul.bf16.gmra.mxu3 %v992_v39  ;;  %57 = vst [vmem:[#allocation2 + $0x58] sm:$0x3] %v1214_v36  ;;  %v1128_v38 = vld [vmem:[%s1564_s0 + $0x74] sm:$0xf0]  ;;  %v1035_v39 = vld [vmem:[%s1564_s0 + $0x110] sm:$0xf] }
  0x33   :  { %v956_v45 = vor.u32 %v1128_v38, %v955_v37  ;;  %v1036_v46 = vor.u32 %v1148_v40, %v1035_v39 }
  0x41   :  { %479 = vmatmul.bf16.gmra.mxu0 %v916_v48  ;;  %529 = vmatmul.bf16.gmra.mxu2 %v996_v49  ;;  %v1040_v48 = vor.u32 %v1147_v43, %v1037_v44  ;;  %v963_v49 = vld [vmem:[%s1564_s0 + $0x80] sm:$0xf] }
  0x42   :  { %587 = vmatmul.bf16.gmra.mxu1 %v920_v50  ;;  %637 = vmatmul.bf16.gmra.mxu3 %v1000_v51  ;;  %v1130_v50 = vld [vmem:[%s1564_s0 + $0x84] sm:$0xf0]  ;;  %v1043_v51 = vld [vmem:[%s1564_s0 + $0x120] sm:$0xf] }
  0x43   :  { %v964_v57 = vor.u32 %v1130_v50, %v963_v49  ;;  %v1044_v58 = vor.u32 %v1150_v52, %v1043_v51 }
  0x51   :  { %484 = vmatmul.bf16.gmra.mxu0 %v924_v60  ;;  %534 = vmatmul.bf16.gmra.mxu2 %v1004_v61  ;;  %v968_v60 = vor.u32 %v1129_v53, %v965_v54  ;;  %v1048_v61 = vor.u32 %v1149_v55, %v1045_v56 }
  0x52   :  { %592 = vmatmul.bf16.gmra.mxu1 %v928_v62  ;;  %642 = vmatmul.bf16.gmra.mxu3 %v1008_v63 }
  0x61   :  { %489 = vmatmul.bf16.gmra.mxu0 %v932_v8  ;;  %539 = vmatmul.bf16.gmra.mxu2 %v1012_v9  ;;  %v283_v9 = vunpack.c.l.b16 %v135_v6 }
  0x62   :  { %597 = vmatmul.bf16.gmra.mxu1 %v936_v10  ;;  %647 = vmatmul.bf16.gmra.mxu3 %v1016_v11  ;;  %v971_v11 = vld [vmem:[%s1564_s0 + $0x90] sm:$0xf]  ;;  %s1215_s0 = smov [#allocation3]  }
  0x63   :  { %v972_v19 = vor.u32 %v1132_v12, %v971_v11  ;;  %s883_s4 = sshll.u32 %s1215_s0, 4  ;;  %s884_s4 = int_to_ptr.vmem [resolvable:$true] %s883_s4 }
  0x71   :  { %494 = vmatmul.bf16.gmra.mxu0 %v940_v20  ;;  %544 = vmatmul.bf16.gmra.mxu2 %v1020_v21  ;;  %v323_v20 = vpack.c.b16 %v283_v9, %v283_v9 }
  0x72   :  { %602 = vmatmul.bf16.gmra.mxu1 %v944_v22  ;;  %652 = vmatmul.bf16.gmra.mxu3 %v1024_v23  ;;  %v976_v23 = vor.u32 %v1131_v14, %v973_v15 }
  0x81   :  { %499 = vmatmul.bf16.gmra.mxu0 %v948_v32  ;;  %549 = vmatmul.bf16.gmra.mxu2 %v1028_v33 }
  0x82   :  { %607 = vmatmul.bf16.gmra.mxu1 %v952_v34  ;;  %657 = vmatmul.bf16.gmra.mxu3 %v1032_v35 }
  0x91   :  { %504 = vmatmul.bf16.gmra.mxu0 %v956_v45  ;;  %554 = vmatmul.bf16.gmra.mxu2 %v1036_v46 }
  0x92   :  { %612 = vmatmul.bf16.gmra.mxu1 %v960_v47  ;;  %662 = vmatmul.bf16.gmra.mxu3 %v1040_v48 }
  0x9e   :  { %v470_v59 = vpop.f32.mrf.mxu0 }
  0x9f   :  { %v578_v62 = vpop.f32.mrf.mxu1 }
  0xa0   :  { %v579_v63 = vadd.f32 %v578_v62, %v470_v59 }
  0xa1   :  { %509 = vmatmul.bf16.gmra.mxu0 %v964_v57  ;;  %559 = vmatmul.bf16.gmra.mxu2 %v1044_v58 }
  0xa2   :  { %617 = vmatmul.bf16.gmra.mxu1 %v968_v60  ;;  %667 = vmatmul.bf16.gmra.mxu3 %v1048_v61  ;;  %v801_v1 = vadd.f32 %v1505_v0, %v579_v63 }
  0xa4   :  { %v520_v2 = vpop.f32.mrf.mxu2  ;;  %840 = vst [vmem:[#allocation3] sm:$0xff] %v801_v1 }
  0xa5   :  { %v628_v3 = vpop.f32.mrf.mxu3 }
  0xa6   :  { %v629_v4 = vadd.f32 %v628_v3, %v520_v2  ;;  %v472_v5 = vpop.f32.mrf.mxu0 }
  0xa7   :  { %v580_v7 = vpop.f32.mrf.mxu1 }
  0xa8   :  { %v581_v8 = vadd.f32 %v580_v7, %v472_v5  ;;  %v821_v10 = vadd.f32 %v1505_v0, %v629_v4 }
  0xaa   :  { %860 = vst [vmem:[#allocation3 + $0xa0] sm:$0xff] %v821_v10  ;;  %v802_v16 = vadd.f32 %v1505_v0, %v581_v8 }
  0xac   :  { %v522_v17 = vpop.f32.mrf.mxu2  ;;  %841 = vst [vmem:[#allocation3 + $0x8] sm:$0xff] %v802_v16 }
  0xad   :  { %v630_v18 = vpop.f32.mrf.mxu3 }
  0xae   :  { %v631_v21 = vadd.f32 %v630_v18, %v522_v17  ;;  %v475_v22 = vpop.f32.mrf.mxu0 }
  0xaf   :  { %v583_v25 = vpop.f32.mrf.mxu1 }
  0xb0   :  { %v584_v26 = vadd.f32 %v583_v25, %v475_v22  ;;  %v822_v27 = vadd.f32 %v1505_v0, %v631_v21 }
  0xb1   :  { %514 = vmatmul.bf16.gmra.mxu0 %v972_v19  ;;  %564 = vmatmul.bf16.gmra.mxu2 %v323_v20 }
  0xb2   :  { %622 = vmatmul.bf16.gmra.mxu1 %v976_v23  ;;  %672 = vmatmul.bf16.gmra.mxu3 %v324_v24  ;;  %861 = vst [vmem:[#allocation3 + $0xa8] sm:$0xff] %v822_v27  ;;  %v803_v28 = vadd.f32 %v1505_v0, %v584_v26 }
  0xb4   :  { %v525_v29 = vpop.f32.mrf.mxu2  ;;  %842 = vst [vmem:[#allocation3 + $0x10] sm:$0xff] %v803_v28 }
  0xb5   :  { %v633_v30 = vpop.f32.mrf.mxu3 }
  0xb6   :  { %v634_v31 = vadd.f32 %v633_v30, %v525_v29  ;;  %v477_v32 = vpop.f32.mrf.mxu0 }
  0xb7   :  { %v585_v33 = vpop.f32.mrf.mxu1 }
  0xb8   :  { %v586_v34 = vadd.f32 %v585_v33, %v477_v32  ;;  %v823_v35 = vadd.f32 %v1505_v0, %v634_v31 }
  0xba   :  { %862 = vst [vmem:[#allocation3 + $0xb0] sm:$0xff] %v823_v35  ;;  %v804_v36 = vadd.f32 %v1505_v0, %v586_v34 }
  0xbc   :  { %v527_v37 = vpop.f32.mrf.mxu2  ;;  %843 = vst [vmem:[#allocation3 + $0x18] sm:$0xff] %v804_v36 }
  0xbd   :  { %v635_v38 = vpop.f32.mrf.mxu3 }
  0xbe   :  { %v636_v39 = vadd.f32 %v635_v38, %v527_v37  ;;  %v480_v40 = vpop.f32.mrf.mxu0 }
  0xbf   :  { %v588_v41 = vpop.f32.mrf.mxu1 }
  0xc0   :  { %v589_v42 = vadd.f32 %v588_v41, %v480_v40  ;;  %v824_v43 = vadd.f32 %v1505_v0, %v636_v39 }
  0xc2   :  { %863 = vst [vmem:[#allocation3 + $0xb8] sm:$0xff] %v824_v43  ;;  %v805_v44 = vadd.f32 %v1505_v0, %v589_v42 }
  0xc4   :  { %v530_v45 = vpop.f32.mrf.mxu2  ;;  %844 = vst [vmem:[#allocation3 + $0x20] sm:$0xff] %v805_v44 }
  0xc5   :  { %v638_v46 = vpop.f32.mrf.mxu3 }
  0xc6   :  { %v639_v47 = vadd.f32 %v638_v46, %v530_v45  ;;  %v482_v48 = vpop.f32.mrf.mxu0 }
  0xc7   :  { %v590_v49 = vpop.f32.mrf.mxu1 }
  0xc8   :  { %v591_v50 = vadd.f32 %v590_v49, %v482_v48  ;;  %v825_v51 = vadd.f32 %v1505_v0, %v639_v47 }
  0xca   :  { %864 = vst [vmem:[#allocation3 + $0xc0] sm:$0xff] %v825_v51  ;;  %v806_v52 = vadd.f32 %v1505_v0, %v591_v50 }
  0xcc   :  { %v532_v53 = vpop.f32.mrf.mxu2  ;;  %845 = vst [vmem:[#allocation3 + $0x28] sm:$0xff] %v806_v52 }
  0xcd   :  { %v640_v54 = vpop.f32.mrf.mxu3 }
  0xce   :  { %v641_v55 = vadd.f32 %v640_v54, %v532_v53  ;;  %v485_v56 = vpop.f32.mrf.mxu0 }
  0xcf   :  { %v593_v57 = vpop.f32.mrf.mxu1 }
  0xd0   :  { %v594_v58 = vadd.f32 %v593_v57, %v485_v56  ;;  %v826_v59 = vadd.f32 %v1505_v0, %v641_v55 }
  0xd2   :  { %865 = vst [vmem:[#allocation3 + $0xc8] sm:$0xff] %v826_v59  ;;  %v807_v60 = vadd.f32 %v1505_v0, %v594_v58 }
  0xd4   :  { %v535_v61 = vpop.f32.mrf.mxu2  ;;  %846 = vst [vmem:[#allocation3 + $0x30] sm:$0xff] %v807_v60 }
  0xd5   :  { %v643_v62 = vpop.f32.mrf.mxu3 }
  0xd6   :  { %v644_v63 = vadd.f32 %v643_v62, %v535_v61  ;;  %v487_v1 = vpop.f32.mrf.mxu0 }
  0xd7   :  { %v595_v2 = vpop.f32.mrf.mxu1 }
  0xd8   :  { %v596_v3 = vadd.f32 %v595_v2, %v487_v1  ;;  %v827_v4 = vadd.f32 %v1505_v0, %v644_v63 }
  0xda   :  { %866 = vst [vmem:[#allocation3 + $0xd0] sm:$0xff] %v827_v4  ;;  %v808_v5 = vadd.f32 %v1505_v0, %v596_v3 }
  0xdc   :  { %v537_v6 = vpop.f32.mrf.mxu2  ;;  %847 = vst [vmem:[#allocation3 + $0x38] sm:$0xff] %v808_v5 }
  0xdd   :  { %v645_v7 = vpop.f32.mrf.mxu3 }
  0xde   :  { %v646_v8 = vadd.f32 %v645_v7, %v537_v6  ;;  %v490_v9 = vpop.f32.mrf.mxu0 }
  0xdf   :  { %v598_v10 = vpop.f32.mrf.mxu1 }
  0xe0   :  { %v599_v11 = vadd.f32 %v598_v10, %v490_v9  ;;  %v828_v12 = vadd.f32 %v1505_v0, %v646_v8 }
  0xe2   :  { %867 = vst [vmem:[#allocation3 + $0xd8] sm:$0xff] %v828_v12  ;;  %v809_v13 = vadd.f32 %v1505_v0, %v599_v11 }
  0xe4   :  { %v540_v14 = vpop.f32.mrf.mxu2  ;;  %848 = vst [vmem:[#allocation3 + $0x40] sm:$0xff] %v809_v13 }
  0xe5   :  { %v648_v15 = vpop.f32.mrf.mxu3 }
  0xe6   :  { %v649_v16 = vadd.f32 %v648_v15, %v540_v14  ;;  %v492_v17 = vpop.f32.mrf.mxu0 }
  0xe7   :  { %v600_v18 = vpop.f32.mrf.mxu1 }
  0xe8   :  { %v601_v19 = vadd.f32 %v600_v18, %v492_v17  ;;  %v829_v20 = vadd.f32 %v1505_v0, %v649_v16 }
  0xea   :  { %868 = vst [vmem:[#allocation3 + $0xe0] sm:$0xff] %v829_v20  ;;  %v810_v21 = vadd.f32 %v1505_v0, %v601_v19 }
  0xec   :  { %v542_v22 = vpop.f32.mrf.mxu2  ;;  %849 = vst [vmem:[#allocation3 + $0x48] sm:$0xff] %v810_v21 }
  0xed   :  { %v650_v23 = vpop.f32.mrf.mxu3 }
  0xee   :  { %v651_v24 = vadd.f32 %v650_v23, %v542_v22  ;;  %v495_v25 = vpop.f32.mrf.mxu0 }
  0xef   :  { %v603_v26 = vpop.f32.mrf.mxu1 }
  0xf0   :  { %v604_v27 = vadd.f32 %v603_v26, %v495_v25  ;;  %v830_v28 = vadd.f32 %v1505_v0, %v651_v24 }
  0xf2   :  { %869 = vst [vmem:[#allocation3 + $0xe8] sm:$0xff] %v830_v28  ;;  %v811_v29 = vadd.f32 %v1505_v0, %v604_v27 }
  0xf4   :  { %v545_v30 = vpop.f32.mrf.mxu2  ;;  %850 = vst [vmem:[#allocation3 + $0x50] sm:$0xff] %v811_v29 }
  0xf5   :  { %v653_v31 = vpop.f32.mrf.mxu3 }
  0xf6   :  { %v654_v32 = vadd.f32 %v653_v31, %v545_v30  ;;  %v497_v33 = vpop.f32.mrf.mxu0 }
  0xf7   :  { %v605_v34 = vpop.f32.mrf.mxu1 }
  0xf8   :  { %v606_v35 = vadd.f32 %v605_v34, %v497_v33  ;;  %v831_v36 = vadd.f32 %v1505_v0, %v654_v32  ;;  %v96_v32 = vld [vmem:[#allocation2 + $0x58] sm:$0x3] }
  0xfa   :  { %870 = vst [vmem:[#allocation3 + $0xf0] sm:$0xff] %v831_v36  ;;  %v812_v37 = vadd.f32 %v1505_v0, %v606_v35 }
  0xfc   :  { %v547_v38 = vpop.f32.mrf.mxu2  ;;  %851 = vst [vmem:[#allocation3 + $0x58] sm:$0xff] %v812_v37 }
  0xfd   :  { %v655_v39 = vpop.f32.mrf.mxu3 }
  0xfe   :  { %v656_v40 = vadd.f32 %v655_v39, %v547_v38  ;;  %v500_v41 = vpop.f32.mrf.mxu0 }
  0xff   :  { %v608_v42 = vpop.f32.mrf.mxu1 }
 0x100   :  { %v609_v43 = vadd.f32 %v608_v42, %v500_v41  ;;  %v832_v44 = vadd.f32 %v1505_v0, %v656_v40 }
 0x102   :  { %871 = vst [vmem:[#allocation3 + $0xf8] sm:$0xff] %v832_v44  ;;  %v813_v45 = vadd.f32 %v1505_v0, %v609_v43 }
 0x104   :  { %v550_v46 = vpop.f32.mrf.mxu2  ;;  %852 = vst [vmem:[#allocation3 + $0x60] sm:$0xff] %v813_v45 }
 0x105   :  { %v658_v47 = vpop.f32.mrf.mxu3 }
 0x106   :  { %v659_v48 = vadd.f32 %v658_v47, %v550_v46  ;;  %v502_v49 = vpop.f32.mrf.mxu0 }
 0x107   :  { %v610_v50 = vpop.f32.mrf.mxu1 }
 0x108   :  { %v611_v51 = vadd.f32 %v610_v50, %v502_v49  ;;  %v833_v52 = vadd.f32 %v1505_v0, %v659_v48 }
 0x10a   :  { %872 = vst [vmem:[#allocation3 + $0x100] sm:$0xff] %v833_v52  ;;  %v814_v53 = vadd.f32 %v1505_v0, %v611_v51 }
 0x10c   :  { %v552_v54 = vpop.f32.mrf.mxu2  ;;  %853 = vst [vmem:[#allocation3 + $0x68] sm:$0xff] %v814_v53 }
 0x10d   :  { %v660_v55 = vpop.f32.mrf.mxu3 }
 0x10e   :  { %v661_v56 = vadd.f32 %v660_v55, %v552_v54  ;;  %v505_v57 = vpop.f32.mrf.mxu0 }
 0x10f   :  { %v613_v58 = vpop.f32.mrf.mxu1 }
 0x110   :  { %v614_v59 = vadd.f32 %v613_v58, %v505_v57  ;;  %v834_v60 = vadd.f32 %v1505_v0, %v661_v56 }
 0x112   :  { %873 = vst [vmem:[#allocation3 + $0x108] sm:$0xff] %v834_v60  ;;  %v815_v61 = vadd.f32 %v1505_v0, %v614_v59 }
 0x114   :  { %v555_v62 = vpop.f32.mrf.mxu2  ;;  %854 = vst [vmem:[#allocation3 + $0x70] sm:$0xff] %v815_v61 }
 0x115   :  { %v663_v63 = vpop.f32.mrf.mxu3 }
 0x116   :  { %v664_v1 = vadd.f32 %v663_v63, %v555_v62  ;;  %v507_v2 = vpop.f32.mrf.mxu0 }
 0x117   :  { %v615_v3 = vpop.f32.mrf.mxu1 }
 0x118   :  { %v616_v4 = vadd.f32 %v615_v3, %v507_v2  ;;  %v835_v5 = vadd.f32 %v1505_v0, %v664_v1 }
 0x11a   :  { %874 = vst [vmem:[#allocation3 + $0x110] sm:$0xff] %v835_v5  ;;  %v816_v6 = vadd.f32 %v1505_v0, %v616_v4 }
 0x11c   :  { %v557_v7 = vpop.f32.mrf.mxu2  ;;  %855 = vst [vmem:[#allocation3 + $0x78] sm:$0xff] %v816_v6 }
 0x11d   :  { %v665_v8 = vpop.f32.mrf.mxu3 }
 0x11e   :  { %v666_v9 = vadd.f32 %v665_v8, %v557_v7  ;;  %v510_v10 = vpop.f32.mrf.mxu0 }
 0x11f   :  { %v618_v11 = vpop.f32.mrf.mxu1 }
 0x120   :  { %v619_v12 = vadd.f32 %v618_v11, %v510_v10  ;;  %v836_v13 = vadd.f32 %v1505_v0, %v666_v9 }
 0x122   :  { %875 = vst [vmem:[#allocation3 + $0x118] sm:$0xff] %v836_v13  ;;  %v817_v14 = vadd.f32 %v1505_v0, %v619_v12 }
 0x124   :  { %v560_v15 = vpop.f32.mrf.mxu2  ;;  %856 = vst [vmem:[#allocation3 + $0x80] sm:$0xff] %v817_v14 }
 0x125   :  { %v668_v16 = vpop.f32.mrf.mxu3 }
 0x126   :  { %v669_v17 = vadd.f32 %v668_v16, %v560_v15  ;;  %v512_v18 = vpop.f32.mrf.mxu0 }
 0x127   :  { %v620_v19 = vpop.f32.mrf.mxu1 }
 0x128   :  { %v621_v20 = vadd.f32 %v620_v19, %v512_v18  ;;  %v837_v21 = vadd.f32 %v1505_v0, %v669_v17 }
 0x12a   :  { %876 = vst [vmem:[#allocation3 + $0x120] sm:$0xff] %v837_v21  ;;  %v818_v22 = vadd.f32 %v1505_v0, %v621_v20 }
 0x12c   :  { %v562_v23 = vpop.f32.mrf.mxu2  ;;  %857 = vst [vmem:[#allocation3 + $0x88] sm:$0xff] %v818_v22 }
 0x12d   :  { %v670_v24 = vpop.f32.mrf.mxu3 }
 0x12e   :  { %v671_v25 = vadd.f32 %v670_v24, %v562_v23  ;;  %v515_v26 = vpop.f32.mrf.mxu0 }
 0x12f   :  { %v623_v27 = vpop.f32.mrf.mxu1 }
 0x130   :  { %v624_v28 = vadd.f32 %v623_v27, %v515_v26  ;;  %v838_v29 = vadd.f32 %v1505_v0, %v671_v25 }
 0x132   :  { %877 = vst [vmem:[#allocation3 + $0x128] sm:$0xff] %v838_v29  ;;  %v819_v30 = vadd.f32 %v1505_v0, %v624_v28 }
 0x134   :  { %v565_v31 = vpop.f32.mrf.mxu2  ;;  %858 = vst [vmem:[#allocation3 + $0x90] sm:$0xff] %v819_v30 }
 0x135   :  { %v673_v33 = vpop.f32.mrf.mxu3 }
 0x136   :  { %v674_v34 = vadd.f32 %v673_v33, %v565_v31  ;;  %v517_v35 = vpop.f32.mrf.mxu0 }
 0x137   :  { %v625_v36 = vpop.f32.mrf.mxu1 }
 0x138   :  { %v715_v37 = vadd.f32 %v674_v34, %v96_v32  ;;  %v626_v38 = vadd.f32 %v625_v36, %v517_v35 }
 0x13a   :  { %754 = vst [vmem:[#allocation2 + $0x58] sm:$0x3] %v715_v37  ;;  %v820_v39 = vadd.f32 %v1505_v0, %v626_v38 }
 0x13c   :  { %v567_v40 = vpop.f32.mrf.mxu2  ;;  %859 = vst [vmem:[#allocation3 + $0x98] sm:$0xff] %v820_v39 }
 0x13d   :  { %v675_v41 = vpop.f32.mrf.mxu3 }
 0x141   :  { %v796_v42 = vld [vmem:[#allocation2 + $0x58] sm:$0x3] }
 0x142   :  { %v839_v43 = vadd.f32 %v1505_v0, %v796_v42 }
 0x144   :  { %878 = vst [vmem:[#allocation3 + $0x130] sm:$0x3] %v839_v43 }
 0x145   :  { %891 = dma.vmem_to_hbm [thread:$0]  %s884_s4, 4992, %s886_s7, [#allocation4], %s1216_s8, %s1216_s8, %s1217_s9  }
 0x146   :  { %1212 = dma.done.wait [#allocation4], 4992  }
 0x147   :  { %1213 = vsyncadd [#allocation4], 4294962304 }
 0x148   :  { %896 = vsyncpa [#allocation4], 1 }

// kernel: patch_merger_forward.3
= control target key start
LH: loop header
LB: loop body
LE: loop exit
PB: predicated region body
PF: predicated region fallthrough
CT: control target
= control target key end

     0   :  { %s3802_s9 = smov 0   ;;  %s3804_s10 = smov 0   ;;  %s6925_s0 = inlined_call_operand.vmem [shape: f32[1224,64], index: 0, kind: input, shape index: {}]   ;;  %s6926_s1 = inlined_call_operand.vmem [shape: f32[1,64], index: 1, kind: input, shape index: {}]   ;;  %s6927_s2 = inlined_call_operand.vmem [shape: bf16[1224,64], index: 2, kind: output, shape index: {}]  }
   0x1   :  { %s3806_s11 = smov 0  }
   0x2 LB: > { %s3815_s12 = sadd.s32 4294967295, %s3752_s11   ;;  %s3817_s13 = sadd.s32 1, %s3752_s11   ;;  %s3752_s11 = sphi %s3806_s11, %s6942_s11   ;;  %s3748_s10 = sphi %s3804_s10, %s6941_s10   ;;  %s3744_s9 = sphi %s3802_s9, %s6940_s9  }
   0x3   : > { %s63_s14 = ssub.s32 %s3752_s11, %s3817_s13  ;;  %s66_s15 = sadd.s32 1, %s3748_s10 }
   0x4   : > { %p64_p0 = scmp.eq.s32.totalorder %s63_s14, 0  ;;  %p76_p1 = scmp.ne.s32.totalorder %s3748_s10, %s3744_s9 }
   0x5   : > { %p77_p2 = scmp.eq.s32.totalorder %s3815_s12, 1  ;;  %p3209_p3 = scmp.ge.s32.totalorder %s3752_s11, 1 }
   0x6   : > { %s3825_s16 = scalar_select %p64_p0, %s3748_s10, %s66_s15  }
   0x7   : > { %p3827_p4 = por %p77_p2, %p76_p1  ;;  %p121_p5 = scmp.lt.s32.totalorder %s3752_s11, 3 }
   0x9   : > { %p122_p6 = pnand %p3209_p3, %p121_p5 }
   0xa   : > { %s3832_s18 = sshll.u32 (!%p122_p6), %s3815_s12, 7  ;;  %s143_s24 = sand.u32 (!%p122_p6), 1, %s3744_s9  }
   0xb   : > { %125 = sbr.rel (%p122_p6) target bundleno = 707 (0x2c3), region = 28  ;;  %p151_p7 = scmp.lt.s32.totalorder (!%p122_p6), %s3832_s18, 152 }
   0xc   : > { %s3210_s27 = sshll.u32 (!%p122_p6), %s143_s24, 9 }
   0xd   : > { %s4149_s28 = scalar_lea.vmem (!%p122_p6), [#allocation2], %s3210_s27  }
  0x10   : > { %s152_s19 = scalar_select %p151_p7, %s3832_s18, 152  ;;  %vm421_vm0 = vcmask 523264   ;;  %vm2737_vm7 = vcmask 519168  }
  0x11   : > { %s2874_s9 = ssub.s32 (%p3827_p4), 153, %s3832_s18  ;;  %s3230_s11 = sshll.u32 (%p3827_p4), %s3815_s12, 9 }
  0x12   : > { %s3212_s20 = sshll.u32 %s152_s19, 3  ;;  %p2875_p8 = scmp.lt.s32.totalorder (%p3827_p4), %s2874_s9, 128 }
  0x13   : > { %s3839_s23 = scalar_lea.vmem %s6925_s0, %s3212_s20  ;;  %s6790_s19 = scalar_lea.vmem (%p3827_p4), %s6927_s2, %s3230_s11  }
  0x14   : > { %v3842_v0 = vld [vmem:[%s3839_s23 + $0x20] sm:$0xff]  ;;  %v3845_v1 = vld [vmem:[%s3839_s23 + $0x10] sm:$0xff]  ;;  %v3857_v6 = vld [vmem:[%s3839_s23 + $0x28] sm:$0xff] }
  0x15   : > { %v3848_v2 = vld [vmem:[%s3839_s23] sm:$0xff]  ;;  %v297_v3 = vmul.f32 %v3842_v0, %v3842_v0  ;;  %v295_v4 = vmul.f32 %v3845_v1, %v3845_v1  ;;  %v3860_v7 = vld [vmem:[%s3839_s23 + $0x18] sm:$0xff]  ;;  %v3866_v11 = vld [vmem:[%s3839_s23 + $0x8] sm:$0xff]  ;;  %v298_v12 = vmul.f32 %v3857_v6, %v3857_v6 }
  0x16   : > { %v293_v5 = vmul.f32 %v3848_v2, %v3848_v2  ;;  %v296_v13 = vmul.f32 %v3860_v7, %v3860_v7  ;;  %v294_v14 = vmul.f32 %v3866_v11, %v3866_v11  ;;  %v3878_v18 = vld [vmem:[%s3839_s23 + $0x40] sm:$0xff]  ;;  %v3881_v19 = vld [vmem:[%s3839_s23 + $0x38] sm:$0xff]  ;;  %v3884_v20 = vld [vmem:[%s3839_s23 + $0x30] sm:$0xff] }
  0x17   : > { %v434_v8 = vsel %vm421_vm0, %v297_v3, 0.0  ;;  %v428_v9 = vsel %vm421_vm0, %v295_v4, 0.0  ;;  %v437_v15 = vsel %vm421_vm0, %v298_v12, 0.0  ;;  %v301_v21 = vmul.f32 %v3878_v18, %v3878_v18  ;;  %v3896_v27 = vld [vmem:[%s3839_s23 + $0x58] sm:$0xff]  ;;  %v3899_v28 = vld [vmem:[%s3839_s23 + $0x50] sm:$0xff]  ;;  %v3902_v29 = vld [vmem:[%s3839_s23 + $0x48] sm:$0xff] }
  0x18   : > { %v422_v10 = vsel %vm421_vm0, %v293_v5, 0.0  ;;  %435 = vadd.xlane.f32.xlu2 %v434_v8  ;;  %429 = vadd.xlane.f32.xlu1 %v428_v9  ;;  %v431_v16 = vsel %vm421_vm0, %v296_v13, 0.0  ;;  %v425_v17 = vsel %vm421_vm0, %v294_v14, 0.0  ;;  %v300_v22 = vmul.f32 %v3881_v19, %v3881_v19  ;;  %v3914_v36 = vld [vmem:[%s3839_s23 + $0x70] sm:$0xff]  ;;  %v3917_v37 = vld [vmem:[%s3839_s23 + $0x68] sm:$0xff]  ;;  %v3920_v38 = vld [vmem:[%s3839_s23 + $0x60] sm:$0xff] }
  0x19   : > { %423 = vadd.xlane.f32.xlu0 %v422_v10  ;;  %v299_v23 = vmul.f32 %v3884_v20, %v3884_v20  ;;  %v446_v24 = vsel %vm421_vm0, %v301_v21, 0.0  ;;  %v304_v30 = vmul.f32 %v3896_v27, %v3896_v27  ;;  %v303_v31 = vmul.f32 %v3899_v28, %v3899_v28  ;;  %v182_v45 = vld [vmem:[%s3839_s23 + $0x88] sm:$0xff]  ;;  %v181_v46 = vld [vmem:[%s3839_s23 + $0x80] sm:$0xff]  ;;  %v180_v47 = vld [vmem:[%s3839_s23 + $0x78] sm:$0xff] }
  0x1a   : > { %v443_v25 = vsel %vm421_vm0, %v300_v22, 0.0  ;;  %v302_v32 = vmul.f32 %v3902_v29, %v3902_v29  ;;  %v307_v39 = vmul.f32 %v3914_v36, %v3914_v36  ;;  %v306_v40 = vmul.f32 %v3917_v37, %v3917_v37  ;;  %v185_v54 = vld [vmem:[%s3839_s23 + $0xa0] sm:$0xff]  ;;  %v184_v55 = vld [vmem:[%s3839_s23 + $0x98] sm:$0xff]  ;;  %v183_v56 = vld [vmem:[%s3839_s23 + $0x90] sm:$0xff] }
  0x1b   : > { %v440_v26 = vsel %vm421_vm0, %v299_v23, 0.0  ;;  %v455_v33 = vsel %vm421_vm0, %v304_v30, 0.0  ;;  %v452_v34 = vsel %vm421_vm0, %v303_v31, 0.0  ;;  %v305_v41 = vmul.f32 %v3920_v38, %v3920_v38  ;;  %v188_v63 = vld [vmem:[%s3839_s23 + $0xb8] sm:$0xff]  ;;  %v187_v3 = vld [vmem:[%s3839_s23 + $0xb0] sm:$0xff]  ;;  %v186_v4 = vld [vmem:[%s3839_s23 + $0xa8] sm:$0xff] }
  0x1c   : > { %v449_v35 = vsel %vm421_vm0, %v302_v32, 0.0  ;;  %v464_v42 = vsel %vm421_vm0, %v307_v39, 0.0  ;;  %v461_v43 = vsel %vm421_vm0, %v306_v40, 0.0  ;;  %v310_v48 = vmul.f32 %v182_v45, %v182_v45  ;;  %v191_v14 = vld [vmem:[%s3839_s23 + $0xd0] sm:$0xff]  ;;  %v193_v30 = vld [vmem:[%s3839_s23 + $0xe0] sm:$0xff]  ;;  %v192_v31 = vld [vmem:[%s3839_s23 + $0xd8] sm:$0xff] }
  0x1d   : > { %v458_v44 = vsel %vm421_vm0, %v305_v41, 0.0  ;;  %v309_v49 = vmul.f32 %v181_v46, %v181_v46  ;;  %v308_v50 = vmul.f32 %v180_v47, %v180_v47  ;;  %v313_v57 = vmul.f32 %v185_v54, %v185_v54  ;;  %v197_v41 = vld [vmem:[%s3839_s23 + $0x100] sm:$0xff] }
  0x1e   : > { %v473_v51 = vsel %vm421_vm0, %v310_v48, 0.0  ;;  %v312_v58 = vmul.f32 %v184_v55, %v184_v55  ;;  %v311_v59 = vmul.f32 %v183_v56, %v183_v56  ;;  %v316_v5 = vmul.f32 %v188_v63, %v188_v63 }
  0x1f   : > { %v470_v52 = vsel %vm421_vm0, %v309_v49, 0.0  ;;  %v467_v53 = vsel %vm421_vm0, %v308_v50, 0.0  ;;  %v482_v60 = vsel %vm421_vm0, %v313_v57, 0.0  ;;  %v315_v8 = vmul.f32 %v187_v3, %v187_v3  ;;  %v200_v50 = vld [vmem:[%s3839_s23 + $0x118] sm:$0xff] }
  0x20   : > { %438 = vadd.xlane.f32.xlu2 %v437_v15  ;;  %432 = vadd.xlane.f32.xlu1 %v431_v16  ;;  %v479_v61 = vsel %vm421_vm0, %v312_v58, 0.0  ;;  %v476_v62 = vsel %vm421_vm0, %v311_v59, 0.0  ;;  %v314_v9 = vmul.f32 %v186_v4, %v186_v4  ;;  %v491_v10 = vsel %vm421_vm0, %v316_v5, 0.0  ;;  %v190_v15 = vld [vmem:[%s3839_s23 + $0xc8] sm:$0xff]  ;;  %v189_v16 = vld [vmem:[%s3839_s23 + $0xc0] sm:$0xff]  ;;  %v203_v59 = vld [vmem:[%s3839_s23 + $0x130] sm:$0xff] }
  0x21   : > { %426 = vadd.xlane.f32.xlu0 %v425_v17  ;;  %v488_v12 = vsel %vm421_vm0, %v315_v8, 0.0  ;;  %v319_v17 = vmul.f32 %v191_v14, %v191_v14  ;;  %v318_v21 = vmul.f32 %v190_v15, %v190_v15  ;;  %v317_v22 = vmul.f32 %v189_v16, %v189_v16  ;;  %v204_v14 = vld [vmem:[%s3839_s23 + $0x138] sm:$0xff] }
  0x22   : > { %v485_v13 = vsel %vm421_vm0, %v314_v9, 0.0  ;;  %v331_v63 = vmul.f32 %v203_v59, %v203_v59  ;;  %v215_v59 = vld [vmem:[%s3839_s23 + $0x190] sm:$0xff] }
  0x23   : > { %v500_v23 = vsel %vm421_vm0, %v319_v17, 0.0 }
  0x24   : > { %v536_v5 = vsel %vm421_vm0, %v331_v63, 0.0 }
  0x28   : > { %447 = vadd.xlane.f32.xlu2 %v446_v24  ;;  %444 = vadd.xlane.f32.xlu1 %v443_v25  ;;  %v497_v24 = vsel %vm421_vm0, %v318_v21, 0.0  ;;  %v494_v25 = vsel %vm421_vm0, %v317_v22, 0.0  ;;  %v332_v21 = vmul.f32 %v204_v14, %v204_v14 }
  0x29   : > { %441 = vadd.xlane.f32.xlu0 %v440_v26  ;;  %v194_v26 = vld [vmem:[%s3839_s23 + $0xe8] sm:$0xff] }
  0x2a   : > { %v322_v32 = vmul.f32 %v194_v26, %v194_v26  ;;  %v209_v26 = vld [vmem:[%s3839_s23 + $0x160] sm:$0xff] }
  0x30   : > { %456 = vadd.xlane.f32.xlu2 %v455_v33  ;;  %453 = vadd.xlane.f32.xlu1 %v452_v34  ;;  %v321_v33 = vmul.f32 %v193_v30, %v193_v30  ;;  %v320_v34 = vmul.f32 %v192_v31, %v192_v31  ;;  %v208_v30 = vld [vmem:[%s3839_s23 + $0x158] sm:$0xff]  ;;  %v207_v31 = vld [vmem:[%s3839_s23 + $0x150] sm:$0xff] }
  0x31   : > { %450 = vadd.xlane.f32.xlu0 %v449_v35  ;;  %v509_v35 = vsel %vm421_vm0, %v322_v32, 0.0  ;;  %v337_v32 = vmul.f32 %v209_v26, %v209_v26 }
  0x32   : > { %v506_v39 = vsel %vm421_vm0, %v321_v33, 0.0  ;;  %v503_v40 = vsel %vm421_vm0, %v320_v34, 0.0  ;;  %v336_v33 = vmul.f32 %v208_v30, %v208_v30 }
  0x38   : > { %465 = vadd.xlane.f32.xlu2 %v464_v42  ;;  %462 = vadd.xlane.f32.xlu1 %v461_v43  ;;  %v196_v42 = vld [vmem:[%s3839_s23 + $0xf8] sm:$0xff]  ;;  %v195_v43 = vld [vmem:[%s3839_s23 + $0xf0] sm:$0xff] }
  0x39   : > { %459 = vadd.xlane.f32.xlu0 %v458_v44  ;;  %v325_v44 = vmul.f32 %v197_v41, %v197_v41  ;;  %v324_v45 = vmul.f32 %v196_v42, %v196_v42  ;;  %v323_v46 = vmul.f32 %v195_v43, %v195_v43  ;;  %v212_v43 = vld [vmem:[%s3839_s23 + $0x178] sm:$0xff] }
  0x3b   : > { %v518_v47 = vsel %vm421_vm0, %v325_v44, 0.0  ;;  %v515_v48 = vsel %vm421_vm0, %v324_v45, 0.0  ;;  %v512_v49 = vsel %vm421_vm0, %v323_v46, 0.0  ;;  %v211_v44 = vld [vmem:[%s3839_s23 + $0x170] sm:$0xff]  ;;  %v210_v45 = vld [vmem:[%s3839_s23 + $0x168] sm:$0xff] }
  0x40   : > { %474 = vadd.xlane.f32.xlu2 %v473_v51  ;;  %471 = vadd.xlane.f32.xlu1 %v470_v52  ;;  %v199_v51 = vld [vmem:[%s3839_s23 + $0x110] sm:$0xff]  ;;  %v198_v52 = vld [vmem:[%s3839_s23 + $0x108] sm:$0xff] }
  0x41   : > { %468 = vadd.xlane.f32.xlu0 %v467_v53  ;;  %v328_v53 = vmul.f32 %v200_v50, %v200_v50  ;;  %v327_v54 = vmul.f32 %v199_v51, %v199_v51  ;;  %v326_v55 = vmul.f32 %v198_v52, %v198_v52 }
  0x43   : > { %v527_v56 = vsel %vm421_vm0, %v328_v53, 0.0  ;;  %v524_v57 = vsel %vm421_vm0, %v327_v54, 0.0  ;;  %v521_v58 = vsel %vm421_vm0, %v326_v55, 0.0 }
  0x48   : > { %483 = vadd.xlane.f32.xlu2 %v482_v60  ;;  %480 = vadd.xlane.f32.xlu1 %v479_v61  ;;  %v202_v60 = vld [vmem:[%s3839_s23 + $0x128] sm:$0xff]  ;;  %v201_v61 = vld [vmem:[%s3839_s23 + $0x120] sm:$0xff] }
  0x49   : > { %477 = vadd.xlane.f32.xlu0 %v476_v62  ;;  %v3786_v62 = vmov 64.0   ;;  %v330_v3 = vmul.f32 %v202_v60, %v202_v60  ;;  %v329_v4 = vmul.f32 %v201_v61, %v201_v61  ;;  %v214_v60 = vld [vmem:[%s3839_s23 + $0x188] sm:$0xff]  ;;  %v213_v61 = vld [vmem:[%s3839_s23 + $0x180] sm:$0xff] }
  0x4a   : > { %3323 = vrcp.f32 %v3786_v62 }
  0x4b   : > { %v533_v8 = vsel %vm421_vm0, %v330_v3, 0.0  ;;  %v218_v3 = vld [vmem:[%s3839_s23 + $0x1a8] sm:$0xff] }
  0x50   : > { %492 = vadd.xlane.f32.xlu2 %v491_v10  ;;  %489 = vadd.xlane.f32.xlu1 %v488_v12  ;;  %v3324_v9 = vpop.eup %3323  ;;  %v530_v10 = vsel %vm421_vm0, %v329_v4, 0.0  ;;  %v206_v12 = vld [vmem:[%s3839_s23 + $0x148] sm:$0xff]  ;;  %v217_v4 = vld [vmem:[%s3839_s23 + $0x1a0] sm:$0xff] }
  0x51   : > { %486 = vadd.xlane.f32.xlu0 %v485_v13  ;;  %v205_v13 = vld [vmem:[%s3839_s23 + $0x140] sm:$0xff]  ;;  %v334_v15 = vmul.f32 %v206_v12, %v206_v12  ;;  %v807_v17 = vmul.f32 64.0, %v3324_v9  ;;  %vm811_vm1 = vweird.f32 %v3324_v9  ;;  %v341_v12 = vmul.f32 %v213_v61, %v213_v61 }
  0x52   : > { %v333_v16 = vmul.f32 %v205_v13, %v205_v13  ;;  %v346_v13 = vmul.f32 %v218_v3, %v218_v3  ;;  %v345_v14 = vmul.f32 %v217_v4, %v217_v4  ;;  %v224_v3 = vld [vmem:[%s3839_s23 + $0x1d8] sm:$0xff]  ;;  %v223_v4 = vld [vmem:[%s3839_s23 + $0x1d0] sm:$0xff] }
  0x53   : > { %v545_v22 = vsel %vm421_vm0, %v334_v15, 0.0 }
  0x58   : > { %501 = vadd.xlane.f32.xlu2 %v500_v23  ;;  %498 = vadd.xlane.f32.xlu1 %v497_v24  ;;  %v542_v23 = vsel %vm421_vm0, %v333_v16, 0.0  ;;  %v808_v24 = vsub.f32 1.0, %v807_v17 }
  0x59   : > { %495 = vadd.xlane.f32.xlu0 %v494_v25  ;;  %v539_v25 = vsel %vm421_vm0, %v332_v21, 0.0  ;;  %v221_v21 = vld [vmem:[%s3839_s23 + $0x1c0] sm:$0xff] }
  0x5a   : > { %v809_v34 = vmul.f32 %v3324_v9, %v808_v24 }
  0x5c   : > { %v810_v41 = vadd.f32 %v3324_v9, %v809_v34  ;;  %v4027_v34 = vsel %vm421_vm0, %v346_v13, 0.0 }
  0x5e   : > { %v3994_v46 = vsel %vm811_vm1, %v3324_v9, %v810_v41  ;;  %v342_v9 = vmul.f32 %v214_v60, %v214_v60 }
  0x60   : > { %510 = vadd.xlane.f32.xlu2 %v509_v35  ;;  %507 = vadd.xlane.f32.xlu1 %v506_v39  ;;  %v335_v35 = vmul.f32 %v207_v31, %v207_v31  ;;  %v554_v39 = vsel %vm421_vm0, %v337_v32, 0.0  ;;  %v569_v30 = vsel %vm421_vm0, %v342_v9, 0.0  ;;  %v219_v31 = vld [vmem:[%s3839_s23 + $0x1b0] sm:$0xff] }
  0x61   : > { %504 = vadd.xlane.f32.xlu0 %v503_v40  ;;  %v551_v40 = vsel %vm421_vm0, %v336_v33, 0.0  ;;  %v566_v33 = vsel %vm421_vm0, %v341_v12, 0.0 }
  0x62   : > { %v548_v42 = vsel %vm421_vm0, %v335_v35, 0.0  ;;  %v4030_v35 = vsel %vm421_vm0, %v345_v14, 0.0 }
  0x68   : > { %519 = vadd.xlane.f32.xlu2 %v518_v47  ;;  %516 = vadd.xlane.f32.xlu1 %v515_v48  ;;  %v340_v47 = vmul.f32 %v212_v43, %v212_v43  ;;  %v339_v48 = vmul.f32 %v211_v44, %v211_v44 }
  0x69   : > { %513 = vadd.xlane.f32.xlu0 %v512_v49  ;;  %v338_v49 = vmul.f32 %v210_v45, %v210_v45 }
  0x70   : > { %528 = vadd.xlane.f32.xlu2 %v527_v56  ;;  %525 = vadd.xlane.f32.xlu1 %v524_v57  ;;  %v563_v56 = vsel %vm421_vm0, %v340_v47, 0.0  ;;  %v560_v57 = vsel %vm421_vm0, %v339_v48, 0.0 }
  0x71   : > { %522 = vadd.xlane.f32.xlu0 %v521_v58  ;;  %v557_v58 = vsel %vm421_vm0, %v338_v49, 0.0  ;;  %v347_v49 = vmul.f32 %v219_v31, %v219_v31 }
  0x73   : > { %v4068_v61 = vsel %vm421_vm0, %v347_v49, 0.0 }
  0x78   : > { %537 = vadd.xlane.f32.xlu2 %v536_v5  ;;  %534 = vadd.xlane.f32.xlu1 %v533_v8  ;;  %v343_v8 = vmul.f32 %v215_v59, %v215_v59 }
  0x79   : > { %531 = vadd.xlane.f32.xlu0 %v530_v10  ;;  %v216_v10 = vld [vmem:[%s3839_s23 + $0x198] sm:$0xff] }
  0x7a   : > { %v344_v17 = vmul.f32 %v216_v10, %v216_v10  ;;  %v572_v26 = vsel %vm421_vm0, %v343_v8, 0.0 }
  0x7c   : > { %v575_v48 = vsel %vm421_vm0, %v344_v17, 0.0 }
  0x80   : > { %546 = vadd.xlane.f32.xlu2 %v545_v22  ;;  %543 = vadd.xlane.f32.xlu1 %v542_v23  ;;  %v220_v22 = vld [vmem:[%s3839_s23 + $0x1b8] sm:$0xff] }
  0x81   : > { %540 = vadd.xlane.f32.xlu0 %v539_v25  ;;  %v348_v43 = vmul.f32 %v220_v22, %v220_v22  ;;  %v4081_v22 = vmul.f32 %v223_v4, %v223_v4 }
  0x88   : > { %555 = vadd.xlane.f32.xlu2 %v554_v39  ;;  %552 = vadd.xlane.f32.xlu1 %v551_v40 }
  0x89   : > { %549 = vadd.xlane.f32.xlu0 %v548_v42  ;;  %v349_v42 = vmul.f32 %v221_v21, %v221_v21  ;;  %v352_v21 = vmul.f32 %v224_v3, %v224_v3 }
  0x8b   : > { %v436_v50 = vpop.xlane.xlu2 %435  ;;  %v430_v51 = vpop.xlane.xlu1 %429 }
  0x8c   : > { %v817_v52 = vmul.f32 %v3994_v46, %v436_v50  ;;  %v815_v53 = vmul.f32 %v3994_v46, %v430_v51  ;;  %v424_v54 = vpop.xlane.xlu0 %423 }
  0x8d   : > { %v813_v55 = vmul.f32 %v3994_v46, %v424_v54 }
  0x8e   : > { %v4005_v62 = vadd.f32 1e-06, %v817_v52  ;;  %v4007_v63 = vadd.f32 1e-06, %v815_v53 }
  0x8f   : > { %v4011_v5 = vadd.f32 1e-06, %v813_v55  ;;  %v4060_v55 = vsel %vm421_vm0, %v349_v42, 0.0 }
  0x90   : > { %3325 = vrsqrt.f32 %v4005_v62  ;;  %564 = vadd.xlane.f32.xlu2 %v563_v56  ;;  %561 = vadd.xlane.f32.xlu1 %v560_v57  ;;  %vm1115_vm2 = vweird.f32 %v4005_v62  ;;  %vm1095_vm3 = vweird.f32 %v4007_v63  ;;  %v4063_v56 = vsel %vm421_vm0, %v348_v43, 0.0 }
  0x91   : > { %3327 = vrsqrt.f32 %v4007_v63  ;;  %558 = vadd.xlane.f32.xlu0 %v557_v58  ;;  %vm1075_vm4 = vweird.f32 %v4011_v5 }
  0x92   : > { %3329 = vrsqrt.f32 %v4011_v5 }
  0x93   : > { %v439_v15 = vpop.xlane.xlu2 %438  ;;  %v433_v16 = vpop.xlane.xlu1 %432 }
  0x94   : > { %v818_v23 = vmul.f32 %v3994_v46, %v439_v15  ;;  %v816_v24 = vmul.f32 %v3994_v46, %v433_v16  ;;  %v427_v25 = vpop.xlane.xlu0 %426 }
  0x95   : > { %v814_v32 = vmul.f32 %v3994_v46, %v427_v25 }
  0x96   : > { %v4032_v39 = vpop.eup %3325  ;;  %v4034_v40 = vadd.f32 1e-06, %v818_v23  ;;  %v4036_v41 = vadd.f32 1e-06, %v816_v24 }
  0x97   : > { %v4038_v44 = vpop.eup %3327  ;;  %v1110_v45 = vmul.f32 %v4032_v39, %v4005_v62  ;;  %v4042_v47 = vadd.f32 1e-06, %v814_v32  ;;  %vm1116_vm5 = vweird.f32 %v4032_v39  ;;  %v4095_v32 = vld [vmem:[%s6926_s1] ss:$0 sm:$0xff] }
  0x98   : > { %v4045_v50 = vpop.eup %3329  ;;  %v1090_v51 = vmul.f32 %v4038_v44, %v4007_v63  ;;  %3331 = vrsqrt.f32 %v4034_v40  ;;  %573 = vadd.xlane.f32.xlu2 %v572_v26  ;;  %570 = vadd.xlane.f32.xlu1 %v569_v30  ;;  %vm1096_vm6 = vweird.f32 %v4038_v44  ;;  %vm1125_vm9 = vweird.f32 %v4034_v40  ;;  %vm4101_vm10 = vmor %vm1115_vm2, %vm1116_vm5 }
  0x99   : > { %v1111_v52 = vmul.f32 %v4032_v39, %v1110_v45  ;;  %v1070_v53 = vmul.f32 %v4045_v50, %v4011_v5  ;;  %3333 = vrsqrt.f32 %v4036_v41  ;;  %567 = vadd.xlane.f32.xlu0 %v566_v33  ;;  %vm1076_vm8 = vweird.f32 %v4045_v50  ;;  %vm1097_vm12 = vmor %vm1095_vm3, %vm1096_vm6 }
  0x9a   : > { %v1091_v54 = vmul.f32 %v4038_v44, %v1090_v51  ;;  %3335 = vrsqrt.f32 %v4042_v47  ;;  %vm1105_vm11 = vweird.f32 %v4036_v41  ;;  %vm1085_vm13 = vweird.f32 %v4042_v47  ;;  %vm1077_vm14 = vmor %vm1075_vm4, %vm1076_vm8 }
  0x9b   : > { %v1112_v57 = vmul.f32 0.5, %v1111_v52  ;;  %v1071_v58 = vmul.f32 %v4045_v50, %v1070_v53  ;;  %v448_v59 = vpop.xlane.xlu2 %447  ;;  %v445_v60 = vpop.xlane.xlu1 %444 }
  0x9c   : > { %v1092_v8 = vmul.f32 0.5, %v1091_v54  ;;  %v821_v9 = vmul.f32 %v3994_v46, %v448_v59  ;;  %v820_v10 = vmul.f32 %v3994_v46, %v445_v60  ;;  %v442_v12 = vpop.xlane.xlu0 %441 }
  0x9d   : > { %v1113_v13 = vsub.f32 1.5, %v1112_v57  ;;  %v1072_v14 = vmul.f32 0.5, %v1071_v58  ;;  %v819_v30 = vmul.f32 %v3994_v46, %v442_v12 }
  0x9e   : > { %v4077_v15 = vpop.eup %3331  ;;  %v1093_v16 = vsub.f32 1.5, %v1092_v8  ;;  %v4079_v17 = vadd.f32 1e-06, %v821_v9  ;;  %v4110_v45 = vadd.f32 1e-06, %v820_v10 }
  0x9f   : > { %v4083_v23 = vpop.eup %3333  ;;  %v1114_v24 = vmul.f32 %v4032_v39, %v1113_v13  ;;  %v1073_v25 = vsub.f32 1.5, %v1072_v14  ;;  %v1120_v26 = vmul.f32 %v4077_v15, %v4034_v40  ;;  %vm1126_vm15 = vweird.f32 %v4077_v15 }
  0xa0   : > { %v4090_v31 = vpop.eup %3335  ;;  %v1094_v42 = vmul.f32 %v4038_v44, %v1093_v16  ;;  %v1100_v43 = vmul.f32 %v4083_v23, %v4036_v41  ;;  %3337 = vrsqrt.f32 %v4079_v17  ;;  %582 = vadd.xlane.f32.xlu2 %v4027_v34  ;;  %579 = vadd.xlane.f32.xlu1 %v4030_v35  ;;  %vm1106_vm1 = vweird.f32 %v4083_v23  ;;  %vm1127_vm3 = vmor %vm1125_vm9, %vm1126_vm15 }
  0xa1   : > { %v1118_v62 = vsel %vm4101_vm10, %v4032_v39, %v1114_v24  ;;  %v1074_v49 = vmul.f32 %v4045_v50, %v1073_v25  ;;  %v1121_v51 = vmul.f32 %v4077_v15, %v1120_v26  ;;  %v1080_v52 = vmul.f32 %v4090_v31, %v4042_v47  ;;  %576 = vadd.xlane.f32.xlu0 %v575_v48  ;;  %vm1107_vm4 = vmor %vm1105_vm11, %vm1106_vm1 }
  0xa2   : > { %v2353_v34 = vmul.f32 %v1118_v62, %v3842_v0  ;;  %v1098_v35 = vsel %vm1097_vm12, %v4038_v44, %v1094_v42  ;;  %v1101_v63 = vmul.f32 %v4083_v23, %v1100_v43  ;;  %3339 = vrsqrt.f32 %v4110_v45 }
  0xa3   : > { %v2351_v39 = vmul.f32 %v1098_v35, %v3845_v1  ;;  %v1078_v53 = vsel %vm1077_vm14, %v4045_v50, %v1074_v49  ;;  %v1122_v54 = vmul.f32 0.5, %v1121_v51  ;;  %v1081_v48 = vmul.f32 %v4090_v31, %v1080_v52  ;;  %v457_v57 = vpop.xlane.xlu2 %456  ;;  %v454_v5 = vpop.xlane.xlu1 %453 }
  0xa4   : > { %v2485_v0 = vmul.f32 %v4095_v32, %v2353_v34  ;;  %v2349_v44 = vmul.f32 %v1078_v53, %v3848_v2  ;;  %v1102_v58 = vmul.f32 0.5, %v1101_v63  ;;  %vm1086_vm2 = vweird.f32 %v4090_v31 }
  0xa5   : > { %v2483_v59 = vmul.f32 %v4095_v32, %v2351_v39  ;;  %v1123_v60 = vsub.f32 1.5, %v1122_v54  ;;  %v1082_v3 = vmul.f32 0.5, %v1081_v48  ;;  %v4158_v16 = vadd.f32 1e-06, %v819_v30  ;;  %vm1087_vm5 = vmor %vm1085_vm13, %vm1086_vm2 }
  0xa6   : > { %v4142_v1 = vpop.eup %3337  ;;  %v2613_v50 = vpack.c.bf16 %v2485_v0, %v2485_v0  ;;  %v2481_v4 = vmul.f32 %v4095_v32, %v2349_v44  ;;  %v1103_v8 = vsub.f32 1.5, %v1102_v58  ;;  %v599_v24 = vsel %vm421_vm0, %v352_v21, 0.0  ;;  %v222_v0 = vld [vmem:[%s3839_s23 + $0x1c8] sm:$0xff] }
  0xa7   : > { %v2611_v9 = vpack.c.bf16 %v2483_v59, %v2483_v59  ;;  %v1124_v2 = vmul.f32 %v4077_v15, %v1123_v60  ;;  %v1083_v10 = vsub.f32 1.5, %v1082_v3  ;;  %v1150_v12 = vmul.f32 %v4142_v1, %v4079_v17 }
  0xa8   : > { %2742 = vst.msk [vmem:[%s4149_s28 + $0x10] sm:$0xf] %vm2737_vm7, %v2613_v50  ;;  %v2609_v13 = vpack.c.bf16 %v2481_v4, %v2481_v4  ;;  %v1104_v14 = vmul.f32 %v4083_v23, %v1103_v8  ;;  %591 = vadd.xlane.f32.xlu2 %v4060_v55  ;;  %588 = vadd.xlane.f32.xlu1 %v4063_v56  ;;  %v451_v55 = vpop.xlane.xlu0 %450  ;;  %3341 = vrsqrt.f32 %v4158_v16  ;;  %v596_v41 = vsel %vm421_vm0, %v4081_v22, 0.0 }
  0xa9   : > { %2740 = vst.msk [vmem:[%s4149_s28 + $0x8] sm:$0xf] %vm2737_vm7, %v2611_v9  ;;  %v1128_v25 = vsel %vm1127_vm3, %v4077_v15, %v1124_v2  ;;  %v1084_v40 = vmul.f32 %v4090_v31, %v1083_v10  ;;  %v1151_v26 = vmul.f32 %v4142_v1, %v1150_v12  ;;  %v824_v30 = vmul.f32 %v3994_v46, %v457_v57  ;;  %v4185_v15 = vpop.eup %3339 }
  0xaa   : > { %2738 = vst.msk [vmem:[%s4149_s28] sm:$0xf] %vm2737_vm7, %v2609_v13  ;;  %v2354_v56 = vmul.f32 %v1128_v25, %v3857_v6  ;;  %v1108_v21 = vsel %vm1107_vm4, %v4083_v23, %v1104_v14  ;;  %585 = vadd.xlane.f32.xlu0 %v4068_v61  ;;  %vm1155_vm6 = vweird.f32 %v4079_v17  ;;  %v1140_v61 = vmul.f32 %v4185_v15, %v4110_v45 }
  0xab   : > { %v2352_v33 = vmul.f32 %v1108_v21, %v3860_v7  ;;  %v1088_v6 = vsel %vm1087_vm5, %v4090_v31, %v1084_v40  ;;  %v1152_v42 = vmul.f32 0.5, %v1151_v26  ;;  %v4189_v23 = vadd.f32 1e-06, %v824_v30  ;;  %v466_v22 = vpop.xlane.xlu2 %465  ;;  %v463_v52 = vpop.xlane.xlu1 %462 }
  0xac   : > { %v2486_v43 = vmul.f32 %v4095_v32, %v2354_v56  ;;  %v2350_v47 = vmul.f32 %v1088_v6, %v3866_v11  ;;  %vm1156_vm8 = vweird.f32 %v4142_v1  ;;  %v1141_v11 = vmul.f32 %v4185_v15, %v1140_v61 }
  0xad   : > { %v2484_v62 = vmul.f32 %v4095_v32, %v2352_v33  ;;  %v1153_v49 = vsub.f32 1.5, %v1152_v42  ;;  %3343 = vrsqrt.f32 %v4189_v23  ;;  %v823_v51 = vmul.f32 %v3994_v46, %v454_v5  ;;  %vm1157_vm9 = vmor %vm1155_vm6, %vm1156_vm8 }
  0xae   : > { %v2614_v7 = vpack.c.bf16 %v2486_v43, %v2486_v43  ;;  %v2482_v31 = vmul.f32 %v4095_v32, %v2350_v47  ;;  %v822_v63 = vmul.f32 %v3994_v46, %v451_v55  ;;  %v827_v39 = vmul.f32 %v3994_v46, %v466_v22  ;;  %v4205_v53 = vpop.eup %3341 }
  0xaf   : > { %v2612_v34 = vpack.c.bf16 %v2484_v62, %v2484_v62  ;;  %v1154_v35 = vmul.f32 %v4142_v1, %v1153_v49  ;;  %v1142_v48 = vmul.f32 0.5, %v1141_v11  ;;  %v4211_v57 = vadd.f32 1e-06, %v823_v51 }
  0xb0   : > { %2743 = vst.msk [vmem:[%s4149_s28 + $0x14] sm:$0xf] %vm2737_vm7, %v2614_v7  ;;  %v2610_v54 = vpack.c.bf16 %v2482_v31, %v2482_v31  ;;  %600 = vadd.xlane.f32.xlu2 %v599_v24  ;;  %597 = vadd.xlane.f32.xlu1 %v596_v41  ;;  %v1130_v58 = vmul.f32 %v4205_v53, %v4158_v16  ;;  %v4219_v5 = vadd.f32 1e-06, %v822_v63  ;;  %vm1146_vm10 = vweird.f32 %v4185_v15  ;;  %v460_v4 = vpop.xlane.xlu0 %459 }
  0xb1   : > { %2741 = vst.msk [vmem:[%s4149_s28 + $0xc] sm:$0xf] %vm2737_vm7, %v2612_v34  ;;  %v1158_v44 = vsel %vm1157_vm9, %v4142_v1, %v1154_v35  ;;  %v826_v59 = vmul.f32 %v3994_v46, %v463_v52  ;;  %v1143_v60 = vsub.f32 1.5, %v1142_v48  ;;  %3345 = vrsqrt.f32 %v4211_v57 }
  0xb2   : > { %2739 = vst.msk [vmem:[%s4149_s28 + $0x4] sm:$0xf] %vm2737_vm7, %v2610_v54  ;;  %v2357_v17 = vmul.f32 %v1158_v44, %v3878_v18  ;;  %v1131_v1 = vmul.f32 %v4205_v53, %v1130_v58  ;;  %3347 = vrsqrt.f32 %v4219_v5  ;;  %v4231_v50 = vadd.f32 1e-06, %v827_v39 }
  0xb3   : > { %v4227_v3 = vpop.eup %3343  ;;  %v350_v8 = vmul.f32 %v222_v0, %v222_v0  ;;  %v1144_v2 = vmul.f32 %v4185_v15, %v1143_v60  ;;  %vm1145_vm11 = vweird.f32 %v4110_v45  ;;  %vm1135_vm13 = vweird.f32 %v4158_v16  ;;  %v475_v45 = vpop.xlane.xlu2 %474 }
  0xb4   : > { %v2489_v9 = vmul.f32 %v4095_v32, %v2357_v17  ;;  %v1180_v18 = vmul.f32 %v4227_v3, %v4189_v23  ;;  %vm1147_vm12 = vmor %vm1145_vm11, %vm1146_vm10  ;;  %v1132_v10 = vmul.f32 0.5, %v1131_v1  ;;  %3349 = vrsqrt.f32 %v4231_v50  ;;  %v472_v11 = vpop.xlane.xlu1 %471 }
  0xb5   : > { %v4240_v12 = vadd.f32 1e-06, %v826_v59  ;;  %v1148_v14 = vsel %vm1147_vm12, %v4185_v15, %v1144_v2  ;;  %v825_v25 = vmul.f32 %v3994_v46, %v460_v4  ;;  %vm1136_vm14 = vweird.f32 %v4205_v53 }
  0xb6   : > { %v2617_v13 = vpack.c.bf16 %v2489_v9, %v2489_v9  ;;  %v1181_v24 = vmul.f32 %v4227_v3, %v1180_v18  ;;  %v2356_v40 = vmul.f32 %v1148_v14, %v3881_v19  ;;  %v1133_v26 = vsub.f32 1.5, %v1132_v10  ;;  %vm1137_vm2 = vmor %vm1135_vm13, %vm1136_vm14 }
  0xb7   : > { %3351 = vrsqrt.f32 %v4240_v12  ;;  %v4248_v30 = vpop.eup %3345  ;;  %vm1185_vm15 = vweird.f32 %v4189_v23  ;;  %v4253_v56 = vadd.f32 1e-06, %v825_v25  ;;  %v593_v21 = vsel %vm421_vm0, %v350_v8, 0.0 }
  0xb8   : > { %2746 = vst.msk [vmem:[%s4149_s28 + $0x20] sm:$0xf] %vm2737_vm7, %v2617_v13  ;;  %v1182_v55 = vmul.f32 0.5, %v1181_v24  ;;  %v4256_v41 = vpop.eup %3347  ;;  %v2488_v19 = vmul.f32 %v4095_v32, %v2356_v40  ;;  %v1134_v15 = vmul.f32 %v4205_v53, %v1133_v26  ;;  %v1170_v33 = vmul.f32 %v4248_v30, %v4211_v57  ;;  %594 = vadd.xlane.f32.xlu0 %v593_v21  ;;  %v469_v8 = vpop.xlane.xlu0 %468 }
  0xb9   : > { %vm1175_vm1 = vweird.f32 %v4211_v57  ;;  %v830_v6 = vmul.f32 %v3994_v46, %v475_v45  ;;  %vm1186_vm3 = vweird.f32 %v4227_v3  ;;  %v1160_v43 = vmul.f32 %v4256_v41, %v4219_v5 }
  0xba   : > { %v1183_v42 = vsub.f32 1.5, %v1182_v55  ;;  %vm1165_vm4 = vweird.f32 %v4219_v5  ;;  %3353 = vrsqrt.f32 %v4253_v56  ;;  %v4273_v47 = vpop.eup %3349  ;;  %v2616_v61 = vpack.c.bf16 %v2488_v19, %v2488_v19  ;;  %vm1187_vm6 = vmor %vm1185_vm15, %vm1186_vm3 }
  0xbb   : > { %v1138_v22 = vsel %vm1137_vm2, %v4205_v53, %v1134_v15  ;;  %v1171_v62 = vmul.f32 %v4248_v30, %v1170_v33  ;;  %vm1215_vm5 = vweird.f32 %v4231_v50  ;;  %v1161_v7 = vmul.f32 %v4256_v41, %v1160_v43  ;;  %v227_v33 = vld [vmem:[%s3839_s23 + $0x1f0] sm:$0xff] }
  0xbc   : > { %v2355_v16 = vmul.f32 %v1138_v22, %v3884_v20  ;;  %v1184_v49 = vmul.f32 %v4227_v3, %v1183_v42  ;;  %v1210_v31 = vmul.f32 %v4273_v47, %v4231_v50  ;;  %2745 = vst.msk [vmem:[%s4149_s28 + $0x1c] sm:$0xf] %vm2737_vm7, %v2616_v61  ;;  %vm1176_vm8 = vweird.f32 %v4248_v30  ;;  %v225_v61 = vld [vmem:[%s3839_s23 + $0x1e0] sm:$0xff] }
  0xbd   : > { %v4283_v51 = vpop.eup %3351  ;;  %v1172_v52 = vmul.f32 0.5, %v1171_v62  ;;  %vm1166_vm9 = vweird.f32 %v4256_v41  ;;  %v4293_v20 = vadd.f32 1e-06, %v830_v6  ;;  %v1162_v63 = vmul.f32 0.5, %v1161_v7  ;;  %vm1177_vm11 = vmor %vm1175_vm1, %vm1176_vm8  ;;  %v481_v62 = vpop.xlane.xlu1 %480 }
  0xbe   : > { %v2487_v34 = vmul.f32 %v4095_v32, %v2355_v16  ;;  %v1188_v35 = vsel %vm1187_vm6, %v4227_v3, %v1184_v49  ;;  %v1211_v39 = vmul.f32 %v4273_v47, %v1210_v31  ;;  %v1200_v23 = vmul.f32 %v4283_v51, %v4240_v12  ;;  %vm1167_vm14 = vmor %vm1165_vm4, %vm1166_vm9 }
  0xbf   : > { %v2360_v53 = vmul.f32 %v1188_v35, %v3896_v27  ;;  %v1173_v54 = vsub.f32 1.5, %v1172_v52  ;;  %vm1205_vm10 = vweird.f32 %v4240_v12  ;;  %v829_v48 = vmul.f32 %v3994_v46, %v472_v11  ;;  %v484_v12 = vpop.xlane.xlu2 %483 }
  0xc0   : > { %v4303_v0 = vpop.eup %3353  ;;  %v2615_v44 = vpack.c.bf16 %v2487_v34, %v2487_v34  ;;  %v1163_v58 = vsub.f32 1.5, %v1162_v63  ;;  %v1212_v59 = vmul.f32 0.5, %v1211_v39  ;;  %3355 = vrsqrt.f32 %v4293_v20  ;;  %v478_v35 = vpop.xlane.xlu0 %477 }
  0xc1   : > { %v2492_v17 = vmul.f32 %v4095_v32, %v2360_v53  ;;  %v1174_v60 = vmul.f32 %v4248_v30, %v1173_v54  ;;  %v1201_v27 = vmul.f32 %v4283_v51, %v1200_v23  ;;  %v1190_v3 = vmul.f32 %v4303_v0, %v4253_v56  ;;  %v230_v54 = vld [vmem:[%s3839_s23 + $0x208] sm:$0xff] }
  0xc2   : > { %2744 = vst.msk [vmem:[%s4149_s28 + $0x18] sm:$0xf] %vm2737_vm7, %v2615_v44  ;;  %v1164_v1 = vmul.f32 %v4256_v41, %v1163_v58  ;;  %v1213_v4 = vsub.f32 1.5, %v1212_v59  ;;  %vm1216_vm12 = vweird.f32 %v4273_v47  ;;  %vm1206_vm13 = vweird.f32 %v4283_v51  ;;  %v229_v44 = vld [vmem:[%s3839_s23 + $0x200] sm:$0xff] }
  0xc3   : > { %v2620_v9 = vpack.c.bf16 %v2492_v17, %v2492_v17  ;;  %v1178_v2 = vsel %vm1177_vm11, %v4248_v30, %v1174_v60  ;;  %v1202_v18 = vmul.f32 0.5, %v1201_v27  ;;  %v1191_v57 = vmul.f32 %v4303_v0, %v1190_v3  ;;  %vm1217_vm15 = vmor %vm1215_vm5, %vm1216_vm12  ;;  %v228_v27 = vld [vmem:[%s3839_s23 + $0x1f8] sm:$0xff] }
  0xc4   : > { %v2359_v10 = vmul.f32 %v1178_v2, %v3899_v28  ;;  %v1168_v13 = vsel %vm1167_vm14, %v4256_v41, %v1164_v1  ;;  %v1214_v14 = vmul.f32 %v4273_v47, %v1213_v4  ;;  %v4329_v24 = vadd.f32 1e-06, %v829_v48  ;;  %vm1207_vm2 = vmor %vm1205_vm10, %vm1206_vm13 }
  0xc5   : > { %2749 = vst.msk [vmem:[%s4149_s28 + $0x2c] sm:$0xf] %vm2737_vm7, %v2620_v9  ;;  %v2358_v25 = vmul.f32 %v1168_v13, %v3902_v29  ;;  %v1203_v5 = vsub.f32 1.5, %v1202_v18  ;;  %v1192_v45 = vmul.f32 0.5, %v1191_v57  ;;  %v828_v40 = vmul.f32 %v3994_v46, %v469_v8 }
  0xc6   : > { %v4337_v28 = vpop.eup %3355  ;;  %v2491_v26 = vmul.f32 %v4095_v32, %v2359_v10  ;;  %v1218_v30 = vsel %vm1217_vm15, %v4273_v47, %v1214_v14  ;;  %vm1196_vm1 = vweird.f32 %v4303_v0  ;;  %3357 = vrsqrt.f32 %v4329_v24 }
  0xc7   : > { %v2490_v29 = vmul.f32 %v4095_v32, %v2358_v25  ;;  %v2363_v50 = vmul.f32 %v1218_v30, %v3914_v36  ;;  %v1204_v55 = vmul.f32 %v4283_v51, %v1203_v5  ;;  %v1193_v21 = vsub.f32 1.5, %v1192_v45  ;;  %v226_v36 = vld [vmem:[%s3839_s23 + $0x1e8] sm:$0xff] }
  0xc8   : > { %v2619_v41 = vpack.c.bf16 %v2491_v26, %v2491_v26  ;;  %vm1195_vm3 = vweird.f32 %v4253_v56  ;;  %v1240_v19 = vmul.f32 %v4337_v28, %v4293_v20  ;;  %v4353_v15 = vadd.f32 1e-06, %v828_v40  ;;  %v3581_v5 = vld [vmem:[%s3839_s23 + $0x88] sm:$0xff]  ;;  %v493_v26 = vpop.xlane.xlu2 %492 }
  0xc9   : > { %v2618_v6 = vpack.c.bf16 %v2490_v29, %v2490_v29  ;;  %v2495_v42 = vmul.f32 %v4095_v32, %v2363_v50  ;;  %v1208_v43 = vsel %vm1207_vm2, %v4283_v51, %v1204_v55  ;;  %v1194_v47 = vmul.f32 %v4303_v0, %v1193_v21  ;;  %vm1197_vm4 = vmor %vm1195_vm3, %vm1196_vm1 }
  0xca   : > { %2748 = vst.msk [vmem:[%s4149_s28 + $0x28] sm:$0xf] %vm2737_vm7, %v2619_v41  ;;  %v2362_v56 = vmul.f32 %v1208_v43, %v3917_v37  ;;  %v1241_v22 = vmul.f32 %v4337_v28, %v1240_v19  ;;  %vm1245_vm5 = vweird.f32 %v4293_v20  ;;  %3359 = vrsqrt.f32 %v4353_v15  ;;  %v487_v19 = vpop.xlane.xlu0 %486  ;;  %v233_v43 = vld [vmem:[%s3839_s23 + $0x220] sm:$0xff] }
  0xcb   : > { %2747 = vst.msk [vmem:[%s4149_s28 + $0x24] sm:$0xf] %vm2737_vm7, %v2618_v6  ;;  %v2623_v16 = vpack.c.bf16 %v2495_v42, %v2495_v42  ;;  %v1198_v49 = vsel %vm1197_vm4, %v4303_v0, %v1194_v47  ;;  %v355_v7 = vmul.f32 %v227_v33, %v227_v33  ;;  %v354_v31 = vmul.f32 %v226_v36, %v226_v36  ;;  %v3582_v47 = vld [vmem:[%s3839_s23 + $0x80] sm:$0xff] }
  0xcc   : > { %v4372_v37 = vpop.eup %3357  ;;  %v2494_v11 = vmul.f32 %v4095_v32, %v2362_v56  ;;  %v2361_v51 = vmul.f32 %v1198_v49, %v3920_v38  ;;  %v1242_v52 = vmul.f32 0.5, %v1241_v22  ;;  %v353_v34 = vmul.f32 %v225_v61, %v225_v61  ;;  %v232_v56 = vld [vmem:[%s3839_s23 + $0x218] sm:$0xff]  ;;  %v231_v22 = vld [vmem:[%s3839_s23 + $0x210] sm:$0xff] }
  0xcd   : > { %2752 = vst.msk [vmem:[%s4149_s28 + $0x38] sm:$0xf] %vm2737_vm7, %v2623_v16  ;;  %vm1246_vm6 = vweird.f32 %v4337_v28  ;;  %v1230_v63 = vmul.f32 %v4372_v37, %v4329_v24  ;;  %v608_v39 = vsel %vm421_vm0, %v355_v7, 0.0  ;;  %v605_v53 = vsel %vm421_vm0, %v354_v31, 0.0 }
  0xce   : > { %v2622_v23 = vpack.c.bf16 %v2494_v11, %v2494_v11  ;;  %v2493_v38 = vmul.f32 %v4095_v32, %v2361_v51  ;;  %v1243_v48 = vsub.f32 1.5, %v1242_v52  ;;  %609 = vadd.xlane.f32.xlu2 %v608_v39  ;;  %606 = vadd.xlane.f32.xlu1 %v605_v53  ;;  %v602_v0 = vsel %vm421_vm0, %v353_v34, 0.0  ;;  %vm1247_vm9 = vmor %vm1245_vm5, %vm1246_vm6  ;;  %v3583_v53 = vld [vmem:[%s3839_s23 + $0x78] sm:$0xff] }
  0xcf   : > { %v1231_v58 = vmul.f32 %v4372_v37, %v1230_v63  ;;  %603 = vadd.xlane.f32.xlu0 %v602_v0  ;;  %v833_v59 = vmul.f32 %v3994_v46, %v484_v12  ;;  %v832_v17 = vmul.f32 %v3994_v46, %v481_v62  ;;  %v831_v60 = vmul.f32 %v3994_v46, %v478_v35 }
  0xd0   : > { %v4392_v3 = vpop.eup %3359  ;;  %2751 = vst.msk [vmem:[%s4149_s28 + $0x34] sm:$0xf] %vm2737_vm7, %v2622_v23  ;;  %v2621_v1 = vpack.c.bf16 %v2493_v38, %v2493_v38  ;;  %v1244_v4 = vmul.f32 %v4337_v28, %v1243_v48  ;;  %vm1236_vm8 = vweird.f32 %v4372_v37  ;;  %v358_v8 = vmul.f32 %v230_v54, %v230_v54 }
  0xd1   : > { %v1232_v9 = vmul.f32 0.5, %v1231_v58  ;;  %v1220_v2 = vmul.f32 %v4392_v3, %v4353_v15  ;;  %v4404_v18 = vadd.f32 1e-06, %v833_v59  ;;  %v357_v57 = vmul.f32 %v229_v44, %v229_v44 }
  0xd2   : > { %2750 = vst.msk [vmem:[%s4149_s28 + $0x30] sm:$0xf] %vm2737_vm7, %v2621_v1  ;;  %v1248_v10 = vsel %vm1247_vm9, %v4337_v28, %v1244_v4  ;;  %v4409_v13 = vadd.f32 1e-06, %v832_v17  ;;  %v4411_v14 = vadd.f32 1e-06, %v831_v60  ;;  %v356_v25 = vmul.f32 %v228_v27, %v228_v27  ;;  %v490_v28 = vpop.xlane.xlu1 %489  ;;  %v502_v1 = vpop.xlane.xlu2 %501 }
  0xd3   : > { %v2366_v45 = vmul.f32 %v3581_v5, %v1248_v10  ;;  %v1233_v20 = vsub.f32 1.5, %v1232_v9  ;;  %v1221_v40 = vmul.f32 %v4392_v3, %v1220_v2  ;;  %3361 = vrsqrt.f32 %v4404_v18  ;;  %v496_v5 = vpop.xlane.xlu0 %495 }
  0xd4   : > { %vm1235_vm10 = vweird.f32 %v4329_v24  ;;  %vm1226_vm11 = vweird.f32 %v4392_v3  ;;  %3363 = vrsqrt.f32 %v4409_v13  ;;  %v617_v55 = vsel %vm421_vm0, %v358_v8, 0.0 }
  0xd5   : > { %v2498_v30 = vmul.f32 %v4095_v32, %v2366_v45  ;;  %v1234_v29 = vmul.f32 %v4372_v37, %v1233_v20  ;;  %v1222_v50 = vmul.f32 0.5, %v1221_v40  ;;  %3365 = vrsqrt.f32 %v4411_v14  ;;  %vm1237_vm12 = vmor %vm1235_vm10, %vm1236_vm8 }
  0xd6   : > { %v614_v24 = vsel %vm421_vm0, %v357_v57, 0.0  ;;  %v611_v21 = vsel %vm421_vm0, %v356_v25, 0.0  ;;  %v836_v41 = vmul.f32 %v3994_v46, %v493_v26  ;;  %618 = vadd.xlane.f32.xlu2 %v617_v55  ;;  %v835_v42 = vmul.f32 %v3994_v46, %v490_v28 }
  0xd7   : > { %v2626_v33 = vpack.c.bf16 %v2498_v30, %v2498_v30  ;;  %v1238_v36 = vsel %vm1237_vm12, %v4372_v37, %v1234_v29  ;;  %v1223_v6 = vsub.f32 1.5, %v1222_v50  ;;  %615 = vadd.xlane.f32.xlu1 %v614_v24  ;;  %vm1225_vm13 = vweird.f32 %v4353_v15  ;;  %612 = vadd.xlane.f32.xlu0 %v611_v21  ;;  %v3584_v21 = vld [vmem:[%s3839_s23 + $0xa0] sm:$0xff] }
  0xd8   : > { %v2365_v61 = vmul.f32 %v3582_v47, %v1238_v36  ;;  %v4433_v12 = vadd.f32 1e-06, %v836_v41  ;;  %vm1275_vm14 = vweird.f32 %v4404_v18  ;;  %v4443_v49 = vadd.f32 1e-06, %v835_v42  ;;  %vm1227_vm15 = vmor %vm1225_vm13, %vm1226_vm11  ;;  %v236_v36 = vld [vmem:[%s3839_s23 + $0x238] sm:$0xff] }
  0xd9   : > { %v4437_v62 = vpop.eup %3361  ;;  %2755 = vst.msk [vmem:[%s4149_s28 + $0x44] sm:$0xf] %vm2737_vm7, %v2626_v33  ;;  %v1224_v16 = vmul.f32 %v4392_v3, %v1223_v6  ;;  %v834_v7 = vmul.f32 %v3994_v46, %v487_v19  ;;  %v361_v11 = vmul.f32 %v233_v43, %v233_v43  ;;  %vm1265_vm1 = vweird.f32 %v4409_v13  ;;  %v3585_v42 = vld [vmem:[%s3839_s23 + $0x98] sm:$0xff] }
  0xda   : > { %v4446_v31 = vpop.eup %3363  ;;  %v2497_v15 = vmul.f32 %v4095_v32, %v2365_v61  ;;  %v1270_v37 = vmul.f32 %v4437_v62, %v4404_v18  ;;  %3367 = vrsqrt.f32 %v4433_v12  ;;  %v360_v35 = vmul.f32 %v232_v56, %v232_v56  ;;  %v499_v4 = vpop.xlane.xlu1 %498 }
  0xdb   : > { %v4454_v51 = vpop.eup %3365  ;;  %v1228_v52 = vsel %vm1227_vm15, %v4392_v3, %v1224_v16  ;;  %v1260_v34 = vmul.f32 %v4446_v31, %v4409_v13  ;;  %v359_v63 = vmul.f32 %v231_v22, %v231_v22  ;;  %vm1276_vm2 = vweird.f32 %v4437_v62 }
  0xdc   : > { %v2625_v39 = vpack.c.bf16 %v2497_v15, %v2497_v15  ;;  %v2364_v54 = vmul.f32 %v3583_v53, %v1228_v52  ;;  %v1271_v23 = vmul.f32 %v4437_v62, %v1270_v37  ;;  %v1250_v38 = vmul.f32 %v4454_v51, %v4411_v14  ;;  %vm1277_vm6 = vmor %vm1275_vm14, %vm1276_vm2  ;;  %v234_v53 = vld [vmem:[%s3839_s23 + $0x228] sm:$0xff] }
  0xdd   : > { %v1261_v48 = vmul.f32 %v4446_v31, %v1260_v34  ;;  %vm1255_vm3 = vweird.f32 %v4411_v14  ;;  %3369 = vrsqrt.f32 %v4443_v49  ;;  %v4472_v59 = vadd.f32 1e-06, %v834_v7 }
  0xde   : > { %2754 = vst.msk [vmem:[%s4149_s28 + $0x40] sm:$0xf] %vm2737_vm7, %v2625_v39  ;;  %v2496_v0 = vmul.f32 %v4095_v32, %v2364_v54  ;;  %v1272_v44 = vmul.f32 0.5, %v1271_v23  ;;  %v1251_v58 = vmul.f32 %v4454_v51, %v1250_v38  ;;  %v626_v60 = vsel %vm421_vm0, %v361_v11, 0.0  ;;  %v235_v39 = vld [vmem:[%s3839_s23 + $0x230] sm:$0xff]  ;;  %v511_v54 = vpop.xlane.xlu2 %510 }
  0xdf   : > { %v1262_v17 = vmul.f32 0.5, %v1261_v48  ;;  %v623_v27 = vsel %vm421_vm0, %v360_v35, 0.0  ;;  %v620_v3 = vsel %vm421_vm0, %v359_v63, 0.0  ;;  %3371 = vrsqrt.f32 %v4472_v59  ;;  %627 = vadd.xlane.f32.xlu2 %v626_v60 }
  0xe0   : > { %v4477_v8 = vpop.eup %3367  ;;  %v2624_v9 = vpack.c.bf16 %v2496_v0, %v2496_v0  ;;  %v1273_v2 = vsub.f32 1.5, %v1272_v44  ;;  %v1252_v57 = vmul.f32 0.5, %v1251_v58  ;;  %624 = vadd.xlane.f32.xlu1 %v623_v27  ;;  %vm1266_vm4 = vweird.f32 %v4446_v31  ;;  %621 = vadd.xlane.f32.xlu0 %v620_v3 }
  0xe1   : > { %v1263_v10 = vsub.f32 1.5, %v1262_v17  ;;  %vm1256_vm5 = vweird.f32 %v4454_v51  ;;  %v1300_v25 = vmul.f32 %v4477_v8, %v4433_v12  ;;  %v839_v40 = vmul.f32 %v3994_v46, %v502_v1  ;;  %vm1267_vm10 = vmor %vm1265_vm1, %vm1266_vm4 }
  0xe2   : > { %2753 = vst.msk [vmem:[%s4149_s28 + $0x3c] sm:$0xf] %vm2737_vm7, %v2624_v9  ;;  %v1274_v45 = vmul.f32 %v4437_v62, %v1273_v2  ;;  %v1253_v20 = vsub.f32 1.5, %v1252_v57  ;;  %v838_v26 = vmul.f32 %v3994_v46, %v499_v4  ;;  %vm1305_vm8 = vweird.f32 %v4433_v12  ;;  %vm1257_vm12 = vmor %vm1255_vm3, %vm1256_vm5  ;;  %v3587_v12 = vld [vmem:[%s3839_s23 + $0xb8] sm:$0xff]  ;;  %v3588_v2 = vld [vmem:[%s3839_s23 + $0xb0] sm:$0xff] }
  0xe3   : > { %v4489_v28 = vpop.eup %3369  ;;  %v1264_v30 = vmul.f32 %v4446_v31, %v1263_v10  ;;  %v1301_v29 = vmul.f32 %v4477_v8, %v1300_v25  ;;  %vm1306_vm9 = vweird.f32 %v4477_v8  ;;  %vm1295_vm11 = vweird.f32 %v4443_v49  ;;  %v508_v25 = vpop.xlane.xlu1 %507 }
  0xe4   : > { %v1278_v50 = vsel %vm1277_vm6, %v4437_v62, %v1274_v45  ;;  %v1254_v18 = vmul.f32 %v4454_v51, %v1253_v20  ;;  %v1290_v55 = vmul.f32 %v4489_v28, %v4443_v49  ;;  %v837_v24 = vmul.f32 %v3994_v46, %v496_v5  ;;  %v3586_v62 = vld [vmem:[%s3839_s23 + $0x90] sm:$0xff]  ;;  %vm1307_vm13 = vmor %vm1305_vm8, %vm1306_vm9  ;;  %v505_v5 = vpop.xlane.xlu0 %504 }
  0xe5   : > { %v2369_v41 = vmul.f32 %v3584_v21, %v1278_v50  ;;  %v1268_v19 = vsel %vm1267_vm10, %v4446_v31, %v1264_v30  ;;  %v1302_v13 = vmul.f32 0.5, %v1301_v29  ;;  %v4515_v33 = vadd.f32 1e-06, %v839_v40  ;;  %v4518_v6 = vpop.eup %3371 }
  0xe6   : > { %v2368_v43 = vmul.f32 %v3585_v42, %v1268_v19  ;;  %v1258_v47 = vsel %vm1257_vm12, %v4454_v51, %v1254_v18  ;;  %v1291_v61 = vmul.f32 %v4489_v28, %v1290_v55  ;;  %v4523_v56 = vadd.f32 1e-06, %v838_v26  ;;  %v239_v18 = vld [vmem:[%s3839_s23 + $0x250] sm:$0xff]  ;;  %v238_v55 = vld [vmem:[%s3839_s23 + $0x248] sm:$0xff] }
  0xe7   : > { %v2501_v22 = vmul.f32 %v4095_v32, %v2369_v41  ;;  %v2367_v16 = vmul.f32 %v3586_v62, %v1258_v47  ;;  %v1303_v14 = vsub.f32 1.5, %v1302_v13  ;;  %v1280_v7 = vmul.f32 %v4518_v6, %v4472_v59 }
  0xe8   : > { %v2500_v31 = vmul.f32 %v4095_v32, %v2368_v43  ;;  %v1292_v15 = vmul.f32 0.5, %v1291_v61  ;;  %3373 = vrsqrt.f32 %v4515_v33  ;;  %v364_v37 = vmul.f32 %v236_v36, %v236_v36 }
  0xe9   : > { %v2629_v11 = vpack.c.bf16 %v2501_v22, %v2501_v22  ;;  %v2499_v51 = vmul.f32 %v4095_v32, %v2367_v16  ;;  %v1304_v52 = vmul.f32 %v4477_v8, %v1303_v14  ;;  %v1281_v34 = vmul.f32 %v4518_v6, %v1280_v7  ;;  %v237_v14 = vld [vmem:[%s3839_s23 + $0x240] sm:$0xff] }
  0xea   : > { %v2628_v35 = vpack.c.bf16 %v2500_v31, %v2500_v31  ;;  %v1293_v63 = vsub.f32 1.5, %v1292_v15  ;;  %vm1296_vm14 = vweird.f32 %v4489_v28  ;;  %3375 = vrsqrt.f32 %v4523_v56 }
  0xeb   : > { %2758 = vst.msk [vmem:[%s4149_s28 + $0x50] sm:$0xf] %vm2737_vm7, %v2629_v11  ;;  %v2627_v23 = vpack.c.bf16 %v2499_v51, %v2499_v51  ;;  %v1308_v38 = vsel %vm1307_vm13, %v4477_v8, %v1304_v52  ;;  %v1282_v48 = vmul.f32 0.5, %v1281_v34  ;;  %vm1286_vm15 = vweird.f32 %v4518_v6  ;;  %vm1297_vm1 = vmor %vm1295_vm11, %vm1296_vm14 }
  0xec   : > { %2757 = vst.msk [vmem:[%s4149_s28 + $0x4c] sm:$0xf] %vm2737_vm7, %v2628_v35  ;;  %v2372_v0 = vmul.f32 %v3587_v12, %v1308_v38  ;;  %v1294_v44 = vmul.f32 %v4489_v28, %v1293_v63  ;;  %v4550_v58 = vadd.f32 1e-06, %v837_v24  ;;  %v635_v17 = vsel %vm421_vm0, %v364_v37, 0.0  ;;  %v3589_v24 = vld [vmem:[%s3839_s23 + $0xa8] sm:$0xff] }
  0xed   : > { %2756 = vst.msk [vmem:[%s4149_s28 + $0x48] sm:$0xf] %vm2737_vm7, %v2627_v23  ;;  %v1283_v60 = vsub.f32 1.5, %v1282_v48  ;;  %636 = vadd.xlane.f32.xlu2 %v635_v17  ;;  %v363_v27 = vmul.f32 %v235_v39, %v235_v39  ;;  %v362_v3 = vmul.f32 %v234_v53, %v234_v53  ;;  %v842_v1 = vmul.f32 %v3994_v46, %v511_v54  ;;  %v520_v39 = vpop.xlane.xlu2 %519  ;;  %v514_v48 = vpop.xlane.xlu0 %513  ;;  %v3590_v12 = vld [vmem:[%s3839_s23 + $0xd0] sm:$0xff] }
  0xee   : > { %v4560_v4 = vpop.eup %3373  ;;  %v2504_v8 = vmul.f32 %v4095_v32, %v2372_v0  ;;  %v1298_v9 = vsel %vm1297_vm1, %v4489_v28, %v1294_v44  ;;  %3377 = vrsqrt.f32 %v4550_v58  ;;  %vm1285_vm2 = vweird.f32 %v4472_v59 }
  0xef   : > { %v2371_v57 = vmul.f32 %v3588_v2, %v1298_v9  ;;  %v1284_v10 = vmul.f32 %v4518_v6, %v1283_v60  ;;  %v1330_v49 = vmul.f32 %v4560_v4, %v4515_v33  ;;  %vm1287_vm3 = vmor %vm1285_vm2, %vm1286_vm15  ;;  %v632_v40 = vsel %vm421_vm0, %v363_v27, 0.0 }
  0xf0   : > { %v4570_v45 = vpop.eup %3375  ;;  %v2632_v20 = vpack.c.bf16 %v2504_v8, %v2504_v8  ;;  %v629_v26 = vsel %vm421_vm0, %v362_v3, 0.0  ;;  %v4576_v28 = vadd.f32 1e-06, %v842_v1  ;;  %633 = vadd.xlane.f32.xlu1 %v632_v40  ;;  %vm1335_vm4 = vweird.f32 %v4515_v33  ;;  %v517_v33 = vpop.xlane.xlu1 %516  ;;  %v3591_v1 = vld [vmem:[%s3839_s23 + $0xc8] sm:$0xff] }
  0xf1   : > { %v2503_v59 = vmul.f32 %v4095_v32, %v2371_v57  ;;  %v1288_v30 = vsel %vm1287_vm3, %v4518_v6, %v1284_v10  ;;  %v1331_v29 = vmul.f32 %v4560_v4, %v1330_v49  ;;  %v1320_v50 = vmul.f32 %v4570_v45, %v4523_v56  ;;  %630 = vadd.xlane.f32.xlu0 %v629_v26  ;;  %v242_v49 = vld [vmem:[%s3839_s23 + $0x268] sm:$0xff] }
  0xf2   : > { %2761 = vst.msk [vmem:[%s4149_s28 + $0x5c] sm:$0xf] %vm2737_vm7, %v2632_v20  ;;  %v2370_v21 = vmul.f32 %v3589_v24, %v1288_v30  ;;  %vm1336_vm5 = vweird.f32 %v4560_v4  ;;  %3379 = vrsqrt.f32 %v4576_v28  ;;  %v841_v36 = vmul.f32 %v3994_v46, %v508_v25 }
  0xf3   : > { %v2631_v41 = vpack.c.bf16 %v2503_v59, %v2503_v59  ;;  %v1332_v19 = vmul.f32 0.5, %v1331_v29  ;;  %v1321_v13 = vmul.f32 %v4570_v45, %v1320_v50  ;;  %v840_v43 = vmul.f32 %v3994_v46, %v505_v5  ;;  %vm1337_vm8 = vmor %vm1335_vm4, %vm1336_vm5  ;;  %v3593_v50 = vld [vmem:[%s3839_s23 + $0xc0] sm:$0xff] }
  0xf4   : > { %v4593_v6 = vpop.eup %3377  ;;  %v2502_v42 = vmul.f32 %v4095_v32, %v2370_v21  ;;  %v367_v47 = vmul.f32 %v239_v18, %v239_v18  ;;  %v366_v61 = vmul.f32 %v238_v55, %v238_v55  ;;  %vm1326_vm6 = vweird.f32 %v4570_v45 }
  0xf5   : > { %2760 = vst.msk [vmem:[%s4149_s28 + $0x58] sm:$0xf] %vm2737_vm7, %v2631_v41  ;;  %v1333_v22 = vsub.f32 1.5, %v1332_v19  ;;  %v1322_v62 = vmul.f32 0.5, %v1321_v13  ;;  %v1310_v16 = vmul.f32 %v4593_v6, %v4550_v58  ;;  %v4603_v31 = vadd.f32 1e-06, %v841_v36 }
  0xf6   : > { %v2630_v7 = vpack.c.bf16 %v2502_v42, %v2502_v42  ;;  %v4605_v15 = vadd.f32 1e-06, %v840_v43  ;;  %v644_v37 = vsel %vm421_vm0, %v367_v47, 0.0  ;;  %v641_v34 = vsel %vm421_vm0, %v366_v61, 0.0  ;;  %v241_v19 = vld [vmem:[%s3839_s23 + $0x260] sm:$0xff]  ;;  %v240_v36 = vld [vmem:[%s3839_s23 + $0x258] sm:$0xff] }
  0xf7   : > { %v1334_v11 = vmul.f32 %v4560_v4, %v1333_v22  ;;  %v1323_v51 = vsub.f32 1.5, %v1322_v62  ;;  %v1311_v52 = vmul.f32 %v4593_v6, %v1310_v16  ;;  %645 = vadd.xlane.f32.xlu2 %v644_v37  ;;  %vm1325_vm9 = vweird.f32 %v4523_v56 }
  0xf8   : > { %v4611_v35 = vpop.eup %3379  ;;  %2759 = vst.msk [vmem:[%s4149_s28 + $0x54] sm:$0xf] %vm2737_vm7, %v2630_v7  ;;  %vm1315_vm10 = vweird.f32 %v4550_v58  ;;  %3381 = vrsqrt.f32 %v4603_v31  ;;  %v365_v63 = vmul.f32 %v237_v14, %v237_v14  ;;  %642 = vadd.xlane.f32.xlu1 %v641_v34  ;;  %vm1327_vm11 = vmor %vm1325_vm9, %vm1326_vm6  ;;  %vm1316_vm12 = vweird.f32 %v4593_v6  ;;  %v526_v61 = vpop.xlane.xlu1 %525 }
  0xf9   : > { %v1338_v53 = vsel %vm1337_vm8, %v4560_v4, %v1334_v11  ;;  %v1324_v54 = vmul.f32 %v4570_v45, %v1323_v51  ;;  %v1312_v23 = vmul.f32 0.5, %v1311_v52  ;;  %v1360_v38 = vmul.f32 %v4611_v35, %v4576_v28  ;;  %vm1317_vm14 = vmor %vm1315_vm10, %vm1316_vm12 }
  0xfa   : > { %v2375_v56 = vmul.f32 %v3590_v12, %v1338_v53  ;;  %3383 = vrsqrt.f32 %v4605_v15  ;;  %v638_v0 = vsel %vm421_vm0, %v365_v63, 0.0  ;;  %v845_v27 = vmul.f32 %v3994_v46, %v520_v39 }
  0xfb   : > { %v1328_v44 = vsel %vm1327_vm11, %v4570_v45, %v1324_v54  ;;  %v1313_v17 = vsub.f32 1.5, %v1312_v23  ;;  %v1361_v60 = vmul.f32 %v4611_v35, %v1360_v38  ;;  %639 = vadd.xlane.f32.xlu0 %v638_v0  ;;  %v844_v8 = vmul.f32 %v3994_v46, %v517_v33  ;;  %v523_v23 = vpop.xlane.xlu0 %522 }
  0xfc   : > { %v2507_v3 = vmul.f32 %v4095_v32, %v2375_v56  ;;  %v2374_v4 = vmul.f32 %v3591_v1, %v1328_v44  ;;  %v843_v9 = vmul.f32 %v3994_v46, %v514_v48  ;;  %vm1365_vm13 = vweird.f32 %v4576_v28  ;;  %v4649_v32 = vld [vmem:[%s6926_s1] ss:$0 sm:$0xff]  ;;  %v3594_v28 = vld [vmem:[%s3839_s23 + $0xe8] sm:$0xff] }
  0xfd   : > { %v1314_v2 = vmul.f32 %v4593_v6, %v1313_v17  ;;  %v1362_v57 = vmul.f32 0.5, %v1361_v60  ;;  %v4641_v10 = vadd.f32 1e-06, %v845_v27  ;;  %vm1366_vm15 = vweird.f32 %v4611_v35 }
  0xfe   : > { %v4644_v25 = vpop.eup %3381  ;;  %v2635_v5 = vpack.c.bf16 %v2507_v3, %v2507_v3  ;;  %v2506_v45 = vmul.f32 %v4649_v32, %v2374_v4  ;;  %v4657_v20 = vadd.f32 1e-06, %v844_v8  ;;  %v4662_v30 = vadd.f32 1e-06, %v843_v9  ;;  %vm1367_vm2 = vmor %vm1365_vm13, %vm1366_vm15 }
  0xff   : > { %v1318_v40 = vsel %vm1317_vm14, %v4593_v6, %v1314_v2  ;;  %v1363_v26 = vsub.f32 1.5, %v1362_v57  ;;  %v1350_v59 = vmul.f32 %v4644_v25, %v4603_v31  ;;  %3385 = vrsqrt.f32 %v4641_v10  ;;  %v529_v6 = vpop.xlane.xlu2 %528 }
 0x100   : > { %v4664_v29 = vpop.eup %3383  ;;  %2764 = vst.msk [vmem:[%s4149_s28 + $0x68] sm:$0xf] %vm2737_vm7, %v2635_v5  ;;  %v2634_v58 = vpack.c.bf16 %v2506_v45, %v2506_v45  ;;  %v2373_v18 = vmul.f32 %v3593_v50, %v1318_v40  ;;  %v370_v55 = vmul.f32 %v242_v49, %v242_v49  ;;  %vm1355_vm1 = vweird.f32 %v4603_v31  ;;  %v3595_v31 = vld [vmem:[%s3839_s23 + $0xe0] sm:$0xff]  ;;  %v3596_v49 = vld [vmem:[%s3839_s23 + $0xd8] sm:$0xff] }
 0x101   : > { %v1364_v24 = vmul.f32 %v4611_v35, %v1363_v26  ;;  %v1351_v21 = vmul.f32 %v4644_v25, %v1350_v59  ;;  %v1340_v41 = vmul.f32 %v4664_v29, %v4605_v15  ;;  %vm1356_vm3 = vweird.f32 %v4644_v25  ;;  %v245_v5 = vld [vmem:[%s3839_s23 + $0x280] sm:$0xff]  ;;  %v244_v45 = vld [vmem:[%s3839_s23 + $0x278] sm:$0xff] }
 0x102   : > { %2763 = vst.msk [vmem:[%s4149_s28 + $0x64] sm:$0xf] %vm2737_vm7, %v2634_v58  ;;  %v2505_v13 = vmul.f32 %v4649_v32, %v2373_v18  ;;  %vm1345_vm4 = vweird.f32 %v4605_v15  ;;  %3387 = vrsqrt.f32 %v4657_v20  ;;  %v653_v16 = vsel %vm421_vm0, %v370_v55, 0.0  ;;  %vm1357_vm8 = vmor %vm1355_vm1, %vm1356_vm3 }
 0x103   : > { %v1368_v42 = vsel %vm1367_vm2, %v4611_v35, %v1364_v24  ;;  %v1352_v43 = vmul.f32 0.5, %v1351_v21  ;;  %v1341_v47 = vmul.f32 %v4664_v29, %v1340_v41  ;;  %3389 = vrsqrt.f32 %v4662_v30  ;;  %654 = vadd.xlane.f32.xlu2 %v653_v16 }
 0x104   : > { %v2633_v22 = vpack.c.bf16 %v2505_v13, %v2505_v13  ;;  %v2378_v62 = vmul.f32 %v3594_v28, %v1368_v42  ;;  %v369_v14 = vmul.f32 %v241_v19, %v241_v19  ;;  %v368_v11 = vmul.f32 %v240_v36, %v240_v36  ;;  %v243_v13 = vld [vmem:[%s3839_s23 + $0x270] sm:$0xff] }
 0x105   : > { %v1353_v7 = vsub.f32 1.5, %v1352_v43  ;;  %v1342_v37 = vmul.f32 0.5, %v1341_v47  ;;  %v848_v51 = vmul.f32 %v3994_v46, %v529_v6  ;;  %v4693_v52 = vpop.eup %3385  ;;  %vm1395_vm5 = vweird.f32 %v4641_v10 }
 0x106   : > { %2762 = vst.msk [vmem:[%s4149_s28 + $0x60] sm:$0xf] %vm2737_vm7, %v2633_v22  ;;  %v2510_v34 = vmul.f32 %v4649_v32, %v2378_v62  ;;  %v650_v35 = vsel %vm421_vm0, %v369_v14, 0.0  ;;  %v847_v63 = vmul.f32 %v3994_v46, %v526_v61  ;;  %vm1346_vm6 = vweird.f32 %v4664_v29  ;;  %v535_v22 = vpop.xlane.xlu1 %534 }
 0x107   : > { %v1354_v39 = vmul.f32 %v4644_v25, %v1353_v7  ;;  %v1343_v53 = vsub.f32 1.5, %v1342_v37  ;;  %v1390_v54 = vmul.f32 %v4693_v52, %v4641_v10  ;;  %651 = vadd.xlane.f32.xlu1 %v650_v35  ;;  %v647_v48 = vsel %vm421_vm0, %v368_v11, 0.0  ;;  %vm1347_vm9 = vmor %vm1345_vm4, %vm1346_vm6  ;;  %v538_v36 = vpop.xlane.xlu2 %537  ;;  %v3597_v10 = vld [vmem:[%s3839_s23 + $0x100] sm:$0xff]  ;;  %v3599_v35 = vld [vmem:[%s3839_s23 + $0xf0] sm:$0xff] }
 0x108   : > { %v4705_v38 = vpop.eup %3387  ;;  %v2638_v33 = vpack.c.bf16 %v2510_v34, %v2510_v34  ;;  %v4712_v12 = vadd.f32 1e-06, %v848_v51  ;;  %v4714_v56 = vadd.f32 1e-06, %v847_v63  ;;  %648 = vadd.xlane.f32.xlu0 %v647_v48  ;;  %vm1385_vm10 = vweird.f32 %v4657_v20 }
 0x109   : > { %v4716_v0 = vpop.eup %3389  ;;  %v1358_v44 = vsel %vm1357_vm8, %v4644_v25, %v1354_v39  ;;  %v1344_v17 = vmul.f32 %v4664_v29, %v1343_v53  ;;  %v1391_v60 = vmul.f32 %v4693_v52, %v1390_v54  ;;  %v1380_v27 = vmul.f32 %v4705_v38, %v4657_v20 }
 0x10a   : > { %2767 = vst.msk [vmem:[%s4149_s28 + $0x74] sm:$0xf] %vm2737_vm7, %v2638_v33  ;;  %v2377_v3 = vmul.f32 %v3595_v31, %v1358_v44  ;;  %v1370_v1 = vmul.f32 %v4716_v0, %v4662_v30  ;;  %v846_v4 = vmul.f32 %v3994_v46, %v523_v23  ;;  %3391 = vrsqrt.f32 %v4712_v12  ;;  %v248_v31 = vld [vmem:[%s3839_s23 + $0x298] sm:$0xff] }
 0x10b   : > { %v1348_v8 = vsel %vm1347_vm9, %v4664_v29, %v1344_v17  ;;  %v1392_v9 = vmul.f32 0.5, %v1391_v60  ;;  %v1381_v2 = vmul.f32 %v4705_v38, %v1380_v27  ;;  %vm1396_vm11 = vweird.f32 %v4693_v52  ;;  %v532_v27 = vpop.xlane.xlu0 %531 }
 0x10c   : > { %v2509_v57 = vmul.f32 %v4649_v32, %v2377_v3  ;;  %v2376_v25 = vmul.f32 %v3596_v49, %v1348_v8  ;;  %v1371_v15 = vmul.f32 %v4716_v0, %v1370_v1  ;;  %vm1386_vm12 = vweird.f32 %v4705_v38  ;;  %vm1397_vm13 = vmor %vm1395_vm5, %vm1396_vm11  ;;  %v247_v3 = vld [vmem:[%s3839_s23 + $0x290] sm:$0xff] }
 0x10d   : > { %v1393_v40 = vsub.f32 1.5, %v1392_v9  ;;  %v1382_v26 = vmul.f32 0.5, %v1381_v2  ;;  %3393 = vrsqrt.f32 %v4714_v56  ;;  %v4746_v50 = vadd.f32 1e-06, %v846_v4  ;;  %vm1387_vm15 = vmor %vm1385_vm10, %vm1386_vm12 }
 0x10e   : > { %v2637_v59 = vpack.c.bf16 %v2509_v57, %v2509_v57  ;;  %v2508_v29 = vmul.f32 %v4649_v32, %v2376_v25  ;;  %v1372_v58 = vmul.f32 0.5, %v1371_v15  ;;  %v373_v24 = vmul.f32 %v245_v5, %v245_v5 }
 0x10f   : > { %v1394_v18 = vmul.f32 %v4693_v52, %v1393_v40  ;;  %v1383_v55 = vsub.f32 1.5, %v1382_v26  ;;  %v372_v21 = vmul.f32 %v244_v45, %v244_v45  ;;  %vm1376_vm14 = vweird.f32 %v4716_v0  ;;  %v246_v45 = vld [vmem:[%s3839_s23 + $0x288] sm:$0xff] }
 0x110   : > { %2766 = vst.msk [vmem:[%s4149_s28 + $0x70] sm:$0xf] %vm2737_vm7, %v2637_v59  ;;  %v2636_v41 = vpack.c.bf16 %v2508_v29, %v2508_v29  ;;  %v1373_v19 = vsub.f32 1.5, %v1372_v58  ;;  %3395 = vrsqrt.f32 %v4746_v50  ;;  %v4758_v6 = vpop.eup %3391  ;;  %v662_v47 = vsel %vm421_vm0, %v373_v24, 0.0  ;;  %v547_v59 = vpop.xlane.xlu2 %546 }
 0x111   : > { %v1398_v42 = vsel %vm1397_vm13, %v4693_v52, %v1394_v18  ;;  %v1384_v43 = vmul.f32 %v4705_v38, %v1383_v55  ;;  %v659_v61 = vsel %vm421_vm0, %v372_v21, 0.0  ;;  %vm1375_vm1 = vweird.f32 %v4662_v30  ;;  %663 = vadd.xlane.f32.xlu2 %v662_v47  ;;  %v3598_v30 = vld [vmem:[%s3839_s23 + $0xf8] sm:$0xff]  ;;  %v544_v29 = vpop.xlane.xlu1 %543 }
 0x112   : > { %2765 = vst.msk [vmem:[%s4149_s28 + $0x6c] sm:$0xf] %vm2737_vm7, %v2636_v41  ;;  %v2381_v28 = vmul.f32 %v3597_v10, %v1398_v42  ;;  %v1374_v62 = vmul.f32 %v4716_v0, %v1373_v19  ;;  %v1420_v16 = vmul.f32 %v4758_v6, %v4712_v12  ;;  %vm1377_vm2 = vmor %vm1375_vm1, %vm1376_vm14  ;;  %vm1425_vm3 = vweird.f32 %v4712_v12  ;;  %660 = vadd.xlane.f32.xlu1 %v659_v61  ;;  %v3600_v21 = vld [vmem:[%s3839_s23 + $0x118] sm:$0xff] }
 0x113   : > { %v4775_v14 = vpop.eup %3393  ;;  %v1388_v7 = vsel %vm1387_vm15, %v4705_v38, %v1384_v43  ;;  %v371_v20 = vmul.f32 %v243_v13, %v243_v13  ;;  %v851_v37 = vmul.f32 %v3994_v46, %v538_v36  ;;  %vm1415_vm4 = vweird.f32 %v4714_v56 }
 0x114   : > { %v2513_v11 = vmul.f32 %v4649_v32, %v2381_v28  ;;  %v2380_v51 = vmul.f32 %v3598_v30, %v1388_v7  ;;  %v1378_v52 = vsel %vm1377_vm2, %v4716_v0, %v1374_v62  ;;  %v1421_v34 = vmul.f32 %v4758_v6, %v1420_v16 }
 0x115   : > { %v2379_v63 = vmul.f32 %v3599_v35, %v1378_v52  ;;  %v1410_v39 = vmul.f32 %v4775_v14, %v4714_v56  ;;  %v656_v53 = vsel %vm421_vm0, %v371_v20, 0.0  ;;  %v850_v54 = vmul.f32 %v3994_v46, %v535_v22  ;;  %v3601_v56 = vld [vmem:[%s3839_s23 + $0x110] sm:$0xff]  ;;  %v541_v52 = vpop.xlane.xlu0 %540 }
 0x116   : > { %v4792_v23 = vpop.eup %3395  ;;  %v2641_v38 = vpack.c.bf16 %v2513_v11, %v2513_v11  ;;  %v2512_v33 = vmul.f32 %v4649_v32, %v2380_v51  ;;  %v1422_v48 = vmul.f32 0.5, %v1421_v34  ;;  %657 = vadd.xlane.f32.xlu0 %v656_v53  ;;  %v4795_v0 = vadd.f32 1e-06, %v851_v37  ;;  %v3602_v11 = vld [vmem:[%s3839_s23 + $0x108] sm:$0xff]  ;;  %v251_v35 = vld [vmem:[%s3839_s23 + $0x2b0] sm:$0xff] }
 0x117   : > { %v2511_v44 = vmul.f32 %v4649_v32, %v2379_v63  ;;  %vm1426_vm5 = vweird.f32 %v4758_v6  ;;  %v1411_v17 = vmul.f32 %v4775_v14, %v1410_v39  ;;  %v1400_v60 = vmul.f32 %v4792_v23, %v4746_v50  ;;  %v250_v63 = vld [vmem:[%s3839_s23 + $0x2a8] sm:$0xff] }
 0x118   : > { %2770 = vst.msk [vmem:[%s4149_s28 + $0x80] sm:$0xf] %vm2737_vm7, %v2641_v38  ;;  %v2640_v1 = vpack.c.bf16 %v2512_v33, %v2512_v33  ;;  %v1423_v4 = vsub.f32 1.5, %v1422_v48  ;;  %vm1416_vm6 = vweird.f32 %v4775_v14  ;;  %3397 = vrsqrt.f32 %v4795_v0  ;;  %vm1427_vm8 = vmor %vm1425_vm3, %vm1426_vm5  ;;  %v249_v38 = vld [vmem:[%s3839_s23 + $0x2a0] sm:$0xff] }
 0x119   : > { %v2639_v8 = vpack.c.bf16 %v2511_v44, %v2511_v44  ;;  %v1412_v9 = vmul.f32 0.5, %v1411_v17  ;;  %v1401_v2 = vmul.f32 %v4792_v23, %v1400_v60  ;;  %v4809_v57 = vadd.f32 1e-06, %v850_v54  ;;  %vm1417_vm10 = vmor %vm1415_vm4, %vm1416_vm6  ;;  %v556_v17 = vpop.xlane.xlu2 %555 }
 0x11a   : > { %2769 = vst.msk [vmem:[%s4149_s28 + $0x7c] sm:$0xf] %vm2737_vm7, %v2640_v1  ;;  %v1424_v49 = vmul.f32 %v4758_v6, %v1423_v4  ;;  %v849_v25 = vmul.f32 %v3994_v46, %v532_v27  ;;  %v376_v15 = vmul.f32 %v248_v31, %v248_v31  ;;  %v375_v5 = vmul.f32 %v247_v3, %v247_v3 }
 0x11b   : > { %2768 = vst.msk [vmem:[%s4149_s28 + $0x78] sm:$0xf] %vm2737_vm7, %v2639_v8  ;;  %v1413_v40 = vsub.f32 1.5, %v1412_v9  ;;  %v1402_v26 = vmul.f32 0.5, %v1401_v2  ;;  %vm1406_vm9 = vweird.f32 %v4792_v23  ;;  %3399 = vrsqrt.f32 %v4809_v57 }
 0x11c   : > { %v1428_v58 = vsel %vm1427_vm8, %v4758_v6, %v1424_v49  ;;  %v4825_v18 = vadd.f32 1e-06, %v849_v25  ;;  %v671_v55 = vsel %vm421_vm0, %v376_v15, 0.0  ;;  %v668_v24 = vsel %vm421_vm0, %v375_v5, 0.0 }
 0x11d   : > { %v2384_v41 = vmul.f32 %v3600_v21, %v1428_v58  ;;  %v1414_v12 = vmul.f32 %v4775_v14, %v1413_v40  ;;  %v1403_v19 = vsub.f32 1.5, %v1402_v26  ;;  %672 = vadd.xlane.f32.xlu2 %v671_v55  ;;  %669 = vadd.xlane.f32.xlu1 %v668_v24  ;;  %v374_v13 = vmul.f32 %v246_v45, %v246_v45  ;;  %v3603_v26 = vld [vmem:[%s3839_s23 + $0x130] sm:$0xff]  ;;  %v553_v55 = vpop.xlane.xlu1 %552 }
 0x11e   : > { %v4831_v36 = vpop.eup %3397  ;;  %vm1405_vm11 = vweird.f32 %v4746_v50  ;;  %3401 = vrsqrt.f32 %v4825_v18  ;;  %v854_v6 = vmul.f32 %v3994_v46, %v547_v59  ;;  %v853_v42 = vmul.f32 %v3994_v46, %v544_v29 }
 0x11f   : > { %v2516_v43 = vmul.f32 %v4649_v32, %v2384_v41  ;;  %v1418_v47 = vsel %vm1417_vm10, %v4775_v14, %v1414_v12  ;;  %v1404_v61 = vmul.f32 %v4792_v23, %v1403_v19  ;;  %v1450_v22 = vmul.f32 %v4831_v36, %v4795_v0  ;;  %vm1407_vm12 = vmor %vm1405_vm11, %vm1406_vm9 }
 0x120   : > { %v2383_v10 = vmul.f32 %v3601_v56, %v1418_v47  ;;  %v665_v50 = vsel %vm421_vm0, %v374_v13, 0.0  ;;  %v4850_v28 = vadd.f32 1e-06, %v854_v6  ;;  %v4856_v20 = vadd.f32 1e-06, %v853_v42  ;;  %v3604_v6 = vld [vmem:[%s3839_s23 + $0x128] sm:$0xff] }
 0x121   : > { %v4852_v62 = vpop.eup %3399  ;;  %v2644_v16 = vpack.c.bf16 %v2516_v43, %v2516_v43  ;;  %v1408_v14 = vsel %vm1407_vm12, %v4792_v23, %v1404_v61  ;;  %v1451_v7 = vmul.f32 %v4831_v36, %v1450_v22  ;;  %666 = vadd.xlane.f32.xlu0 %v665_v50  ;;  %vm1455_vm13 = vweird.f32 %v4795_v0  ;;  %v550_v61 = vpop.xlane.xlu0 %549 }
 0x122   : > { %v2515_v37 = vmul.f32 %v4649_v32, %v2383_v10  ;;  %v2382_v30 = vmul.f32 %v3602_v11, %v1408_v14  ;;  %v1440_v51 = vmul.f32 %v4852_v62, %v4809_v57  ;;  %vm1456_vm14 = vweird.f32 %v4831_v36 }
 0x123   : > { %2773 = vst.msk [vmem:[%s4149_s28 + $0x8c] sm:$0xf] %vm2737_vm7, %v2644_v16  ;;  %v1452_v34 = vmul.f32 0.5, %v1451_v7  ;;  %vm1445_vm15 = vweird.f32 %v4809_v57  ;;  %3403 = vrsqrt.f32 %v4850_v28  ;;  %vm1446_vm1 = vweird.f32 %v4852_v62  ;;  %vm1457_vm2 = vmor %vm1455_vm13, %vm1456_vm14 }
 0x124   : > { %v4870_v39 = vpop.eup %3401  ;;  %v2643_v53 = vpack.c.bf16 %v2515_v37, %v2515_v37  ;;  %v2514_v54 = vmul.f32 %v4649_v32, %v2382_v30  ;;  %v1441_v23 = vmul.f32 %v4852_v62, %v1440_v51  ;;  %3405 = vrsqrt.f32 %v4856_v20  ;;  %vm1447_vm5 = vmor %vm1445_vm15, %vm1446_vm1  ;;  %v254_v30 = vld [vmem:[%s3839_s23 + $0x2c8] sm:$0xff]  ;;  %v253_v51 = vld [vmem:[%s3839_s23 + $0x2c0] sm:$0xff] }
 0x125   : > { %v1453_v33 = vsub.f32 1.5, %v1452_v34  ;;  %v1430_v48 = vmul.f32 %v4870_v39, %v4825_v18  ;;  %v852_v44 = vmul.f32 %v3994_v46, %v541_v52  ;;  %v379_v31 = vmul.f32 %v251_v35, %v251_v35 }
 0x126   : > { %2772 = vst.msk [vmem:[%s4149_s28 + $0x88] sm:$0xf] %vm2737_vm7, %v2643_v53  ;;  %v2642_v60 = vpack.c.bf16 %v2514_v54, %v2514_v54  ;;  %v1442_v27 = vmul.f32 0.5, %v1441_v23  ;;  %v378_v3 = vmul.f32 %v250_v63, %v250_v63  ;;  %v377_v9 = vmul.f32 %v249_v38, %v249_v38  ;;  %v252_v54 = vld [vmem:[%s3839_s23 + $0x2b8] sm:$0xff] }
 0x127   : > { %v1454_v1 = vmul.f32 %v4831_v36, %v1453_v33  ;;  %v1431_v4 = vmul.f32 %v4870_v39, %v1430_v48  ;;  %v4884_v8 = vadd.f32 1e-06, %v852_v44  ;;  %v680_v49 = vsel %vm421_vm0, %v379_v31, 0.0  ;;  %v3606_v31 = vld [vmem:[%s3839_s23 + $0x148] sm:$0xff] }
 0x128   : > { %2771 = vst.msk [vmem:[%s4149_s28 + $0x84] sm:$0xf] %vm2737_vm7, %v2642_v60  ;;  %v1443_v2 = vsub.f32 1.5, %v1442_v27  ;;  %v677_v25 = vsel %vm421_vm0, %v378_v3, 0.0  ;;  %v857_v15 = vmul.f32 %v3994_v46, %v556_v17  ;;  %vm1435_vm3 = vweird.f32 %v4825_v18  ;;  %681 = vadd.xlane.f32.xlu2 %v680_v49  ;;  %v3605_v18 = vld [vmem:[%s3839_s23 + $0x120] sm:$0xff]  ;;  %v565_v27 = vpop.xlane.xlu2 %564 }
 0x129   : > { %v4895_v5 = vpop.eup %3403  ;;  %v1458_v45 = vsel %vm1457_vm2, %v4831_v36, %v1454_v1  ;;  %v1432_v40 = vmul.f32 0.5, %v1431_v4  ;;  %3407 = vrsqrt.f32 %v4884_v8  ;;  %678 = vadd.xlane.f32.xlu1 %v677_v25  ;;  %vm1485_vm4 = vweird.f32 %v4850_v28 }
 0x12a   : > { %v4900_v0 = vpop.eup %3405  ;;  %v2387_v59 = vmul.f32 %v3603_v26, %v1458_v45  ;;  %v1444_v29 = vmul.f32 %v4852_v62, %v1443_v2  ;;  %v1480_v58 = vmul.f32 %v4895_v5, %v4850_v28  ;;  %vm1436_vm6 = vweird.f32 %v4870_v39  ;;  %v3607_v2 = vld [vmem:[%s3839_s23 + $0x140] sm:$0xff]  ;;  %v559_v26 = vpop.xlane.xlu0 %558 }
 0x12b   : > { %v1433_v24 = vsub.f32 1.5, %v1432_v40  ;;  %v1470_v21 = vmul.f32 %v4900_v0, %v4856_v20  ;;  %v674_v41 = vsel %vm421_vm0, %v377_v9, 0.0  ;;  %v4918_v36 = vadd.f32 1e-06, %v857_v15  ;;  %vm1437_vm8 = vmor %vm1435_vm3, %vm1436_vm6 }
 0x12c   : > { %v2519_v12 = vmul.f32 %v4649_v32, %v2387_v59  ;;  %v1448_v19 = vsel %vm1447_vm5, %v4852_v62, %v1444_v29  ;;  %v1481_v13 = vmul.f32 %v4895_v5, %v1480_v58  ;;  %675 = vadd.xlane.f32.xlu0 %v674_v41  ;;  %v856_v47 = vmul.f32 %v3994_v46, %v553_v55 }
 0x12d   : > { %v2386_v57 = vmul.f32 %v3604_v6, %v1448_v19  ;;  %v1434_v42 = vmul.f32 %v4870_v39, %v1433_v24  ;;  %v1471_v43 = vmul.f32 %v4900_v0, %v1470_v21  ;;  %vm1475_vm9 = vweird.f32 %v4856_v20 }
 0x12e   : > { %v2647_v22 = vpack.c.bf16 %v2519_v12, %v2519_v12  ;;  %v1482_v56 = vmul.f32 0.5, %v1481_v13  ;;  %3409 = vrsqrt.f32 %v4918_v36  ;;  %v4934_v14 = vadd.f32 1e-06, %v856_v47  ;;  %v257_v12 = vld [vmem:[%s3839_s23 + $0x2e0] sm:$0xff] }
 0x12f   : > { %v4930_v10 = vpop.eup %3407  ;;  %v2518_v50 = vmul.f32 %v4649_v32, %v2386_v57  ;;  %v1438_v62 = vsel %vm1437_vm8, %v4870_v39, %v1434_v42  ;;  %v1472_v16 = vmul.f32 0.5, %v1471_v43  ;;  %vm1486_vm10 = vweird.f32 %v4895_v5  ;;  %v256_v42 = vld [vmem:[%s3839_s23 + $0x2d8] sm:$0xff] }
 0x130   : > { %2776 = vst.msk [vmem:[%s4149_s28 + $0x98] sm:$0xf] %vm2737_vm7, %v2647_v22  ;;  %v2385_v7 = vmul.f32 %v3605_v18, %v1438_v62  ;;  %v1483_v37 = vsub.f32 1.5, %v1482_v56  ;;  %v1460_v11 = vmul.f32 %v4930_v10, %v4884_v8  ;;  %vm1476_vm11 = vweird.f32 %v4900_v0  ;;  %vm1487_vm12 = vmor %vm1485_vm4, %vm1486_vm10 }
 0x131   : > { %v2646_v52 = vpack.c.bf16 %v2518_v50, %v2518_v50  ;;  %v1473_v34 = vsub.f32 1.5, %v1472_v16  ;;  %3411 = vrsqrt.f32 %v4934_v14  ;;  %v855_v53 = vmul.f32 %v3994_v46, %v550_v61  ;;  %vm1477_vm14 = vmor %vm1475_vm9, %vm1476_vm11 }
 0x132   : > { %v2517_v35 = vmul.f32 %v4649_v32, %v2385_v7  ;;  %v1484_v63 = vmul.f32 %v4895_v5, %v1483_v37  ;;  %v1461_v39 = vmul.f32 %v4930_v10, %v1460_v11  ;;  %vm1465_vm13 = vweird.f32 %v4884_v8  ;;  %v3608_v8 = vld [vmem:[%s3839_s23 + $0x138] sm:$0xff] }
 0x133   : > { %2775 = vst.msk [vmem:[%s4149_s28 + $0x94] sm:$0xf] %vm2737_vm7, %v2646_v52  ;;  %v1474_v23 = vmul.f32 %v4900_v0, %v1473_v34  ;;  %v382_v38 = vmul.f32 %v254_v30, %v254_v30  ;;  %v381_v33 = vmul.f32 %v253_v51, %v253_v51  ;;  %v4964_v60 = vadd.f32 1e-06, %v855_v53  ;;  %v255_v30 = vld [vmem:[%s3839_s23 + $0x2d0] sm:$0xff]  ;;  %v574_v51 = vpop.xlane.xlu2 %573 }
 0x134   : > { %v4957_v48 = vpop.eup %3409  ;;  %v2645_v44 = vpack.c.bf16 %v2517_v35, %v2517_v35  ;;  %v1488_v17 = vsel %vm1487_vm12, %v4895_v5, %v1484_v63  ;;  %v1462_v28 = vmul.f32 0.5, %v1461_v39  ;;  %v380_v9 = vmul.f32 %v252_v54, %v252_v54 }
 0x135   : > { %v2390_v3 = vmul.f32 %v3606_v31, %v1488_v17  ;;  %v1478_v1 = vsel %vm1477_vm14, %v4900_v0, %v1474_v23  ;;  %v1510_v4 = vmul.f32 %v4957_v48, %v4918_v36  ;;  %vm1466_vm15 = vweird.f32 %v4930_v10  ;;  %v562_v0 = vpop.xlane.xlu1 %561  ;;  %v568_v17 = vpop.xlane.xlu0 %567 }
 0x136   : > { %2774 = vst.msk [vmem:[%s4149_s28 + $0x90] sm:$0xf] %vm2737_vm7, %v2645_v44  ;;  %v2389_v49 = vmul.f32 %v3607_v2, %v1478_v1  ;;  %v1463_v25 = vsub.f32 1.5, %v1462_v28  ;;  %3413 = vrsqrt.f32 %v4964_v60  ;;  %v689_v45 = vsel %vm421_vm0, %v382_v38, 0.0  ;;  %vm1467_vm2 = vmor %vm1465_vm13, %vm1466_vm15  ;;  %v260_v28 = vld [vmem:[%s3839_s23 + $0x2f8] sm:$0xff] }
 0x137   : > { %v4975_v20 = vpop.eup %3411  ;;  %v2522_v15 = vmul.f32 %v4649_v32, %v2390_v3  ;;  %v1511_v5 = vmul.f32 %v4957_v48, %v1510_v4  ;;  %v686_v40 = vsel %vm421_vm0, %v381_v33, 0.0  ;;  %vm1515_vm1 = vweird.f32 %v4918_v36  ;;  %690 = vadd.xlane.f32.xlu2 %v689_v45  ;;  %v3609_v36 = vld [vmem:[%s3839_s23 + $0x160] sm:$0xff] }
 0x138   : > { %v2521_v59 = vmul.f32 %v4649_v32, %v2389_v49  ;;  %v1464_v29 = vmul.f32 %v4930_v10, %v1463_v25  ;;  %v1500_v58 = vmul.f32 %v4975_v20, %v4934_v14  ;;  %687 = vadd.xlane.f32.xlu1 %v686_v40  ;;  %v683_v21 = vsel %vm421_vm0, %v380_v9, 0.0 }
 0x139   : > { %v2650_v55 = vpack.c.bf16 %v2522_v15, %v2522_v15  ;;  %v1512_v24 = vmul.f32 0.5, %v1511_v5  ;;  %v860_v41 = vmul.f32 %v3994_v46, %v565_v27  ;;  %684 = vadd.xlane.f32.xlu0 %v683_v21  ;;  %v859_v57 = vmul.f32 %v3994_v46, %v562_v0 }
 0x13a   : > { %v2649_v19 = vpack.c.bf16 %v2521_v59, %v2521_v59  ;;  %v1468_v13 = vsel %vm1467_vm2, %v4930_v10, %v1464_v29  ;;  %v1501_v6 = vmul.f32 %v4975_v20, %v1500_v58  ;;  %vm1516_vm3 = vweird.f32 %v4957_v48 }
 0x13b   : > { %2779 = vst.msk [vmem:[%s4149_s28 + $0xa4] sm:$0xf] %vm2737_vm7, %v2650_v55  ;;  %v2388_v43 = vmul.f32 %v3608_v8, %v1468_v13  ;;  %v1513_v47 = vsub.f32 1.5, %v1512_v24  ;;  %v5001_v61 = vadd.f32 1e-06, %v860_v41  ;;  %v858_v50 = vmul.f32 %v3994_v46, %v559_v26  ;;  %vm1517_vm4 = vmor %vm1515_vm1, %vm1516_vm3  ;;  %v3611_v24 = vld [vmem:[%s3839_s23 + $0x150] sm:$0xff]  ;;  %v583_v8 = vpop.xlane.xlu2 %582 }
 0x13c   : > { %v5003_v22 = vpop.eup %3413  ;;  %2778 = vst.msk [vmem:[%s4149_s28 + $0xa0] sm:$0xf] %vm2737_vm7, %v2649_v19  ;;  %v1502_v56 = vmul.f32 0.5, %v1501_v6  ;;  %v5007_v10 = vadd.f32 1e-06, %v859_v57  ;;  %v385_v62 = vmul.f32 %v257_v12, %v257_v12  ;;  %v384_v37 = vmul.f32 %v256_v42, %v256_v42  ;;  %v259_v13 = vld [vmem:[%s3839_s23 + $0x2f0] sm:$0xff] }
 0x13d   : > { %v2520_v16 = vmul.f32 %v4649_v32, %v2388_v43  ;;  %v1514_v18 = vmul.f32 %v4957_v48, %v1513_v47  ;;  %v1490_v7 = vmul.f32 %v5003_v22, %v4964_v60  ;;  %vm1505_vm5 = vweird.f32 %v4934_v14  ;;  %v571_v44 = vpop.xlane.xlu1 %570  ;;  %v3610_v14 = vld [vmem:[%s3839_s23 + $0x158] sm:$0xff]  ;;  %v258_v42 = vld [vmem:[%s3839_s23 + $0x2e8] sm:$0xff] }
 0x13e   : > { %v1503_v11 = vsub.f32 1.5, %v1502_v56  ;;  %vm1506_vm6 = vweird.f32 %v4975_v20  ;;  %3415 = vrsqrt.f32 %v5001_v61  ;;  %v5025_v53 = vadd.f32 1e-06, %v858_v50 }
 0x13f   : > { %v2648_v52 = vpack.c.bf16 %v2520_v16, %v2520_v16  ;;  %v1518_v34 = vsel %vm1517_vm4, %v4957_v48, %v1514_v18  ;;  %v1491_v35 = vmul.f32 %v5003_v22, %v1490_v7  ;;  %3417 = vrsqrt.f32 %v5007_v10  ;;  %vm1507_vm8 = vmor %vm1505_vm5, %vm1506_vm6 }
 0x140   : > { %v2393_v63 = vmul.f32 %v3609_v36, %v1518_v34  ;;  %v1504_v39 = vmul.f32 %v4975_v20, %v1503_v11  ;;  %v698_v54 = vsel %vm421_vm0, %v385_v62, 0.0  ;;  %v695_v38 = vsel %vm421_vm0, %v384_v37, 0.0 }
 0x141   : > { %2777 = vst.msk [vmem:[%s4149_s28 + $0x9c] sm:$0xf] %vm2737_vm7, %v2648_v52  ;;  %v1492_v23 = vmul.f32 0.5, %v1491_v35  ;;  %699 = vadd.xlane.f32.xlu2 %v698_v54  ;;  %v383_v33 = vmul.f32 %v255_v30, %v255_v30  ;;  %v863_v48 = vmul.f32 %v3994_v46, %v574_v51  ;;  %vm1496_vm9 = vweird.f32 %v5003_v22  ;;  %696 = vadd.xlane.f32.xlu1 %v695_v38 }
 0x142   : > { %v2525_v27 = vmul.f32 %v4649_v32, %v2393_v63  ;;  %v1508_v31 = vsel %vm1507_vm8, %v4975_v20, %v1504_v39  ;;  %3419 = vrsqrt.f32 %v5025_v53  ;;  %v862_v25 = vmul.f32 %v3994_v46, %v571_v44 }
 0x143   : > { %v2392_v3 = vmul.f32 %v3610_v14, %v1508_v31  ;;  %v1493_v1 = vsub.f32 1.5, %v1492_v23  ;;  %v692_v4 = vsel %vm421_vm0, %v383_v33, 0.0  ;;  %v5041_v9 = vadd.f32 1e-06, %v863_v48  ;;  %v3612_v33 = vld [vmem:[%s3839_s23 + $0x178] sm:$0xff] }
 0x144   : > { %v5043_v2 = vpop.eup %3415  ;;  %v2653_v49 = vpack.c.bf16 %v2525_v27, %v2525_v27  ;;  %693 = vadd.xlane.f32.xlu0 %v692_v4  ;;  %v861_v20 = vmul.f32 %v3994_v46, %v568_v17  ;;  %v388_v15 = vmul.f32 %v260_v28, %v260_v28  ;;  %vm1495_vm10 = vweird.f32 %v4964_v60  ;;  %v577_v28 = vpop.xlane.xlu0 %576  ;;  %v3613_v27 = vld [vmem:[%s3839_s23 + $0x170] sm:$0xff] }
 0x145   : > { %v5047_v5 = vpop.eup %3417  ;;  %v2524_v45 = vmul.f32 %v4649_v32, %v2392_v3  ;;  %v1494_v40 = vmul.f32 %v5003_v22, %v1493_v1  ;;  %v1540_v0 = vmul.f32 %v5043_v2, %v5001_v61  ;;  %vm1497_vm11 = vmor %vm1495_vm10, %vm1496_vm9  ;;  %vm1545_vm12 = vweird.f32 %v5001_v61  ;;  %v580_v52 = vpop.xlane.xlu1 %579 }
 0x146   : > { %2782 = vst.msk [vmem:[%s4149_s28 + $0xb0] sm:$0xf] %vm2737_vm7, %v2653_v49  ;;  %v1530_v26 = vmul.f32 %v5047_v5, %v5007_v10  ;;  %vm1535_vm13 = vweird.f32 %v5007_v10  ;;  %3421 = vrsqrt.f32 %v5041_v9  ;;  %v5065_v58 = vadd.f32 1e-06, %v862_v25 }
 0x147   : > { %v2652_v60 = vpack.c.bf16 %v2524_v45, %v2524_v45  ;;  %v1498_v59 = vsel %vm1497_vm11, %v5003_v22, %v1494_v40  ;;  %v1541_v29 = vmul.f32 %v5043_v2, %v1540_v0  ;;  %v5071_v12 = vadd.f32 1e-06, %v861_v20  ;;  %v3614_v40 = vld [vmem:[%s3839_s23 + $0x168] sm:$0xff] }
 0x148   : > { %v5067_v55 = vpop.eup %3419  ;;  %v2391_v21 = vmul.f32 %v3611_v24, %v1498_v59  ;;  %v1531_v41 = vmul.f32 %v5047_v5, %v1530_v26  ;;  %v707_v19 = vsel %vm421_vm0, %v388_v15, 0.0  ;;  %vm1525_vm14 = vweird.f32 %v5025_v53 }
 0x149   : > { %2781 = vst.msk [vmem:[%s4149_s28 + $0xac] sm:$0xf] %vm2737_vm7, %v2652_v60  ;;  %v1542_v6 = vmul.f32 0.5, %v1541_v29  ;;  %v1520_v57 = vmul.f32 %v5067_v55, %v5025_v53  ;;  %3423 = vrsqrt.f32 %v5065_v58  ;;  %708 = vadd.xlane.f32.xlu2 %v707_v19  ;;  %vm1546_vm15 = vweird.f32 %v5043_v2 }
 0x14a   : > { %v2523_v43 = vmul.f32 %v4649_v32, %v2391_v21  ;;  %v1532_v47 = vmul.f32 0.5, %v1531_v41  ;;  %3425 = vrsqrt.f32 %v5071_v12  ;;  %vm1536_vm1 = vweird.f32 %v5047_v5  ;;  %vm1547_vm3 = vmor %vm1545_vm12, %vm1546_vm15 }
 0x14b   : > { %v1543_v22 = vsub.f32 1.5, %v1542_v6  ;;  %v1521_v56 = vmul.f32 %v5067_v55, %v1520_v57  ;;  %v387_v50 = vmul.f32 %v259_v13, %v259_v13  ;;  %v386_v7 = vmul.f32 %v258_v42, %v258_v42  ;;  %vm1537_vm4 = vmor %vm1535_vm13, %vm1536_vm1  ;;  %v3615_v57 = vld [vmem:[%s3839_s23 + $0x190] sm:$0xff] }
 0x14c   : > { %v5087_v62 = vpop.eup %3421  ;;  %v2651_v16 = vpack.c.bf16 %v2523_v43, %v2523_v43  ;;  %v1533_v18 = vsub.f32 1.5, %v1532_v47  ;;  %v866_v37 = vmul.f32 %v3994_v46, %v583_v8  ;;  %vm1575_vm2 = vweird.f32 %v5041_v9  ;;  %v262_v47 = vld [vmem:[%s3839_s23 + $0x308] sm:$0xff] }
 0x14d   : > { %v1544_v11 = vmul.f32 %v5043_v2, %v1543_v22  ;;  %v1522_v30 = vmul.f32 0.5, %v1521_v56  ;;  %v1570_v51 = vmul.f32 %v5087_v62, %v5041_v9  ;;  %v704_v35 = vsel %vm421_vm0, %v387_v50, 0.0  ;;  %v592_v22 = vpop.xlane.xlu2 %591 }
 0x14e   : > { %2780 = vst.msk [vmem:[%s4149_s28 + $0xa8] sm:$0xf] %vm2737_vm7, %v2651_v16  ;;  %v1534_v34 = vmul.f32 %v5047_v5, %v1533_v18  ;;  %v701_v36 = vsel %vm421_vm0, %v386_v7, 0.0  ;;  %v5103_v63 = vadd.f32 1e-06, %v866_v37  ;;  %vm1526_vm5 = vweird.f32 %v5067_v55  ;;  %705 = vadd.xlane.f32.xlu1 %v704_v35  ;;  %v261_v18 = vld [vmem:[%s3839_s23 + $0x300] sm:$0xff]  ;;  %v586_v37 = vpop.xlane.xlu0 %585 }
 0x14f   : > { %v5105_v39 = vpop.eup %3423  ;;  %v1548_v54 = vsel %vm1547_vm3, %v5043_v2, %v1544_v11  ;;  %v1523_v61 = vsub.f32 1.5, %v1522_v30  ;;  %v1571_v23 = vmul.f32 %v5087_v62, %v1570_v51  ;;  %702 = vadd.xlane.f32.xlu0 %v701_v36  ;;  %vm1565_vm6 = vweird.f32 %v5065_v58  ;;  %vm1527_vm8 = vmor %vm1525_vm14, %vm1526_vm5  ;;  %v3616_v11 = vld [vmem:[%s3839_s23 + $0x188] sm:$0xff]  ;;  %v3617_v35 = vld [vmem:[%s3839_s23 + $0x180] sm:$0xff] }
 0x150   : > { %v5114_v38 = vpop.eup %3425  ;;  %v2396_v48 = vmul.f32 %v3612_v33, %v1548_v54  ;;  %v1538_v44 = vsel %vm1537_vm4, %v5047_v5, %v1534_v34  ;;  %v1560_v17 = vmul.f32 %v5105_v39, %v5065_v58  ;;  %v865_v10 = vmul.f32 %v3994_v46, %v580_v52  ;;  %v263_v5 = vld [vmem:[%s3839_s23 + $0x310] sm:$0xff] }
 0x151   : > { %v2395_v31 = vmul.f32 %v3613_v27, %v1538_v44  ;;  %v1524_v14 = vmul.f32 %v5067_v55, %v1523_v61  ;;  %v1572_v3 = vmul.f32 0.5, %v1571_v23  ;;  %v1550_v1 = vmul.f32 %v5114_v38, %v5071_v12  ;;  %v5197_v23 = vld [vmem:[%s6926_s1] ss:$0 sm:$0xff] }
 0x152   : > { %v2528_v4 = vmul.f32 %v4649_v32, %v2396_v48  ;;  %vm1576_vm9 = vweird.f32 %v5087_v62  ;;  %v1561_v2 = vmul.f32 %v5105_v39, %v1560_v17  ;;  %3427 = vrsqrt.f32 %v5103_v63  ;;  %v266_v17 = vld [vmem:[%s3839_s23 + $0x328] sm:$0xff] }
 0x153   : > { %v2527_v49 = vmul.f32 %v4649_v32, %v2395_v31  ;;  %v1528_v25 = vsel %vm1527_vm8, %v5067_v55, %v1524_v14  ;;  %v1573_v20 = vsub.f32 1.5, %v1572_v3  ;;  %v1551_v15 = vmul.f32 %v5114_v38, %v1550_v1  ;;  %vm1577_vm11 = vmor %vm1575_vm2, %vm1576_vm9 }
 0x154   : > { %v2656_v45 = vpack.c.bf16 %v2528_v4, %v2528_v4  ;;  %v2394_v53 = vmul.f32 %v3614_v40, %v1528_v25  ;;  %v1562_v0 = vmul.f32 0.5, %v1561_v2  ;;  %vm1566_vm10 = vweird.f32 %v5105_v39  ;;  %v264_v40 = vld [vmem:[%s3839_s23 + $0x318] sm:$0xff] }
 0x155   : > { %v2655_v26 = vpack.c.bf16 %v2527_v49, %v2527_v49  ;;  %v1574_v60 = vmul.f32 %v5087_v62, %v1573_v20  ;;  %v1552_v59 = vmul.f32 0.5, %v1551_v15  ;;  %v5141_v29 = vadd.f32 1e-06, %v865_v10  ;;  %vm5167_vm13 = vmor %vm1565_vm6, %vm1566_vm10 }
 0x156   : > { %2785 = vst.msk [vmem:[%s4149_s28 + $0xbc] sm:$0xf] %vm2737_vm7, %v2656_v45  ;;  %v2526_v55 = vmul.f32 %v4649_v32, %v2394_v53  ;;  %v1563_v24 = vsub.f32 1.5, %v1562_v0  ;;  %v864_v21 = vmul.f32 %v3994_v46, %v577_v28  ;;  %v391_v41 = vmul.f32 %v263_v5, %v263_v5  ;;  %v265_v45 = vld [vmem:[%s3839_s23 + $0x320] sm:$0xff]  ;;  %v601_v0 = vpop.xlane.xlu2 %600 }
 0x157   : > { %2784 = vst.msk [vmem:[%s4149_s28 + $0xb8] sm:$0xf] %vm2737_vm7, %v2655_v26  ;;  %v1578_v19 = vsel %vm1577_vm11, %v5087_v62, %v1574_v60  ;;  %v1553_v13 = vsub.f32 1.5, %v1552_v59  ;;  %vm1556_vm12 = vweird.f32 %v5114_v38  ;;  %3429 = vrsqrt.f32 %v5141_v29 }
 0x158   : > { %v5156_v6 = vpop.eup %3427  ;;  %v2654_v9 = vpack.c.bf16 %v2526_v55, %v2526_v55  ;;  %v2399_v42 = vmul.f32 %v3615_v57, %v1578_v19  ;;  %v1564_v8 = vmul.f32 %v5105_v39, %v1563_v24  ;;  %v5160_v43 = vadd.f32 1e-06, %v864_v21  ;;  %v3619_v24 = vld [vmem:[%s3839_s23 + $0x1a8] sm:$0xff] }
 0x159   : > { %v1554_v50 = vmul.f32 %v5114_v38, %v1553_v13  ;;  %vm1555_vm14 = vweird.f32 %v5071_v12  ;;  %v1600_v62 = vmul.f32 %v5156_v6, %v5103_v63  ;;  %v716_v16 = vsel %vm421_vm0, %v391_v41, 0.0  ;;  %v589_v12 = vpop.xlane.xlu1 %588 }
 0x15a   : > { %2783 = vst.msk [vmem:[%s4149_s28 + $0xb4] sm:$0xf] %vm2737_vm7, %v2654_v9  ;;  %v2531_v58 = vmul.f32 %v4649_v32, %v2399_v42  ;;  %v1568_v7 = vsel %vm5167_vm13, %v5105_v39, %v1564_v8  ;;  %vm1557_vm15 = vmor %vm1555_vm14, %vm1556_vm12  ;;  %vm1605_vm1 = vweird.f32 %v5103_v63  ;;  %3431 = vrsqrt.f32 %v5160_v43  ;;  %717 = vadd.xlane.f32.xlu2 %v716_v16  ;;  %v595_v9 = vpop.xlane.xlu0 %594 }
 0x15b   : > { %v2398_v30 = vmul.f32 %v3616_v11, %v1568_v7  ;;  %v1558_v32 = vsel %vm1557_vm15, %v5114_v38, %v1554_v50  ;;  %v1601_v51 = vmul.f32 %v5156_v6, %v1600_v62  ;;  %v390_v52 = vmul.f32 %v262_v47, %v262_v47 }
 0x15c   : > { %v2659_v34 = vpack.c.bf16 %v2531_v58, %v2531_v58  ;;  %v2397_v36 = vmul.f32 %v3617_v35, %v1558_v32  ;;  %v389_v39 = vmul.f32 %v261_v18, %v261_v18  ;;  %v869_v54 = vmul.f32 %v3994_v46, %v592_v22 }
 0x15d   : > { %v5192_v61 = vpop.eup %3429  ;;  %v2530_v33 = vmul.f32 %v5197_v23, %v2398_v30  ;;  %v1602_v48 = vmul.f32 0.5, %v1601_v51  ;;  %v713_v38 = vsel %vm421_vm0, %v390_v52, 0.0  ;;  %v868_v44 = vmul.f32 %v3994_v46, %v589_v12 }
 0x15e   : > { %2788 = vst.msk [vmem:[%s4149_s28 + $0xc8] sm:$0xf] %vm2737_vm7, %v2659_v34  ;;  %v2529_v10 = vmul.f32 %v5197_v23, %v2397_v36  ;;  %vm1606_vm2 = vweird.f32 %v5156_v6  ;;  %v1590_v28 = vmul.f32 %v5192_v61, %v5141_v29  ;;  %714 = vadd.xlane.f32.xlu1 %v713_v38  ;;  %v710_v27 = vsel %vm421_vm0, %v389_v39, 0.0  ;;  %v269_v38 = vld [vmem:[%s3839_s23 + $0x340] sm:$0xff] }
 0x15f   : > { %v2658_v31 = vpack.c.bf16 %v2530_v33, %v2530_v33  ;;  %v1603_v14 = vsub.f32 1.5, %v1602_v48  ;;  %711 = vadd.xlane.f32.xlu0 %v710_v27  ;;  %v5210_v3 = vadd.f32 1e-06, %v869_v54  ;;  %v5212_v1 = vadd.f32 1e-06, %v868_v44  ;;  %vm1607_vm3 = vmor %vm1605_vm1, %vm1606_vm2  ;;  %v3621_v54 = vld [vmem:[%s3839_s23 + $0x198] sm:$0xff] }
 0x160   : > { %v5214_v4 = vpop.eup %3431  ;;  %v2657_v2 = vpack.c.bf16 %v2529_v10, %v2529_v10  ;;  %v1591_v49 = vmul.f32 %v5192_v61, %v1590_v28  ;;  %v867_v25 = vmul.f32 %v3994_v46, %v586_v37  ;;  %v394_v20 = vmul.f32 %v266_v17, %v266_v17  ;;  %v3620_v37 = vld [vmem:[%s3839_s23 + $0x1a0] sm:$0xff]  ;;  %v268_v44 = vld [vmem:[%s3839_s23 + $0x338] sm:$0xff]  ;;  %v267_v28 = vld [vmem:[%s3839_s23 + $0x330] sm:$0xff] }
 0x161   : > { %2787 = vst.msk [vmem:[%s4149_s28 + $0xc4] sm:$0xf] %vm2737_vm7, %v2658_v31  ;;  %v1604_v15 = vmul.f32 %v5156_v6, %v1603_v14  ;;  %v1580_v5 = vmul.f32 %v5214_v4, %v5160_v43  ;;  %3433 = vrsqrt.f32 %v5210_v3  ;;  %vm1595_vm4 = vweird.f32 %v5141_v29  ;;  %v598_v13 = vpop.xlane.xlu1 %597 }
 0x162   : > { %2786 = vst.msk [vmem:[%s4149_s28 + $0xc0] sm:$0xf] %vm2737_vm7, %v2657_v2  ;;  %v1592_v53 = vmul.f32 0.5, %v1591_v49  ;;  %vm1596_vm5 = vweird.f32 %v5192_v61  ;;  %3435 = vrsqrt.f32 %v5212_v1  ;;  %v5237_v59 = vadd.f32 1e-06, %v867_v25 }
 0x163   : > { %v1608_v26 = vsel %vm1607_vm3, %v5156_v6, %v1604_v15  ;;  %v1581_v60 = vmul.f32 %v5214_v4, %v1580_v5  ;;  %v725_v55 = vsel %vm421_vm0, %v394_v20, 0.0  ;;  %v393_v41 = vmul.f32 %v265_v45, %v265_v45  ;;  %vm1597_vm8 = vmor %vm1595_vm4, %vm1596_vm5 }
 0x164   : > { %v2402_v21 = vmul.f32 %v3619_v24, %v1608_v26  ;;  %v1593_v63 = vsub.f32 1.5, %v1592_v53  ;;  %726 = vadd.xlane.f32.xlu2 %v725_v55  ;;  %v392_v19 = vmul.f32 %v264_v40, %v264_v40  ;;  %vm1586_vm6 = vweird.f32 %v5214_v4 }
 0x165   : > { %v1582_v57 = vmul.f32 0.5, %v1581_v60  ;;  %3437 = vrsqrt.f32 %v5237_v59  ;;  %v872_v6 = vmul.f32 %v3994_v46, %v601_v0  ;;  %v722_v47 = vsel %vm421_vm0, %v393_v41, 0.0  ;;  %v3622_v41 = vld [vmem:[%s3839_s23 + $0x1c0] sm:$0xff] }
 0x166   : > { %v2534_v42 = vmul.f32 %v5197_v23, %v2402_v21  ;;  %v1594_v8 = vmul.f32 %v5192_v61, %v1593_v63  ;;  %v719_v22 = vsel %vm421_vm0, %v392_v19, 0.0  ;;  %723 = vadd.xlane.f32.xlu1 %v722_v47  ;;  %v871_v16 = vmul.f32 %v3994_v46, %v598_v13  ;;  %v610_v21 = vpop.xlane.xlu2 %609 }
 0x167   : > { %v5248_v56 = vpop.eup %3433  ;;  %v1583_v50 = vsub.f32 1.5, %v1582_v57  ;;  %720 = vadd.xlane.f32.xlu0 %v719_v22  ;;  %v5254_v62 = vadd.f32 1e-06, %v872_v6  ;;  %v870_v18 = vmul.f32 %v3994_v46, %v595_v9  ;;  %vm1585_vm9 = vweird.f32 %v5160_v43  ;;  %v3623_v6 = vld [vmem:[%s3839_s23 + $0x1b8] sm:$0xff]  ;;  %v604_v22 = vpop.xlane.xlu0 %603 }
 0x168   : > { %v5258_v58 = vpop.eup %3435  ;;  %v2662_v7 = vpack.c.bf16 %v2534_v42, %v2534_v42  ;;  %v1598_v12 = vsel %vm1597_vm8, %v5192_v61, %v1594_v8  ;;  %v1630_v29 = vmul.f32 %v5248_v56, %v5210_v3  ;;  %vm1635_vm10 = vweird.f32 %v5210_v3  ;;  %vm1587_vm11 = vmor %vm1585_vm9, %vm1586_vm6 }
 0x169   : > { %v2401_v11 = vmul.f32 %v3620_v37, %v1598_v12  ;;  %v1584_v30 = vmul.f32 %v5214_v4, %v1583_v50  ;;  %v1620_v32 = vmul.f32 %v5258_v58, %v5212_v1  ;;  %vm1625_vm12 = vweird.f32 %v5212_v1  ;;  %v607_v9 = vpop.xlane.xlu1 %606  ;;  %v3624_v37 = vld [vmem:[%s3839_s23 + $0x1b0] sm:$0xff] }
 0x16a   : > { %2791 = vst.msk [vmem:[%s4149_s28 + $0xd4] sm:$0xf] %vm2737_vm7, %v2662_v7  ;;  %v1631_v43 = vmul.f32 %v5248_v56, %v1630_v29  ;;  %3439 = vrsqrt.f32 %v5254_v62  ;;  %v5276_v51 = vadd.f32 1e-06, %v871_v16  ;;  %v5283_v39 = vadd.f32 1e-06, %v870_v18 }
 0x16b   : > { %v5278_v52 = vpop.eup %3437  ;;  %v2533_v34 = vmul.f32 %v5197_v23, %v2401_v11  ;;  %v1588_v35 = vsel %vm1587_vm11, %v5214_v4, %v1584_v30  ;;  %v1621_v36 = vmul.f32 %v5258_v58, %v1620_v32  ;;  %vm1615_vm13 = vweird.f32 %v5237_v59 }
 0x16c   : > { %v2400_v61 = vmul.f32 %v3621_v54, %v1588_v35  ;;  %v1632_v33 = vmul.f32 0.5, %v1631_v43  ;;  %v1610_v48 = vmul.f32 %v5278_v52, %v5237_v59  ;;  %vm1636_vm14 = vweird.f32 %v5248_v56 }
 0x16d   : > { %v2661_v17 = vpack.c.bf16 %v2533_v34, %v2533_v34  ;;  %v1622_v10 = vmul.f32 0.5, %v1621_v36  ;;  %3441 = vrsqrt.f32 %v5276_v51  ;;  %vm1626_vm15 = vweird.f32 %v5258_v58  ;;  %vm1637_vm1 = vmor %vm1635_vm10, %vm1636_vm14 }
 0x16e   : > { %v2532_v27 = vmul.f32 %v5197_v23, %v2400_v61  ;;  %v1633_v31 = vsub.f32 1.5, %v1632_v33  ;;  %v1611_v14 = vmul.f32 %v5278_v52, %v1610_v48  ;;  %3443 = vrsqrt.f32 %v5283_v39  ;;  %vm5319_vm3 = vmor %vm1625_vm12, %vm1626_vm15 }
 0x16f   : > { %2790 = vst.msk [vmem:[%s4149_s28 + $0xd0] sm:$0xf] %vm2737_vm7, %v2661_v17  ;;  %v1623_v4 = vsub.f32 1.5, %v1622_v10  ;;  %v397_v2 = vmul.f32 %v269_v38, %v269_v38  ;;  %v396_v49 = vmul.f32 %v268_v44, %v268_v44  ;;  %v395_v45 = vmul.f32 %v267_v28, %v267_v28  ;;  %v272_v38 = vld [vmem:[%s3839_s23 + $0x358] sm:$0xff] }
 0x170   : > { %v5300_v25 = vpop.eup %3439  ;;  %v2660_v20 = vpack.c.bf16 %v2532_v27, %v2532_v27  ;;  %v1634_v15 = vmul.f32 %v5248_v56, %v1633_v31  ;;  %v1612_v5 = vmul.f32 0.5, %v1611_v14  ;;  %vm1616_vm2 = vweird.f32 %v5278_v52  ;;  %v271_v27 = vld [vmem:[%s3839_s23 + $0x350] sm:$0xff]  ;;  %v270_v31 = vld [vmem:[%s3839_s23 + $0x348] sm:$0xff]  ;;  %v3625_v14 = vld [vmem:[%s3839_s23 + $0x1d8] sm:$0xff] }
 0x171   : > { %v1624_v40 = vmul.f32 %v5258_v58, %v1623_v4  ;;  %v1660_v53 = vmul.f32 %v5300_v25, %v5254_v62  ;;  %v734_v0 = vsel %vm421_vm0, %v397_v2, 0.0  ;;  %v731_v55 = vsel %vm421_vm0, %v396_v49, 0.0  ;;  %vm1617_vm6 = vmor %vm1615_vm13, %vm1616_vm2  ;;  %v619_v2 = vpop.xlane.xlu2 %618 }
 0x172   : > { %2789 = vst.msk [vmem:[%s4149_s28 + $0xcc] sm:$0xf] %vm2737_vm7, %v2660_v20  ;;  %v1638_v26 = vsel %vm1637_vm1, %v5248_v56, %v1634_v15  ;;  %v1613_v60 = vsub.f32 1.5, %v1612_v5  ;;  %735 = vadd.xlane.f32.xlu2 %v734_v0  ;;  %v728_v24 = vsel %vm421_vm0, %v395_v45, 0.0  ;;  %vm1665_vm4 = vweird.f32 %v5254_v62  ;;  %732 = vadd.xlane.f32.xlu1 %v731_v55  ;;  %v616_v20 = vpop.xlane.xlu1 %615 }
 0x173   : > { %v5325_v63 = vpop.eup %3441  ;;  %v2405_v19 = vmul.f32 %v3622_v41, %v1638_v26  ;;  %v1628_v1 = vsel %vm5319_vm3, %v5258_v58, %v1624_v40  ;;  %v1661_v13 = vmul.f32 %v5300_v25, %v1660_v53  ;;  %729 = vadd.xlane.f32.xlu0 %v728_v24  ;;  %vm1666_vm5 = vweird.f32 %v5300_v25  ;;  %v613_v40 = vpop.xlane.xlu0 %612  ;;  %v3626_v53 = vld [vmem:[%s3839_s23 + $0x1d0] sm:$0xff] }
 0x174   : > { %v5333_v57 = vpop.eup %3443  ;;  %v2404_v42 = vmul.f32 %v3623_v6, %v1628_v1  ;;  %v1614_v8 = vmul.f32 %v5278_v52, %v1613_v60  ;;  %v1650_v47 = vmul.f32 %v5325_v63, %v5276_v51  ;;  %vm1656_vm8 = vweird.f32 %v5325_v63  ;;  %vm1667_vm9 = vmor %vm1665_vm4, %vm1666_vm5  ;;  %v275_v60 = vld [vmem:[%s3839_s23 + $0x370] sm:$0xff] }
 0x175   : > { %v2537_v56 = vmul.f32 %v5197_v23, %v2405_v19  ;;  %v1662_v50 = vmul.f32 0.5, %v1661_v13  ;;  %v1640_v16 = vmul.f32 %v5333_v57, %v5283_v39  ;;  %v875_v12 = vmul.f32 %v3994_v46, %v610_v21  ;;  %v3627_v21 = vld [vmem:[%s3839_s23 + $0x1c8] sm:$0xff] }
 0x176   : > { %v2536_v18 = vmul.f32 %v5197_v23, %v2404_v42  ;;  %v1618_v58 = vsel %vm1617_vm6, %v5278_v52, %v1614_v8  ;;  %v1651_v7 = vmul.f32 %v5325_v63, %v1650_v47  ;;  %v874_v35 = vmul.f32 %v3994_v46, %v607_v9 }
 0x177   : > { %v2665_v29 = vpack.c.bf16 %v2537_v56, %v2537_v56  ;;  %v2403_v59 = vmul.f32 %v3624_v37, %v1618_v58  ;;  %v1663_v11 = vsub.f32 1.5, %v1662_v50  ;;  %v1641_v30 = vmul.f32 %v5333_v57, %v1640_v16 }
 0x178   : > { %v2664_v32 = vpack.c.bf16 %v2536_v18, %v2536_v18  ;;  %v1652_v43 = vmul.f32 0.5, %v1651_v7  ;;  %v5354_v34 = vadd.f32 1e-06, %v875_v12  ;;  %v873_v61 = vmul.f32 %v3994_v46, %v604_v22  ;;  %v274_v18 = vld [vmem:[%s3839_s23 + $0x368] sm:$0xff] }
 0x179   : > { %2794 = vst.msk [vmem:[%s4149_s28 + $0xe0] sm:$0xf] %vm2737_vm7, %v2665_v29  ;;  %v2535_v52 = vmul.f32 %v5197_v23, %v2403_v59  ;;  %v1664_v36 = vmul.f32 %v5300_v25, %v1663_v11  ;;  %v1642_v54 = vmul.f32 0.5, %v1641_v30  ;;  %vm1646_vm10 = vweird.f32 %v5333_v57 }
 0x17a   : > { %2793 = vst.msk [vmem:[%s4149_s28 + $0xdc] sm:$0xf] %vm2737_vm7, %v2664_v32  ;;  %v1653_v33 = vsub.f32 1.5, %v1652_v43  ;;  %3445 = vrsqrt.f32 %v5354_v34  ;;  %v5370_v48 = vadd.f32 1e-06, %v874_v35  ;;  %vm1655_vm11 = vweird.f32 %v5276_v51  ;;  %v273_v43 = vld [vmem:[%s3839_s23 + $0x360] sm:$0xff]  ;;  %v628_v35 = vpop.xlane.xlu2 %627 }
 0x17b   : > { %v2663_v44 = vpack.c.bf16 %v2535_v52, %v2535_v52  ;;  %v1668_v17 = vsel %vm1667_vm9, %v5300_v25, %v1664_v36  ;;  %v1643_v10 = vsub.f32 1.5, %v1642_v54  ;;  %v5374_v28 = vadd.f32 1e-06, %v873_v61  ;;  %vm1657_vm12 = vmor %vm1655_vm11, %vm1656_vm8  ;;  %v625_v54 = vpop.xlane.xlu1 %624 }
 0x17c   : > { %v2408_v62 = vmul.f32 %v3625_v14, %v1668_v17  ;;  %v1654_v4 = vmul.f32 %v5325_v63, %v1653_v33  ;;  %3447 = vrsqrt.f32 %v5370_v48  ;;  %vm1645_vm13 = vweird.f32 %v5283_v39 }
 0x17d   : > { %2792 = vst.msk [vmem:[%s4149_s28 + $0xd8] sm:$0xf] %vm2737_vm7, %v2663_v44  ;;  %v1644_v49 = vmul.f32 %v5333_v57, %v1643_v10  ;;  %3449 = vrsqrt.f32 %v5374_v28  ;;  %v400_v25 = vmul.f32 %v272_v38, %v272_v38  ;;  %vm1647_vm14 = vmor %vm1645_vm13, %vm1646_vm10  ;;  %v399_v5 = vmul.f32 %v271_v27, %v271_v27  ;;  %v622_v38 = vpop.xlane.xlu0 %621 }
 0x17e   : > { %v2540_v51 = vmul.f32 %v5197_v23, %v2408_v62  ;;  %v1658_v15 = vsel %vm1657_vm12, %v5325_v63, %v1654_v4  ;;  %v398_v45 = vmul.f32 %v270_v31, %v270_v31  ;;  %v878_v3 = vmul.f32 %v3994_v46, %v619_v2  ;;  %v278_v31 = vld [vmem:[%s3839_s23 + $0x388] sm:$0xff] }
 0x17f   : > { %v2407_v0 = vmul.f32 %v3626_v53, %v1658_v15  ;;  %v1648_v26 = vsel %vm1647_vm14, %v5333_v57, %v1644_v49  ;;  %v743_v39 = vsel %vm421_vm0, %v400_v25, 0.0  ;;  %v740_v41 = vsel %vm421_vm0, %v399_v5, 0.0 }
 0x180   : > { %v5398_v55 = vpop.eup %3445  ;;  %v2668_v24 = vpack.c.bf16 %v2540_v51, %v2540_v51  ;;  %v2406_v63 = vmul.f32 %v3627_v21, %v1648_v26  ;;  %744 = vadd.xlane.f32.xlu2 %v743_v39  ;;  %v737_v19 = vsel %vm421_vm0, %v398_v45, 0.0  ;;  %741 = vadd.xlane.f32.xlu1 %v740_v41  ;;  %v5406_v9 = vadd.f32 1e-06, %v878_v3  ;;  %v3628_v51 = vld [vmem:[%s3839_s23 + $0x1f0] sm:$0xff]  ;;  %v3630_v21 = vld [vmem:[%s3839_s23 + $0x1e0] sm:$0xff] }
 0x181   : > { %v2539_v1 = vmul.f32 %v5197_v23, %v2407_v0  ;;  %v1690_v13 = vmul.f32 %v5398_v55, %v5354_v34  ;;  %738 = vadd.xlane.f32.xlu0 %v737_v19  ;;  %v877_v42 = vmul.f32 %v3994_v46, %v616_v20  ;;  %v876_v8 = vmul.f32 %v3994_v46, %v613_v40 }
 0x182   : > { %v5408_v57 = vpop.eup %3447  ;;  %2797 = vst.msk [vmem:[%s4149_s28 + $0xec] sm:$0xf] %vm2737_vm7, %v2668_v24  ;;  %v2538_v6 = vmul.f32 %v5197_v23, %v2406_v63  ;;  %v403_v47 = vmul.f32 %v275_v60, %v275_v60  ;;  %vm1695_vm15 = vweird.f32 %v5354_v34  ;;  %vm1685_vm1 = vweird.f32 %v5370_v48  ;;  %v3629_v60 = vld [vmem:[%s3839_s23 + $0x1e8] sm:$0xff] }
 0x183   : > { %v5415_v22 = vpop.eup %3449  ;;  %v2667_v56 = vpack.c.bf16 %v2539_v1, %v2539_v1  ;;  %v1691_v50 = vmul.f32 %v5398_v55, %v1690_v13  ;;  %v1680_v16 = vmul.f32 %v5408_v57, %v5370_v48  ;;  %3451 = vrsqrt.f32 %v5406_v9 }
 0x184   : > { %v2666_v58 = vpack.c.bf16 %v2538_v6, %v2538_v6  ;;  %v1670_v7 = vmul.f32 %v5415_v22, %v5374_v28  ;;  %vm1675_vm2 = vweird.f32 %v5374_v28  ;;  %v5430_v37 = vadd.f32 1e-06, %v877_v42 }
 0x185   : > { %2796 = vst.msk [vmem:[%s4149_s28 + $0xe8] sm:$0xf] %vm2737_vm7, %v2667_v56  ;;  %v1692_v12 = vmul.f32 0.5, %v1691_v50  ;;  %v1681_v29 = vmul.f32 %v5408_v57, %v1680_v16  ;;  %v5435_v11 = vadd.f32 1e-06, %v876_v8  ;;  %v752_v30 = vsel %vm421_vm0, %v403_v47, 0.0 }
 0x186   : > { %2795 = vst.msk [vmem:[%s4149_s28 + $0xe4] sm:$0xf] %vm2737_vm7, %v2666_v58  ;;  %v1671_v59 = vmul.f32 %v5415_v22, %v1670_v7  ;;  %v402_v32 = vmul.f32 %v274_v18, %v274_v18  ;;  %vm1696_vm3 = vweird.f32 %v5398_v55  ;;  %3453 = vrsqrt.f32 %v5430_v37  ;;  %v277_v50 = vld [vmem:[%s3839_s23 + $0x380] sm:$0xff]  ;;  %v276_v16 = vld [vmem:[%s3839_s23 + $0x378] sm:$0xff] }
 0x187   : > { %v1693_v52 = vsub.f32 1.5, %v1692_v12  ;;  %v1682_v36 = vmul.f32 0.5, %v1681_v29  ;;  %vm1686_vm4 = vweird.f32 %v5408_v57  ;;  %3455 = vrsqrt.f32 %v5435_v11  ;;  %vm1697_vm5 = vmor %vm1695_vm15, %vm1696_vm3  ;;  %v637_v12 = vpop.xlane.xlu2 %636 }
 0x188   : > { %v1672_v61 = vmul.f32 0.5, %v1671_v59  ;;  %753 = vadd.xlane.f32.xlu2 %v752_v30  ;;  %v749_v33 = vsel %vm421_vm0, %v402_v32, 0.0  ;;  %v401_v10 = vmul.f32 %v273_v43, %v273_v43  ;;  %v881_v27 = vmul.f32 %v3994_v46, %v628_v35  ;;  %vm1687_vm9 = vmor %vm1685_vm1, %vm1686_vm4  ;;  %v634_v30 = vpop.xlane.xlu1 %633 }
 0x189   : > { %v1694_v44 = vmul.f32 %v5398_v55, %v1693_v52  ;;  %v1683_v17 = vsub.f32 1.5, %v1682_v36  ;;  %750 = vadd.xlane.f32.xlu1 %v749_v33  ;;  %v5447_v14 = vpop.eup %3451  ;;  %vm1676_vm6 = vweird.f32 %v5415_v22  ;;  %vm1725_vm8 = vweird.f32 %v5406_v9  ;;  %v3631_v36 = vld [vmem:[%s3839_s23 + $0x208] sm:$0xff]  ;;  %v631_v33 = vpop.xlane.xlu0 %630 }
 0x18a   : > { %v1673_v62 = vsub.f32 1.5, %v1672_v61  ;;  %v880_v4 = vmul.f32 %v3994_v46, %v625_v54  ;;  %v1720_v25 = vmul.f32 %v5447_v14, %v5406_v9  ;;  %v879_v20 = vmul.f32 %v3994_v46, %v622_v38  ;;  %vm1677_vm10 = vmor %vm1675_vm2, %vm1676_vm6 }
 0x18b   : > { %v1698_v2 = vsel %vm1697_vm5, %v5398_v55, %v1694_v44  ;;  %v1684_v49 = vmul.f32 %v5408_v57, %v1683_v17  ;;  %v746_v5 = vsel %vm421_vm0, %v401_v10, 0.0  ;;  %v406_v45 = vmul.f32 %v278_v31, %v278_v31 }
 0x18c   : > { %v2411_v34 = vmul.f32 %v3628_v51, %v1698_v2  ;;  %v1674_v15 = vmul.f32 %v5415_v22, %v1673_v62  ;;  %v5468_v40 = vpop.eup %3453  ;;  %v1721_v0 = vmul.f32 %v5447_v14, %v1720_v25  ;;  %747 = vadd.xlane.f32.xlu0 %v746_v5  ;;  %v5476_v48 = vadd.f32 1e-06, %v881_v27  ;;  %v3632_v62 = vld [vmem:[%s3839_s23 + $0x200] sm:$0xff] }
 0x18d   : > { %v1688_v53 = vsel %vm1687_vm9, %v5408_v57, %v1684_v49  ;;  %v5478_v26 = vadd.f32 1e-06, %v880_v4  ;;  %v5480_v39 = vpop.eup %3455  ;;  %v1710_v28 = vmul.f32 %v5468_v40, %v5430_v37  ;;  %vm1726_vm11 = vweird.f32 %v5447_v14 }
 0x18e   : > { %v2543_v3 = vmul.f32 %v5197_v23, %v2411_v34  ;;  %v2410_v55 = vmul.f32 %v3629_v60, %v1688_v53  ;;  %v1678_v24 = vsel %vm1677_vm10, %v5415_v22, %v1674_v15  ;;  %v1722_v41 = vmul.f32 0.5, %v1721_v0  ;;  %vm1727_vm14 = vmor %vm1725_vm8, %vm1726_vm11  ;;  %v3633_v34 = vld [vmem:[%s3839_s23 + $0x1f8] sm:$0xff] }
 0x18f   : > { %v2409_v63 = vmul.f32 %v3630_v21, %v1678_v24  ;;  %v1700_v19 = vmul.f32 %v5480_v39, %v5435_v11  ;;  %v1711_v57 = vmul.f32 %v5468_v40, %v1710_v28  ;;  %v5493_v6 = vadd.f32 1e-06, %v879_v20 }
 0x190   : > { %v2671_v1 = vpack.c.bf16 %v2543_v3, %v2543_v3  ;;  %v2542_v13 = vmul.f32 %v5197_v23, %v2410_v55  ;;  %v1723_v8 = vsub.f32 1.5, %v1722_v41  ;;  %3457 = vrsqrt.f32 %v5476_v48 }
 0x191   : > { %v2541_v42 = vmul.f32 %v5197_v23, %v2409_v63  ;;  %v1701_v47 = vmul.f32 %v5480_v39, %v1700_v19  ;;  %v1712_v56 = vmul.f32 0.5, %v1711_v57  ;;  %vm1715_vm12 = vweird.f32 %v5430_v37  ;;  %v279_v57 = vld [vmem:[%s3839_s23 + $0x390] sm:$0xff] }
 0x192   : > { %2800 = vst.msk [vmem:[%s4149_s28 + $0xf8] sm:$0xf] %vm2737_vm7, %v2671_v1  ;;  %v2670_v22 = vpack.c.bf16 %v2542_v13, %v2542_v13  ;;  %3459 = vrsqrt.f32 %v5478_v26  ;;  %v1724_v58 = vmul.f32 %v5447_v14, %v1723_v8  ;;  %vm1716_vm13 = vweird.f32 %v5468_v40  ;;  %v280_v13 = vld [vmem:[%s3839_s23 + $0x398] sm:$0xff] }
 0x193   : > { %v2669_v18 = vpack.c.bf16 %v2541_v42, %v2541_v42  ;;  %v1702_v7 = vmul.f32 0.5, %v1701_v47  ;;  %v1713_v29 = vsub.f32 1.5, %v1712_v56  ;;  %vm1706_vm15 = vweird.f32 %v5480_v39  ;;  %vm1717_vm2 = vmor %vm1715_vm12, %vm1716_vm13  ;;  %v646_v47 = vpop.xlane.xlu2 %645 }
 0x194   : > { %2799 = vst.msk [vmem:[%s4149_s28 + $0xf4] sm:$0xf] %vm2737_vm7, %v2670_v22  ;;  %3461 = vrsqrt.f32 %v5493_v6  ;;  %v761_v59 = vsel %vm421_vm0, %v406_v45, 0.0  ;;  %v1728_v32 = vsel %vm1727_vm14, %v5447_v14, %v1724_v58  ;;  %v405_v35 = vmul.f32 %v277_v50, %v277_v50 }
 0x195   : > { %2798 = vst.msk [vmem:[%s4149_s28 + $0xf0] sm:$0xf] %vm2737_vm7, %v2669_v18  ;;  %v1703_v43 = vsub.f32 1.5, %v1702_v7  ;;  %762 = vadd.xlane.f32.xlu2 %v761_v59  ;;  %v404_v52 = vmul.f32 %v276_v16, %v276_v16  ;;  %v2414_v54 = vmul.f32 %v3631_v36, %v1728_v32  ;;  %v1714_v9 = vmul.f32 %v5468_v40, %v1713_v29  ;;  %v643_v7 = vpop.xlane.xlu1 %642  ;;  %v3634_v59 = vld [vmem:[%s3839_s23 + $0x220] sm:$0xff]  ;;  %v3635_v36 = vld [vmem:[%s3839_s23 + $0x218] sm:$0xff] }
 0x196   : > { %vm1705_vm1 = vweird.f32 %v5435_v11  ;;  %v884_v61 = vmul.f32 %v3994_v46, %v637_v12  ;;  %v5522_v38 = vpop.eup %3457  ;;  %v758_v17 = vsel %vm421_vm0, %v405_v35, 0.0  ;;  %v883_v27 = vmul.f32 %v3994_v46, %v634_v30 }
 0x197   : > { %v1704_v44 = vmul.f32 %v5480_v39, %v1703_v43  ;;  %v755_v10 = vsel %vm421_vm0, %v404_v52, 0.0  ;;  %v2546_v31 = vmul.f32 %v5197_v23, %v2414_v54  ;;  %v1718_v14 = vsel %vm1717_vm2, %v5468_v40, %v1714_v9  ;;  %vm1707_vm3 = vmor %vm1705_vm1, %vm1706_vm15  ;;  %759 = vadd.xlane.f32.xlu1 %v758_v17  ;;  %v640_v52 = vpop.xlane.xlu0 %639 }
 0x198   : > { %v5532_v11 = vpop.eup %3459  ;;  %v1750_v37 = vmul.f32 %v5522_v38, %v5476_v48  ;;  %vm1755_vm4 = vweird.f32 %v5476_v48  ;;  %756 = vadd.xlane.f32.xlu0 %v755_v10  ;;  %v2413_v4 = vmul.f32 %v3632_v62, %v1718_v14  ;;  %v882_v25 = vmul.f32 %v3994_v46, %v631_v33 }
 0x199   : > { %v1708_v2 = vsel %vm1707_vm3, %v5480_v39, %v1704_v44  ;;  %v1740_v49 = vmul.f32 %v5532_v11, %v5478_v26  ;;  %v2674_v51 = vpack.c.bf16 %v2546_v31, %v2546_v31  ;;  %v5550_v45 = vadd.f32 1e-06, %v884_v61  ;;  %v281_v39 = vld [vmem:[%s3839_s23 + $0x3a0] sm:$0xff] }
 0x19a   : > { %v5546_v20 = vpop.eup %3461  ;;  %v2412_v15 = vmul.f32 %v3633_v34, %v1708_v2  ;;  %v1751_v5 = vmul.f32 %v5522_v38, %v1750_v37  ;;  %v2545_v40 = vmul.f32 %v5197_v23, %v2413_v4  ;;  %vm1745_vm5 = vweird.f32 %v5478_v26 }
 0x19b   : > { %v1741_v53 = vmul.f32 %v5532_v11, %v1740_v49  ;;  %v1730_v0 = vmul.f32 %v5546_v20, %v5493_v6  ;;  %2803 = vst.msk [vmem:[%s4149_s28 + $0x104] sm:$0xf] %vm2737_vm7, %v2674_v51  ;;  %vm1756_vm6 = vweird.f32 %v5522_v38  ;;  %3463 = vrsqrt.f32 %v5550_v45  ;;  %v284_v49 = vld [vmem:[%s3839_s23 + $0x3b8] sm:$0xff] }
 0x19c   : > { %v2544_v3 = vmul.f32 %v5197_v23, %v2412_v15  ;;  %v1752_v60 = vmul.f32 0.5, %v1751_v5  ;;  %v2673_v55 = vpack.c.bf16 %v2545_v40, %v2545_v40  ;;  %v5564_v21 = vadd.f32 1e-06, %v883_v27  ;;  %vm1757_vm10 = vmor %vm1755_vm4, %vm1756_vm6  ;;  %v283_v40 = vld [vmem:[%s3839_s23 + $0x3b0] sm:$0xff] }
 0x19d   : > { %v1742_v24 = vmul.f32 0.5, %v1741_v53  ;;  %v1731_v28 = vmul.f32 %v5546_v20, %v1730_v0  ;;  %v5566_v19 = vadd.f32 1e-06, %v882_v25  ;;  %v409_v1 = vmul.f32 %v281_v39, %v281_v39 }
 0x19e   : > { %v2672_v63 = vpack.c.bf16 %v2544_v3, %v2544_v3  ;;  %v1753_v41 = vsub.f32 1.5, %v1752_v60  ;;  %2802 = vst.msk [vmem:[%s4149_s28 + $0x100] sm:$0xf] %vm2737_vm7, %v2673_v55  ;;  %vm1746_vm8 = vweird.f32 %v5532_v11  ;;  %3465 = vrsqrt.f32 %v5564_v21  ;;  %v282_v60 = vld [vmem:[%s3839_s23 + $0x3a8] sm:$0xff] }
 0x19f   : > { %v1743_v42 = vsub.f32 1.5, %v1742_v24  ;;  %v1732_v8 = vmul.f32 0.5, %v1731_v28  ;;  %vm1736_vm9 = vweird.f32 %v5546_v20  ;;  %3467 = vrsqrt.f32 %v5566_v19  ;;  %vm1747_vm11 = vmor %vm1745_vm5, %vm1746_vm8  ;;  %v655_v28 = vpop.xlane.xlu2 %654 }
 0x1a0   : > { %2801 = vst.msk [vmem:[%s4149_s28 + $0xfc] sm:$0xf] %vm2737_vm7, %v2672_v63  ;;  %v1754_v22 = vmul.f32 %v5522_v38, %v1753_v41  ;;  %v770_v56 = vsel %vm421_vm0, %v409_v1, 0.0  ;;  %v408_v18 = vmul.f32 %v280_v13, %v280_v13  ;;  %v407_v58 = vmul.f32 %v279_v57, %v279_v57  ;;  %v652_v63 = vpop.xlane.xlu1 %651 }
 0x1a1   : > { %v1744_v50 = vmul.f32 %v5532_v11, %v1743_v42  ;;  %v1733_v16 = vsub.f32 1.5, %v1732_v8  ;;  %771 = vadd.xlane.f32.xlu2 %v770_v56  ;;  %v5585_v12 = vpop.eup %3463  ;;  %vm1735_vm12 = vweird.f32 %v5493_v6  ;;  %vm1785_vm13 = vweird.f32 %v5550_v45 }
 0x1a2   : > { %v1758_v29 = vsel %vm1757_vm10, %v5522_v38, %v1754_v22  ;;  %v887_v48 = vmul.f32 %v3994_v46, %v646_v47  ;;  %v1780_v35 = vmul.f32 %v5585_v12, %v5550_v45  ;;  %vm1737_vm14 = vmor %vm1735_vm12, %vm1736_vm9  ;;  %v767_v6 = vsel %vm421_vm0, %v408_v18, 0.0  ;;  %v3637_v22 = vld [vmem:[%s3839_s23 + $0x238] sm:$0xff] }
 0x1a3   : > { %v2417_v30 = vmul.f32 %v3634_v59, %v1758_v29  ;;  %v1748_v32 = vsel %vm1747_vm11, %v5532_v11, %v1744_v50  ;;  %v1734_v43 = vmul.f32 %v5546_v20, %v1733_v16  ;;  %v764_v54 = vsel %vm421_vm0, %v407_v58, 0.0  ;;  %768 = vadd.xlane.f32.xlu1 %v767_v6  ;;  %v3636_v11 = vld [vmem:[%s3839_s23 + $0x210] sm:$0xff]  ;;  %v3639_v6 = vld [vmem:[%s3839_s23 + $0x228] sm:$0xff] }
 0x1a4   : > { %v2416_v26 = vmul.f32 %v3635_v36, %v1748_v32  ;;  %v886_v9 = vmul.f32 %v3994_v46, %v643_v7  ;;  %v5606_v61 = vpop.eup %3465  ;;  %v1781_v44 = vmul.f32 %v5585_v12, %v1780_v35  ;;  %765 = vadd.xlane.f32.xlu0 %v764_v54  ;;  %v5611_v17 = vadd.f32 1e-06, %v887_v48 }
 0x1a5   : > { %v2549_v33 = vmul.f32 %v5197_v23, %v2417_v30  ;;  %v1738_v38 = vsel %vm1737_vm14, %v5546_v20, %v1734_v43  ;;  %v5613_v10 = vpop.eup %3467  ;;  %v1770_v14 = vmul.f32 %v5606_v61, %v5564_v21  ;;  %v885_v37 = vmul.f32 %v3994_v46, %v640_v52  ;;  %v649_v52 = vpop.xlane.xlu0 %648 }
 0x1a6   : > { %v2548_v27 = vmul.f32 %v5197_v23, %v2416_v26  ;;  %v2415_v31 = vmul.f32 %v3636_v11, %v1738_v38  ;;  %v1782_v4 = vmul.f32 0.5, %v1781_v44  ;;  %vm1775_vm15 = vweird.f32 %v5564_v21  ;;  %v286_v11 = vld [vmem:[%s3839_s23 + $0x3c8] sm:$0xff] }
 0x1a7   : > { %v2677_v62 = vpack.c.bf16 %v2549_v33, %v2549_v33  ;;  %v1760_v2 = vmul.f32 %v5613_v10, %v5566_v19  ;;  %v1771_v51 = vmul.f32 %v5606_v61, %v1770_v14  ;;  %3469 = vrsqrt.f32 %v5611_v17 }
 0x1a8   : > { %v2676_v25 = vpack.c.bf16 %v2548_v27, %v2548_v27  ;;  %v2547_v20 = vmul.f32 %v5197_v23, %v2415_v31  ;;  %v1783_v34 = vsub.f32 1.5, %v1782_v4  ;;  %vm1786_vm1 = vweird.f32 %v5585_v12  ;;  %v287_v27 = vld [vmem:[%s3839_s23 + $0x3d0] sm:$0xff]  ;;  %v664_v4 = vpop.xlane.xlu2 %663 }
 0x1a9   : > { %2806 = vst.msk [vmem:[%s4149_s28 + $0x110] sm:$0xf] %vm2737_vm7, %v2677_v62  ;;  %v1761_v15 = vmul.f32 %v5613_v10, %v1760_v2  ;;  %v5631_v5 = vadd.f32 1e-06, %v886_v9  ;;  %v1772_v0 = vmul.f32 0.5, %v1771_v51  ;;  %v412_v3 = vmul.f32 %v284_v49, %v284_v49  ;;  %vm1787_vm3 = vmor %vm1785_vm13, %vm1786_vm1  ;;  %v285_v62 = vld [vmem:[%s3839_s23 + $0x3c0] sm:$0xff] }
 0x1aa   : > { %2805 = vst.msk [vmem:[%s4149_s28 + $0x10c] sm:$0xf] %vm2737_vm7, %v2676_v25  ;;  %v2675_v53 = vpack.c.bf16 %v2547_v20, %v2547_v20  ;;  %v5636_v39 = vadd.f32 1e-06, %v885_v37  ;;  %v1784_v55 = vmul.f32 %v5585_v12, %v1783_v34  ;;  %vm1776_vm2 = vweird.f32 %v5606_v61 }
 0x1ab   : > { %v1762_v24 = vmul.f32 0.5, %v1761_v15  ;;  %3471 = vrsqrt.f32 %v5631_v5  ;;  %v1773_v41 = vsub.f32 1.5, %v1772_v0  ;;  %vm1766_vm4 = vweird.f32 %v5613_v10  ;;  %vm1777_vm5 = vmor %vm1775_vm15, %vm1776_vm2  ;;  %v661_v15 = vpop.xlane.xlu1 %660 }
 0x1ac   : > { %2804 = vst.msk [vmem:[%s4149_s28 + $0x108] sm:$0xf] %vm2737_vm7, %v2675_v53  ;;  %3473 = vrsqrt.f32 %v5636_v39  ;;  %v779_v1 = vsel %vm421_vm0, %v412_v3, 0.0  ;;  %v1788_v13 = vsel %vm1787_vm3, %v5585_v12, %v1784_v55  ;;  %v411_v42 = vmul.f32 %v283_v40, %v283_v40 }
 0x1ad   : > { %v1763_v57 = vsub.f32 1.5, %v1762_v24  ;;  %780 = vadd.xlane.f32.xlu2 %v779_v1  ;;  %v410_v8 = vmul.f32 %v282_v60, %v282_v60  ;;  %v5652_v47 = vpop.eup %3469  ;;  %v2420_v56 = vmul.f32 %v3637_v22, %v1788_v13  ;;  %v1774_v45 = vmul.f32 %v5606_v61, %v1773_v41  ;;  %v3640_v41 = vld [vmem:[%s3839_s23 + $0x250] sm:$0xff] }
 0x1ae   : > { %v890_v50 = vmul.f32 %v3994_v46, %v655_v28  ;;  %v889_v16 = vmul.f32 %v3994_v46, %v652_v63  ;;  %vm1765_vm6 = vweird.f32 %v5566_v19  ;;  %v1810_v58 = vmul.f32 %v5652_v47, %v5611_v17  ;;  %v3638_v19 = vld [vmem:[%s3839_s23 + $0x230] sm:$0xff] }
 0x1af   : > { %v1764_v18 = vmul.f32 %v5613_v10, %v1763_v57  ;;  %v776_v7 = vsel %vm421_vm0, %v411_v42, 0.0  ;;  %v2552_v12 = vmul.f32 %v5197_v23, %v2420_v56  ;;  %v1778_v29 = vsel %vm1777_vm5, %v5606_v61, %v1774_v45  ;;  %vm1767_vm8 = vmor %vm1765_vm6, %vm1766_vm4  ;;  %v3642_v45 = vld [vmem:[%s3839_s23 + $0x248] sm:$0xff] }
 0x1b0   : > { %777 = vadd.xlane.f32.xlu1 %v776_v7  ;;  %v773_v21 = vsel %vm421_vm0, %v410_v8, 0.0  ;;  %v5672_v48 = vadd.f32 1e-06, %v890_v50  ;;  %v2419_v30 = vmul.f32 %v3638_v19, %v1778_v29  ;;  %v1811_v43 = vmul.f32 %v5652_v47, %v1810_v58  ;;  %v658_v8 = vpop.xlane.xlu0 %657 }
 0x1b1   : > { %v5674_v59 = vpop.eup %3471  ;;  %v1768_v32 = vsel %vm1767_vm8, %v5613_v10, %v1764_v18  ;;  %774 = vadd.xlane.f32.xlu0 %v773_v21  ;;  %v5679_v35 = vadd.f32 1e-06, %v889_v16  ;;  %v2680_v26 = vpack.c.bf16 %v2552_v12, %v2552_v12  ;;  %vm1815_vm9 = vweird.f32 %v5611_v17  ;;  %v3643_v12 = vld [vmem:[%s3839_s23 + $0x240] sm:$0xff] }
 0x1b2   : > { %v5681_v36 = vpop.eup %3473  ;;  %v2418_v54 = vmul.f32 %v3639_v6, %v1768_v32  ;;  %v1800_v9 = vmul.f32 %v5674_v59, %v5631_v5  ;;  %v2551_v61 = vmul.f32 %v5197_v23, %v2419_v30  ;;  %v1812_v33 = vmul.f32 0.5, %v1811_v43  ;;  %v290_v6 = vld [vmem:[%s3839_s23 + $0x3e8] sm:$0xff] }
 0x1b3   : > { %vm1816_vm10 = vweird.f32 %v5652_v47  ;;  %v1790_v38 = vmul.f32 %v5681_v36, %v5636_v39  ;;  %2809 = vst.msk [vmem:[%s4149_s28 + $0x11c] sm:$0xf] %vm2737_vm7, %v2680_v26  ;;  %vm1806_vm11 = vweird.f32 %v5674_v59  ;;  %3475 = vrsqrt.f32 %v5672_v48 }
 0x1b4   : > { %v2550_v44 = vmul.f32 %v5197_v23, %v2418_v54  ;;  %v1801_v10 = vmul.f32 %v5674_v59, %v1800_v9  ;;  %v2679_v31 = vpack.c.bf16 %v2551_v61, %v2551_v61  ;;  %v1813_v14 = vsub.f32 1.5, %v1812_v33  ;;  %vm1817_vm13 = vmor %vm1815_vm9, %vm1816_vm10  ;;  %v673_v54 = vpop.xlane.xlu2 %672 }
 0x1b5   : > { %v1791_v37 = vmul.f32 %v5681_v36, %v1790_v38  ;;  %3477 = vrsqrt.f32 %v5679_v35  ;;  %vm1796_vm12 = vweird.f32 %v5681_v36  ;;  %v888_v49 = vmul.f32 %v3994_v46, %v649_v52  ;;  %v289_v38 = vld [vmem:[%s3839_s23 + $0x3e0] sm:$0xff] }
 0x1b6   : > { %v2678_v2 = vpack.c.bf16 %v2550_v44, %v2550_v44  ;;  %v1802_v23 = vmul.f32 0.5, %v1801_v10  ;;  %2808 = vst.msk [vmem:[%s4149_s28 + $0x118] sm:$0xf] %vm2737_vm7, %v2679_v31  ;;  %v1814_v25 = vmul.f32 %v5652_v47, %v1813_v14  ;;  %v415_v51 = vmul.f32 %v287_v27, %v287_v27  ;;  %v288_v44 = vld [vmem:[%s3839_s23 + $0x3d8] sm:$0xff]  ;;  %v670_v10 = vpop.xlane.xlu1 %669 }
 0x1b7   : > { %v1792_v20 = vmul.f32 0.5, %v1791_v37  ;;  %v414_v34 = vmul.f32 %v286_v11, %v286_v11  ;;  %v5713_v53 = vadd.f32 1e-06, %v888_v49  ;;  %v413_v0 = vmul.f32 %v285_v62, %v285_v62 }
 0x1b8   : > { %2807 = vst.msk [vmem:[%s4149_s28 + $0x114] sm:$0xf] %vm2737_vm7, %v2678_v2  ;;  %v1803_v40 = vsub.f32 1.5, %v1802_v23  ;;  %v893_v3 = vmul.f32 %v3994_v46, %v664_v4  ;;  %v1818_v60 = vsel %vm1817_vm13, %v5652_v47, %v1814_v25  ;;  %v788_v24 = vsel %vm421_vm0, %v415_v51, 0.0  ;;  %v5737_v47 = vld [vmem:[%s6926_s1] ss:$0 sm:$0xff] }
 0x1b9   : > { %v1793_v55 = vsub.f32 1.5, %v1792_v20  ;;  %v785_v28 = vsel %vm421_vm0, %v414_v34, 0.0  ;;  %v5719_v63 = vpop.eup %3475  ;;  %v2423_v1 = vmul.f32 %v3640_v41, %v1818_v60  ;;  %vm1805_vm14 = vweird.f32 %v5631_v5  ;;  %789 = vadd.xlane.f32.xlu2 %v788_v24  ;;  %v3644_v34 = vld [vmem:[%s3839_s23 + $0x268] sm:$0xff] }
 0x1ba   : > { %v1804_v17 = vmul.f32 %v5674_v59, %v1803_v40  ;;  %3479 = vrsqrt.f32 %v5713_v53  ;;  %786 = vadd.xlane.f32.xlu1 %v785_v28  ;;  %vm1807_vm15 = vmor %vm1805_vm14, %vm1806_vm11  ;;  %vm1795_vm1 = vweird.f32 %v5636_v39  ;;  %v1840_v42 = vmul.f32 %v5719_v63, %v5672_v48 }
 0x1bb   : > { %v5725_v13 = vpop.eup %3477  ;;  %v1794_v57 = vmul.f32 %v5681_v36, %v1793_v55  ;;  %v782_v5 = vsel %vm421_vm0, %v413_v0, 0.0  ;;  %v2555_v22 = vmul.f32 %v5737_v47, %v2423_v1  ;;  %vm1797_vm2 = vmor %vm1795_vm1, %vm1796_vm12  ;;  %vm1845_vm3 = vweird.f32 %v5672_v48  ;;  %v667_v48 = vpop.xlane.xlu0 %666 }
 0x1bc   : > { %v1808_v56 = vsel %vm1807_vm15, %v5674_v59, %v1804_v17  ;;  %v1830_v39 = vmul.f32 %v5725_v13, %v5679_v35  ;;  %783 = vadd.xlane.f32.xlu0 %v782_v5  ;;  %v1841_v18 = vmul.f32 %v5719_v63, %v1840_v42  ;;  %v5749_v58 = vadd.f32 1e-06, %v893_v3  ;;  %v3645_v3 = vld [vmem:[%s3839_s23 + $0x260] sm:$0xff] }
 0x1bd   : > { %v2422_v50 = vmul.f32 %v3642_v45, %v1808_v56  ;;  %v1798_v16 = vsel %vm1797_vm2, %v5681_v36, %v1794_v57  ;;  %v2683_v7 = vpack.c.bf16 %v2555_v22, %v2555_v22  ;;  %v892_v59 = vmul.f32 %v3994_v46, %v661_v15  ;;  %v292_v22 = vld [vmem:[%s3839_s23 + $0x3f8] sm:$0xff]  ;;  %v682_v56 = vpop.xlane.xlu2 %681 }
 0x1be   : > { %v2421_v29 = vmul.f32 %v3643_v12, %v1798_v16  ;;  %v1831_v21 = vmul.f32 %v5725_v13, %v1830_v39  ;;  %v1842_v30 = vmul.f32 0.5, %v1841_v18  ;;  %vm1835_vm4 = vweird.f32 %v5679_v35  ;;  %v3646_v12 = vld [vmem:[%s3839_s23 + $0x258] sm:$0xff] }
 0x1bf   : > { %v2554_v19 = vmul.f32 %v5737_v47, %v2422_v50  ;;  %3481 = vrsqrt.f32 %v5749_v58  ;;  %2812 = vst.msk [vmem:[%s4149_s28 + $0x128] sm:$0xf] %vm2737_vm7, %v2683_v7  ;;  %v5762_v36 = vadd.f32 1e-06, %v892_v59  ;;  %v891_v26 = vmul.f32 %v3994_v46, %v658_v8  ;;  %v291_v7 = vld [vmem:[%s3839_s23 + $0x3f0] sm:$0xff] }
 0x1c0   : > { %v5757_v32 = vpop.eup %3479  ;;  %v2553_v43 = vmul.f32 %v5737_v47, %v2421_v29  ;;  %v1832_v52 = vmul.f32 0.5, %v1831_v21  ;;  %v1843_v61 = vsub.f32 1.5, %v1842_v30  ;;  %vm1846_vm5 = vweird.f32 %v5719_v63 }
 0x1c1   : > { %v2682_v9 = vpack.c.bf16 %v2554_v19, %v2554_v19  ;;  %v1820_v33 = vmul.f32 %v5757_v32, %v5713_v53  ;;  %vm1836_vm6 = vweird.f32 %v5725_v13  ;;  %3483 = vrsqrt.f32 %v5762_v36  ;;  %vm1847_vm8 = vmor %vm1845_vm3, %vm1846_vm5 }
 0x1c2   : > { %v2681_v27 = vpack.c.bf16 %v2553_v43, %v2553_v43  ;;  %v1833_v11 = vsub.f32 1.5, %v1832_v52  ;;  %v1844_v31 = vmul.f32 %v5719_v63, %v1843_v61  ;;  %v5777_v37 = vadd.f32 1e-06, %v891_v26  ;;  %vm1837_vm9 = vmor %vm1835_vm4, %vm1836_vm6 }
 0x1c3   : > { %2811 = vst.msk [vmem:[%s4149_s28 + $0x124] sm:$0xf] %vm2737_vm7, %v2682_v9  ;;  %v1821_v14 = vmul.f32 %v5757_v32, %v1820_v33  ;;  %v418_v62 = vmul.f32 %v290_v6, %v290_v6  ;;  %v417_v2 = vmul.f32 %v289_v38, %v289_v38  ;;  %v416_v23 = vmul.f32 %v288_v44, %v288_v44  ;;  %v676_v33 = vpop.xlane.xlu0 %675 }
 0x1c4   : > { %2810 = vst.msk [vmem:[%s4149_s28 + $0x120] sm:$0xf] %vm2737_vm7, %v2681_v27  ;;  %v1834_v4 = vmul.f32 %v5725_v13, %v1833_v11  ;;  %v896_v49 = vmul.f32 %v3994_v46, %v673_v54  ;;  %v1848_v20 = vsel %vm1847_vm8, %v5719_v63, %v1844_v31  ;;  %vm1825_vm10 = vweird.f32 %v5713_v53  ;;  %v679_v53 = vpop.xlane.xlu1 %678  ;;  %v3647_v31 = vld [vmem:[%s3839_s23 + $0x280] sm:$0xff] }
 0x1c5   : > { %v5787_v25 = vpop.eup %3481  ;;  %v1822_v51 = vmul.f32 0.5, %v1821_v14  ;;  %3485 = vrsqrt.f32 %v5777_v37  ;;  %v2426_v15 = vmul.f32 %v3644_v34, %v1848_v20  ;;  %vm1826_vm11 = vweird.f32 %v5757_v32 }
 0x1c6   : > { %v1838_v40 = vsel %vm1837_vm9, %v5725_v13, %v1834_v4  ;;  %v1870_v0 = vmul.f32 %v5787_v25, %v5749_v58  ;;  %v797_v35 = vsel %vm421_vm0, %v418_v62, 0.0  ;;  %v794_v24 = vsel %vm421_vm0, %v417_v2, 0.0  ;;  %vm1827_vm13 = vmor %vm1825_vm10, %vm1826_vm11 }
 0x1c7   : > { %v2425_v60 = vmul.f32 %v3645_v3, %v1838_v40  ;;  %v1823_v55 = vsub.f32 1.5, %v1822_v51  ;;  %v5804_v28 = vpop.eup %3483  ;;  %v2558_v63 = vmul.f32 %v5737_v47, %v2426_v15  ;;  %798 = vadd.xlane.f32.xlu2 %v797_v35  ;;  %795 = vadd.xlane.f32.xlu1 %v794_v24  ;;  %v791_v1 = vsel %vm421_vm0, %v416_v23, 0.0  ;;  %v3648_v51 = vld [vmem:[%s3839_s23 + $0x278] sm:$0xff]  ;;  %v691_v40 = vpop.xlane.xlu2 %690 }
 0x1c8   : > { %v1871_v41 = vmul.f32 %v5787_v25, %v1870_v0  ;;  %v5809_v17 = vadd.f32 1e-06, %v896_v49  ;;  %vm1875_vm12 = vweird.f32 %v5749_v58  ;;  %v1860_v42 = vmul.f32 %v5804_v28, %v5762_v36  ;;  %792 = vadd.xlane.f32.xlu0 %v791_v1 }
 0x1c9   : > { %v2557_v13 = vmul.f32 %v5737_v47, %v2425_v60  ;;  %v1824_v57 = vmul.f32 %v5757_v32, %v1823_v55  ;;  %v2686_v5 = vpack.c.bf16 %v2558_v63, %v2558_v63  ;;  %vm1865_vm14 = vweird.f32 %v5762_v36 }
 0x1ca   : > { %v1872_v8 = vmul.f32 0.5, %v1871_v41  ;;  %3487 = vrsqrt.f32 %v5809_v17  ;;  %v1861_v16 = vmul.f32 %v5804_v28, %v1860_v42  ;;  %v895_v18 = vmul.f32 %v3994_v46, %v670_v10 }
 0x1cb   : > { %v5823_v39 = vpop.eup %3485  ;;  %v2685_v45 = vpack.c.bf16 %v2557_v13, %v2557_v13  ;;  %v1828_v50 = vsel %vm1827_vm13, %v5757_v32, %v1824_v57  ;;  %2815 = vst.msk [vmem:[%s4149_s28 + $0x134] sm:$0xf] %vm2737_vm7, %v2686_v5  ;;  %vm1876_vm15 = vweird.f32 %v5787_v25  ;;  %v894_v32 = vmul.f32 %v3994_v46, %v667_v48 }
 0x1cc   : > { %v2424_v29 = vmul.f32 %v3646_v12, %v1828_v50  ;;  %v1873_v21 = vsub.f32 1.5, %v1872_v8  ;;  %v1850_v59 = vmul.f32 %v5823_v39, %v5777_v37  ;;  %v1862_v19 = vmul.f32 0.5, %v1861_v16  ;;  %vm1877_vm1 = vmor %vm1875_vm12, %vm1876_vm15  ;;  %v688_v35 = vpop.xlane.xlu1 %687  ;;  %v685_v50 = vpop.xlane.xlu0 %684  ;;  %v3650_v12 = vld [vmem:[%s3839_s23 + $0x298] sm:$0xff] }
 0x1cd   : > { %2814 = vst.msk [vmem:[%s4149_s28 + $0x130] sm:$0xf] %vm2737_vm7, %v2685_v45  ;;  %v5837_v30 = vadd.f32 1e-06, %v895_v18  ;;  %v420_v43 = vmul.f32 %v292_v22, %v292_v22  ;;  %v419_v54 = vmul.f32 %v291_v7, %v291_v7  ;;  %vm1866_vm2 = vweird.f32 %v5804_v28 }
 0x1ce   : > { %v2556_v52 = vmul.f32 %v5737_v47, %v2424_v29  ;;  %v1874_v26 = vmul.f32 %v5787_v25, %v1873_v21  ;;  %v1851_v6 = vmul.f32 %v5823_v39, %v1850_v59  ;;  %v1863_v9 = vsub.f32 1.5, %v1862_v19  ;;  %vm1867_vm4 = vmor %vm1865_vm14, %vm1866_vm2 }
 0x1cf   : > { %3489 = vrsqrt.f32 %v5837_v30  ;;  %v5847_v61 = vadd.f32 1e-06, %v894_v32  ;;  %v803_v11 = vsel %vm421_vm0, %v420_v43, 0.0  ;;  %vm1855_vm3 = vweird.f32 %v5777_v37  ;;  %v3649_v37 = vld [vmem:[%s3839_s23 + $0x270] sm:$0xff] }
 0x1d0   : > { %v5849_v38 = vpop.eup %3487  ;;  %v2684_v44 = vpack.c.bf16 %v2556_v52, %v2556_v52  ;;  %v1878_v10 = vsel %vm1877_vm1, %v5787_v25, %v1874_v26  ;;  %v1852_v27 = vmul.f32 0.5, %v1851_v6  ;;  %v1864_v14 = vmul.f32 %v5804_v28, %v1863_v9  ;;  %804 = vadd.xlane.f32.xlu1 %v803_v11 }
 0x1d1   : > { %v2429_v58 = vmul.f32 %v3647_v31, %v1878_v10  ;;  %v1900_v62 = vmul.f32 %v5849_v38, %v5809_v17  ;;  %vm1856_vm5 = vweird.f32 %v5823_v39  ;;  %3491 = vrsqrt.f32 %v5847_v61 }
 0x1d2   : > { %2813 = vst.msk [vmem:[%s4149_s28 + $0x12c] sm:$0xf] %vm2737_vm7, %v2684_v44  ;;  %v1853_v4 = vsub.f32 1.5, %v1852_v27  ;;  %v800_v2 = vsel %vm421_vm0, %v419_v54, 0.0  ;;  %v1868_v49 = vsel %vm1867_vm4, %v5804_v28, %v1864_v14  ;;  %v899_v20 = vmul.f32 %v3994_v46, %v682_v56  ;;  %vm1857_vm0 = vmor %vm1855_vm3, %vm1856_vm5  ;;  %v700_v54 = vpop.xlane.xlu2 %699 }
 0x1d3   : > { %v2561_v23 = vmul.f32 %v5737_v47, %v2429_v58  ;;  %v1901_v25 = vmul.f32 %v5849_v38, %v1900_v62  ;;  %801 = vadd.xlane.f32.xlu0 %v800_v2  ;;  %v2428_v48 = vmul.f32 %v3648_v51, %v1868_v49  ;;  %v898_v34 = vmul.f32 %v3994_v46, %v679_v53  ;;  %v3651_v58 = vld [vmem:[%s3839_s23 + $0x290] sm:$0xff] }
 0x1d4   : > { %v1854_v36 = vmul.f32 %v5823_v39, %v1853_v4  ;;  %v897_v15 = vmul.f32 %v3994_v46, %v676_v33  ;;  %vm1905_vm6 = vweird.f32 %v5809_v17  ;;  %v5882_v55 = vadd.f32 1e-06, %v899_v20  ;;  %v697_v33 = vpop.xlane.xlu1 %696 }
 0x1d5   : > { %v5875_v0 = vpop.eup %3489  ;;  %v2689_v3 = vpack.c.bf16 %v2561_v23, %v2561_v23  ;;  %v1902_v60 = vmul.f32 0.5, %v1901_v25  ;;  %v2560_v24 = vmul.f32 %v5737_v47, %v2428_v48  ;;  %vm1906_vm8 = vweird.f32 %v5849_v38 }
 0x1d6   : > { %v1858_v28 = vsel %vm1857_vm0, %v5823_v39, %v1854_v36  ;;  %v1890_v63 = vmul.f32 %v5875_v0, %v5837_v30  ;;  %3493 = vrsqrt.f32 %v5882_v55  ;;  %v902_v13 = vmul.f32 %v3994_v46, %v691_v40  ;;  %vm1907_vm9 = vmor %vm1905_vm6, %vm1906_vm8  ;;  %v3652_v36 = vld [vmem:[%s3839_s23 + $0x288] sm:$0xff] }
 0x1d7   : > { %2818 = vst.msk [vmem:[%s4149_s28 + $0x140] sm:$0xf] %vm2737_vm7, %v2689_v3  ;;  %v2427_v41 = vmul.f32 %v3649_v37, %v1858_v28  ;;  %v1903_v1 = vsub.f32 1.5, %v1902_v60  ;;  %v5894_v57 = vpop.eup %3491  ;;  %v2688_v42 = vpack.c.bf16 %v2560_v24, %v2560_v24  ;;  %v5897_v8 = vadd.f32 1e-06, %v898_v34 }
 0x1d8   : > { %v1891_v5 = vmul.f32 %v5875_v0, %v1890_v63  ;;  %v5899_v22 = vadd.f32 1e-06, %v897_v15  ;;  %v1880_v45 = vmul.f32 %v5894_v57, %v5847_v61  ;;  %vm1896_vm10 = vweird.f32 %v5875_v0 }
 0x1d9   : > { %v2559_v56 = vmul.f32 %v5737_v47, %v2427_v41  ;;  %v1904_v39 = vmul.f32 %v5849_v38, %v1903_v1  ;;  %2817 = vst.msk [vmem:[%s4149_s28 + $0x13c] sm:$0xf] %vm2737_vm7, %v2688_v42  ;;  %3495 = vrsqrt.f32 %v5897_v8  ;;  %v5917_v59 = vadd.f32 1e-06, %v902_v13 }
 0x1da   : > { %v1892_v16 = vmul.f32 0.5, %v1891_v5  ;;  %v1881_v53 = vmul.f32 %v5894_v57, %v1880_v45  ;;  %3497 = vrsqrt.f32 %v5899_v22  ;;  %v901_v17 = vmul.f32 %v3994_v46, %v688_v35 }
 0x1db   : > { %v2687_v18 = vpack.c.bf16 %v2559_v56, %v2559_v56  ;;  %v1908_v7 = vsel %vm1907_vm9, %v5849_v38, %v1904_v39  ;;  %vm1895_vm11 = vweird.f32 %v5837_v30  ;;  %vm1885_vm12 = vweird.f32 %v5847_v61  ;;  %v694_v61 = vpop.xlane.xlu0 %693  ;;  %v709_v56 = vpop.xlane.xlu2 %708  ;;  %v3653_v39 = vld [vmem:[%s3839_s23 + $0x2b0] sm:$0xff] }
 0x1dc   : > { %v2432_v29 = vmul.f32 %v3650_v12, %v1908_v7  ;;  %v1893_v21 = vsub.f32 1.5, %v1892_v16  ;;  %v5920_v19 = vpop.eup %3493  ;;  %v1882_v32 = vmul.f32 0.5, %v1881_v53  ;;  %v900_v43 = vmul.f32 %v3994_v46, %v685_v50  ;;  %vm1897_vm14 = vmor %vm1895_vm11, %vm1896_vm10 }
 0x1dd   : > { %2816 = vst.msk [vmem:[%s4149_s28 + $0x138] sm:$0xf] %vm2737_vm7, %v2687_v18  ;;  %v1930_v6 = vmul.f32 %v5920_v19, %v5882_v55  ;;  %vm1935_vm13 = vweird.f32 %v5882_v55  ;;  %vm1886_vm15 = vweird.f32 %v5894_v57  ;;  %3499 = vrsqrt.f32 %v5917_v59 }
 0x1de   : > { %v2564_v52 = vmul.f32 %v5737_v47, %v2432_v29  ;;  %v1894_v26 = vmul.f32 %v5875_v0, %v1893_v21  ;;  %v1883_v30 = vsub.f32 1.5, %v1882_v32  ;;  %v5936_v9 = vadd.f32 1e-06, %v901_v17  ;;  %vm1887_vm2 = vmor %vm1885_vm12, %vm1886_vm15  ;;  %v3654_v17 = vld [vmem:[%s3839_s23 + $0x2a8] sm:$0xff] }
 0x1df   : > { %v5938_v38 = vpop.eup %3495  ;;  %v1931_v27 = vmul.f32 %v5920_v19, %v1930_v6  ;;  %v5942_v11 = vadd.f32 1e-06, %v900_v43  ;;  %vm1925_vm1 = vweird.f32 %v5897_v8  ;;  %v905_v2 = vmul.f32 %v3994_v46, %v700_v54 }
 0x1e0   : > { %v2692_v44 = vpack.c.bf16 %v2564_v52, %v2564_v52  ;;  %v1898_v10 = vsel %vm1897_vm14, %v5875_v0, %v1894_v26  ;;  %v5944_v31 = vpop.eup %3497  ;;  %v1884_v62 = vmul.f32 %v5894_v57, %v1883_v30  ;;  %v1920_v4 = vmul.f32 %v5938_v38, %v5897_v8  ;;  %v3655_v26 = vld [vmem:[%s3839_s23 + $0x2a0] sm:$0xff] }
 0x1e1   : > { %v2431_v14 = vmul.f32 %v3651_v58, %v1898_v10  ;;  %v1932_v23 = vmul.f32 0.5, %v1931_v27  ;;  %v1910_v49 = vmul.f32 %v5944_v31, %v5899_v22  ;;  %vm1915_vm3 = vweird.f32 %v5899_v22 }
 0x1e2   : > { %2821 = vst.msk [vmem:[%s4149_s28 + $0x14c] sm:$0xf] %vm2737_vm7, %v2692_v44  ;;  %3501 = vrsqrt.f32 %v5936_v9  ;;  %v904_v25 = vmul.f32 %v3994_v46, %v697_v33  ;;  %v1888_v51 = vsel %vm1887_vm2, %v5894_v57, %v1884_v62  ;;  %vm1936_vm4 = vweird.f32 %v5920_v19  ;;  %v706_v33 = vpop.xlane.xlu1 %705 }
 0x1e3   : > { %v2563_v20 = vmul.f32 %v5737_v47, %v2431_v14  ;;  %v1921_v48 = vmul.f32 %v5938_v38, %v1920_v4  ;;  %v2430_v34 = vmul.f32 %v3652_v36, %v1888_v51  ;;  %v1933_v15 = vsub.f32 1.5, %v1932_v23  ;;  %v5970_v0 = vpop.eup %3499  ;;  %vm1937_vm0 = vmor %vm1935_vm13, %vm1936_vm4 }
 0x1e4   : > { %v1911_v40 = vmul.f32 %v5944_v31, %v1910_v49  ;;  %3503 = vrsqrt.f32 %v5942_v11  ;;  %vm1965_vm5 = vweird.f32 %v5917_v59  ;;  %v5973_v35 = vadd.f32 1e-06, %v905_v2 }
 0x1e5   : > { %v2691_v3 = vpack.c.bf16 %v2563_v20, %v2563_v20  ;;  %v1922_v60 = vmul.f32 0.5, %v1921_v48  ;;  %v2562_v24 = vmul.f32 %v5737_v47, %v2430_v34  ;;  %v1934_v28 = vmul.f32 %v5920_v19, %v1933_v15  ;;  %v718_v15 = vpop.xlane.xlu2 %717 }
 0x1e6   : > { %v1912_v63 = vmul.f32 0.5, %v1911_v40  ;;  %v1960_v37 = vmul.f32 %v5970_v0, %v5917_v59  ;;  %vm1926_vm6 = vweird.f32 %v5938_v38  ;;  %vm1916_vm8 = vweird.f32 %v5944_v31 }
 0x1e7   : > { %2820 = vst.msk [vmem:[%s4149_s28 + $0x148] sm:$0xf] %vm2737_vm7, %v2691_v3  ;;  %v1923_v41 = vsub.f32 1.5, %v1922_v60  ;;  %3505 = vrsqrt.f32 %v5973_v35  ;;  %v2690_v13 = vpack.c.bf16 %v2562_v24, %v2562_v24  ;;  %v1938_v57 = vsel %vm1937_vm0, %v5920_v19, %v1934_v28  ;;  %vm1927_vm10 = vmor %vm1925_vm1, %vm1926_vm6 }
 0x1e8   : > { %v5988_v1 = vpop.eup %3501  ;;  %v1913_v42 = vsub.f32 1.5, %v1912_v63  ;;  %v1961_v5 = vmul.f32 %v5970_v0, %v1960_v37  ;;  %v2435_v55 = vmul.f32 %v3653_v39, %v1938_v57  ;;  %vm1955_vm9 = vweird.f32 %v5936_v9  ;;  %vm1917_vm12 = vmor %vm1915_vm3, %vm1916_vm8 }
 0x1e9   : > { %v1924_v45 = vmul.f32 %v5938_v38, %v1923_v41  ;;  %v1950_v50 = vmul.f32 %v5988_v1, %v5936_v9  ;;  %2819 = vst.msk [vmem:[%s4149_s28 + $0x144] sm:$0xf] %vm2737_vm7, %v2690_v13  ;;  %vm1966_vm11 = vweird.f32 %v5970_v0  ;;  %v6007_v53 = vadd.f32 1e-06, %v904_v25  ;;  %v3656_v25 = vld [vmem:[%s3839_s23 + $0x2c8] sm:$0xff]  ;;  %v3657_v9 = vld [vmem:[%s3839_s23 + $0x2c0] sm:$0xff] }
 0x1ea   : > { %v5997_v16 = vpop.eup %3503  ;;  %v1914_v18 = vmul.f32 %v5944_v31, %v1913_v42  ;;  %v1962_v7 = vmul.f32 0.5, %v1961_v5  ;;  %v2567_v12 = vmul.f32 %v5737_v47, %v2435_v55  ;;  %vm1945_vm13 = vweird.f32 %v5942_v11  ;;  %vm1967_vm1 = vmor %vm1965_vm5, %vm1966_vm11  ;;  %v3658_v42 = vld [vmem:[%s3839_s23 + $0x2b8] sm:$0xff]  ;;  %v715_v39 = vpop.xlane.xlu1 %714 }
 0x1eb   : > { %v1928_v29 = vsel %vm1927_vm10, %v5938_v38, %v1924_v45  ;;  %v1951_v8 = vmul.f32 %v5988_v1, %v1950_v50  ;;  %v1940_v21 = vmul.f32 %v5997_v16, %v5942_v11  ;;  %vm1956_vm14 = vweird.f32 %v5988_v1  ;;  %v703_v38 = vpop.xlane.xlu0 %702 }
 0x1ec   : > { %v2434_v19 = vmul.f32 %v3654_v17, %v1928_v29  ;;  %v1918_v32 = vsel %vm1917_vm12, %v5944_v31, %v1914_v18  ;;  %v1963_v43 = vsub.f32 1.5, %v1962_v7  ;;  %vm1995_vm15 = vweird.f32 %v5973_v35  ;;  %vm1957_vm3 = vmor %vm1955_vm9, %vm1956_vm14  ;;  %v3659_v7 = vld [vmem:[%s3839_s23 + $0x2e0] sm:$0xff] }
 0x1ed   : > { %v6023_v52 = vpop.eup %3505  ;;  %v2695_v22 = vpack.c.bf16 %v2567_v12, %v2567_v12  ;;  %v2433_v6 = vmul.f32 %v3655_v26, %v1918_v32  ;;  %v1952_v54 = vmul.f32 0.5, %v1951_v8  ;;  %v1941_v30 = vmul.f32 %v5997_v16, %v1940_v21 }
 0x1ee   : > { %v2566_v44 = vmul.f32 %v5737_v47, %v2434_v19  ;;  %v1964_v10 = vmul.f32 %v5970_v0, %v1963_v43  ;;  %v1990_v27 = vmul.f32 %v6023_v52, %v5973_v35  ;;  %v903_v31 = vmul.f32 %v3994_v46, %v694_v61 }
 0x1ef   : > { %2824 = vst.msk [vmem:[%s4149_s28 + $0x158] sm:$0xf] %vm2737_vm7, %v2695_v22  ;;  %v2565_v58 = vmul.f32 %v5737_v47, %v2433_v6  ;;  %v1953_v14 = vsub.f32 1.5, %v1952_v54  ;;  %v1942_v62 = vmul.f32 0.5, %v1941_v30  ;;  %3507 = vrsqrt.f32 %v6007_v53  ;;  %v727_v6 = vpop.xlane.xlu2 %726 }
 0x1f0   : > { %v2694_v4 = vpack.c.bf16 %v2566_v44, %v2566_v44  ;;  %v1968_v2 = vsel %vm1967_vm1, %v5970_v0, %v1964_v10  ;;  %vm1946_vm2 = vweird.f32 %v5997_v16  ;;  %v1991_v23 = vmul.f32 %v6023_v52, %v1990_v27 }
 0x1f1   : > { %v2693_v49 = vpack.c.bf16 %v2565_v58, %v2565_v58  ;;  %v2438_v20 = vmul.f32 %v3656_v25, %v1968_v2  ;;  %v1954_v51 = vmul.f32 %v5988_v1, %v1953_v14  ;;  %v1943_v59 = vsub.f32 1.5, %v1942_v62  ;;  %vm1947_vm5 = vmor %vm1945_vm13, %vm1946_vm2 }
 0x1f2   : > { %2823 = vst.msk [vmem:[%s4149_s28 + $0x154] sm:$0xf] %vm2737_vm7, %v2694_v4  ;;  %v1992_v48 = vmul.f32 0.5, %v1991_v23  ;;  %v6051_v61 = vadd.f32 1e-06, %v903_v31  ;;  %v908_v36 = vmul.f32 %v3994_v46, %v709_v56  ;;  %v907_v34 = vmul.f32 %v3994_v46, %v706_v33 }
 0x1f3   : > { %2822 = vst.msk [vmem:[%s4149_s28 + $0x150] sm:$0xf] %vm2737_vm7, %v2693_v49  ;;  %v2570_v40 = vmul.f32 %v5737_v47, %v2438_v20  ;;  %v1958_v0 = vsel %vm1957_vm3, %v5988_v1, %v1954_v51  ;;  %v1944_v3 = vmul.f32 %v5997_v16, %v1943_v59  ;;  %vm1996_vm4 = vweird.f32 %v6023_v52  ;;  %v712_v55 = vpop.xlane.xlu0 %711  ;;  %v3660_v49 = vld [vmem:[%s3839_s23 + $0x2d8] sm:$0xff] }
 0x1f4   : > { %v2437_v60 = vmul.f32 %v3657_v9, %v1958_v0  ;;  %v1993_v24 = vsub.f32 1.5, %v1992_v48  ;;  %3509 = vrsqrt.f32 %v6051_v61  ;;  %v906_v28 = vmul.f32 %v3994_v46, %v703_v38  ;;  %vm1997_vm0 = vmor %vm1995_vm15, %vm1996_vm4  ;;  %v724_v48 = vpop.xlane.xlu1 %723 }
 0x1f5   : > { %v3508_v63 = vpop.eup %3507  ;;  %v2698_v37 = vpack.c.bf16 %v2570_v40, %v2570_v40  ;;  %v1948_v41 = vsel %vm1947_vm5, %v5997_v16, %v1944_v3  ;;  %v6069_v1 = vadd.f32 1e-06, %v908_v36  ;;  %v6071_v13 = vadd.f32 1e-06, %v907_v34 }
 0x1f6   : > { %v2569_v57 = vmul.f32 %v5737_v47, %v2437_v60  ;;  %v2436_v5 = vmul.f32 %v3658_v42, %v1948_v41  ;;  %v1994_v11 = vmul.f32 %v6023_v52, %v1993_v24  ;;  %v1980_v56 = vmul.f32 %v3508_v63, %v6007_v53 }
 0x1f7   : > { %2827 = vst.msk [vmem:[%s4149_s28 + $0x164] sm:$0xf] %vm2737_vm7, %v2698_v37  ;;  %3511 = vrsqrt.f32 %v6069_v1  ;;  %v6088_v29 = vadd.f32 1e-06, %v906_v28  ;;  %v911_v35 = vmul.f32 %v3994_v46, %v718_v15  ;;  %v910_v19 = vmul.f32 %v3994_v46, %v715_v39 }
 0x1f8   : > { %v2697_v45 = vpack.c.bf16 %v2569_v57, %v2569_v57  ;;  %v2568_v50 = vmul.f32 %v5737_v47, %v2436_v5  ;;  %v1998_v16 = vsel %vm1997_vm0, %v6023_v52, %v1994_v11  ;;  %v1981_v18 = vmul.f32 %v3508_v63, %v1980_v56 }
 0x1f9   : > { %v2441_v12 = vmul.f32 %v3659_v7, %v1998_v16  ;;  %3513 = vrsqrt.f32 %v6071_v13  ;;  %v909_v32 = vmul.f32 %v3994_v46, %v712_v55  ;;  %vm1985_vm6 = vweird.f32 %v6007_v53 }
 0x1fa   : > { %v6091_v8 = vpop.eup %3509  ;;  %2826 = vst.msk [vmem:[%s4149_s28 + $0x160] sm:$0xf] %vm2737_vm7, %v2697_v45  ;;  %v2696_v21 = vpack.c.bf16 %v2568_v50, %v2568_v50  ;;  %v1982_v17 = vmul.f32 0.5, %v1981_v18  ;;  %3515 = vrsqrt.f32 %v6088_v29  ;;  %vm1986_vm8 = vweird.f32 %v3508_v63 }
 0x1fb   : > { %v2573_v43 = vmul.f32 %v5737_v47, %v2441_v12  ;;  %v1970_v52 = vmul.f32 %v6091_v8, %v6051_v61  ;;  %v6104_v26 = vadd.f32 1e-06, %v911_v35  ;;  %v6109_v38 = vadd.f32 1e-06, %v910_v19  ;;  %vm1987_vm10 = vmor %vm1985_vm6, %vm1986_vm8  ;;  %v721_v60 = vpop.xlane.xlu0 %720  ;;  %v3662_v12 = vld [vmem:[%s3839_s23 + $0x2f8] sm:$0xff] }
 0x1fc   : > { %2825 = vst.msk [vmem:[%s4149_s28 + $0x15c] sm:$0xf] %vm2737_vm7, %v2696_v21  ;;  %v1983_v22 = vsub.f32 1.5, %v1982_v17  ;;  %v6111_v44 = vadd.f32 1e-06, %v909_v32  ;;  %vm1975_vm9 = vweird.f32 %v6051_v61  ;;  %vm2025_vm11 = vweird.f32 %v6069_v1  ;;  %v3661_v61 = vld [vmem:[%s3839_s23 + $0x2d0] sm:$0xff] }
 0x1fd   : > { %v6106_v54 = vpop.eup %3511  ;;  %v2701_v30 = vpack.c.bf16 %v2573_v43, %v2573_v43  ;;  %v1971_v33 = vmul.f32 %v6091_v8, %v1970_v52  ;;  %3517 = vrsqrt.f32 %v6104_v26  ;;  %v914_v14 = vmul.f32 %v3994_v46, %v727_v6  ;;  %v3663_v52 = vld [vmem:[%s3839_s23 + $0x2f0] sm:$0xff] }
 0x1fe   : > { %v1984_v10 = vmul.f32 %v3508_v63, %v1983_v22  ;;  %v2020_v27 = vmul.f32 %v6106_v54, %v6069_v1  ;;  %3519 = vrsqrt.f32 %v6109_v38  ;;  %vm2015_vm12 = vweird.f32 %v6071_v13  ;;  %v736_v1 = vpop.xlane.xlu2 %735 }
 0x1ff   : > { %v6117_v31 = vpop.eup %3513  ;;  %2830 = vst.msk [vmem:[%s4149_s28 + $0x170] sm:$0xf] %vm2737_vm7, %v2701_v30  ;;  %v1972_v58 = vmul.f32 0.5, %v1971_v33  ;;  %vm1976_vm13 = vweird.f32 %v6091_v8  ;;  %3521 = vrsqrt.f32 %v6111_v44  ;;  %vm2026_vm14 = vweird.f32 %v6106_v54 }
 0x200   : > { %v1988_v62 = vsel %vm1987_vm10, %v3508_v63, %v1984_v10  ;;  %v2021_v4 = vmul.f32 %v6106_v54, %v2020_v27  ;;  %v2010_v2 = vmul.f32 %v6117_v31, %v6071_v13  ;;  %v6130_v23 = vpop.eup %3515  ;;  %vm2005_vm15 = vweird.f32 %v6088_v29  ;;  %vm1977_vm3 = vmor %vm1975_vm9, %vm1976_vm13  ;;  %v733_v27 = vpop.xlane.xlu1 %732 }
 0x201   : > { %v2440_v53 = vmul.f32 %v3660_v49, %v1988_v62  ;;  %v1973_v25 = vsub.f32 1.5, %v1972_v58  ;;  %v2000_v59 = vmul.f32 %v6130_v23, %v6088_v29  ;;  %vm2016_vm1 = vweird.f32 %v6117_v31  ;;  %vm2027_vm5 = vmor %vm2025_vm11, %vm2026_vm14 }
 0x202   : > { %v2022_v20 = vmul.f32 0.5, %v2021_v4  ;;  %v2011_v51 = vmul.f32 %v6117_v31, %v2010_v2  ;;  %vm2055_vm2 = vweird.f32 %v6104_v26  ;;  %v6144_v15 = vadd.f32 1e-06, %v914_v14  ;;  %vm2017_vm6 = vmor %vm2015_vm12, %vm2016_vm1  ;;  %v3664_v14 = vld [vmem:[%s3839_s23 + $0x2e8] sm:$0xff] }
 0x203   : > { %v2572_v36 = vmul.f32 %v5737_v47, %v2440_v53  ;;  %v1974_v34 = vmul.f32 %v6091_v8, %v1973_v25  ;;  %v6146_v40 = vpop.eup %3517  ;;  %v2001_v9 = vmul.f32 %v6130_v23, %v2000_v59  ;;  %vm2006_vm4 = vweird.f32 %v6130_v23 }
 0x204   : > { %v2023_v0 = vsub.f32 1.5, %v2022_v20  ;;  %v2012_v3 = vmul.f32 0.5, %v2011_v51  ;;  %v6152_v24 = vpop.eup %3519  ;;  %v2050_v37 = vmul.f32 %v6146_v40, %v6104_v26  ;;  %v913_v41 = vmul.f32 %v3994_v46, %v724_v48  ;;  %vm2007_vm10 = vmor %vm2005_vm15, %vm2006_vm4  ;;  %v3665_v51 = vld [vmem:[%s3839_s23 + $0x310] sm:$0xff] }
 0x205   : > { %v2700_v28 = vpack.c.bf16 %v2572_v36, %v2572_v36  ;;  %v1978_v63 = vsel %vm1977_vm3, %v6091_v8, %v1974_v34  ;;  %v2002_v11 = vmul.f32 0.5, %v2001_v9  ;;  %v6160_v56 = vpop.eup %3521  ;;  %v2040_v55 = vmul.f32 %v6152_v24, %v6109_v38  ;;  %v730_v34 = vpop.xlane.xlu0 %729 }
 0x206   : > { %v2439_v57 = vmul.f32 %v3661_v61, %v1978_v63  ;;  %v2024_v42 = vmul.f32 %v6106_v54, %v2023_v0  ;;  %v2013_v5 = vsub.f32 1.5, %v2012_v3  ;;  %v2051_v39 = vmul.f32 %v6146_v40, %v2050_v37  ;;  %v745_v37 = vpop.xlane.xlu2 %744 }
 0x207   : > { %2829 = vst.msk [vmem:[%s4149_s28 + $0x16c] sm:$0xf] %vm2737_vm7, %v2700_v28  ;;  %3523 = vrsqrt.f32 %v6144_v15  ;;  %v912_v45 = vmul.f32 %v3994_v46, %v721_v60  ;;  %v2003_v7 = vsub.f32 1.5, %v2002_v11  ;;  %vm2045_vm0 = vweird.f32 %v6109_v38  ;;  %v3666_v38 = vld [vmem:[%s3839_s23 + $0x308] sm:$0xff] }
 0x208   : > { %v2571_v50 = vmul.f32 %v5737_v47, %v2439_v57  ;;  %v2028_v16 = vsel %vm2027_vm5, %v6106_v54, %v2024_v42  ;;  %v2014_v18 = vmul.f32 %v6117_v31, %v2013_v5  ;;  %v2052_v8 = vmul.f32 0.5, %v2051_v39 }
 0x209   : > { %v2444_v35 = vmul.f32 %v3662_v12, %v2028_v16  ;;  %v2041_v21 = vmul.f32 %v6152_v24, %v2040_v55  ;;  %v2030_v17 = vmul.f32 %v6160_v56, %v6111_v44  ;;  %v2004_v43 = vmul.f32 %v6130_v23, %v2003_v7  ;;  %v3667_v55 = vld [vmem:[%s3839_s23 + $0x300] sm:$0xff]  ;;  %v742_v16 = vpop.xlane.xlu1 %741 }
 0x20a   : > { %v2699_v19 = vpack.c.bf16 %v2571_v50, %v2571_v50  ;;  %v2018_v32 = vsel %vm2017_vm6, %v6117_v31, %v2014_v18  ;;  %vm2056_vm8 = vweird.f32 %v6146_v40  ;;  %vm2035_vm9 = vweird.f32 %v6111_v44 }
 0x20b   : > { %v2576_v13 = vmul.f32 %v5737_v47, %v2444_v35  ;;  %v2443_v22 = vmul.f32 %v3663_v52, %v2018_v32  ;;  %v2053_v6 = vsub.f32 1.5, %v2052_v8  ;;  %v2042_v54 = vmul.f32 0.5, %v2041_v21  ;;  %vm2057_vm12 = vmor %vm2055_vm2, %vm2056_vm8 }
 0x20c   : > { %2828 = vst.msk [vmem:[%s4149_s28 + $0x168] sm:$0xf] %vm2737_vm7, %v2699_v19  ;;  %v2008_v30 = vsel %vm2007_vm10, %v6130_v23, %v2004_v43  ;;  %vm2046_vm11 = vweird.f32 %v6152_v24  ;;  %v2031_v33 = vmul.f32 %v6160_v56, %v2030_v17  ;;  %v6200_v10 = vadd.f32 1e-06, %v913_v41  ;;  %v3668_v19 = vld [vmem:[%s3839_s23 + $0x328] sm:$0xff] }
 0x20d   : > { %v6202_v31 = vpop.eup %3523  ;;  %v2704_v58 = vpack.c.bf16 %v2576_v13, %v2576_v13  ;;  %v2575_v29 = vmul.f32 %v5737_v47, %v2443_v22  ;;  %v2442_v62 = vmul.f32 %v3664_v14, %v2008_v30  ;;  %v2054_v4 = vmul.f32 %v6146_v40, %v2053_v6  ;;  %vm2047_vm14 = vmor %vm2045_vm0, %vm2046_vm11  ;;  %v739_v6 = vpop.xlane.xlu0 %738 }
 0x20e   : > { %v2043_v2 = vsub.f32 1.5, %v2042_v54  ;;  %v2032_v23 = vmul.f32 0.5, %v2031_v33  ;;  %vm2036_vm13 = vweird.f32 %v6160_v56  ;;  %v2080_v49 = vmul.f32 %v6202_v31, %v6144_v15 }
 0x20f   : > { %2833 = vst.msk [vmem:[%s4149_s28 + $0x17c] sm:$0xf] %vm2737_vm7, %v2704_v58  ;;  %v2703_v53 = vpack.c.bf16 %v2575_v29, %v2575_v29  ;;  %v2574_v25 = vmul.f32 %v5737_v47, %v2442_v62  ;;  %v2058_v20 = vsel %vm2057_vm12, %v6146_v40, %v2054_v4  ;;  %3525 = vrsqrt.f32 %v6200_v10  ;;  %vm2037_vm1 = vmor %vm2035_vm9, %vm2036_vm13  ;;  %v754_v58 = vpop.xlane.xlu2 %753 }
 0x210   : > { %v2447_v26 = vmul.f32 %v3665_v51, %v2058_v20  ;;  %v2044_v59 = vmul.f32 %v6152_v24, %v2043_v2  ;;  %v2033_v48 = vsub.f32 1.5, %v2032_v23  ;;  %v2081_v36 = vmul.f32 %v6202_v31, %v2080_v49 }
 0x211   : > { %2832 = vst.msk [vmem:[%s4149_s28 + $0x178] sm:$0xf] %vm2737_vm7, %v2703_v53  ;;  %v2702_v0 = vpack.c.bf16 %v2574_v25, %v2574_v25  ;;  %vm2085_vm15 = vweird.f32 %v6144_v15  ;;  %v6229_v40 = vadd.f32 1e-06, %v912_v45  ;;  %v917_v3 = vmul.f32 %v3994_v46, %v736_v1 }
 0x212   : > { %v2579_v9 = vmul.f32 %v5737_v47, %v2447_v26  ;;  %v2048_v60 = vsel %vm2047_vm14, %v6152_v24, %v2044_v59  ;;  %v2034_v28 = vmul.f32 %v6160_v56, %v2033_v48  ;;  %v2082_v63 = vmul.f32 0.5, %v2081_v36  ;;  %v751_v59 = vpop.xlane.xlu1 %750 }
 0x213   : > { %2831 = vst.msk [vmem:[%s4149_s28 + $0x174] sm:$0xf] %vm2737_vm7, %v2702_v0  ;;  %v2446_v41 = vmul.f32 %v3666_v38, %v2048_v60  ;;  %vm2086_vm2 = vweird.f32 %v6202_v31  ;;  %3527 = vrsqrt.f32 %v6229_v40  ;;  %v6244_v24 = vadd.f32 1e-06, %v917_v3 }
 0x214   : > { %v2707_v61 = vpack.c.bf16 %v2579_v9, %v2579_v9  ;;  %v2038_v57 = vsel %vm2037_vm1, %v6160_v56, %v2034_v28  ;;  %v2083_v42 = vsub.f32 1.5, %v2082_v63  ;;  %v916_v5 = vmul.f32 %v3994_v46, %v733_v27  ;;  %vm2087_vm3 = vmor %vm2085_vm15, %vm2086_vm2  ;;  %v6332_v28 = vld [vmem:[%s6926_s1] ss:$0 sm:$0xff] }
 0x215   : > { %v6248_v11 = vpop.eup %3525  ;;  %v2578_v39 = vmul.f32 %v5737_v47, %v2446_v41  ;;  %v2445_v45 = vmul.f32 %v3667_v55, %v2038_v57  ;;  %3529 = vrsqrt.f32 %v6244_v24  ;;  %v915_v1 = vmul.f32 %v3994_v46, %v730_v34 }
 0x216   : > { %2836 = vst.msk [vmem:[%s4149_s28 + $0x188] sm:$0xf] %vm2737_vm7, %v2707_v61  ;;  %v2084_v44 = vmul.f32 %v6202_v31, %v2083_v42  ;;  %v2070_v56 = vmul.f32 %v6248_v11, %v6200_v10  ;;  %v6258_v50 = vadd.f32 1e-06, %v916_v5  ;;  %v920_v12 = vmul.f32 %v3994_v46, %v745_v37 }
 0x217   : > { %v2706_v18 = vpack.c.bf16 %v2578_v39, %v2578_v39  ;;  %v2577_v7 = vmul.f32 %v5737_v47, %v2445_v45  ;;  %v6275_v15 = vadd.f32 1e-06, %v915_v1  ;;  %v919_v22 = vmul.f32 %v3994_v46, %v742_v16  ;;  %v3672_v1 = vld [vmem:[%s3839_s23 + $0x340] sm:$0xff] }
 0x218   : > { %v2088_v35 = vsel %vm2087_vm3, %v6202_v31, %v2084_v44  ;;  %v2071_v8 = vmul.f32 %v6248_v11, %v2070_v56  ;;  %3531 = vrsqrt.f32 %v6258_v50  ;;  %v6277_v43 = vadd.f32 1e-06, %v920_v12 }
 0x219   : > { %v6270_v21 = vpop.eup %3527  ;;  %2835 = vst.msk [vmem:[%s4149_s28 + $0x184] sm:$0xf] %vm2737_vm7, %v2706_v18  ;;  %v2705_v17 = vpack.c.bf16 %v2577_v7, %v2577_v7  ;;  %v2450_v32 = vmul.f32 %v3668_v19, %v2088_v35  ;;  %vm2075_vm4 = vweird.f32 %v6200_v10  ;;  %vm2065_vm5 = vweird.f32 %v6229_v40  ;;  %v3669_v10 = vld [vmem:[%s3839_s23 + $0x320] sm:$0xff]  ;;  %v748_v35 = vpop.xlane.xlu0 %747 }
 0x21a   : > { %v2072_v13 = vmul.f32 0.5, %v2071_v8  ;;  %v2060_v52 = vmul.f32 %v6270_v21, %v6229_v40  ;;  %3533 = vrsqrt.f32 %v6275_v15  ;;  %vm2076_vm0 = vweird.f32 %v6248_v11 }
 0x21b   : > { %v6282_v54 = vpop.eup %3529  ;;  %2834 = vst.msk [vmem:[%s4149_s28 + $0x180] sm:$0xf] %vm2737_vm7, %v2705_v17  ;;  %v2582_v30 = vmul.f32 %v5737_v47, %v2450_v32  ;;  %3535 = vrsqrt.f32 %v6277_v43  ;;  %v6295_v47 = vadd.f32 1e-06, %v919_v22  ;;  %v918_v14 = vmul.f32 %v3994_v46, %v739_v6  ;;  %vm2077_vm8 = vmor %vm2075_vm4, %vm2076_vm0  ;;  %v763_v22 = vpop.xlane.xlu2 %762  ;;  %v3673_v6 = vld [vmem:[%s3839_s23 + $0x338] sm:$0xff] }
 0x21c   : > { %v2073_v33 = vsub.f32 1.5, %v2072_v13  ;;  %v2061_v27 = vmul.f32 %v6270_v21, %v2060_v52  ;;  %v2110_v31 = vmul.f32 %v6282_v54, %v6244_v24  ;;  %vm2115_vm6 = vweird.f32 %v6244_v24 }
 0x21d   : > { %v2710_v29 = vpack.c.bf16 %v2582_v30, %v2582_v30  ;;  %vm2066_vm9 = vweird.f32 %v6270_v21  ;;  %3537 = vrsqrt.f32 %v6295_v47  ;;  %v923_v53 = vmul.f32 %v3994_v46, %v754_v58 }
 0x21e   : > { %v6298_v62 = vpop.eup %3531  ;;  %v2074_v4 = vmul.f32 %v6248_v11, %v2073_v33  ;;  %v2062_v2 = vmul.f32 0.5, %v2061_v27  ;;  %v2111_v23 = vmul.f32 %v6282_v54, %v2110_v31  ;;  %v6313_v26 = vadd.f32 1e-06, %v918_v14  ;;  %vm2067_vm15 = vmor %vm2065_vm5, %vm2066_vm9  ;;  %v760_v27 = vpop.xlane.xlu1 %759 }
 0x21f   : > { %2839 = vst.msk [vmem:[%s4149_s28 + $0x194] sm:$0xf] %vm2737_vm7, %v2710_v29  ;;  %v2100_v49 = vmul.f32 %v6298_v62, %v6258_v50  ;;  %vm2116_vm10 = vweird.f32 %v6282_v54  ;;  %vm2105_vm11 = vweird.f32 %v6258_v50  ;;  %vm2106_vm12 = vweird.f32 %v6298_v62 }
 0x220   : > { %v2078_v25 = vsel %vm2077_vm8, %v6248_v11, %v2074_v4  ;;  %v2063_v20 = vsub.f32 1.5, %v2062_v2  ;;  %v2112_v51 = vmul.f32 0.5, %v2111_v23  ;;  %v6315_v48 = vpop.eup %3533  ;;  %vm2095_vm13 = vweird.f32 %v6275_v15  ;;  %v3671_v11 = vld [vmem:[%s3839_s23 + $0x318] sm:$0xff]  ;;  %vm2117_vm1 = vmor %vm2115_vm6, %vm2116_vm10  ;;  %v3674_v23 = vld [vmem:[%s3839_s23 + $0x330] sm:$0xff] }
 0x221   : > { %v2449_v36 = vmul.f32 %v3669_v10, %v2078_v25  ;;  %v2101_v34 = vmul.f32 %v6298_v62, %v2100_v49  ;;  %v2090_v9 = vmul.f32 %v6315_v48, %v6275_v15  ;;  %vm2145_vm14 = vweird.f32 %v6277_v43  ;;  %v6327_v60 = vpop.eup %3535  ;;  %vm2107_vm3 = vmor %vm2105_vm11, %vm2106_vm12 }
 0x222   : > { %v2064_v0 = vmul.f32 %v6270_v21, %v2063_v20  ;;  %v2113_v3 = vsub.f32 1.5, %v2112_v51  ;;  %3539 = vrsqrt.f32 %v6313_v26  ;;  %v6340_v38 = vadd.f32 1e-06, %v923_v53 }
 0x223   : > { %v2581_v63 = vmul.f32 %v6332_v28, %v2449_v36  ;;  %v2102_v37 = vmul.f32 0.5, %v2101_v34  ;;  %v2091_v57 = vmul.f32 %v6315_v48, %v2090_v9  ;;  %v2140_v42 = vmul.f32 %v6327_v60, %v6277_v43  ;;  %v6347_v5 = vpop.eup %3537 }
 0x224   : > { %v2068_v41 = vsel %vm2067_vm15, %v6270_v21, %v2064_v0  ;;  %v2114_v61 = vmul.f32 %v6282_v54, %v2113_v3  ;;  %v922_v45 = vmul.f32 %v3994_v46, %v751_v59  ;;  %v2130_v18 = vmul.f32 %v6347_v5, %v6295_v47 }
 0x225   : > { %v2709_v40 = vpack.c.bf16 %v2581_v63, %v2581_v63  ;;  %v2448_v39 = vmul.f32 %v3671_v11, %v2068_v41  ;;  %v2103_v55 = vsub.f32 1.5, %v2102_v37  ;;  %v2092_v56 = vmul.f32 0.5, %v2091_v57  ;;  %v3676_v63 = vld [vmem:[%s3839_s23 + $0x350] sm:$0xff] }
 0x226   : > { %v2118_v44 = vsel %vm2117_vm1, %v6282_v54, %v2114_v61  ;;  %v2141_v16 = vmul.f32 %v6327_v60, %v2140_v42  ;;  %vm2096_vm2 = vweird.f32 %v6315_v48  ;;  %v2131_v17 = vmul.f32 %v6347_v5, %v2130_v18  ;;  %v757_v61 = vpop.xlane.xlu0 %756 }
 0x227   : > { %2838 = vst.msk [vmem:[%s4149_s28 + $0x190] sm:$0xf] %vm2737_vm7, %v2709_v40  ;;  %v2580_v7 = vmul.f32 %v6332_v28, %v2448_v39  ;;  %v2453_v12 = vmul.f32 %v3672_v1, %v2118_v44  ;;  %v2104_v24 = vmul.f32 %v6298_v62, %v2103_v55  ;;  %v2093_v8 = vsub.f32 1.5, %v2092_v56  ;;  %vm2097_vm5 = vmor %vm2095_vm13, %vm2096_vm2  ;;  %v769_v56 = vpop.xlane.xlu1 %768  ;;  %v3677_v1 = vld [vmem:[%s3839_s23 + $0x348] sm:$0xff] }
 0x228   : > { %v2142_v21 = vmul.f32 0.5, %v2141_v16  ;;  %3541 = vrsqrt.f32 %v6340_v38  ;;  %v6371_v19 = vpop.eup %3539  ;;  %vm2146_vm4 = vweird.f32 %v6327_v60  ;;  %v2132_v33 = vmul.f32 0.5, %v2131_v17 }
 0x229   : > { %v2708_v32 = vpack.c.bf16 %v2580_v7, %v2580_v7  ;;  %v2585_v13 = vmul.f32 %v6332_v28, %v2453_v12  ;;  %v2108_v52 = vsel %vm2107_vm3, %v6298_v62, %v2104_v24  ;;  %v2094_v54 = vmul.f32 %v6315_v48, %v2093_v8  ;;  %vm2147_vm6 = vmor %vm2145_vm14, %vm2146_vm4 }
 0x22a   : > { %v2452_v50 = vmul.f32 %v3673_v6, %v2108_v52  ;;  %v2143_v30 = vsub.f32 1.5, %v2142_v21  ;;  %vm2136_vm0 = vweird.f32 %v6347_v5  ;;  %v2120_v58 = vmul.f32 %v6371_v19, %v6313_v26 }
 0x22b   : > { %2837 = vst.msk [vmem:[%s4149_s28 + $0x18c] sm:$0xf] %vm2737_vm7, %v2708_v32  ;;  %v2713_v31 = vpack.c.bf16 %v2585_v13, %v2585_v13  ;;  %v6387_v29 = vadd.f32 1e-06, %v922_v45  ;;  %v2098_v62 = vsel %vm2097_vm5, %v6315_v48, %v2094_v54  ;;  %v2133_v2 = vsub.f32 1.5, %v2132_v33  ;;  %v3675_v48 = vld [vmem:[%s3839_s23 + $0x358] sm:$0xff] }
 0x22c   : > { %v2584_v14 = vmul.f32 %v6332_v28, %v2452_v50  ;;  %v2144_v4 = vmul.f32 %v6327_v60, %v2143_v30  ;;  %v2451_v15 = vmul.f32 %v3674_v23, %v2098_v62  ;;  %vm2135_vm8 = vweird.f32 %v6295_v47 }
 0x22d   : > { %2842 = vst.msk [vmem:[%s4149_s28 + $0x1a0] sm:$0xf] %vm2737_vm7, %v2713_v31  ;;  %v2121_v49 = vmul.f32 %v6371_v19, %v2120_v58  ;;  %3543 = vrsqrt.f32 %v6387_v29  ;;  %v2134_v51 = vmul.f32 %v6347_v5, %v2133_v2  ;;  %v921_v59 = vmul.f32 %v3994_v46, %v748_v35  ;;  %vm2137_vm9 = vmor %vm2135_vm8, %vm2136_vm0 }
 0x22e   : > { %v6402_v53 = vpop.eup %3541  ;;  %v2712_v25 = vpack.c.bf16 %v2584_v14, %v2584_v14  ;;  %v2148_v20 = vsel %vm2147_vm6, %v6327_v60, %v2144_v4  ;;  %v2583_v43 = vmul.f32 %v6332_v28, %v2451_v15  ;;  %vm2126_vm10 = vweird.f32 %v6371_v19  ;;  %v766_v4 = vpop.xlane.xlu0 %765 }
 0x22f   : > { %v2456_v10 = vmul.f32 %v3675_v48, %v2148_v20  ;;  %v2122_v47 = vmul.f32 0.5, %v2121_v49  ;;  %v2170_v36 = vmul.f32 %v6402_v53, %v6340_v38  ;;  %v2138_v34 = vsel %vm2137_vm9, %v6347_v5, %v2134_v51 }
 0x230   : > { %2841 = vst.msk [vmem:[%s4149_s28 + $0x19c] sm:$0xf] %vm2737_vm7, %v2712_v25  ;;  %v6417_v0 = vadd.f32 1e-06, %v921_v59  ;;  %v926_v3 = vmul.f32 %v3994_v46, %v763_v22  ;;  %v2711_v9 = vpack.c.bf16 %v2583_v43, %v2583_v43  ;;  %v2455_v37 = vmul.f32 %v3676_v63, %v2138_v34  ;;  %v3679_v59 = vld [vmem:[%s3839_s23 + $0x368] sm:$0xff] }
 0x231   : > { %v2588_v60 = vmul.f32 %v6332_v28, %v2456_v10  ;;  %v2123_v41 = vsub.f32 1.5, %v2122_v47  ;;  %vm2125_vm11 = vweird.f32 %v6313_v26  ;;  %v2171_v57 = vmul.f32 %v6402_v53, %v2170_v36  ;;  %v772_v26 = vpop.xlane.xlu2 %771  ;;  %v778_v47 = vpop.xlane.xlu1 %777 }
 0x232   : > { %3545 = vrsqrt.f32 %v6417_v0  ;;  %v6425_v42 = vadd.f32 1e-06, %v926_v3  ;;  %2840 = vst.msk [vmem:[%s4149_s28 + $0x198] sm:$0xf] %vm2737_vm7, %v2711_v9  ;;  %v2587_v11 = vmul.f32 %v6332_v28, %v2455_v37  ;;  %v925_v55 = vmul.f32 %v3994_v46, %v760_v27  ;;  %vm2127_vm12 = vmor %vm2125_vm11, %vm2126_vm10 }
 0x233   : > { %v6427_v5 = vpop.eup %3543  ;;  %v2716_v40 = vpack.c.bf16 %v2588_v60, %v2588_v60  ;;  %v2124_v39 = vmul.f32 %v6371_v19, %v2123_v41  ;;  %v2172_v45 = vmul.f32 0.5, %v2171_v57  ;;  %vm2175_vm13 = vweird.f32 %v6340_v38  ;;  %v3678_v38 = vld [vmem:[%s3839_s23 + $0x370] sm:$0xff] }
 0x234   : > { %v2160_v44 = vmul.f32 %v6427_v5, %v6387_v29  ;;  %3547 = vrsqrt.f32 %v6425_v42  ;;  %v2715_v16 = vpack.c.bf16 %v2587_v11, %v2587_v11  ;;  %vm2176_vm14 = vweird.f32 %v6402_v53 }
 0x235   : > { %2845 = vst.msk [vmem:[%s4149_s28 + $0x1ac] sm:$0xf] %vm2737_vm7, %v2716_v40  ;;  %v2128_v18 = vsel %vm2127_vm12, %v6371_v19, %v2124_v39  ;;  %v6444_v7 = vadd.f32 1e-06, %v925_v55  ;;  %v2173_v24 = vsub.f32 1.5, %v2172_v45  ;;  %v924_v8 = vmul.f32 %v3994_v46, %v757_v61  ;;  %vm2177_vm15 = vmor %vm2175_vm13, %vm2176_vm14  ;;  %v3680_v45 = vld [vmem:[%s3839_s23 + $0x360] sm:$0xff] }
 0x236   : > { %v2454_v12 = vmul.f32 %v3677_v1, %v2128_v18  ;;  %v2161_v35 = vmul.f32 %v6427_v5, %v2160_v44  ;;  %2844 = vst.msk [vmem:[%s4149_s28 + $0x1a8] sm:$0xf] %vm2737_vm7, %v2715_v16  ;;  %v929_v21 = vmul.f32 %v3994_v46, %v772_v26  ;;  %v928_v17 = vmul.f32 %v3994_v46, %v769_v56 }
 0x237   : > { %3549 = vrsqrt.f32 %v6444_v7  ;;  %v2174_v13 = vmul.f32 %v6402_v53, %v2173_v24  ;;  %v6458_v22 = vadd.f32 1e-06, %v924_v8  ;;  %vm2166_vm1 = vweird.f32 %v6427_v5  ;;  %v3681_v8 = vld [vmem:[%s3839_s23 + $0x388] sm:$0xff] }
 0x238   : > { %v6454_v19 = vpop.eup %3545  ;;  %v2586_v32 = vmul.f32 %v6332_v28, %v2454_v12  ;;  %v2162_v52 = vmul.f32 0.5, %v2161_v35  ;;  %v6467_v50 = vadd.f32 1e-06, %v929_v21  ;;  %v6469_v54 = vadd.f32 1e-06, %v928_v17  ;;  %v775_v35 = vpop.xlane.xlu0 %774 }
 0x239   : > { %v2150_v6 = vmul.f32 %v6454_v19, %v6417_v0  ;;  %v2178_v27 = vsel %vm2177_vm15, %v6402_v53, %v2174_v13  ;;  %3551 = vrsqrt.f32 %v6458_v22  ;;  %vm2165_vm2 = vweird.f32 %v6387_v29  ;;  %v781_v53 = vpop.xlane.xlu2 %780 }
 0x23a   : > { %v6471_v30 = vpop.eup %3547  ;;  %v2714_v33 = vpack.c.bf16 %v2586_v32, %v2586_v32  ;;  %v2163_v31 = vsub.f32 1.5, %v2162_v52  ;;  %v2459_v58 = vmul.f32 %v3678_v38, %v2178_v27  ;;  %vm2155_vm3 = vweird.f32 %v6417_v0  ;;  %vm2167_vm5 = vmor %vm2165_vm2, %vm2166_vm1 }
 0x23b   : > { %v2151_v14 = vmul.f32 %v6454_v19, %v2150_v6  ;;  %v2200_v62 = vmul.f32 %v6471_v30, %v6425_v42  ;;  %vm2205_vm4 = vweird.f32 %v6425_v42  ;;  %3553 = vrsqrt.f32 %v6467_v50 }
 0x23c   : > { %2843 = vst.msk [vmem:[%s4149_s28 + $0x1a4] sm:$0xf] %vm2737_vm7, %v2714_v33  ;;  %v2164_v2 = vmul.f32 %v6427_v5, %v2163_v31  ;;  %v2591_v29 = vmul.f32 %v6332_v28, %v2459_v58  ;;  %3555 = vrsqrt.f32 %v6469_v54  ;;  %vm2156_vm0 = vweird.f32 %v6454_v19  ;;  %v3682_v31 = vld [vmem:[%s3839_s23 + $0x380] sm:$0xff] }
 0x23d   : > { %v6486_v23 = vpop.eup %3549  ;;  %v2152_v15 = vmul.f32 0.5, %v2151_v14  ;;  %v2201_v49 = vmul.f32 %v6471_v30, %v2200_v62  ;;  %vm2195_vm6 = vweird.f32 %v6444_v7  ;;  %vm2206_vm8 = vweird.f32 %v6471_v30  ;;  %vm2157_vm10 = vmor %vm2155_vm3, %vm2156_vm0 }
 0x23e   : > { %v2168_v25 = vsel %vm2167_vm5, %v6427_v5, %v2164_v2  ;;  %v2190_v20 = vmul.f32 %v6486_v23, %v6444_v7  ;;  %v2719_v51 = vpack.c.bf16 %v2591_v29, %v2591_v29  ;;  %v927_v3 = vmul.f32 %v3994_v46, %v766_v4  ;;  %vm2207_vm13 = vmor %vm2205_vm4, %vm2206_vm8 }
 0x23f   : > { %v2458_v43 = vmul.f32 %v3679_v59, %v2168_v25  ;;  %v2153_v48 = vsub.f32 1.5, %v2152_v15  ;;  %v2202_v10 = vmul.f32 0.5, %v2201_v49  ;;  %v6499_v36 = vpop.eup %3551  ;;  %v932_v9 = vmul.f32 %v3994_v46, %v781_v53  ;;  %v3683_v49 = vld [vmem:[%s3839_s23 + $0x378] sm:$0xff]  ;;  %v787_v25 = vpop.xlane.xlu1 %786 }
 0x240   : > { %v2191_v34 = vmul.f32 %v6486_v23, %v2190_v20  ;;  %2848 = vst.msk [vmem:[%s4149_s28 + $0x1b8] sm:$0xf] %vm2737_vm7, %v2719_v51  ;;  %v2180_v41 = vmul.f32 %v6499_v36, %v6458_v22  ;;  %vm2185_vm9 = vweird.f32 %v6458_v22  ;;  %vm2196_vm11 = vweird.f32 %v6486_v23 }
 0x241   : > { %v2590_v60 = vmul.f32 %v6332_v28, %v2458_v43  ;;  %v2154_v63 = vmul.f32 %v6454_v19, %v2153_v48  ;;  %v2203_v37 = vsub.f32 1.5, %v2202_v10  ;;  %v6512_v61 = vpop.eup %3553  ;;  %vm2235_vm12 = vweird.f32 %v6467_v50  ;;  %vm2197_vm15 = vmor %vm2195_vm6, %vm2196_vm11  ;;  %v790_v27 = vpop.xlane.xlu2 %789 }
 0x242   : > { %v2192_v57 = vmul.f32 0.5, %v2191_v34  ;;  %v6520_v5 = vadd.f32 1e-06, %v927_v3  ;;  %v931_v40 = vmul.f32 %v3994_v46, %v778_v47  ;;  %v6523_v11 = vpop.eup %3555  ;;  %v2181_v0 = vmul.f32 %v6499_v36, %v2180_v41 }
 0x243   : > { %v2718_v39 = vpack.c.bf16 %v2590_v60, %v2590_v60  ;;  %v2158_v55 = vsel %vm2157_vm10, %v6454_v19, %v2154_v63  ;;  %v2204_v26 = vmul.f32 %v6471_v30, %v2203_v37  ;;  %vm2186_vm14 = vweird.f32 %v6499_v36  ;;  %v3685_v63 = vld [vmem:[%s3839_s23 + $0x398] sm:$0xff] }
 0x244   : > { %v2457_v44 = vmul.f32 %v3680_v45, %v2158_v55  ;;  %v2193_v56 = vsub.f32 1.5, %v2192_v57  ;;  %v2230_v16 = vmul.f32 %v6512_v61, %v6467_v50  ;;  %v2182_v1 = vmul.f32 0.5, %v2181_v0  ;;  %vm2187_vm2 = vmor %vm2185_vm9, %vm2186_vm14  ;;  %v3684_v50 = vld [vmem:[%s3839_s23 + $0x3a0] sm:$0xff] }
 0x245   : > { %2847 = vst.msk [vmem:[%s4149_s28 + $0x1b4] sm:$0xf] %vm2737_vm7, %v2718_v39  ;;  %v2208_v18 = vsel %vm2207_vm13, %v6471_v30, %v2204_v26  ;;  %v2220_v12 = vmul.f32 %v6523_v11, %v6469_v54  ;;  %v6541_v24 = vadd.f32 1e-06, %v932_v9  ;;  %vm2236_vm1 = vweird.f32 %v6512_v61  ;;  %v784_v9 = vpop.xlane.xlu0 %783 }
 0x246   : > { %v2589_v42 = vmul.f32 %v6332_v28, %v2457_v44  ;;  %v2462_v21 = vmul.f32 %v3681_v8, %v2208_v18  ;;  %v2194_v17 = vmul.f32 %v6486_v23, %v2193_v56  ;;  %v2231_v19 = vmul.f32 %v6512_v61, %v2230_v16  ;;  %vm2237_vm5 = vmor %vm2235_vm12, %vm2236_vm1 }
 0x247   : > { %v2183_v32 = vsub.f32 1.5, %v2182_v1  ;;  %v2221_v13 = vmul.f32 %v6523_v11, %v2220_v12  ;;  %3557 = vrsqrt.f32 %v6520_v5  ;;  %vm2226_vm3 = vweird.f32 %v6523_v11 }
 0x248   : > { %v2717_v52 = vpack.c.bf16 %v2589_v42, %v2589_v42  ;;  %v2594_v6 = vmul.f32 %v6332_v28, %v2462_v21  ;;  %v2198_v30 = vsel %vm2197_vm15, %v6486_v23, %v2194_v17  ;;  %v2232_v33 = vmul.f32 0.5, %v2231_v19 }
 0x249   : > { %v2461_v7 = vmul.f32 %v3682_v31, %v2198_v30  ;;  %v2184_v38 = vmul.f32 %v6499_v36, %v2183_v32  ;;  %v2222_v58 = vmul.f32 0.5, %v2221_v13  ;;  %3559 = vrsqrt.f32 %v6541_v24  ;;  %v799_v44 = vpop.xlane.xlu2 %798 }
 0x24a   : > { %2846 = vst.msk [vmem:[%s4149_s28 + $0x1b0] sm:$0xf] %vm2737_vm7, %v2717_v52  ;;  %v2722_v14 = vpack.c.bf16 %v2594_v6, %v2594_v6  ;;  %v2233_v62 = vsub.f32 1.5, %v2232_v33  ;;  %v6566_v4 = vadd.f32 1e-06, %v931_v40  ;;  %v930_v15 = vmul.f32 %v3994_v46, %v775_v35  ;;  %v796_v52 = vpop.xlane.xlu1 %795 }
 0x24b   : > { %v2593_v2 = vmul.f32 %v6332_v28, %v2461_v7  ;;  %v2188_v23 = vsel %vm2187_vm2, %v6499_v36, %v2184_v38  ;;  %v2223_v29 = vsub.f32 1.5, %v2222_v58  ;;  %vm2225_vm4 = vweird.f32 %v6469_v54 }
 0x24c   : > { %2851 = vst.msk [vmem:[%s4149_s28 + $0x1c4] sm:$0xf] %vm2737_vm7, %v2722_v14  ;;  %v2460_v53 = vmul.f32 %v3683_v49, %v2188_v23  ;;  %v2234_v22 = vmul.f32 %v6512_v61, %v2233_v62  ;;  %3561 = vrsqrt.f32 %v6566_v4  ;;  %v6584_v43 = vadd.f32 1e-06, %v930_v15  ;;  %vm2227_vm0 = vmor %vm2225_vm4, %vm2226_vm3  ;;  %v3687_v49 = vld [vmem:[%s3839_s23 + $0x3b8] sm:$0xff] }
 0x24d   : > { %v6577_v20 = vpop.eup %3557  ;;  %v2721_v51 = vpack.c.bf16 %v2593_v2, %v2593_v2  ;;  %v2224_v59 = vmul.f32 %v6523_v11, %v2223_v29  ;;  %v935_v48 = vmul.f32 %v3994_v46, %v790_v27  ;;  %vm2215_vm6 = vweird.f32 %v6520_v5  ;;  %v793_v29 = vpop.xlane.xlu0 %792 }
 0x24e   : > { %v2592_v54 = vmul.f32 %v6332_v28, %v2460_v53  ;;  %v2238_v10 = vsel %vm2237_vm5, %v6512_v61, %v2234_v22  ;;  %v2210_v47 = vmul.f32 %v6577_v20, %v6520_v5  ;;  %3563 = vrsqrt.f32 %v6584_v43  ;;  %v3686_v5 = vld [vmem:[%s3839_s23 + $0x390] sm:$0xff] }
 0x24f   : > { %v6593_v36 = vpop.eup %3559  ;;  %2850 = vst.msk [vmem:[%s4149_s28 + $0x1c0] sm:$0xf] %vm2737_vm7, %v2721_v51  ;;  %v2465_v34 = vmul.f32 %v3684_v50, %v2238_v10  ;;  %v2228_v3 = vsel %vm2227_vm0, %v6523_v11, %v2224_v59  ;;  %v6606_v40 = vadd.f32 1e-06, %v935_v48  ;;  %v934_v39 = vmul.f32 %v3994_v46, %v787_v25 }
 0x250   : > { %v2720_v60 = vpack.c.bf16 %v2592_v54, %v2592_v54  ;;  %v2464_v37 = vmul.f32 %v3685_v63, %v2228_v3  ;;  %v2211_v41 = vmul.f32 %v6577_v20, %v2210_v47  ;;  %v2260_v61 = vmul.f32 %v6593_v36, %v6541_v24 }
 0x251   : > { %v2597_v57 = vmul.f32 %v6332_v28, %v2465_v34  ;;  %v933_v45 = vmul.f32 %v3994_v46, %v784_v9  ;;  %vm2265_vm8 = vweird.f32 %v6541_v24  ;;  %3565 = vrsqrt.f32 %v6606_v40 }
 0x252   : > { %v6609_v11 = vpop.eup %3561  ;;  %2849 = vst.msk [vmem:[%s4149_s28 + $0x1bc] sm:$0xf] %vm2737_vm7, %v2720_v60  ;;  %v2596_v55 = vmul.f32 %v6332_v28, %v2464_v37  ;;  %v2212_v26 = vmul.f32 0.5, %v2211_v41  ;;  %v2261_v0 = vmul.f32 %v6593_v36, %v2260_v61  ;;  %vm2216_vm9 = vweird.f32 %v6577_v20 }
 0x253   : > { %v2725_v56 = vpack.c.bf16 %v2597_v57, %v2597_v57  ;;  %v2250_v16 = vmul.f32 %v6609_v11, %v6566_v4  ;;  %v6626_v8 = vadd.f32 1e-06, %v934_v39  ;;  %v6628_v21 = vadd.f32 1e-06, %v933_v45  ;;  %vm2217_vm11 = vmor %vm2215_vm6, %vm2216_vm9 }
 0x254   : > { %v2724_v18 = vpack.c.bf16 %v2596_v55, %v2596_v55  ;;  %v2213_v1 = vsub.f32 1.5, %v2212_v26  ;;  %v2262_v12 = vmul.f32 0.5, %v2261_v0  ;;  %v6621_v35 = vpop.eup %3563  ;;  %v938_v17 = vmul.f32 %v3994_v46, %v799_v44  ;;  %v805_v55 = vpop.xlane.xlu1 %804 }
 0x255   : > { %2854 = vst.msk [vmem:[%s4149_s28 + $0x1d0] sm:$0xf] %vm2737_vm7, %v2725_v56  ;;  %v2251_v42 = vmul.f32 %v6609_v11, %v2250_v16  ;;  %vm2266_vm10 = vweird.f32 %v6593_v36  ;;  %v2240_v13 = vmul.f32 %v6621_v35, %v6584_v43  ;;  %vm2255_vm12 = vweird.f32 %v6566_v4  ;;  %v3688_v4 = vld [vmem:[%s3839_s23 + $0x3b0] sm:$0xff] }
 0x256   : > { %2853 = vst.msk [vmem:[%s4149_s28 + $0x1cc] sm:$0xf] %vm2737_vm7, %v2724_v18  ;;  %v2214_v19 = vmul.f32 %v6577_v20, %v2213_v1  ;;  %v2263_v32 = vsub.f32 1.5, %v2262_v12  ;;  %vm2256_vm13 = vweird.f32 %v6609_v11  ;;  %3567 = vrsqrt.f32 %v6626_v8  ;;  %vm2267_vm14 = vmor %vm2265_vm8, %vm2266_vm10 }
 0x257   : > { %v2252_v6 = vmul.f32 0.5, %v2251_v42  ;;  %v2241_v27 = vmul.f32 %v6621_v35, %v2240_v13  ;;  %3569 = vrsqrt.f32 %v6628_v21  ;;  %v6646_v31 = vpop.eup %3565  ;;  %v6653_v58 = vadd.f32 1e-06, %v938_v17  ;;  %vm2257_vm1 = vmor %vm2255_vm12, %vm2256_vm13  ;;  %v802_v17 = vpop.xlane.xlu0 %801 }
 0x258   : > { %v2218_v30 = vsel %vm2217_vm11, %v6577_v20, %v2214_v19  ;;  %v2264_v33 = vmul.f32 %v6593_v36, %v2263_v32  ;;  %v937_v14 = vmul.f32 %v3994_v46, %v796_v52  ;;  %vm2245_vm15 = vweird.f32 %v6584_v43  ;;  %v3689_v43 = vld [vmem:[%s3839_s23 + $0x3a8] sm:$0xff]  ;;  %v3690_v32 = vld [vmem:[%s3839_s23 + $0x3d0] sm:$0xff] }
 0x259   : > { %v2463_v7 = vmul.f32 %v3686_v5, %v2218_v30  ;;  %v2253_v38 = vsub.f32 1.5, %v2252_v6  ;;  %v2242_v2 = vmul.f32 0.5, %v2241_v27  ;;  %v2290_v23 = vmul.f32 %v6646_v31, %v6606_v40 }
 0x25a   : > { %v2268_v62 = vsel %vm2267_vm14, %v6593_v36, %v2264_v33  ;;  %3571 = vrsqrt.f32 %v6653_v58  ;;  %vm2246_vm2 = vweird.f32 %v6621_v35  ;;  %vm2295_vm3 = vweird.f32 %v6606_v40 }
 0x25b   : > { %v2595_v15 = vmul.f32 %v6332_v28, %v2463_v7  ;;  %v2468_v24 = vmul.f32 %v3687_v49, %v2268_v62  ;;  %v2254_v53 = vmul.f32 %v6609_v11, %v2253_v38  ;;  %v2243_v22 = vsub.f32 1.5, %v2242_v2  ;;  %vm2247_vm5 = vmor %vm2245_vm15, %vm2246_vm2 }
 0x25c   : > { %v2291_v25 = vmul.f32 %v6646_v31, %v2290_v23  ;;  %v6671_v20 = vpop.eup %3567  ;;  %v6675_v54 = vadd.f32 1e-06, %v937_v14  ;;  %vm2285_vm4 = vweird.f32 %v6626_v8  ;;  %vm2296_vm0 = vweird.f32 %v6646_v31 }
 0x25d   : > { %v2723_v51 = vpack.c.bf16 %v2595_v15, %v2595_v15  ;;  %v2600_v59 = vmul.f32 %v6332_v28, %v2468_v24  ;;  %v2258_v48 = vsel %vm2257_vm1, %v6609_v11, %v2254_v53  ;;  %v6677_v10 = vpop.eup %3569  ;;  %v2244_v36 = vmul.f32 %v6621_v35, %v2243_v22  ;;  %vm2297_vm8 = vmor %vm2295_vm3, %vm2296_vm0 }
 0x25e   : > { %v2467_v47 = vmul.f32 %v3688_v4, %v2258_v48  ;;  %v2292_v50 = vmul.f32 0.5, %v2291_v25  ;;  %v2280_v34 = vmul.f32 %v6671_v20, %v6626_v8  ;;  %v2270_v9 = vmul.f32 %v6677_v10, %v6628_v21  ;;  %v3691_v8 = vld [vmem:[%s3839_s23 + $0x3c8] sm:$0xff] }
 0x25f   : > { %2852 = vst.msk [vmem:[%s4149_s28 + $0x1c8] sm:$0xf] %vm2737_vm7, %v2723_v51  ;;  %v2728_v3 = vpack.c.bf16 %v2600_v59, %v2600_v59  ;;  %v936_v60 = vmul.f32 %v3994_v46, %v793_v29  ;;  %v2248_v37 = vsel %vm2247_vm5, %v6621_v35, %v2244_v36  ;;  %vm2286_vm6 = vweird.f32 %v6671_v20  ;;  %v3693_v48 = vld [vmem:[%s3839_s23 + $0x3e8] sm:$0xff] }
 0x260   : > { %v2599_v63 = vmul.f32 %v6332_v28, %v2467_v47  ;;  %v2293_v41 = vsub.f32 1.5, %v2292_v50  ;;  %v2281_v61 = vmul.f32 %v6671_v20, %v2280_v34  ;;  %v6697_v57 = vpop.eup %3571  ;;  %v2466_v39 = vmul.f32 %v3689_v43, %v2248_v37  ;;  %vm2287_vm11 = vmor %vm2285_vm4, %vm2286_vm6 }
 0x261   : > { %2857 = vst.msk [vmem:[%s4149_s28 + $0x1dc] sm:$0xf] %vm2737_vm7, %v2728_v3  ;;  %v2271_v11 = vmul.f32 %v6677_v10, %v2270_v9  ;;  %3573 = vrsqrt.f32 %v6675_v54  ;;  %v2320_v44 = vmul.f32 %v6697_v57, %v6653_v58  ;;  %vm2276_vm9 = vweird.f32 %v6677_v10 }
 0x262   : > { %v2727_v26 = vpack.c.bf16 %v2599_v63, %v2599_v63  ;;  %v2294_v0 = vmul.f32 %v6646_v31, %v2293_v41  ;;  %v2282_v45 = vmul.f32 0.5, %v2281_v61  ;;  %v2598_v56 = vmul.f32 %v6332_v28, %v2466_v39 }
 0x263   : > { %v2272_v16 = vmul.f32 0.5, %v2271_v11  ;;  %v6714_v18 = vadd.f32 1e-06, %v936_v60  ;;  %v2321_v35 = vmul.f32 %v6697_v57, %v2320_v44  ;;  %v940_v42 = vmul.f32 %v3994_v46, %v805_v55 }
 0x264   : > { %2856 = vst.msk [vmem:[%s4149_s28 + $0x1d8] sm:$0xf] %vm2737_vm7, %v2727_v26  ;;  %v2298_v1 = vsel %vm2297_vm8, %v6646_v31, %v2294_v0  ;;  %v2283_v12 = vsub.f32 1.5, %v2282_v45  ;;  %v2726_v19 = vpack.c.bf16 %v2598_v56, %v2598_v56  ;;  %vm2275_vm10 = vweird.f32 %v6628_v21  ;;  %v3695_v56 = vld [vmem:[%s3839_s23 + $0x3d8] sm:$0xff] }
 0x265   : > { %v2471_v40 = vmul.f32 %v3690_v32, %v2298_v1  ;;  %v2273_v13 = vsub.f32 1.5, %v2272_v16  ;;  %3575 = vrsqrt.f32 %v6714_v18  ;;  %v2322_v6 = vmul.f32 0.5, %v2321_v35  ;;  %vm2277_vm13 = vmor %vm2275_vm10, %vm2276_vm9 }
 0x266   : > { %v2284_v52 = vmul.f32 %v6671_v20, %v2283_v12  ;;  %v6725_v30 = vadd.f32 1e-06, %v940_v42  ;;  %2855 = vst.msk [vmem:[%s4149_s28 + $0x1d4] sm:$0xf] %vm2737_vm7, %v2726_v19  ;;  %vm2325_vm12 = vweird.f32 %v6653_v58  ;;  %v939_v21 = vmul.f32 %v3994_v46, %v802_v17  ;;  %v3692_v46 = vld [vmem:[%s3839_s23 + $0x3c0] sm:$0xff]  ;;  %v3696_v19 = vld [vmem:[%s3839_s23 + $0x3f8] sm:$0xff] }
 0x267   : > { %v3574_v33 = vpop.eup %3573  ;;  %v2603_v27 = vmul.f32 %v6332_v28, %v2471_v40  ;;  %v2274_v31 = vmul.f32 %v6677_v10, %v2273_v13  ;;  %v2323_v7 = vsub.f32 1.5, %v2322_v6  ;;  %vm2326_vm14 = vweird.f32 %v6697_v57 }
 0x268   : > { %v2288_v5 = vsel %vm2287_vm11, %v6671_v20, %v2284_v52  ;;  %v2310_v38 = vmul.f32 %v3574_v33, %v6675_v54  ;;  %3577 = vrsqrt.f32 %v6725_v30  ;;  %vm2327_vm15 = vmor %vm2325_vm12, %vm2326_vm14  ;;  %v1067_v53 = vadd.f32 1e-06, %v939_v21 }
 0x269   : > { %v2731_v14 = vpack.c.bf16 %v2603_v27, %v2603_v27  ;;  %v2470_v62 = vmul.f32 %v3691_v8, %v2288_v5  ;;  %v2278_v2 = vsel %vm2277_vm13, %v6677_v10, %v2274_v31  ;;  %v2324_v29 = vmul.f32 %v6697_v57, %v2323_v7 }
 0x26a   : > { %v2469_v23 = vmul.f32 %v3692_v46, %v2278_v2  ;;  %v2311_v15 = vmul.f32 %v3574_v33, %v2310_v38  ;;  %3579 = vrsqrt.f32 %v1067_v53  ;;  %vm2316_vm1 = vweird.f32 %v3574_v33 }
 0x26b   : > { %v3576_v49 = vpop.eup %3575  ;;  %2860 = vst.msk [vmem:[%s4149_s28 + $0x1e8] sm:$0xf] %vm2737_vm7, %v2731_v14  ;;  %v2602_v24 = vmul.f32 %v6332_v28, %v2470_v62  ;;  %v2328_v25 = vsel %vm2327_vm15, %v6697_v57, %v2324_v29  ;;  %vm2315_vm2 = vweird.f32 %v6675_v54  ;;  %v3694_v57 = vld [vmem:[%s3839_s23 + $0x3e0] sm:$0xff]  ;;  %vm2305_vm5 = vweird.f32 %v6714_v18 }
 0x26c   : > { %v2601_v22 = vmul.f32 %v6332_v28, %v2469_v23  ;;  %v2312_v20 = vmul.f32 0.5, %v2311_v15  ;;  %v2300_v51 = vmul.f32 %v3576_v49, %v6714_v18  ;;  %v2474_v10 = vmul.f32 %v3693_v48, %v2328_v25  ;;  %vm2317_vm3 = vmor %vm2315_vm2, %vm2316_vm1 }
 0x26d   : > { %v2730_v59 = vpack.c.bf16 %v2602_v24, %v2602_v24  ;;  %vm2306_vm4 = vweird.f32 %v3576_v49  ;;  %vm2345_vm8 = vweird.f32 %v6725_v30  ;;  %vm2335_vm11 = vweird.f32 %v1067_v53 }
 0x26e   : > { %v2729_v4 = vpack.c.bf16 %v2601_v22, %v2601_v22  ;;  %v2313_v47 = vsub.f32 1.5, %v2312_v20  ;;  %v2301_v36 = vmul.f32 %v3576_v49, %v2300_v51  ;;  %v3578_v58 = vpop.eup %3577  ;;  %v2606_v50 = vmul.f32 %v6332_v28, %v2474_v10  ;;  %vm2307_vm0 = vmor %vm2305_vm5, %vm2306_vm4 }
 0x26f   : > { %2859 = vst.msk [vmem:[%s4149_s28 + $0x1e4] sm:$0xf] %vm2737_vm7, %v2730_v59  ;;  %v2340_v9 = vmul.f32 %v3578_v58, %v6725_v30  ;;  %vm2346_vm6 = vweird.f32 %v3578_v58  ;;  %v3697_v30 = vld [vmem:[%s3839_s23 + $0x3f0] sm:$0xff] }
 0x270   : > { %2858 = vst.msk [vmem:[%s4149_s28 + $0x1e0] sm:$0xf] %vm2737_vm7, %v2729_v4  ;;  %v2314_v34 = vmul.f32 %v3574_v33, %v2313_v47  ;;  %v2302_v3 = vmul.f32 0.5, %v2301_v36  ;;  %v2734_v60 = vpack.c.bf16 %v2606_v50, %v2606_v50  ;;  %v3580_v61 = vpop.eup %3579  ;;  %vm2347_vm9 = vmor %vm2345_vm8, %vm2346_vm6 }
 0x271   : > { %v2341_v41 = vmul.f32 %v3578_v58, %v2340_v9  ;;  %v2330_v11 = vmul.f32 %v3580_v61, %v1067_v53  ;;  %vm2336_vm10 = vweird.f32 %v3580_v61 }
 0x272   : > { %v2318_v63 = vsel %vm2317_vm3, %v3574_v33, %v2314_v34  ;;  %v2303_v37 = vsub.f32 1.5, %v2302_v3  ;;  %2863 = vst.msk [vmem:[%s4149_s28 + $0x1f4] sm:$0xf] %vm2737_vm7, %v2734_v60  ;;  %vm2337_vm12 = vmor %vm2335_vm11, %vm2336_vm10 }
 0x273   : > { %v2473_v43 = vmul.f32 %v3694_v57, %v2318_v63  ;;  %v2342_v54 = vmul.f32 0.5, %v2341_v41  ;;  %v2331_v45 = vmul.f32 %v3580_v61, %v2330_v11 }
 0x274   : > { %v2304_v39 = vmul.f32 %v3576_v49, %v2303_v37 }
 0x275   : > { %v2605_v55 = vmul.f32 %v6332_v28, %v2473_v43  ;;  %v2343_v0 = vsub.f32 1.5, %v2342_v54  ;;  %v2332_v12 = vmul.f32 0.5, %v2331_v45 }
 0x276   : > { %v2308_v26 = vsel %vm2307_vm0, %v3576_v49, %v2304_v39 }
 0x277   : > { %v2733_v44 = vpack.c.bf16 %v2605_v55, %v2605_v55  ;;  %v2472_v16 = vmul.f32 %v3695_v56, %v2308_v26  ;;  %v2344_v1 = vmul.f32 %v3578_v58, %v2343_v0  ;;  %v2333_v42 = vsub.f32 1.5, %v2332_v12 }
 0x279   : > { %2862 = vst.msk [vmem:[%s4149_s28 + $0x1f0] sm:$0xf] %vm2737_vm7, %v2733_v44  ;;  %v2604_v18 = vmul.f32 %v6332_v28, %v2472_v16  ;;  %v2348_v35 = vsel %vm2347_vm9, %v3578_v58, %v2344_v1  ;;  %v2334_v40 = vmul.f32 %v3580_v61, %v2333_v42 }
 0x27a   : > { %v2476_v32 = vmul.f32 %v3696_v19, %v2348_v35 }
 0x27b   : > { %v2732_v17 = vpack.c.bf16 %v2604_v18, %v2604_v18  ;;  %v2338_v52 = vsel %vm2337_vm12, %v3580_v61, %v2334_v40 }
 0x27c   : > { %v2608_v13 = vmul.f32 %v6332_v28, %v2476_v32  ;;  %v2475_v33 = vmul.f32 %v3697_v30, %v2338_v52 }
 0x27d   : > { %2861 = vst.msk [vmem:[%s4149_s28 + $0x1ec] sm:$0xf] %vm2737_vm7, %v2732_v17 }
 0x27e   : > { %v2736_v6 = vpack.c.bf16 %v2608_v13, %v2608_v13  ;;  %v2607_v27 = vmul.f32 %v6332_v28, %v2475_v33  ;;  %2872 = sbr.rel (!%p3827_p4) target bundleno = 707 (0x2c3), region = 32 }
 0x280   : > { %2865 = vst.msk [vmem:[%s4149_s28 + $0x1fc] sm:$0xf] %vm2737_vm7, %v2736_v6  ;;  %v2735_v31 = vpack.c.bf16 %v2607_v27, %v2607_v27 }
 0x282   : > { %2864 = vst.msk [vmem:[%s4149_s28 + $0x1f8] sm:$0xf] %vm2737_vm7, %v2735_v31 }
 0x283   : > { %s6944_s9 = smov (!%p2875_p8, %s2874_s9), 128 }
 0x284   : > { %s3215_s20 = sshll.u32 %s6944_s9, 2 }
 0x285   : > { %p3218_p9 = scmp.eq.s32.totalorder %s3215_s20, 0 }
 0x286   : > { %s6796_s21 = sshrl.u32 (!%p3218_p9), %s6944_s9, 5 }
 0x287   : > { %2883 = sbr.rel (%p3218_p9) target bundleno = 707 (0x2c3), region = 36  ;;  %p3219_p10 = scmp.le.s32.totalorder (!%p3218_p9), %s6796_s21, 0 }
 0x28c   : > { %3162 = sbr.rel (%p3219_p10) target bundleno = 690 (0x2b2), region = 108  ;;  %s6935_s12 = smov (!%p3219_p10), %s6790_s19 }
 0x28d   : > { %s6936_s17 = smov (!%p3219_p10), %s4149_s28  ;;  %s6805_s18 = smov (!%p3219_p10), 0  }
 0x28e   : > { %s6807_s22 = smov (!%p3219_p10), 0  }
 0x291 LB: >> { %v2900_v28 = vld [vmem:[%s3760_s17] sm:$0xf]  ;;  %v2902_v21 = vld [vmem:[%s3760_s17 + $0x4] sm:$0xf]  ;;  %v2904_v5 = vld [vmem:[%s3760_s17 + $0x8] sm:$0xf]  ;;  %s3768_s22 = sphi %s6807_s22, %s2894_s22   ;;  %s3764_s18 = sphi %s6805_s18, %s6939_s18   ;;  %s3760_s17 = sphi %s6936_s17, %s6938_s17   ;;  %s3756_s12 = sphi %s6935_s12, %s6937_s12  }
 0x292   : >> { %2901 = vst [vmem:[%s3756_s12] sm:$0xf] %v2900_v28  ;;  %v2906_v7 = vld [vmem:[%s3760_s17 + $0xc] sm:$0xf]  ;;  %v2908_v38 = vld [vmem:[%s3760_s17 + $0x10] sm:$0xf]  ;;  %s2964_s23 = sadd.s32 1, %s3764_s18 }
 0x293   : >> { %2903 = vst [vmem:[%s3756_s12 + $0x4] sm:$0xf] %v2902_v21  ;;  %v2910_v14 = vld [vmem:[%s3760_s17 + $0x14] sm:$0xf]  ;;  %v2912_v8 = vld [vmem:[%s3760_s17 + $0x18] sm:$0xf]  ;;  %p2965_p11 = scmp.ge.s32.totalorder %s2964_s23, %s6796_s21 }
 0x294   : >> { %2905 = vst [vmem:[%s3756_s12 + $0x8] sm:$0xf] %v2904_v5  ;;  %v2914_v62 = vld [vmem:[%s3760_s17 + $0x1c] sm:$0xf]  ;;  %v2916_v2 = vld [vmem:[%s3760_s17 + $0x20] sm:$0xf] }
 0x295   : >> { %2907 = vst [vmem:[%s3756_s12 + $0xc] sm:$0xf] %v2906_v7  ;;  %v2918_v46 = vld [vmem:[%s3760_s17 + $0x24] sm:$0xf]  ;;  %v2920_v23 = vld [vmem:[%s3760_s17 + $0x28] sm:$0xf] }
 0x296   : >> { %2909 = vst [vmem:[%s3756_s12 + $0x10] sm:$0xf] %v2908_v38  ;;  %v2922_v29 = vld [vmem:[%s3760_s17 + $0x2c] sm:$0xf]  ;;  %v2924_v15 = vld [vmem:[%s3760_s17 + $0x30] sm:$0xf] }
 0x297   : >> { %2911 = vst [vmem:[%s3756_s12 + $0x14] sm:$0xf] %v2910_v14  ;;  %v2926_v49 = vld [vmem:[%s3760_s17 + $0x34] sm:$0xf]  ;;  %v2928_v24 = vld [vmem:[%s3760_s17 + $0x38] sm:$0xf] }
 0x298   : >> { %2913 = vst [vmem:[%s3756_s12 + $0x18] sm:$0xf] %v2912_v8  ;;  %v2930_v53 = vld [vmem:[%s3760_s17 + $0x3c] sm:$0xf]  ;;  %v2932_v22 = vld [vmem:[%s3760_s17 + $0x40] sm:$0xf] }
 0x299   : >> { %2915 = vst [vmem:[%s3756_s12 + $0x1c] sm:$0xf] %v2914_v62  ;;  %v2934_v25 = vld [vmem:[%s3760_s17 + $0x44] sm:$0xf]  ;;  %s6946_s23 = smov (%p2965_p11, %s2964_s23), 0  ;;  %s2894_s22 = sadd.s32 1, %s3768_s22  }
 0x29a   : >> { %2917 = vst [vmem:[%s3756_s12 + $0x20] sm:$0xf] %v2916_v2  ;;  %v2936_v20 = vld [vmem:[%s3760_s17 + $0x48] sm:$0xf]  ;;  %v2938_v51 = vld [vmem:[%s3760_s17 + $0x4c] sm:$0xf]  ;;  %p2893_p12 = scmp.ge.s32.totalorder %s2894_s22, %s6796_s21  ;;  %s6939_s18 = smov %s6946_s23 }
 0x29b   : >> { %2919 = vst [vmem:[%s3756_s12 + $0x24] sm:$0xf] %v2918_v46  ;;  %s3220_s24 = sshll.u32 %s6946_s23, 7  ;;  %v2940_v59 = vld [vmem:[%s3760_s17 + $0x50] sm:$0xf] }
 0x29c   : >> { %2921 = vst [vmem:[%s3756_s12 + $0x28] sm:$0xf] %v2920_v23  ;;  %s6866_s25 = scalar_lea.vmem %s4149_s28, %s3220_s24 [#allocation2]   ;;  %s2970_s26 = scalar_lea.vmem %s6790_s19, %s3220_s24   ;;  %v2942_v48 = vld [vmem:[%s3760_s17 + $0x54] sm:$0xf]  ;;  %v2944_v10 = vld [vmem:[%s3760_s17 + $0x58] sm:$0xf] }
 0x29d   : >> { %2923 = vst [vmem:[%s3756_s12 + $0x2c] sm:$0xf] %v2922_v29  ;;  %v2946_v4 = vld [vmem:[%s3760_s17 + $0x5c] sm:$0xf]  ;;  %v2948_v47 = vld [vmem:[%s3760_s17 + $0x60] sm:$0xf] }
 0x29e   : >> { %2925 = vst [vmem:[%s3756_s12 + $0x30] sm:$0xf] %v2924_v15  ;;  %v2950_v36 = vld [vmem:[%s3760_s17 + $0x64] sm:$0xf]  ;;  %v2952_v58 = vld [vmem:[%s3760_s17 + $0x68] sm:$0xf] }
 0x29f   : >> { %2927 = vst [vmem:[%s3756_s12 + $0x34] sm:$0xf] %v2926_v49  ;;  %v2954_v50 = vld [vmem:[%s3760_s17 + $0x6c] sm:$0xf]  ;;  %v2956_v34 = vld [vmem:[%s3760_s17 + $0x70] sm:$0xf] }
 0x2a0   : >> { %2929 = vst [vmem:[%s3756_s12 + $0x38] sm:$0xf] %v2928_v24  ;;  %v2958_v3 = vld [vmem:[%s3760_s17 + $0x74] sm:$0xf]  ;;  %v2960_v9 = vld [vmem:[%s3760_s17 + $0x78] sm:$0xf] }
 0x2a1   : >> { %2931 = vst [vmem:[%s3756_s12 + $0x3c] sm:$0xf] %v2930_v53  ;;  %v2962_v60 = vld [vmem:[%s3760_s17 + $0x7c] sm:$0xf]  ;;  %s6938_s17 = smov %s6866_s25 }
 0x2a2   : >> { %2933 = vst [vmem:[%s3756_s12 + $0x40] sm:$0xf] %v2932_v22 }
 0x2a3   : >> { %2935 = vst [vmem:[%s3756_s12 + $0x44] sm:$0xf] %v2934_v25 }
 0x2a4   : >> { %2937 = vst [vmem:[%s3756_s12 + $0x48] sm:$0xf] %v2936_v20 }
 0x2a5   : >> { %2939 = vst [vmem:[%s3756_s12 + $0x4c] sm:$0xf] %v2938_v51 }
 0x2a6   : >> { %2941 = vst [vmem:[%s3756_s12 + $0x50] sm:$0xf] %v2940_v59 }
 0x2a7   : >> { %2943 = vst [vmem:[%s3756_s12 + $0x54] sm:$0xf] %v2942_v48 }
 0x2a8   : >> { %2945 = vst [vmem:[%s3756_s12 + $0x58] sm:$0xf] %v2944_v10 }
 0x2a9   : >> { %2947 = vst [vmem:[%s3756_s12 + $0x5c] sm:$0xf] %v2946_v4 }
 0x2aa   : >> { %2949 = vst [vmem:[%s3756_s12 + $0x60] sm:$0xf] %v2948_v47 }
 0x2ab   : >> { %2951 = vst [vmem:[%s3756_s12 + $0x64] sm:$0xf] %v2950_v36 }
 0x2ac   : >> { %2953 = vst [vmem:[%s3756_s12 + $0x68] sm:$0xf] %v2952_v58 }
 0x2ad   : >> { %2955 = vst [vmem:[%s3756_s12 + $0x6c] sm:$0xf] %v2954_v50  ;;  %2896 = sbr.rel (!%p2893_p12) target bundleno = 657 (0x291), region = 114 }
 0x2ae   : >> { %2957 = vst [vmem:[%s3756_s12 + $0x70] sm:$0xf] %v2956_v34 }
 0x2af   : >> { %2959 = vst [vmem:[%s3756_s12 + $0x74] sm:$0xf] %v2958_v3 }
 0x2b0   : >> { %2961 = vst [vmem:[%s3756_s12 + $0x78] sm:$0xf] %v2960_v9 }
 0x2b1   : >> { %2963 = vst [vmem:[%s3756_s12 + $0x7c] sm:$0xf] %v2962_v60  ;;  %s6937_s12 = smov %s2970_s26 }
 0x2b2 PF: > { %s6907_s27 = sand.u32 31, %s6944_s9   ;;  %s3231_s29 = sshll.u32 %s6796_s21, 7 }
 0x2b3   : > { %s2975_s30 = scalar_lea.vmem %s4149_s28, %s3231_s29 [#allocation2]   ;;  %s2977_s3 = scalar_lea.vmem %s6790_s19, %s3231_s29  }
 0x2b4   : > { %p3225_p13 = scmp.le.s32.totalorder %s6907_s27, 0 }
 0x2b5   : > { %s3770_s4 = smov (!%p3225_p13), %s2977_s3   ;;  %s3774_s5 = smov (!%p3225_p13), %s2975_s30  }
 0x2b6   : > { %3176 = sbr.rel (%p3225_p13) target bundleno = 707 (0x2c3), region = 119  ;;  %s3778_s6 = smov (!%p3225_p13), 0  }
 0x2b7   : > { %s3782_s7 = smov (!%p3225_p13), 0  }
 0x2bb LB: >> { %v2987_v63 = vld [vmem:[%s3776_s5] sm:$0xf]  ;;  %s2989_s8 = sadd.s32 1, %s3780_s6  ;;  %s2981_s7 = sadd.s32 1, %s3784_s7   ;;  %s3784_s7 = sphi %s3782_s7, %s2981_s7   ;;  %s3780_s6 = sphi %s3778_s6, %s3779_s6   ;;  %s3776_s5 = sphi %s3774_s5, %s2994_s5   ;;  %s3772_s4 = sphi %s3770_s4, %s2995_s4  }
 0x2bc   : >> { %2988 = vst [vmem:[%s3772_s4] sm:$0xf] %v2987_v63  ;;  %p2990_p0 = scmp.ge.s32.totalorder %s2989_s8, %s6907_s27  ;;  %p2980_p1 = scmp.ge.s32.totalorder %s2981_s7, %s6907_s27 }
 0x2be   : >> { %s6948_s8 = smov (%p2990_p0, %s2989_s8), 0  ;;  %2983 = sbr.rel (!%p2980_p1) target bundleno = 699 (0x2bb), region = 125 }
 0x2bf   : >> { %s3226_s28 = sshll.u32 %s6948_s8, 2  ;;  %s3779_s6 = smov %s6948_s8  }
 0x2c0   : >> { %s2994_s5 = scalar_lea.vmem %s2975_s30, %s3226_s28 [#allocation2]   ;;  %s2995_s4 = scalar_lea.vmem %s2977_s3, %s3226_s28  }
 0x2c3 PF: > { %p9_p2 = scmp.ge.s32.totalorder %s3817_s13, 4   ;;  %s6940_s9 = smov %s3748_s10 }
 0x2c4   : > { %s6941_s10 = smov %s3825_s16  ;;  %s6942_s11 = smov %s3817_s13 }
 0x2c5   :  { %11 = sbr.rel (!%p9_p2) target bundleno = 2 (0x2), region = 136 }

// kernel: patch_merger_forward.4
= control target key start
LH: loop header
LB: loop body
LE: loop exit
PB: predicated region body
PF: predicated region fallthrough
CT: control target
= control target key end

     0   :  { %s6620_s1 = inlined_call_operand.vmem [shape: bf16[256,256], index: 1, kind: input, shape index: {}]   ;;  %s6621_s0 = inlined_call_operand.vmem [shape: bf16[306,256], index: 0, kind: input, shape index: {}]   ;;  %s6622_s2 = inlined_call_operand.vmem [shape: f32[1,256], index: 2, kind: input, shape index: {}]   ;;  %s6623_s3 = inlined_call_operand.vmem [shape: bf16[306,256], index: 3, kind: output, shape index: {}]  }
   0x1   :  { %v3675_v0 = vld [vmem:[%s6620_s1 + $0x70] sm:$0xf]  ;;  %v3798_v1 = vld [vmem:[%s6620_s1 + $0x74] sm:$0xf0]  ;;  %v3797_v5 = vld [vmem:[%s6620_s1 + $0x74] sm:$0xf] }
   0x2   :  { %v3739_v2 = vld [vmem:[%s6620_s1 + $0xf0] sm:$0xf]  ;;  %v3676_v3 = vor.u32 %v3798_v1, %v3675_v0  ;;  %v3814_v4 = vld [vmem:[%s6620_s1 + $0xf4] sm:$0xf0]  ;;  %v3677_v6 = vld [vmem:[%s6620_s1 + $0x78] sm:$0xf0] }
   0x3   :  { %v3740_v7 = vor.u32 %v3814_v4, %v3739_v2  ;;  %v3680_v8 = vor.u32 %v3797_v5, %v3677_v6  ;;  %v3813_v9 = vld [vmem:[%s6620_s1 + $0xf4] sm:$0xf]  ;;  %v3741_v10 = vld [vmem:[%s6620_s1 + $0xf8] sm:$0xf0]  ;;  %v3667_v11 = vld [vmem:[%s6620_s1 + $0x60] sm:$0xf] }
   0x4   :  { %602 = vmatpush.bf16.msra.mxu0 %v3676_v3  ;;  %v3744_v12 = vor.u32 %v3813_v9, %v3741_v10  ;;  %v3796_v13 = vld [vmem:[%s6620_s1 + $0x64] sm:$0xf0]  ;;  %v3731_v14 = vld [vmem:[%s6620_s1 + $0xe0] sm:$0xf]  ;;  %v3795_v18 = vld [vmem:[%s6620_s1 + $0x64] sm:$0xf] }
   0x5   :  { %v3812_v15 = vld [vmem:[%s6620_s1 + $0xe4] sm:$0xf0]  ;;  %710 = vmatpush.bf16.msra.mxu1 %v3740_v7  ;;  %818 = vmatpush.bf16.msra.mxu2 %v3680_v8  ;;  %v3668_v16 = vor.u32 %v3796_v13, %v3667_v11  ;;  %v3669_v19 = vld [vmem:[%s6620_s1 + $0x68] sm:$0xf0]  ;;  %v3811_v20 = vld [vmem:[%s6620_s1 + $0xe4] sm:$0xf] }
   0x6   :  { %v3732_v17 = vor.u32 %v3812_v15, %v3731_v14  ;;  %926 = vmatpush.bf16.msra.mxu3 %v3744_v12  ;;  %v3672_v21 = vor.u32 %v3795_v18, %v3669_v19  ;;  %v3733_v22 = vld [vmem:[%s6620_s1 + $0xe8] sm:$0xf0]  ;;  %v3659_v23 = vld [vmem:[%s6620_s1 + $0x50] sm:$0xf]  ;;  %v3794_v24 = vld [vmem:[%s6620_s1 + $0x54] sm:$0xf0] }
   0x7   :  { %v3736_v25 = vor.u32 %v3811_v20, %v3733_v22  ;;  %v3723_v26 = vld [vmem:[%s6620_s1 + $0xd0] sm:$0xf]  ;;  %v3810_v27 = vld [vmem:[%s6620_s1 + $0xd4] sm:$0xf0]  ;;  %v3793_v28 = vld [vmem:[%s6620_s1 + $0x54] sm:$0xf]  ;;  %v3660_v29 = vor.u32 %v3794_v24, %v3659_v23 }
   0x8   :  { %603 = vmatpush.bf16.msra.mxu0 %v3668_v16  ;;  %v3661_v30 = vld [vmem:[%s6620_s1 + $0x58] sm:$0xf0]  ;;  %v3809_v31 = vld [vmem:[%s6620_s1 + $0xd4] sm:$0xf]  ;;  %v3724_v33 = vor.u32 %v3810_v27, %v3723_v26  ;;  %v3651_v35 = vld [vmem:[%s6620_s1 + $0x40] sm:$0xf] }
   0x9   :  { %v3725_v32 = vld [vmem:[%s6620_s1 + $0xd8] sm:$0xf0]  ;;  %711 = vmatpush.bf16.msra.mxu1 %v3732_v17  ;;  %819 = vmatpush.bf16.msra.mxu2 %v3672_v21  ;;  %v3664_v34 = vor.u32 %v3793_v28, %v3661_v30  ;;  %v3792_v36 = vld [vmem:[%s6620_s1 + $0x44] sm:$0xf0]  ;;  %v3715_v37 = vld [vmem:[%s6620_s1 + $0xc0] sm:$0xf] }
   0xa   :  { %927 = vmatpush.bf16.msra.mxu3 %v3736_v25  ;;  %v3728_v38 = vor.u32 %v3809_v31, %v3725_v32  ;;  %v3808_v39 = vld [vmem:[%s6620_s1 + $0xc4] sm:$0xf0]  ;;  %v3791_v40 = vld [vmem:[%s6620_s1 + $0x44] sm:$0xf]  ;;  %v3653_v41 = vld [vmem:[%s6620_s1 + $0x48] sm:$0xf0]  ;;  %v3652_v44 = vor.u32 %v3792_v36, %v3651_v35 }
   0xb   :  { %v3807_v42 = vld [vmem:[%s6620_s1 + $0xc4] sm:$0xf]  ;;  %v3717_v43 = vld [vmem:[%s6620_s1 + $0xc8] sm:$0xf0]  ;;  %v3716_v45 = vor.u32 %v3808_v39, %v3715_v37  ;;  %v3656_v46 = vor.u32 %v3791_v40, %v3653_v41  ;;  %v3643_v47 = vld [vmem:[%s6620_s1 + $0x30] sm:$0xf] }
   0xc   :  { %604 = vmatpush.bf16.msra.mxu0 %v3660_v29  ;;  %v3790_v48 = vld [vmem:[%s6620_s1 + $0x34] sm:$0xf0]  ;;  %v3707_v49 = vld [vmem:[%s6620_s1 + $0xb0] sm:$0xf]  ;;  %v3720_v50 = vor.u32 %v3807_v42, %v3717_v43  ;;  %v3789_v52 = vld [vmem:[%s6620_s1 + $0x34] sm:$0xf] }
   0xd   :  { %712 = vmatpush.bf16.msra.mxu1 %v3724_v33  ;;  %820 = vmatpush.bf16.msra.mxu2 %v3664_v34  ;;  %v3806_v51 = vld [vmem:[%s6620_s1 + $0xb4] sm:$0xf0]  ;;  %v3645_v53 = vld [vmem:[%s6620_s1 + $0x38] sm:$0xf0]  ;;  %v3805_v54 = vld [vmem:[%s6620_s1 + $0xb4] sm:$0xf]  ;;  %v3644_v56 = vor.u32 %v3790_v48, %v3643_v47 }
   0xe   :  { %928 = vmatpush.bf16.msra.mxu3 %v3728_v38  ;;  %v3709_v55 = vld [vmem:[%s6620_s1 + $0xb8] sm:$0xf0]  ;;  %v3708_v57 = vor.u32 %v3806_v51, %v3707_v49  ;;  %v3648_v58 = vor.u32 %v3789_v52, %v3645_v53  ;;  %v3635_v59 = vld [vmem:[%s6620_s1 + $0x20] sm:$0xf]  ;;  %v3788_v60 = vld [vmem:[%s6620_s1 + $0x24] sm:$0xf0] }
   0xf   :  { %v3699_v61 = vld [vmem:[%s6620_s1 + $0xa0] sm:$0xf]  ;;  %v3712_v62 = vor.u32 %v3805_v54, %v3709_v55  ;;  %v3804_v63 = vld [vmem:[%s6620_s1 + $0xa4] sm:$0xf0]  ;;  %v3787_v0 = vld [vmem:[%s6620_s1 + $0x24] sm:$0xf]  ;;  %v3636_v4 = vor.u32 %v3788_v60, %v3635_v59 }
  0x10   :  { %605 = vmatpush.bf16.msra.mxu0 %v3652_v44  ;;  %v3637_v1 = vld [vmem:[%s6620_s1 + $0x28] sm:$0xf0]  ;;  %v3803_v2 = vld [vmem:[%s6620_s1 + $0xa4] sm:$0xf]  ;;  %v3700_v5 = vor.u32 %v3804_v63, %v3699_v61  ;;  %v3627_v7 = vld [vmem:[%s6620_s1 + $0x10] sm:$0xf] }
  0x11   :  { %713 = vmatpush.bf16.msra.mxu1 %v3716_v45  ;;  %821 = vmatpush.bf16.msra.mxu2 %v3656_v46  ;;  %v3701_v3 = vld [vmem:[%s6620_s1 + $0xa8] sm:$0xf0]  ;;  %v3640_v6 = vor.u32 %v3787_v0, %v3637_v1  ;;  %v3786_v8 = vld [vmem:[%s6620_s1 + $0x14] sm:$0xf0]  ;;  %v3691_v9 = vld [vmem:[%s6620_s1 + $0x90] sm:$0xf] }
  0x12   :  { %929 = vmatpush.bf16.msra.mxu3 %v3720_v50  ;;  %v3704_v10 = vor.u32 %v3803_v2, %v3701_v3  ;;  %v3802_v11 = vld [vmem:[%s6620_s1 + $0x94] sm:$0xf0]  ;;  %v3785_v12 = vld [vmem:[%s6620_s1 + $0x14] sm:$0xf]  ;;  %v3629_v13 = vld [vmem:[%s6620_s1 + $0x18] sm:$0xf0]  ;;  %v3628_v16 = vor.u32 %v3786_v8, %v3627_v7 }
  0x13   :  { %v3801_v14 = vld [vmem:[%s6620_s1 + $0x94] sm:$0xf]  ;;  %v3693_v15 = vld [vmem:[%s6620_s1 + $0x98] sm:$0xf0]  ;;  %v3692_v17 = vor.u32 %v3802_v11, %v3691_v9  ;;  %v3632_v18 = vor.u32 %v3785_v12, %v3629_v13  ;;  %v3619_v19 = vld [vmem:[%s6620_s1] sm:$0xf] }
  0x14   :  { %606 = vmatpush.bf16.msra.mxu0 %v3644_v56  ;;  %v3784_v20 = vld [vmem:[%s6620_s1 + $0x4] sm:$0xf0]  ;;  %v3683_v21 = vld [vmem:[%s6620_s1 + $0x80] sm:$0xf]  ;;  %v3696_v22 = vor.u32 %v3801_v14, %v3693_v15  ;;  %v3783_v24 = vld [vmem:[%s6620_s1 + $0x4] sm:$0xf] }
  0x15   :  { %714 = vmatpush.bf16.msra.mxu1 %v3708_v57  ;;  %822 = vmatpush.bf16.msra.mxu2 %v3648_v58  ;;  %v3800_v23 = vld [vmem:[%s6620_s1 + $0x84] sm:$0xf0]  ;;  %v3621_v25 = vld [vmem:[%s6620_s1 + $0x8] sm:$0xf0]  ;;  %v3799_v26 = vld [vmem:[%s6620_s1 + $0x84] sm:$0xf]  ;;  %v3620_v28 = vor.u32 %v3784_v20, %v3619_v19 }
  0x16   :  { %930 = vmatpush.bf16.msra.mxu3 %v3712_v62  ;;  %v3685_v27 = vld [vmem:[%s6620_s1 + $0x88] sm:$0xf0]  ;;  %v3467_v29 = vld [vmem:[%s6621_s0] sm:$0xf]  ;;  %v3746_v30 = vld [vmem:[%s6621_s0 + $0x4] sm:$0xf0]  ;;  %v3684_v31 = vor.u32 %v3800_v23, %v3683_v21  ;;  %v3624_v32 = vor.u32 %v3783_v24, %v3621_v25 }
  0x17   :  { %v3745_v33 = vld [vmem:[%s6621_s0 + $0x4] sm:$0xf]  ;;  %v3469_v34 = vld [vmem:[%s6621_s0 + $0x8] sm:$0xf0]  ;;  %v3688_v35 = vor.u32 %v3799_v26, %v3685_v27  ;;  %v3468_v36 = vor.u32 %v3746_v30, %v3467_v29  ;;  %v3475_v38 = vld [vmem:[%s6621_s0 + $0x10] sm:$0xf] }
  0x18   :  { %607 = vmatpush.bf16.msra.mxu0 %v3636_v4  ;;  %v3472_v37 = vor.u32 %v3745_v33, %v3469_v34  ;;  %v3748_v39 = vld [vmem:[%s6621_s0 + $0x14] sm:$0xf0]  ;;  %v3747_v40 = vld [vmem:[%s6621_s0 + $0x14] sm:$0xf]  ;;  %v3477_v41 = vld [vmem:[%s6621_s0 + $0x18] sm:$0xf0] }
  0x19   :  { %715 = vmatpush.bf16.msra.mxu1 %v3700_v5  ;;  %823 = vmatpush.bf16.msra.mxu2 %v3640_v6  ;;  %v3476_v42 = vor.u32 %v3748_v39, %v3475_v38  ;;  %v3480_v43 = vor.u32 %v3747_v40, %v3477_v41  ;;  %v3483_v44 = vld [vmem:[%s6621_s0 + $0x20] sm:$0xf]  ;;  %v3750_v45 = vld [vmem:[%s6621_s0 + $0x24] sm:$0xf0]  ;;  %v3749_v46 = vld [vmem:[%s6621_s0 + $0x24] sm:$0xf] }
  0x1a   :  { %931 = vmatpush.bf16.msra.mxu3 %v3704_v10  ;;  %v3485_v47 = vld [vmem:[%s6621_s0 + $0x28] sm:$0xf0]  ;;  %v3484_v48 = vor.u32 %v3750_v45, %v3483_v44  ;;  %v3491_v50 = vld [vmem:[%s6621_s0 + $0x30] sm:$0xf]  ;;  %v3752_v51 = vld [vmem:[%s6621_s0 + $0x34] sm:$0xf0] }
  0x1b   :  { %v3488_v49 = vor.u32 %v3749_v46, %v3485_v47  ;;  %v3751_v52 = vld [vmem:[%s6621_s0 + $0x34] sm:$0xf]  ;;  %v3493_v53 = vld [vmem:[%s6621_s0 + $0x38] sm:$0xf0]  ;;  %v3492_v54 = vor.u32 %v3752_v51, %v3491_v50  ;;  %v3499_v56 = vld [vmem:[%s6621_s0 + $0x40] sm:$0xf] }
  0x1c   :  { %608 = vmatpush.bf16.msra.mxu0 %v3628_v16  ;;  %v3496_v55 = vor.u32 %v3751_v52, %v3493_v53  ;;  %v3754_v57 = vld [vmem:[%s6621_s0 + $0x44] sm:$0xf0]  ;;  %v3753_v58 = vld [vmem:[%s6621_s0 + $0x44] sm:$0xf]  ;;  %v3501_v59 = vld [vmem:[%s6621_s0 + $0x48] sm:$0xf0] }
  0x1d   :  { %716 = vmatpush.bf16.msra.mxu1 %v3692_v17  ;;  %824 = vmatpush.bf16.msra.mxu2 %v3632_v18  ;;  %v3500_v60 = vor.u32 %v3754_v57, %v3499_v56  ;;  %v3504_v61 = vor.u32 %v3753_v58, %v3501_v59  ;;  %v3507_v62 = vld [vmem:[%s6621_s0 + $0x50] sm:$0xf]  ;;  %v3756_v63 = vld [vmem:[%s6621_s0 + $0x54] sm:$0xf0]  ;;  %v3755_v0 = vld [vmem:[%s6621_s0 + $0x54] sm:$0xf] }
  0x1e   :  { %932 = vmatpush.bf16.msra.mxu3 %v3696_v22  ;;  %v3509_v1 = vld [vmem:[%s6621_s0 + $0x58] sm:$0xf0]  ;;  %v3508_v2 = vor.u32 %v3756_v63, %v3507_v62  ;;  %v3515_v4 = vld [vmem:[%s6621_s0 + $0x60] sm:$0xf]  ;;  %v3758_v5 = vld [vmem:[%s6621_s0 + $0x64] sm:$0xf0] }
  0x1f   :  { %v3512_v3 = vor.u32 %v3755_v0, %v3509_v1  ;;  %v3757_v6 = vld [vmem:[%s6621_s0 + $0x64] sm:$0xf]  ;;  %v3517_v7 = vld [vmem:[%s6621_s0 + $0x68] sm:$0xf0]  ;;  %v3516_v8 = vor.u32 %v3758_v5, %v3515_v4  ;;  %v4129_v10 = vmov 0.0  }
  0x20   :  { %609 = vmatpush.bf16.msra.mxu0 %v3620_v28  ;;  %v3520_v9 = vor.u32 %v3757_v6, %v3517_v7  ;;  %94 = vst [vmem:[#allocation2 + $0x98] sm:$0x3] %v4129_v10  ;;  %v3523_v11 = vld [vmem:[%s6621_s0 + $0x70] sm:$0xf]  ;;  %v3760_v12 = vld [vmem:[%s6621_s0 + $0x74] sm:$0xf0] }
  0x21   :  { %717 = vmatpush.bf16.msra.mxu1 %v3684_v31  ;;  %825 = vmatpush.bf16.msra.mxu2 %v3624_v32  ;;  %95 = vst [vmem:[#allocation2 + $0x110] sm:$0x3] %v4129_v10  ;;  %v3759_v13 = vld [vmem:[%s6621_s0 + $0x74] sm:$0xf]  ;;  %v3525_v14 = vld [vmem:[%s6621_s0 + $0x78] sm:$0xf0]  ;;  %v3524_v15 = vor.u32 %v3760_v12, %v3523_v11 }
  0x22   :  { %933 = vmatpush.bf16.msra.mxu3 %v3688_v35  ;;  %v3528_v16 = vor.u32 %v3759_v13, %v3525_v14  ;;  %v3531_v17 = vld [vmem:[%s6621_s0 + $0x80] sm:$0xf]  ;;  %v3762_v18 = vld [vmem:[%s6621_s0 + $0x84] sm:$0xf0]  ;;  %v3761_v19 = vld [vmem:[%s6621_s0 + $0x84] sm:$0xf] }
  0x23   :  { %610 = vmatmul.bf16.vlgmr.msra.gmra.mxu0 %v3468_v36  ;;  %v3533_v20 = vld [vmem:[%s6621_s0 + $0x88] sm:$0xf0]  ;;  %v1271_v21 = vld [vmem:[%s6622_s2] sm:$0x3]  ;;  %v3532_v22 = vor.u32 %v3762_v18, %v3531_v17  ;;  %v3539_v39 = vld [vmem:[%s6621_s0 + $0x90] sm:$0xf] }
  0x24   :  { %718 = vmatmul.bf16.vlgmr.msra.gmra.mxu1 %v3472_v37  ;;  %826 = vmatmul.bf16.vlgmr.msra.gmra.mxu2 %v3468_v36  ;;  %v3536_v24 = vor.u32 %v3761_v19, %v3533_v20  ;;  %v4454_v27 = vperm.slane %v1271_v21, 0  ;;  %v4457_v34 = vperm.slane %v1271_v21, 1  ;;  %v3764_v40 = vld [vmem:[%s6621_s0 + $0x94] sm:$0xf0]  ;;  %v4130_v13 = vmov -1.0  }
  0x25   :  { %934 = vmatmul.bf16.vlgmr.msra.gmra.mxu3 %v3472_v37 }
  0x33   :  { %615 = vmatmul.bf16.gmra.mxu0 %v3476_v42 }
  0x34   :  { %723 = vmatmul.bf16.gmra.mxu1 %v3480_v43  ;;  %831 = vmatmul.bf16.gmra.mxu2 %v3476_v42  ;;  %v3763_v42 = vld [vmem:[%s6621_s0 + $0x94] sm:$0xf] }
  0x35   :  { %939 = vmatmul.bf16.gmra.mxu3 %v3480_v43  ;;  %v3541_v43 = vld [vmem:[%s6621_s0 + $0x98] sm:$0xf0] }
  0x36   :  { %v3544_v51 = vor.u32 %v3763_v42, %v3541_v43 }
  0x43   :  { %620 = vmatmul.bf16.gmra.mxu0 %v3484_v48 }
  0x44   :  { %728 = vmatmul.bf16.gmra.mxu1 %v3488_v49  ;;  %836 = vmatmul.bf16.gmra.mxu2 %v3484_v48  ;;  %v3540_v48 = vor.u32 %v3764_v40, %v3539_v39 }
  0x45   :  { %944 = vmatmul.bf16.gmra.mxu3 %v3488_v49 }
  0x53   :  { %625 = vmatmul.bf16.gmra.mxu0 %v3492_v54 }
  0x54   :  { %733 = vmatmul.bf16.gmra.mxu1 %v3496_v55  ;;  %841 = vmatmul.bf16.gmra.mxu2 %v3492_v54 }
  0x55   :  { %949 = vmatmul.bf16.gmra.mxu3 %v3496_v55 }
  0x63   :  { %630 = vmatmul.bf16.gmra.mxu0 %v3500_v60 }
  0x64   :  { %738 = vmatmul.bf16.gmra.mxu1 %v3504_v61  ;;  %846 = vmatmul.bf16.gmra.mxu2 %v3500_v60 }
  0x65   :  { %954 = vmatmul.bf16.gmra.mxu3 %v3504_v61 }
  0x73   :  { %635 = vmatmul.bf16.gmra.mxu0 %v3508_v2 }
  0x74   :  { %743 = vmatmul.bf16.gmra.mxu1 %v3512_v3  ;;  %851 = vmatmul.bf16.gmra.mxu2 %v3508_v2 }
  0x75   :  { %959 = vmatmul.bf16.gmra.mxu3 %v3512_v3 }
  0x83   :  { %640 = vmatmul.bf16.gmra.mxu0 %v3516_v8 }
  0x84   :  { %748 = vmatmul.bf16.gmra.mxu1 %v3520_v9  ;;  %856 = vmatmul.bf16.gmra.mxu2 %v3516_v8 }
  0x85   :  { %964 = vmatmul.bf16.gmra.mxu3 %v3520_v9 }
  0x93   :  { %645 = vmatmul.bf16.gmra.mxu0 %v3524_v15 }
  0x94   :  { %753 = vmatmul.bf16.gmra.mxu1 %v3528_v16  ;;  %861 = vmatmul.bf16.gmra.mxu2 %v3524_v15 }
  0x95   :  { %969 = vmatmul.bf16.gmra.mxu3 %v3528_v16 }
  0xa0   :  { %v611_v23 = vpop.f32.mrf.mxu0 }
  0xa1   :  { %v719_v25 = vpop.f32.mrf.mxu1 }
  0xa2   :  { %v720_v26 = vadd.f32 %v719_v25, %v611_v23  ;;  %v3547_v25 = vld [vmem:[%s6621_s0 + $0xa0] sm:$0xf] }
  0xa3   :  { %650 = vmatmul.bf16.gmra.mxu0 %v3532_v22 }
  0xa4   :  { %758 = vmatmul.bf16.gmra.mxu1 %v3536_v24  ;;  %866 = vmatmul.bf16.gmra.mxu2 %v3532_v22  ;;  %v1277_v28 = vadd.f32 %v4454_v27, %v720_v26  ;;  %v3766_v26 = vld [vmem:[%s6621_s0 + $0xa4] sm:$0xf0] }
  0xa5   :  { %974 = vmatmul.bf16.gmra.mxu3 %v3536_v24  ;;  %v3548_v40 = vor.u32 %v3766_v26, %v3547_v25 }
  0xa6   :  { %v1433_v30 = vmul.f32 0.70710677, %v1277_v28  ;;  %v4491_v12 = vmul.f32 0.5, %v1277_v28 }
  0xa7   :  { %v827_v29 = vpop.f32.mrf.mxu2 }
  0xa8   :  { %v935_v31 = vpop.f32.mrf.mxu3  ;;  %v613_v32 = vpop.f32.mrf.mxu0  ;;  %v1667_v36 = vand.u32 2147483647, %v1433_v30  ;;  %vm1511_vm0 = vcmp.ge.f32.partialorder %v1433_v30, 0.0 }
  0xa9   :  { %v936_v33 = vadd.f32 %v935_v31, %v827_v29  ;;  %v721_v35 = vpop.f32.mrf.mxu1  ;;  %v4494_v14 = vsel %vm1511_vm0, 1.0, %v4130_v13 }
  0xaa   :  { %v722_v37 = vadd.f32 %v721_v35, %v613_v32  ;;  %v1745_v38 = vmul.f32 0.3275911, %v1667_v36  ;;  %v2681_v52 = vsub.f32 0.0, %v1667_v36 }
  0xab   :  { %v1278_v41 = vadd.f32 %v4457_v34, %v936_v33 }
  0xac   :  { %v1823_v44 = vadd.f32 1.0, %v1745_v38  ;;  %v1279_v45 = vadd.f32 %v4454_v27, %v722_v37  ;;  %v2759_v61 = vmul.f32 %v2681_v52, %v1667_v36 }
  0xad   :  { %v4473_v46 = vmul.f32 0.70710677, %v1278_v41  ;;  %v4496_v15 = vmul.f32 0.5, %v1278_v41 }
  0xae   :  { %3817 = vrcp.f32 %v1823_v44  ;;  %v4475_v49 = vmul.f32 0.70710677, %v1279_v45  ;;  %v2837_v10 = vmul.f32 1.442695, %v2759_v61  ;;  %v4500_v18 = vmul.f32 0.5, %v1279_v45 }
  0xaf   :  { %v829_v47 = vpop.f32.mrf.mxu2  ;;  %v1668_v53 = vand.u32 2147483647, %v4473_v46  ;;  %vm1512_vm1 = vcmp.ge.f32.partialorder %v4473_v46, 0.0 }
  0xb0   :  { %v937_v50 = vpop.f32.mrf.mxu3  ;;  %v616_v55 = vpop.f32.mrf.mxu0  ;;  %v1669_v57 = vand.u32 2147483647, %v4475_v49  ;;  %vm1513_vm2 = vcmp.ge.f32.partialorder %v4475_v49, 0.0 }
  0xb1   :  { %v938_v54 = vadd.f32 %v937_v50, %v829_v47  ;;  %v724_v56 = vpop.f32.mrf.mxu1  ;;  %v1746_v58 = vmul.f32 0.3275911, %v1668_v53  ;;  %v2682_v3 = vsub.f32 0.0, %v1668_v53 }
  0xb2   :  { %v1747_v59 = vmul.f32 0.3275911, %v1669_v57  ;;  %v725_v60 = vadd.f32 %v724_v56, %v616_v55  ;;  %v2683_v5 = vsub.f32 0.0, %v1669_v57  ;;  %v4539_v56 = vsel %vm1513_vm2, 1.0, %v4130_v13 }
  0xb3   :  { %655 = vmatmul.bf16.gmra.mxu0 %v3540_v48  ;;  %v1824_v62 = vadd.f32 1.0, %v1746_v58  ;;  %v4480_v63 = vadd.f32 %v4457_v34, %v938_v54  ;;  %v2760_v22 = vmul.f32 %v2682_v3, %v1668_v53  ;;  %v4535_v54 = vsel %vm1512_vm1, 1.0, %v4130_v13 }
  0xb4   :  { %763 = vmatmul.bf16.gmra.mxu1 %v3544_v51  ;;  %871 = vmatmul.bf16.gmra.mxu2 %v3540_v48  ;;  %v4482_v0 = vpop.eup %3817  ;;  %v1825_v1 = vadd.f32 1.0, %v1747_v59  ;;  %v4489_v7 = vadd.f32 %v4454_v27, %v725_v60  ;;  %v2761_v23 = vmul.f32 %v2683_v5, %v1669_v57 }
  0xb5   :  { %979 = vmatmul.bf16.gmra.mxu3 %v3544_v51  ;;  %v1979_v2 = vmul.f32 1.0614054, %v4482_v0  ;;  %3819 = vrcp.f32 %v1824_v62  ;;  %v4486_v6 = vmul.f32 0.70710677, %v4480_v63  ;;  %v2839_v42 = vmul.f32 1.442695, %v2760_v22 }
  0xb6   :  { %3821 = vrcp.f32 %v1825_v1  ;;  %v4503_v19 = vmul.f32 0.70710677, %v4489_v7  ;;  %v2841_v43 = vmul.f32 1.442695, %v2761_v23  ;;  %v4546_v46 = vmul.f32 0.5, %v4480_v63 }
  0xb7   :  { %v832_v4 = vpop.f32.mrf.mxu2  ;;  %v2057_v9 = vadd.f32 -1.4531521, %v1979_v2  ;;  %v1670_v16 = vand.u32 2147483647, %v4486_v6  ;;  %3823 = vpow2.f32 %v2837_v10  ;;  %vm1514_vm3 = vcmp.ge.f32.partialorder %v4486_v6, 0.0 }
  0xb8   :  { %v940_v8 = vpop.f32.mrf.mxu3  ;;  %v618_v20 = vpop.f32.mrf.mxu0  ;;  %v4515_v30 = vand.u32 2147483647, %v4503_v19  ;;  %vm1515_vm4 = vcmp.ge.f32.partialorder %v4503_v19, 0.0 }
  0xb9   :  { %v941_v11 = vadd.f32 %v940_v8, %v832_v4  ;;  %v2135_v17 = vmul.f32 %v4482_v0, %v2057_v9  ;;  %v726_v21 = vpop.f32.mrf.mxu1  ;;  %v1748_v24 = vmul.f32 0.3275911, %v1670_v16  ;;  %v2684_v50 = vsub.f32 0.0, %v1670_v16 }
  0xba   :  { %v727_v36 = vadd.f32 %v726_v21, %v618_v20  ;;  %v1749_v39 = vmul.f32 0.3275911, %v4515_v30  ;;  %v2685_v63 = vsub.f32 0.0, %v4515_v30 }
  0xbb   :  { %v4511_v28 = vpop.eup %3819  ;;  %v2213_v29 = vadd.f32 1.4214138, %v2135_v17  ;;  %v1826_v33 = vadd.f32 1.0, %v1748_v24  ;;  %v4521_v35 = vadd.f32 %v4457_v34, %v941_v11  ;;  %v2762_v1 = vmul.f32 %v2684_v50, %v1670_v16 }
  0xbc   :  { %v4517_v31 = vpop.eup %3821  ;;  %v1980_v32 = vmul.f32 1.0614054, %v4511_v28  ;;  %v1827_v47 = vadd.f32 1.0, %v1749_v39  ;;  %v4543_v58 = vadd.f32 %v4454_v27, %v727_v36  ;;  %v2763_v36 = vmul.f32 %v2685_v63, %v4515_v30 }
  0xbd   :  { %v2291_v37 = vmul.f32 %v4482_v0, %v2213_v29  ;;  %v1981_v38 = vmul.f32 1.0614054, %v4517_v31  ;;  %3825 = vrcp.f32 %v1826_v33  ;;  %v4529_v51 = vmul.f32 0.70710677, %v4521_v35  ;;  %v3824_v52 = vpop.eup %3823 }
  0xbe   :  { %v2058_v41 = vadd.f32 -1.4531521, %v1980_v32  ;;  %3827 = vrcp.f32 %v1827_v47  ;;  %v4558_v17 = vmul.f32 0.70710677, %v4543_v58  ;;  %v2843_v24 = vmul.f32 1.442695, %v2762_v1 }
  0xbf   :  { %v2369_v44 = vadd.f32 -0.28449672, %v2291_v37  ;;  %v2059_v45 = vadd.f32 -1.4531521, %v1981_v38  ;;  %v1672_v57 = vand.u32 2147483647, %v4529_v51  ;;  %3829 = vpow2.f32 %v2839_v42  ;;  %v834_v3 = vpop.f32.mrf.mxu2 }
  0xc0   :  { %v2136_v48 = vmul.f32 %v4511_v28, %v2058_v41  ;;  %3831 = vpow2.f32 %v2841_v43  ;;  %v942_v4 = vpop.f32.mrf.mxu3  ;;  %v4590_v63 = vsel %vm1515_vm4, 1.0, %v4130_v13  ;;  %vm1516_vm5 = vcmp.ge.f32.partialorder %v4529_v51, 0.0 }
  0xc1   :  { %v2447_v53 = vmul.f32 %v4482_v0, %v2369_v44  ;;  %v2137_v55 = vmul.f32 %v4517_v31, %v2059_v45  ;;  %v1750_v2 = vmul.f32 0.3275911, %v1672_v57  ;;  %v943_v22 = vadd.f32 %v942_v4, %v834_v3  ;;  %v621_v3 = vpop.f32.mrf.mxu0 }
  0xc2   :  { %v2214_v49 = vadd.f32 1.4214138, %v2136_v48  ;;  %v2686_v43 = vsub.f32 0.0, %v1672_v57  ;;  %vm1517_vm6 = vcmp.ge.f32.partialorder %v4558_v17, 0.0 }
  0xc3   :  { %660 = vmatmul.bf16.gmra.mxu0 %v3548_v40  ;;  %v2525_v59 = vadd.f32 0.2548296, %v2447_v53  ;;  %v2215_v60 = vadd.f32 1.4214138, %v2137_v55  ;;  %v4548_v61 = vpop.eup %3825  ;;  %v1828_v11 = vadd.f32 1.0, %v1750_v2 }
  0xc4   :  { %876 = vmatmul.bf16.gmra.mxu2 %v3548_v40  ;;  %v2292_v62 = vmul.f32 %v4511_v28, %v2214_v49  ;;  %v1982_v9 = vmul.f32 1.0614054, %v4548_v61  ;;  %v4560_v16 = vpop.eup %3827  ;;  %v4568_v40 = vand.u32 2147483647, %v4558_v17  ;;  %v2764_v2 = vmul.f32 %v2686_v43, %v1672_v57 }
  0xc5   :  { %v2603_v5 = vmul.f32 %v4482_v0, %v2525_v59  ;;  %v2293_v8 = vmul.f32 %v4517_v31, %v2215_v60  ;;  %v1983_v25 = vmul.f32 1.0614054, %v4560_v16  ;;  %3833 = vrcp.f32 %v1828_v11  ;;  %v3830_v26 = vpop.eup %3829 }
  0xc6   :  { %v2370_v10 = vadd.f32 -0.28449672, %v2292_v62  ;;  %v2060_v0 = vadd.f32 -1.4531521, %v1982_v9  ;;  %v3832_v37 = vpop.eup %3831  ;;  %3835 = vpow2.f32 %v2843_v24  ;;  %v1751_v47 = vmul.f32 0.3275911, %v4568_v40 }
  0xc7   :  { %v2993_v20 = vmul.f32 %v3824_v52, %v2603_v5  ;;  %v2371_v21 = vadd.f32 -0.28449672, %v2293_v8  ;;  %v2061_v39 = vadd.f32 -1.4531521, %v1983_v25  ;;  %v2845_v52 = vmul.f32 1.442695, %v2763_v36  ;;  %v837_v24 = vpop.f32.mrf.mxu2 }
  0xc8   :  { %v2448_v23 = vmul.f32 %v4511_v28, %v2370_v10  ;;  %v2138_v33 = vmul.f32 %v4548_v61, %v2060_v0  ;;  %v1829_v59 = vadd.f32 1.0, %v1751_v47  ;;  %v4579_v60 = vadd.f32 %v4457_v34, %v943_v22  ;;  %v945_v25 = vpop.f32.mrf.mxu3 }
  0xc9   :  { %v3071_v29 = vsub.f32 1.0, %v2993_v20  ;;  %v2449_v32 = vmul.f32 %v4517_v31, %v2371_v21  ;;  %v2139_v45 = vmul.f32 %v4560_v16, %v2061_v39 }
  0xca   :  { %v2526_v38 = vadd.f32 0.2548296, %v2448_v23  ;;  %v2216_v42 = vadd.f32 1.4214138, %v2138_v33  ;;  %3837 = vrcp.f32 %v1829_v59  ;;  %v4594_v6 = vmul.f32 0.70710677, %v4579_v60  ;;  %v623_v59 = vpop.f32.mrf.mxu0 }
  0xcb   :  { %v2527_v41 = vadd.f32 0.2548296, %v2449_v32  ;;  %v3149_v48 = vmul.f32 %v3071_v29, %v4494_v14  ;;  %v4576_v53 = vpop.eup %3833  ;;  %v2217_v49 = vadd.f32 1.4214138, %v2139_v45  ;;  %v729_v14 = vpop.f32.mrf.mxu1  ;;  %3839 = vpow2.f32 %v2845_v52 }
  0xcc   :  { %v2604_v44 = vmul.f32 %v4511_v28, %v2526_v38  ;;  %v2294_v50 = vmul.f32 %v4548_v61, %v2216_v42  ;;  %v1984_v1 = vmul.f32 1.0614054, %v4576_v53  ;;  %v3836_v57 = vpop.eup %3835  ;;  %v2847_v23 = vmul.f32 1.442695, %v2764_v2 }
  0xcd   :  { %v2605_v30 = vmul.f32 %v4517_v31, %v2527_v41  ;;  %v1592_v31 = vsel %vm1514_vm3, 1.0, %v4130_v13  ;;  %v2295_v5 = vmul.f32 %v4560_v16, %v2217_v49  ;;  %v3227_v8 = vadd.f32 1.0, %v3149_v48 }
  0xce   :  { %v2994_v55 = vmul.f32 %v3830_v26, %v2604_v44  ;;  %v2372_v62 = vadd.f32 -0.28449672, %v2294_v50  ;;  %v2062_v10 = vadd.f32 -1.4531521, %v1984_v1  ;;  %v2687_v29 = vsub.f32 0.0, %v4568_v40 }
  0xcf   :  { %v2995_v28 = vmul.f32 %v3832_v37, %v2605_v30  ;;  %v2373_v21 = vadd.f32 -0.28449672, %v2295_v5  ;;  %v4600_v32 = vand.u32 2147483647, %v4594_v6  ;;  %v730_v37 = vadd.f32 %v729_v14, %v621_v3 }
  0xd0   :  { %v3072_v4 = vsub.f32 1.0, %v2994_v55  ;;  %v2450_v9 = vmul.f32 %v4548_v61, %v2372_v62  ;;  %v2140_v22 = vmul.f32 %v4576_v53, %v2062_v10  ;;  %v4604_v38 = vpop.eup %3837  ;;  %3841 = vpow2.f32 %v2847_v23 }
  0xd1   :  { %v3073_v20 = vsub.f32 1.0, %v2995_v28  ;;  %v2451_v19 = vmul.f32 %v4560_v16, %v2373_v21  ;;  %v1752_v43 = vmul.f32 0.3275911, %v4600_v32  ;;  %v2765_v48 = vmul.f32 %v2687_v29, %v4568_v40  ;;  %v3840_v50 = vpop.eup %3839 }
  0xd2   :  { %v3150_v11 = vmul.f32 %v3072_v4, %v4535_v54  ;;  %v2528_v0 = vadd.f32 0.2548296, %v2450_v9  ;;  %v3305_v54 = vmul.f32 %v3227_v8, %v4491_v12  ;;  %v2218_v36 = vadd.f32 1.4214138, %v2140_v22 }
  0xd3   :  { %v3151_v41 = vmul.f32 %v3073_v20, %v4539_v56  ;;  %v2529_v42 = vadd.f32 0.2548296, %v2451_v19  ;;  %v1985_v12 = vmul.f32 1.0614054, %v4604_v38  ;;  %v1830_v30 = vadd.f32 1.0, %v1752_v43  ;;  %v731_v28 = vpop.f32.mrf.mxu1 }
  0xd4   :  { %v3228_v26 = vadd.f32 1.0, %v3150_v11  ;;  %v2606_v33 = vmul.f32 %v4548_v61, %v2528_v0  ;;  %v2296_v45 = vmul.f32 %v4576_v53, %v2218_v36  ;;  %v3765_v61 = vld [vmem:[%s6621_s0 + $0xa4] sm:$0xf]  ;;  %v4626_v14 = vadd.f32 %v4454_v27, %v730_v37  ;;  %v947_v0 = vpop.f32.mrf.mxu3 }
  0xd5   :  { %v2607_v47 = vmul.f32 %v4560_v16, %v2529_v42  ;;  %v2063_v49 = vadd.f32 -1.4531521, %v1985_v12  ;;  %v3229_v62 = vadd.f32 1.0, %v3151_v41  ;;  %3843 = vrcp.f32 %v1830_v30 }
  0xd6   :  { %v3306_v39 = vmul.f32 %v3228_v26, %v4496_v15  ;;  %v2996_v44 = vmul.f32 %v3836_v57, %v2606_v33  ;;  %v3549_v15 = vld [vmem:[%s6621_s0 + $0xa8] sm:$0xf0]  ;;  %v2374_v55 = vadd.f32 -0.28449672, %v2296_v45  ;;  %v2849_v5 = vmul.f32 1.442695, %v2765_v48  ;;  %v3842_v10 = vpop.eup %3841 }
  0xd7   :  { %v2997_v1 = vmul.f32 %v3840_v50, %v2607_v47  ;;  %v3552_v2 = vor.u32 %v3765_v61, %v3549_v15  ;;  %v2141_v40 = vmul.f32 %v4604_v38, %v2063_v49  ;;  %v946_v8 = vadd.f32 %v945_v25, %v837_v24 }
  0xd8   :  { %v3383_v56 = vpack.c.bf16 %v3306_v39, %v3305_v54  ;;  %v3074_v52 = vsub.f32 1.0, %v2996_v44  ;;  %v2452_v16 = vmul.f32 %v4576_v53, %v2374_v55  ;;  %v732_v9 = vadd.f32 %v731_v28, %v623_v59 }
  0xd9   :  { %v3075_v4 = vsub.f32 1.0, %v2997_v1  ;;  %768 = vmatmul.bf16.gmra.mxu1 %v3552_v2  ;;  %984 = vmatmul.bf16.gmra.mxu3 %v3552_v2  ;;  %v2219_v20 = vadd.f32 1.4214138, %v2141_v40  ;;  %v2688_v21 = vsub.f32 0.0, %v4600_v32  ;;  %v3307_v22 = vmul.f32 %v3229_v62, %v4500_v18  ;;  %v626_v1 = vpop.f32.mrf.mxu0 }
  0xda   :  { %3422 = vst [vmem:[%s6623_s3] sm:$0xff] %v3383_v56  ;;  %v3152_v3 = vmul.f32 %v3074_v52, %v1592_v31  ;;  %v2530_v11 = vadd.f32 0.2548296, %v2452_v16  ;;  %v839_v31 = vpop.f32.mrf.mxu2  ;;  %v4631_v23 = vmul.f32 0.70710677, %v4626_v14  ;;  %v1359_v54 = vmul.f32 0.5, %v4489_v7 }
  0xdb   :  { %v3153_v19 = vmul.f32 %v3075_v4, %v4590_v63  ;;  %v2297_v25 = vmul.f32 %v4604_v38, %v2219_v20  ;;  %v4637_v29 = vpop.eup %3843  ;;  %v4642_v36 = vadd.f32 %v4457_v34, %v946_v8  ;;  %v948_v18 = vadd.f32 %v947_v0, %v839_v31  ;;  %v734_v2 = vpop.f32.mrf.mxu1 }
  0xdc   :  { %v3230_v57 = vadd.f32 1.0, %v3152_v3  ;;  %v2608_v24 = vmul.f32 %v4576_v53, %v2530_v11  ;;  %v1675_v33 = vand.u32 2147483647, %v4631_v23  ;;  %v1594_v53 = vsel %vm1516_vm5, 1.0, %v4130_v13 }
  0xdd   :  { %v2375_v41 = vadd.f32 -0.28449672, %v2297_v25  ;;  %3845 = vpow2.f32 %v2849_v5  ;;  %v2766_v63 = vmul.f32 %v2688_v21, %v4600_v32  ;;  %v3231_v7 = vadd.f32 1.0, %v3153_v19 }
  0xde   :  { %v3308_v26 = vmul.f32 %v3230_v57, %v4546_v46  ;;  %v2998_v39 = vmul.f32 %v3842_v10, %v2608_v24  ;;  %v1986_v46 = vmul.f32 1.0614054, %v4637_v29  ;;  %v1753_v42 = vmul.f32 0.3275911, %v1675_v33 }
  0xdf   :  { %v2453_v44 = vmul.f32 %v4604_v38, %v2375_v41  ;;  %v2689_v61 = vsub.f32 0.0, %v1675_v33  ;;  %v4654_v15 = vmul.f32 0.70710677, %v4642_v36  ;;  %v4657_v51 = vadd.f32 %v4454_v27, %v732_v9 }
  0xe0   :  { %v3384_v37 = vpack.c.bf16 %v3308_v26, %v3307_v22  ;;  %v3076_v43 = vsub.f32 1.0, %v2998_v39  ;;  %v2064_v45 = vadd.f32 -1.4531521, %v1986_v46  ;;  %v1831_v12 = vadd.f32 1.0, %v1753_v42  ;;  %v3555_v46 = vld [vmem:[%s6621_s0 + $0xb0] sm:$0xf] }
  0xe1   :  { %v2531_v32 = vadd.f32 0.2548296, %v2453_v44  ;;  %v1360_v48 = vmul.f32 0.5, %v4521_v35  ;;  %v4663_v30 = vand.u32 2147483647, %v4654_v15  ;;  %v3309_v28 = vmul.f32 %v3231_v7, %v1359_v54 }
  0xe2   :  { %3423 = vst [vmem:[%s6623_s3 + $0x8] sm:$0xff] %v3384_v37  ;;  %v3154_v56 = vmul.f32 %v3076_v43, %v1594_v53  ;;  %v2142_v47 = vmul.f32 %v4637_v29, %v2064_v45  ;;  %3847 = vrcp.f32 %v1831_v12  ;;  %v2851_v49 = vmul.f32 1.442695, %v2766_v63  ;;  %v3768_v53 = vld [vmem:[%s6621_s0 + $0xb4] sm:$0xf0] }
  0xe3   :  { %v2609_v52 = vmul.f32 %v4604_v38, %v2531_v32  ;;  %v3846_v59 = vpop.eup %3845  ;;  %v4667_v62 = vmul.f32 0.5, %v4543_v58  ;;  %vm1518_vm7 = vcmp.ge.f32.partialorder %v4594_v6, 0.0  ;;  %v1754_v35 = vmul.f32 0.3275911, %v4663_v30 }
  0xe4   :  { %v3232_v50 = vadd.f32 1.0, %v3154_v56  ;;  %v2220_v55 = vadd.f32 1.4214138, %v2142_v47  ;;  %v2767_v40 = vmul.f32 %v2689_v61, %v1675_v33  ;;  %v4673_v4 = vmul.f32 0.70710677, %v4657_v51  ;;  %v950_v56 = vpop.f32.mrf.mxu3 }
  0xe5   :  { %v1595_v38 = vsel %vm1517_vm6, 1.0, %v4130_v13  ;;  %v2999_v5 = vmul.f32 %v3846_v59, %v2609_v52  ;;  %v1832_v58 = vadd.f32 1.0, %v1754_v35  ;;  %v4679_v8 = vadd.f32 %v4457_v34, %v948_v18  ;;  %v3557_v61 = vld [vmem:[%s6621_s0 + $0xb8] sm:$0xf0]  ;;  %v628_v59 = vpop.f32.mrf.mxu0 }
  0xe6   :  { %v3310_v3 = vmul.f32 %v3232_v50, %v1360_v48  ;;  %v2298_v16 = vmul.f32 %v4637_v29, %v2220_v55  ;;  %3849 = vpow2.f32 %v2851_v49  ;;  %v735_v57 = vadd.f32 %v734_v2, %v626_v1 }
  0xe7   :  { %v4684_v20 = vmul.f32 0.5, %v4579_v60  ;;  %v1596_v21 = vsel %vm1518_vm7, 1.0, %v4130_v13  ;;  %3851 = vrcp.f32 %v1832_v58  ;;  %v1677_v17 = vand.u32 2147483647, %v4673_v4 }
  0xe8   :  { %v3385_v9 = vpack.c.bf16 %v3310_v3, %v3309_v28  ;;  %v2376_v10 = vadd.f32 -0.28449672, %v2298_v16  ;;  %v4681_v11 = vpop.eup %3847  ;;  %vm1519_vm8 = vcmp.ge.f32.partialorder %v4631_v23, 0.0  ;;  %v2853_v22 = vmul.f32 1.442695, %v2767_v40  ;;  %v736_v28 = vpop.f32.mrf.mxu1 }
  0xe9   :  { %v1987_v0 = vmul.f32 1.0614054, %v4681_v11  ;;  %v3077_v60 = vsub.f32 1.0, %v2999_v5  ;;  %v4697_v26 = vmul.f32 0.5, %v4626_v14  ;;  %v1755_v6 = vmul.f32 0.3275911, %v1677_v17 }
  0xea   :  { %3424 = vst [vmem:[%s6623_s3 + $0x10] sm:$0xff] %v3385_v9  ;;  %v2454_v31 = vmul.f32 %v4637_v29, %v2376_v10  ;;  %v4700_v19 = vmul.f32 0.70710677, %v4679_v8  ;;  %vm1520_vm9 = vcmp.ge.f32.partialorder %v4654_v15, 0.0  ;;  %v4704_v54 = vsel %vm1519_vm8, 1.0, %v4130_v13  ;;  %v842_v15 = vpop.f32.mrf.mxu2 }
  0xeb   :  { %v2065_v25 = vadd.f32 -1.4531521, %v1987_v0  ;;  %v2690_v23 = vsub.f32 0.0, %v4663_v30  ;;  %v1833_v33 = vadd.f32 1.0, %v1755_v6  ;;  %3853 = vpow2.f32 %v2853_v22 }
  0xec   :  { %v2532_v24 = vadd.f32 0.2548296, %v2454_v31  ;;  %v4708_v18 = vand.u32 2147483647, %v4700_v19  ;;  %v3850_v37 = vpop.eup %3849  ;;  %v4713_v41 = vmul.f32 0.5, %v4642_v36  ;;  %v3155_v42 = vmul.f32 %v3077_v60, %v1595_v38 }
  0xed   :  { %v2143_v39 = vmul.f32 %v4681_v11, %v2065_v25  ;;  %v4721_v63 = vpop.eup %3851  ;;  %v4724_v7 = vsel %vm1520_vm9, 1.0, %v4130_v13  ;;  %3855 = vrcp.f32 %v1833_v33  ;;  %v3767_v36 = vld [vmem:[%s6621_s0 + $0xb4] sm:$0xf]  ;;  %v4732_v12 = vadd.f32 %v4454_v27, %v735_v57 }
  0xee   :  { %v2610_v14 = vmul.f32 %v4637_v29, %v2532_v24  ;;  %v1756_v29 = vmul.f32 0.3275911, %v4708_v18  ;;  %v1988_v45 = vmul.f32 1.0614054, %v4721_v63  ;;  %v2768_v32 = vmul.f32 %v2690_v23, %v4663_v30 }
  0xef   :  { %v2221_v44 = vadd.f32 1.4214138, %v2143_v39  ;;  %v2691_v47 = vsub.f32 0.0, %v1677_v17  ;;  %v3556_v50 = vor.u32 %v3768_v53, %v3555_v46  ;;  %vm1521_vm10 = vcmp.ge.f32.partialorder %v4673_v4, 0.0 }
  0xf0   :  { %v3000_v43 = vmul.f32 %v3850_v37, %v2610_v14  ;;  %v1834_v48 = vadd.f32 1.0, %v1756_v29  ;;  %v2066_v49 = vadd.f32 -1.4531521, %v1988_v45  ;;  %v3233_v35 = vadd.f32 1.0, %v3155_v42 }
  0xf1   :  { %v2299_v55 = vmul.f32 %v4681_v11, %v2221_v44  ;;  %v4741_v1 = vmul.f32 0.70710677, %v4732_v12  ;;  %665 = vmatmul.bf16.gmra.mxu0 %v3556_v50  ;;  %v3560_v2 = vor.u32 %v3767_v36, %v3557_v61  ;;  %881 = vmatmul.bf16.gmra.mxu2 %v3556_v50  ;;  %v3854_v30 = vpop.eup %3853  ;;  %v951_v38 = vadd.f32 %v950_v56, %v842_v15  ;;  %v952_v36 = vpop.f32.mrf.mxu3 }
  0xf2   :  { %v3078_v52 = vsub.f32 1.0, %v3000_v43  ;;  %3857 = vrcp.f32 %v1834_v48  ;;  %v2144_v40 = vmul.f32 %v4721_v63, %v2066_v49  ;;  %v2855_v58 = vmul.f32 1.442695, %v2768_v32  ;;  %v844_v29 = vpop.f32.mrf.mxu2 }
  0xf3   :  { %v2377_v16 = vadd.f32 -0.28449672, %v2299_v55  ;;  %v4744_v5 = vpop.eup %3855  ;;  %v2769_v9 = vmul.f32 %v2691_v47, %v1677_v17  ;;  %v4747_v10 = vand.u32 2147483647, %v4741_v1  ;;  %773 = vmatmul.bf16.gmra.mxu1 %v3560_v2  ;;  %989 = vmatmul.bf16.gmra.mxu3 %v3560_v2  ;;  %v737_v57 = vadd.f32 %v736_v28, %v628_v59 }
  0xf4   :  { %v3156_v3 = vmul.f32 %v3078_v52, %v1596_v21  ;;  %v2222_v22 = vadd.f32 1.4214138, %v2144_v40  ;;  %v1989_v21 = vmul.f32 1.0614054, %v4744_v5  ;;  %v3311_v60 = vmul.f32 %v3233_v35, %v4667_v62 }
  0xf5   :  { %v2455_v0 = vmul.f32 %v4681_v11, %v2377_v16  ;;  %v2692_v6 = vsub.f32 0.0, %v4708_v18  ;;  %v1757_v24 = vmul.f32 0.3275911, %v4747_v10  ;;  %3859 = vpow2.f32 %v2855_v58 }
  0xf6   :  { %v3234_v31 = vadd.f32 1.0, %v3156_v3  ;;  %v2300_v23 = vmul.f32 %v4721_v63, %v2222_v22  ;;  %v2067_v33 = vadd.f32 -1.4531521, %v1989_v21  ;;  %v4759_v39 = vadd.f32 %v4457_v34, %v951_v38 }
  0xf7   :  { %v2533_v25 = vadd.f32 0.2548296, %v2455_v0  ;;  %v1835_v14 = vadd.f32 1.0, %v1757_v24  ;;  %v2770_v44 = vmul.f32 %v2692_v6, %v4708_v18  ;;  %v4773_v56 = vmul.f32 0.5, %v4657_v51 }
  0xf8   :  { %v3312_v17 = vmul.f32 %v3234_v31, %v4684_v20  ;;  %v4756_v37 = vpop.eup %3857  ;;  %v2378_v53 = vadd.f32 -0.28449672, %v2300_v23  ;;  %v2145_v42 = vmul.f32 %v4744_v5, %v2067_v33  ;;  %v2857_v20 = vmul.f32 1.442695, %v2769_v9 }
  0xf9   :  { %v2611_v62 = vmul.f32 %v4681_v11, %v2533_v25  ;;  %v1990_v43 = vmul.f32 1.0614054, %v4756_v37  ;;  %3861 = vrcp.f32 %v1835_v14  ;;  %v4770_v11 = vmul.f32 0.70710677, %v4759_v39 }
  0xfa   :  { %v3386_v46 = vpack.c.bf16 %v3312_v17, %v3311_v60  ;;  %v2456_v61 = vmul.f32 %v4721_v63, %v2378_v53  ;;  %v2223_v15 = vadd.f32 1.4214138, %v2145_v42  ;;  %v4778_v32 = vsel %vm1521_vm10, 1.0, %v4130_v13 }
  0xfb   :  { %v3001_v45 = vmul.f32 %v3854_v30, %v2611_v62  ;;  %v2068_v18 = vadd.f32 -1.4531521, %v1990_v43  ;;  %v953_v47 = vadd.f32 %v952_v36, %v844_v29  ;;  %v4782_v55 = vadd.f32 %v4454_v27, %v737_v57  ;;  %v3860_v49 = vpop.eup %3859  ;;  %v631_v29 = vpop.f32.mrf.mxu0 }
  0xfc   :  { %3425 = vst [vmem:[%s6623_s3 + $0x18] sm:$0xff] %v3386_v46  ;;  %v2534_v50 = vadd.f32 0.2548296, %v2456_v61  ;;  %v2301_v52 = vmul.f32 %v4744_v5, %v2223_v15  ;;  %3863 = vpow2.f32 %v2857_v20  ;;  %vm1522_vm11 = vcmp.ge.f32.partialorder %v4700_v19, 0.0 }
  0xfd   :  { %v3079_v48 = vsub.f32 1.0, %v3001_v45  ;;  %v2146_v51 = vmul.f32 %v4756_v37, %v2068_v18  ;;  %v1680_v59 = vand.u32 2147483647, %v4770_v11  ;;  %v2859_v35 = vmul.f32 1.442695, %v2770_v44 }
  0xfe   :  { %v2612_v4 = vmul.f32 %v4721_v63, %v2534_v50  ;;  %v2379_v28 = vadd.f32 -0.28449672, %v2301_v52  ;;  %v2693_v2 = vsub.f32 0.0, %v4747_v10  ;;  %v4795_v57 = vmul.f32 0.70710677, %v4782_v55 }
  0xff   :  { %v4789_v30 = vpop.eup %3861  ;;  %v3157_v3 = vmul.f32 %v3079_v48, %v4704_v54  ;;  %v2224_v16 = vadd.f32 1.4214138, %v2146_v51  ;;  %v1758_v40 = vmul.f32 0.3275911, %v1680_v59  ;;  %v4798_v63 = vmul.f32 0.5, %v4679_v8 }
 0x100   :  { %v3002_v38 = vmul.f32 %v3860_v49, %v2612_v4  ;;  %v2457_v58 = vmul.f32 %v4744_v5, %v2379_v28  ;;  %v1991_v9 = vmul.f32 1.0614054, %v4789_v30  ;;  %v4803_v31 = vsel %vm1522_vm11, 1.0, %v4130_v13 }
 0x101   :  { %v2302_v54 = vmul.f32 %v4756_v37, %v2224_v16  ;;  %v1836_v0 = vadd.f32 1.0, %v1758_v40  ;;  %3865 = vpow2.f32 %v2859_v35  ;;  %v3235_v24 = vadd.f32 1.0, %v3157_v3  ;;  %v3563_v35 = vld [vmem:[%s6621_s0 + $0xc0] sm:$0xf] }
 0x102   :  { %v3080_v22 = vsub.f32 1.0, %v3002_v38  ;;  %v2535_v21 = vadd.f32 0.2548296, %v2457_v58  ;;  %v2069_v60 = vadd.f32 -1.4531521, %v1991_v9  ;;  %v3864_v6 = vpop.eup %3863  ;;  %v2771_v25 = vmul.f32 %v2693_v2, %v4747_v10 }
 0x103   :  { %v2380_v17 = vadd.f32 -0.28449672, %v2302_v54  ;;  %3867 = vrcp.f32 %v1836_v0  ;;  %v4811_v33 = vand.u32 2147483647, %v4795_v57  ;;  %vm1523_vm12 = vcmp.ge.f32.partialorder %v4741_v1, 0.0 }
 0x104   :  { %v3158_v8 = vmul.f32 %v3080_v22, %v4724_v7  ;;  %v2613_v23 = vmul.f32 %v4744_v5, %v2535_v21  ;;  %v2147_v19 = vmul.f32 %v4789_v30, %v2069_v60  ;;  %v2694_v46 = vsub.f32 0.0, %v1680_v59  ;;  %v739_v5 = vpop.f32.mrf.mxu1  ;;  %v3565_v58 = vld [vmem:[%s6621_s0 + $0xc8] sm:$0xf0]  ;;  %v847_v21 = vpop.f32.mrf.mxu2 }
 0x105   :  { %v2458_v14 = vmul.f32 %v4756_v37, %v2380_v17  ;;  %v4816_v62 = vadd.f32 %v4457_v34, %v953_v47  ;;  %v1759_v7 = vmul.f32 0.3275911, %v4811_v33  ;;  %v3313_v36 = vmul.f32 %v3235_v24, %v4697_v26  ;;  %v955_v60 = vpop.f32.mrf.mxu3 }
 0x106   :  { %v3236_v53 = vadd.f32 1.0, %v3158_v8  ;;  %v3003_v10 = vmul.f32 %v3864_v6, %v2613_v23  ;;  %v2225_v42 = vadd.f32 1.4214138, %v2147_v19  ;;  %v2861_v43 = vmul.f32 1.442695, %v2771_v25 }
 0x107   :  { %v2536_v20 = vadd.f32 0.2548296, %v2458_v14  ;;  %v4821_v44 = vmul.f32 0.70710677, %v4816_v62  ;;  %v3866_v45 = vpop.eup %3865  ;;  %v1837_v47 = vadd.f32 1.0, %v1759_v7  ;;  %v4829_v52 = vmul.f32 0.5, %v4732_v12 }
 0x108   :  { %v3314_v61 = vmul.f32 %v3236_v53, %v4713_v41  ;;  %v3081_v15 = vsub.f32 1.0, %v3003_v10  ;;  %v2303_v18 = vmul.f32 %v4789_v30, %v2225_v42  ;;  %v740_v49 = vadd.f32 %v739_v5, %v631_v29 }
 0x109   :  { %v4825_v48 = vpop.eup %3867  ;;  %v2614_v50 = vmul.f32 %v4756_v37, %v2536_v20  ;;  %v4832_v26 = vand.u32 2147483647, %v4821_v44  ;;  %v2772_v41 = vmul.f32 %v2694_v46, %v1680_v59  ;;  %v4842_v12 = vsel %vm1523_vm12, 1.0, %v4130_v13  ;;  %v3770_v37 = vld [vmem:[%s6621_s0 + $0xc4] sm:$0xf0] }
 0x10a   :  { %v3387_v51 = vpack.c.bf16 %v3314_v61, %v3313_v36  ;;  %v2381_v4 = vadd.f32 -0.28449672, %v2303_v18  ;;  %v1992_v28 = vmul.f32 1.0614054, %v4825_v48  ;;  %v3159_v2 = vmul.f32 %v3081_v15, %v4778_v32  ;;  %v3769_v59 = vld [vmem:[%s6621_s0 + $0xc4] sm:$0xf] }
 0x10b   :  { %v3004_v3 = vmul.f32 %v3866_v45, %v2614_v50  ;;  %3869 = vrcp.f32 %v1837_v47  ;;  %v1760_v1 = vmul.f32 0.3275911, %v4832_v26  ;;  %v4856_v38 = vmul.f32 0.5, %v4759_v39 }
 0x10c   :  { %3426 = vst [vmem:[%s6623_s3 + $0x20] sm:$0xff] %v3387_v51  ;;  %v2459_v32 = vmul.f32 %v4789_v30, %v2381_v4  ;;  %3871 = vpow2.f32 %v2861_v43  ;;  %v2070_v16 = vadd.f32 -1.4531521, %v1992_v28  ;;  %vm1524_vm13 = vcmp.ge.f32.partialorder %v4770_v11, 0.0  ;;  %v633_v43 = vpop.f32.mrf.mxu0  ;;  %v741_v45 = vpop.f32.mrf.mxu1 }
 0x10d   :  { %v3082_v40 = vsub.f32 1.0, %v3004_v3  ;;  %v2863_v0 = vmul.f32 1.442695, %v2772_v41  ;;  %v1838_v22 = vadd.f32 1.0, %v1760_v1  ;;  %v3237_v6 = vadd.f32 1.0, %v3159_v2 }
 0x10e   :  { %v2537_v9 = vadd.f32 0.2548296, %v2459_v32  ;;  %v2148_v54 = vmul.f32 %v4825_v48, %v2070_v16  ;;  %v4865_v17 = vadd.f32 %v4454_v27, %v740_v49  ;;  %v3564_v39 = vor.u32 %v3770_v37, %v3563_v35  ;;  %v849_v37 = vpop.f32.mrf.mxu2 }
 0x10f   :  { %v3160_v24 = vmul.f32 %v3082_v40, %v4803_v31  ;;  %3873 = vrcp.f32 %v1838_v22  ;;  %v3568_v23 = vor.u32 %v3769_v59, %v3565_v58  ;;  %v4873_v46 = vsel %vm1524_vm13, 1.0, %v4130_v13 }
 0x110   :  { %v2615_v25 = vmul.f32 %v4789_v30, %v2537_v9  ;;  %v2226_v8 = vadd.f32 1.4214138, %v2148_v54  ;;  %v2695_v53 = vsub.f32 0.0, %v4811_v33  ;;  %v4877_v31 = vmul.f32 0.70710677, %v4865_v17  ;;  %670 = vmatmul.bf16.gmra.mxu0 %v3564_v39  ;;  %886 = vmatmul.bf16.gmra.mxu2 %v3564_v39 }
 0x111   :  { %v4868_v19 = vpop.eup %3869  ;;  %v3238_v14 = vadd.f32 1.0, %v3160_v24  ;;  %v4881_v42 = vmul.f32 0.5, %v4782_v55  ;;  %778 = vmatmul.bf16.gmra.mxu1 %v3568_v23  ;;  %994 = vmatmul.bf16.gmra.mxu3 %v3568_v23  ;;  %v956_v11 = vadd.f32 %v955_v60, %v847_v21  ;;  %v3315_v29 = vmul.f32 %v3237_v6, %v4773_v56 }
 0x112   :  { %v3872_v10 = vpop.eup %3871  ;;  %v2304_v30 = vmul.f32 %v4825_v48, %v2226_v8  ;;  %v1993_v7 = vmul.f32 1.0614054, %v4868_v19  ;;  %v1683_v20 = vand.u32 2147483647, %v4877_v31  ;;  %3875 = vpow2.f32 %v2863_v0 }
 0x113   :  { %v3316_v5 = vmul.f32 %v3238_v14, %v4798_v63  ;;  %v3005_v36 = vmul.f32 %v3872_v10, %v2615_v25  ;;  %v2696_v55 = vsub.f32 0.0, %v4832_v26  ;;  %v2773_v47 = vmul.f32 %v2695_v53, %v4811_v33 }
 0x114   :  { %v2382_v61 = vadd.f32 -0.28449672, %v2304_v30  ;;  %v2071_v15 = vadd.f32 -1.4531521, %v1993_v7  ;;  %v1761_v50 = vmul.f32 0.3275911, %v1683_v20  ;;  %v742_v51 = vadd.f32 %v741_v45, %v633_v43 }
 0x115   :  { %v3388_v18 = vpack.c.bf16 %v3316_v5, %v3315_v29  ;;  %v4889_v49 = vpop.eup %3873  ;;  %vm1525_vm14 = vcmp.ge.f32.partialorder %v4795_v57, 0.0  ;;  %v3083_v4 = vsub.f32 1.0, %v3005_v36  ;;  %v4899_v33 = vadd.f32 %v4457_v34, %v956_v11  ;;  %v957_v57 = vpop.f32.mrf.mxu3 }
 0x116   :  { %v2460_v56 = vmul.f32 %v4825_v48, %v2382_v61  ;;  %v2149_v63 = vmul.f32 %v4868_v19, %v2071_v15  ;;  %v1994_v28 = vmul.f32 1.0614054, %v4889_v49  ;;  %v1839_v41 = vadd.f32 1.0, %v1761_v50 }
 0x117   :  { %3427 = vst [vmem:[%s6623_s3 + $0x28] sm:$0xff] %v3388_v18  ;;  %v2774_v3 = vmul.f32 %v2696_v55, %v4832_v26  ;;  %v4903_v59 = vsel %vm1525_vm14, 1.0, %v4130_v13  ;;  %v2865_v32 = vmul.f32 1.442695, %v2773_v47  ;;  %v4908_v9 = vmul.f32 0.5, %v4816_v62  ;;  %v636_v18 = vpop.f32.mrf.mxu0  ;;  %v744_v47 = vpop.f32.mrf.mxu1 }
 0x118   :  { %v2538_v35 = vadd.f32 0.2548296, %v2460_v56  ;;  %v2227_v2 = vadd.f32 1.4214138, %v2149_v63  ;;  %v2072_v16 = vadd.f32 -1.4531521, %v1994_v28  ;;  %3877 = vrcp.f32 %v1839_v41  ;;  %v3876_v1 = vpop.eup %3875 }
 0x119   :  { %v4911_v54 = vmul.f32 0.70710677, %v4899_v33  ;;  %v3161_v26 = vmul.f32 %v3083_v4, %v4842_v12  ;;  %v4916_v22 = vadd.f32 %v4454_v27, %v742_v51  ;;  %v958_v21 = vadd.f32 %v957_v57, %v849_v37 }
 0x11a   :  { %v2616_v40 = vmul.f32 %v4825_v48, %v2538_v35  ;;  %v2305_v58 = vmul.f32 %v4868_v19, %v2227_v2  ;;  %v2150_v0 = vmul.f32 %v4889_v49, %v2072_v16  ;;  %v2867_v24 = vmul.f32 1.442695, %v2774_v3 }
 0x11b   :  { %v4919_v48 = vand.u32 2147483647, %v4911_v54  ;;  %3879 = vpow2.f32 %v2865_v32  ;;  %v2697_v39 = vsub.f32 0.0, %v1683_v20  ;;  %v4922_v25 = vmul.f32 0.70710677, %v4916_v22 }
 0x11c   :  { %v3006_v60 = vmul.f32 %v3876_v1, %v2616_v40  ;;  %v2383_v6 = vadd.f32 -0.28449672, %v2305_v58  ;;  %v2228_v62 = vadd.f32 1.4214138, %v2150_v0  ;;  %vm1526_vm15 = vcmp.ge.f32.partialorder %v4821_v44, 0.0 }
 0x11d   :  { %v1762_v23 = vmul.f32 0.3275911, %v4919_v48  ;;  %v3239_v53 = vadd.f32 1.0, %v3161_v26  ;;  %v4931_v30 = vand.u32 2147483647, %v4922_v25  ;;  %3881 = vpow2.f32 %v2867_v24 }
 0x11e   :  { %v3084_v8 = vsub.f32 1.0, %v3006_v60  ;;  %v2461_v12 = vmul.f32 %v4868_v19, %v2383_v6  ;;  %v4927_v14 = vpop.eup %3877  ;;  %v2306_v10 = vmul.f32 %v4889_v49, %v2228_v62  ;;  %v2775_v43 = vmul.f32 %v2697_v39, %v1683_v20  ;;  %v3573_v0 = vld [vmem:[%s6621_s0 + $0xd8] sm:$0xf0] }
 0x11f   :  { %v1995_v29 = vmul.f32 1.0614054, %v4927_v14  ;;  %v1840_v5 = vadd.f32 1.0, %v1762_v23  ;;  %v1763_v45 = vmul.f32 0.3275911, %v4931_v30  ;;  %v3317_v56 = vmul.f32 %v3239_v53, %v4829_v52 }
 0x120   :  { %v3162_v7 = vmul.f32 %v3084_v8, %v4873_v46  ;;  %v2539_v11 = vadd.f32 0.2548296, %v2461_v12  ;;  %v2384_v36 = vadd.f32 -0.28449672, %v2306_v10  ;;  %vm1527_vm0 = vcmp.ge.f32.partialorder %v4877_v31, 0.0  ;;  %v852_v10 = vpop.f32.mrf.mxu2 }
 0x121   :  { %v2073_v55 = vadd.f32 -1.4531521, %v1995_v29  ;;  %3883 = vrcp.f32 %v1840_v5  ;;  %v3880_v50 = vpop.eup %3879  ;;  %v1841_v63 = vadd.f32 1.0, %v1763_v45  ;;  %v4943_v28 = vadd.f32 %v4457_v34, %v958_v21  ;;  %v3772_v52 = vld [vmem:[%s6621_s0 + $0xd4] sm:$0xf0] }
 0x122   :  { %v3240_v61 = vadd.f32 1.0, %v3162_v7  ;;  %v2617_v15 = vmul.f32 %v4868_v19, %v2539_v11  ;;  %v2462_v46 = vmul.f32 %v4889_v49, %v2384_v36  ;;  %v3571_v19 = vld [vmem:[%s6621_s0 + $0xd0] sm:$0xf]  ;;  %v1604_v41 = vsel %vm1526_vm15, 1.0, %v4130_v13  ;;  %v3771_v31 = vld [vmem:[%s6621_s0 + $0xd4] sm:$0xf] }
 0x123   :  { %v2151_v4 = vmul.f32 %v4927_v14, %v2073_v55  ;;  %v745_v2 = vadd.f32 %v744_v47, %v636_v18  ;;  %3885 = vrcp.f32 %v1841_v63  ;;  %v3882_v32 = vpop.eup %3881  ;;  %v4956_v1 = vmul.f32 0.5, %v4865_v17 }
 0x124   :  { %v3318_v51 = vmul.f32 %v3240_v61, %v4856_v38  ;;  %v3007_v20 = vmul.f32 %v3880_v50, %v2617_v15  ;;  %v2540_v35 = vadd.f32 0.2548296, %v2462_v46  ;;  %v2869_v38 = vmul.f32 1.442695, %v2775_v43 }
 0x125   :  { %v2229_v57 = vadd.f32 1.4214138, %v2151_v4  ;;  %v4961_v40 = vsel %vm1527_vm0, 1.0, %v4130_v13  ;;  %v4964_v44 = vmul.f32 0.70710677, %v4943_v28  ;;  %v3572_v17 = vor.u32 %v3772_v52, %v3571_v19  ;;  %v638_v19 = vpop.f32.mrf.mxu0 }
 0x126   :  { %v3389_v3 = vpack.c.bf16 %v3318_v51, %v3317_v56  ;;  %v3085_v37 = vsub.f32 1.0, %v3007_v20  ;;  %v2618_v16 = vmul.f32 %v4889_v49, %v2540_v35  ;;  %v2698_v49 = vsub.f32 0.0, %v4919_v48 }
 0x127   :  { %v4966_v58 = vpop.eup %3883  ;;  %v2307_v26 = vmul.f32 %v4927_v14, %v2229_v57  ;;  %v4981_v6 = vmul.f32 0.5, %v4899_v33  ;;  %3887 = vpow2.f32 %v2869_v38  ;;  %v2699_v39 = vsub.f32 0.0, %v4931_v30  ;;  %675 = vmatmul.bf16.gmra.mxu0 %v3572_v17  ;;  %891 = vmatmul.bf16.gmra.mxu2 %v3572_v17  ;;  %v960_v33 = vpop.f32.mrf.mxu3 }
 0x128   :  { %3428 = vst [vmem:[%s6623_s3 + $0x30] sm:$0xff] %v3389_v3  ;;  %v3163_v21 = vmul.f32 %v3085_v37, %v4903_v59  ;;  %v3008_v60 = vmul.f32 %v3882_v32, %v2618_v16  ;;  %v1996_v24 = vmul.f32 1.0614054, %v4966_v58  ;;  %v4986_v8 = vand.u32 2147483647, %v4964_v44 }
 0x129   :  { %v2385_v62 = vadd.f32 -0.28449672, %v2307_v26  ;;  %v4989_v53 = vadd.f32 %v4454_v27, %v745_v2  ;;  %v3576_v59 = vor.u32 %v3771_v31, %v3573_v0  ;;  %v4991_v7 = vpop.eup %3885  ;;  %vm1528_vm1 = vcmp.ge.f32.partialorder %v4911_v54, 0.0  ;;  %v854_v31 = vpop.f32.mrf.mxu2 }
 0x12a   :  { %v3086_v12 = vsub.f32 1.0, %v3008_v60  ;;  %v2074_v23 = vadd.f32 -1.4531521, %v1996_v24  ;;  %v2776_v29 = vmul.f32 %v2698_v49, %v4919_v48  ;;  %v1764_v5 = vmul.f32 0.3275911, %v4986_v8 }
 0x12b   :  { %v2463_v11 = vmul.f32 %v4927_v14, %v2385_v62  ;;  %v3241_v36 = vadd.f32 1.0, %v3163_v21  ;;  %v1997_v61 = vmul.f32 1.0614054, %v4991_v7  ;;  %783 = vmatmul.bf16.gmra.mxu1 %v3576_v59  ;;  %999 = vmatmul.bf16.gmra.mxu3 %v3576_v59  ;;  %v2777_v55 = vmul.f32 %v2699_v39, %v4931_v30  ;;  %v746_v30 = vpop.f32.mrf.mxu1 }
 0x12c   :  { %v3164_v43 = vmul.f32 %v3086_v12, %v1604_v41  ;;  %v2152_v45 = vmul.f32 %v4966_v58, %v2074_v23  ;;  %v1842_v18 = vadd.f32 1.0, %v1764_v5  ;;  %v5001_v47 = vmul.f32 0.70710677, %v4989_v53 }
 0x12d   :  { %v2541_v15 = vadd.f32 0.2548296, %v2463_v11  ;;  %v2075_v48 = vadd.f32 -1.4531521, %v1997_v61  ;;  %v961_v46 = vadd.f32 %v960_v33, %v852_v10  ;;  %v3888_v63 = vpop.eup %3887  ;;  %v5007_v20 = vsel %vm1528_vm1, 1.0, %v4130_v13 }
 0x12e   :  { %v3242_v50 = vadd.f32 1.0, %v3164_v43  ;;  %v2230_v56 = vadd.f32 1.4214138, %v2152_v45  ;;  %v2871_v4 = vmul.f32 1.442695, %v2776_v29  ;;  %3889 = vrcp.f32 %v1842_v18 }
 0x12f   :  { %v2619_v51 = vmul.f32 %v4927_v14, %v2541_v15  ;;  %v3319_v52 = vmul.f32 %v3241_v36, %v4881_v42  ;;  %v2153_v38 = vmul.f32 %v4991_v7, %v2075_v48  ;;  %v2873_v3 = vmul.f32 1.442695, %v2777_v55  ;;  %v962_v0 = vpop.f32.mrf.mxu3 }
 0x130   :  { %v3320_v41 = vmul.f32 %v3242_v50, %v4908_v9  ;;  %v2308_v35 = vmul.f32 %v4966_v58, %v2230_v56  ;;  %v1687_v14 = vand.u32 2147483647, %v5001_v47  ;;  %v747_v32 = vadd.f32 %v746_v30, %v638_v19 }
 0x131   :  { %v3009_v2 = vmul.f32 %v3888_v63, %v2619_v51  ;;  %v2231_v57 = vadd.f32 1.4214138, %v2153_v38  ;;  %3891 = vpow2.f32 %v2871_v4  ;;  %v5015_v16 = vmul.f32 0.5, %v4916_v22  ;;  %v641_v38 = vpop.f32.mrf.mxu0 }
 0x132   :  { %v3390_v37 = vpack.c.bf16 %v3320_v41, %v3319_v52  ;;  %v2386_v54 = vadd.f32 -0.28449672, %v2308_v35  ;;  %v1765_v26 = vmul.f32 0.3275911, %v1687_v14  ;;  %v5018_v42 = vadd.f32 %v4457_v34, %v961_v46 }
 0x133   :  { %v2309_v49 = vmul.f32 %v4991_v7, %v2231_v57  ;;  %v2700_v17 = vsub.f32 0.0, %v4986_v8  ;;  %v3087_v22 = vsub.f32 1.0, %v3009_v2  ;;  %vm1529_vm2 = vcmp.ge.f32.partialorder %v4922_v25, 0.0 }
 0x134   :  { %3429 = vst [vmem:[%s6623_s3 + $0x38] sm:$0xff] %v3390_v37  ;;  %v2464_v9 = vmul.f32 %v4966_v58, %v2386_v54  ;;  %v5026_v21 = vpop.eup %3889  ;;  %vm1530_vm3 = vcmp.ge.f32.partialorder %v4964_v44, 0.0  ;;  %v1843_v60 = vadd.f32 1.0, %v1765_v26  ;;  %3893 = vpow2.f32 %v2873_v3 }
 0x135   :  { %v2387_v62 = vadd.f32 -0.28449672, %v2309_v49  ;;  %v1998_v39 = vmul.f32 1.0614054, %v5026_v21  ;;  %v5032_v12 = vmul.f32 0.70710677, %v5018_v42  ;;  %v5035_v23 = vadd.f32 %v4454_v27, %v747_v32 }
 0x136   :  { %v2542_v24 = vadd.f32 0.2548296, %v2464_v9  ;;  %3895 = vrcp.f32 %v1843_v60  ;;  %v963_v59 = vadd.f32 %v962_v0, %v854_v31  ;;  %v2778_v29 = vmul.f32 %v2700_v17, %v4986_v8 }
 0x137   :  { %v2465_v33 = vmul.f32 %v4991_v7, %v2387_v62  ;;  %v2076_v11 = vadd.f32 -1.4531521, %v1998_v39  ;;  %v3892_v5 = vpop.eup %3891  ;;  %v5043_v36 = vsel %vm1529_vm2, 1.0, %v4130_v13  ;;  %v5046_v43 = vmul.f32 0.5, %v4943_v28  ;;  %v3774_v39 = vld [vmem:[%s6621_s0 + $0xe4] sm:$0xf0] }
 0x138   :  { %v2620_v10 = vmul.f32 %v4966_v58, %v2542_v24  ;;  %v2701_v45 = vsub.f32 0.0, %v1687_v14  ;;  %v5049_v61 = vand.u32 2147483647, %v5032_v12  ;;  %v3165_v58 = vmul.f32 %v3087_v22, %v4961_v40 }
 0x139   :  { %v2543_v55 = vadd.f32 0.2548296, %v2465_v33  ;;  %v2154_v18 = vmul.f32 %v5026_v21, %v2076_v11  ;;  %v5056_v8 = vsel %vm1530_vm3, 1.0, %v4130_v13  ;;  %v5060_v28 = vmul.f32 0.70710677, %v5035_v23 }
 0x13a   :  { %v3010_v15 = vmul.f32 %v3892_v5, %v2620_v10  ;;  %v1766_v25 = vmul.f32 0.3275911, %v5049_v61  ;;  %v3894_v50 = vpop.eup %3893  ;;  %v2875_v40 = vmul.f32 1.442695, %v2778_v29  ;;  %v5066_v51 = vmul.f32 0.5, %v4989_v53 }
 0x13b   :  { %v2621_v48 = vmul.f32 %v4991_v7, %v2543_v55  ;;  %v2232_v46 = vadd.f32 1.4214138, %v2154_v18  ;;  %v2779_v4 = vmul.f32 %v2701_v45, %v1687_v14  ;;  %v1689_v19 = vand.u32 2147483647, %v5060_v28  ;;  %v749_v7 = vpop.f32.mrf.mxu1 }
 0x13c   :  { %v3088_v56 = vsub.f32 1.0, %v3010_v15  ;;  %v5063_v63 = vpop.eup %3895  ;;  %v1844_v44 = vadd.f32 1.0, %v1766_v25  ;;  %v3243_v30 = vadd.f32 1.0, %v3165_v58  ;;  %vm1531_vm4 = vcmp.ge.f32.partialorder %v5001_v47, 0.0  ;;  %v3773_v47 = vld [vmem:[%s6621_s0 + $0xe4] sm:$0xf] }
 0x13d   :  { %v2310_v41 = vmul.f32 %v5026_v21, %v2232_v46  ;;  %v1999_v35 = vmul.f32 1.0614054, %v5063_v63  ;;  %v3011_v2 = vmul.f32 %v3894_v50, %v2621_v48  ;;  %v1767_v3 = vmul.f32 0.3275911, %v1689_v19  ;;  %v3581_v15 = vld [vmem:[%s6621_s0 + $0xe8] sm:$0xf0]  ;;  %v857_v46 = vpop.f32.mrf.mxu2 }
 0x13e   :  { %v3166_v52 = vmul.f32 %v3088_v56, %v5007_v20  ;;  %3897 = vrcp.f32 %v1844_v44  ;;  %v2877_v54 = vmul.f32 1.442695, %v2779_v4  ;;  %v5074_v32 = vadd.f32 %v4457_v34, %v963_v59 }
 0x13f   :  { %v2388_v37 = vadd.f32 -0.28449672, %v2310_v41  ;;  %3899 = vpow2.f32 %v2875_v40  ;;  %v2077_v14 = vadd.f32 -1.4531521, %v1999_v35  ;;  %v1845_v57 = vadd.f32 1.0, %v1767_v3 }
 0x140   :  { %v3244_v53 = vadd.f32 1.0, %v3166_v52  ;;  %v750_v20 = vadd.f32 %v749_v7, %v641_v38  ;;  %v3321_v26 = vmul.f32 %v3243_v30, %v4956_v1  ;;  %v3089_v31 = vsub.f32 1.0, %v3011_v2 }
 0x141   :  { %v2466_v49 = vmul.f32 %v5026_v21, %v2388_v37  ;;  %v2155_v17 = vmul.f32 %v5063_v63, %v2077_v14  ;;  %v2702_v0 = vsub.f32 0.0, %v5049_v61  ;;  %3901 = vrcp.f32 %v1845_v57 }
 0x142   :  { %v3322_v9 = vmul.f32 %v3244_v53, %v4981_v6  ;;  %v5082_v22 = vmul.f32 0.70710677, %v5074_v32  ;;  %v5087_v62 = vsel %vm1531_vm4, 1.0, %v4130_v13  ;;  %v3579_v6 = vld [vmem:[%s6621_s0 + $0xe0] sm:$0xf]  ;;  %v5098_v10 = vmul.f32 0.5, %v5018_v42 }
 0x143   :  { %v2544_v24 = vadd.f32 0.2548296, %v2466_v49  ;;  %v2233_v1 = vadd.f32 1.4214138, %v2155_v17  ;;  %v2703_v33 = vsub.f32 0.0, %v1689_v19  ;;  %v5113_v58 = vmul.f32 0.5, %v5035_v23  ;;  %v965_v23 = vpop.f32.mrf.mxu3 }
 0x144   :  { %v3391_v60 = vpack.c.bf16 %v3322_v9, %v3321_v26  ;;  %v5095_v59 = vpop.eup %3897  ;;  %v5101_v11 = vand.u32 2147483647, %v5082_v22  ;;  %v3167_v55 = vmul.f32 %v3089_v31, %v5043_v36  ;;  %3903 = vpow2.f32 %v2877_v54  ;;  %v643_v31 = vpop.f32.mrf.mxu0 }
 0x145   :  { %v3900_v29 = vpop.eup %3899  ;;  %v2622_v5 = vmul.f32 %v5026_v21, %v2544_v24  ;;  %v2311_v45 = vmul.f32 %v5063_v63, %v2233_v1  ;;  %v2000_v42 = vmul.f32 1.0614054, %v5095_v59  ;;  %v2780_v18 = vmul.f32 %v2702_v0, %v5049_v61 }
 0x146   :  { %3430 = vst [vmem:[%s6623_s3 + $0x40] sm:$0xff] %v3391_v60  ;;  %v1768_v25 = vmul.f32 0.3275911, %v5101_v11  ;;  %v5122_v48 = vadd.f32 %v4454_v27, %v750_v20  ;;  %v2781_v4 = vmul.f32 %v2703_v33, %v1689_v19  ;;  %v3580_v30 = vor.u32 %v3774_v39, %v3579_v6 }
 0x147   :  { %v3012_v50 = vmul.f32 %v3900_v29, %v2622_v5  ;;  %v2389_v21 = vadd.f32 -0.28449672, %v2311_v45  ;;  %v2078_v56 = vadd.f32 -1.4531521, %v2000_v42  ;;  %v5124_v40 = vpop.eup %3901  ;;  %v3584_v52 = vor.u32 %v3773_v47, %v3581_v15  ;;  %v859_v15 = vpop.f32.mrf.mxu2 }
 0x148   :  { %v1846_v44 = vadd.f32 1.0, %v1768_v25  ;;  %v2001_v35 = vmul.f32 1.0614054, %v5124_v40  ;;  %v3245_v38 = vadd.f32 1.0, %v3167_v55  ;;  %vm1532_vm5 = vcmp.ge.f32.partialorder %v5032_v12, 0.0  ;;  %680 = vmatmul.bf16.gmra.mxu0 %v3580_v30  ;;  %896 = vmatmul.bf16.gmra.mxu2 %v3580_v30 }
 0x149   :  { %v3090_v36 = vsub.f32 1.0, %v3012_v50  ;;  %v2467_v41 = vmul.f32 %v5063_v63, %v2389_v21  ;;  %v2156_v61 = vmul.f32 %v5095_v59, %v2078_v56  ;;  %v5131_v7 = vmul.f32 0.70710677, %v5122_v48  ;;  %788 = vmatmul.bf16.gmra.mxu1 %v3584_v52  ;;  %1004 = vmatmul.bf16.gmra.mxu3 %v3584_v52 }
 0x14a   :  { %3905 = vrcp.f32 %v1846_v44  ;;  %v2079_v53 = vadd.f32 -1.4531521, %v2001_v35  ;;  %v3904_v37 = vpop.eup %3903  ;;  %v2879_v14 = vmul.f32 1.442695, %v2780_v18  ;;  %v2881_v54 = vmul.f32 1.442695, %v2781_v4 }
 0x14b   :  { %v3168_v19 = vmul.f32 %v3090_v36, %v5056_v8  ;;  %v2545_v2 = vadd.f32 0.2548296, %v2467_v41  ;;  %v2234_v3 = vadd.f32 1.4214138, %v2156_v61  ;;  %v1691_v57 = vand.u32 2147483647, %v5131_v7  ;;  %v751_v8 = vpop.f32.mrf.mxu1  ;;  %v967_v55 = vpop.f32.mrf.mxu3 }
 0x14c   :  { %v966_v20 = vadd.f32 %v965_v23, %v857_v46  ;;  %v2157_v17 = vmul.f32 %v5124_v40, %v2079_v53  ;;  %v3323_v0 = vmul.f32 %v3245_v38, %v5015_v16  ;;  %v2704_v60 = vsub.f32 0.0, %v5101_v11 }
 0x14d   :  { %v3246_v26 = vadd.f32 1.0, %v3168_v19  ;;  %v2623_v9 = vmul.f32 %v5063_v63, %v2545_v2  ;;  %v2312_v49 = vmul.f32 %v5095_v59, %v2234_v3  ;;  %v1769_v24 = vmul.f32 0.3275911, %v1691_v57 }
 0x14e   :  { %v2235_v33 = vadd.f32 1.4214138, %v2157_v17  ;;  %3907 = vpow2.f32 %v2879_v14  ;;  %v5144_v29 = vadd.f32 %v4457_v34, %v966_v20  ;;  %v752_v5 = vadd.f32 %v751_v8, %v643_v31 }
 0x14f   :  { %v3324_v1 = vmul.f32 %v3246_v26, %v5046_v43  ;;  %v3013_v6 = vmul.f32 %v3904_v37, %v2623_v9  ;;  %v2390_v39 = vadd.f32 -0.28449672, %v2312_v49  ;;  %v1847_v63 = vadd.f32 1.0, %v1769_v24 }
 0x150   :  { %v5141_v47 = vpop.eup %3905  ;;  %v2313_v16 = vmul.f32 %v5124_v40, %v2235_v33  ;;  %3909 = vpow2.f32 %v2881_v54  ;;  %vm1533_vm6 = vcmp.ge.f32.partialorder %v5060_v28, 0.0  ;;  %v2782_v18 = vmul.f32 %v2704_v60, %v5101_v11 }
 0x151   :  { %v3392_v45 = vpack.c.bf16 %v3324_v1, %v3323_v0  ;;  %v2468_v42 = vmul.f32 %v5095_v59, %v2390_v39  ;;  %v2002_v43 = vmul.f32 1.0614054, %v5141_v47  ;;  %3911 = vrcp.f32 %v1847_v63  ;;  %v646_v0 = vpop.f32.mrf.mxu0 }
 0x152   :  { %v3091_v25 = vsub.f32 1.0, %v3013_v6  ;;  %v2391_v21 = vadd.f32 -0.28449672, %v2313_v16  ;;  %v2705_v46 = vsub.f32 0.0, %v1691_v57  ;;  %v5155_v23 = vmul.f32 0.70710677, %v5144_v29 }
 0x153   :  { %3431 = vst [vmem:[%s6623_s3 + $0x48] sm:$0xff] %v3392_v45  ;;  %v2546_v50 = vadd.f32 0.2548296, %v2468_v42  ;;  %v2080_v56 = vadd.f32 -1.4531521, %v2002_v43  ;;  %v968_v4 = vadd.f32 %v967_v55, %v859_v15  ;;  %v1610_v44 = vsel %vm1532_vm5, 1.0, %v4130_v13  ;;  %v754_v60 = vpop.f32.mrf.mxu1 }
 0x154   :  { %v2469_v30 = vmul.f32 %v5124_v40, %v2391_v21  ;;  %v5163_v52 = vadd.f32 %v4454_v27, %v752_v5  ;;  %v3908_v36 = vpop.eup %3907  ;;  %v2883_v61 = vmul.f32 1.442695, %v2782_v18  ;;  %v1692_v35 = vand.u32 2147483647, %v5155_v23 }
 0x155   :  { %v2624_v11 = vmul.f32 %v5095_v59, %v2546_v50  ;;  %v2158_v41 = vmul.f32 %v5141_v47, %v2080_v56  ;;  %v3169_v19 = vmul.f32 %v3091_v25, %v5087_v62  ;;  %v1611_v12 = vsel %vm1533_vm6, 1.0, %v4130_v13 }
 0x156   :  { %v3910_v38 = vpop.eup %3909  ;;  %v2547_v59 = vadd.f32 0.2548296, %v2469_v30  ;;  %vm1534_vm7 = vcmp.ge.f32.partialorder %v5082_v22, 0.0  ;;  %v2783_v37 = vmul.f32 %v2705_v46, %v1691_v57  ;;  %v1770_v14 = vmul.f32 0.3275911, %v1692_v35 }
 0x157   :  { %v3014_v2 = vmul.f32 %v3908_v36, %v2624_v11  ;;  %v5171_v3 = vpop.eup %3911  ;;  %v2236_v53 = vadd.f32 1.4214138, %v2158_v41  ;;  %v5177_v62 = vmul.f32 0.70710677, %v5163_v52  ;;  %3913 = vpow2.f32 %v2883_v61  ;;  %v3776_v46 = vld [vmem:[%s6621_s0 + $0xf4] sm:$0xf0] }
 0x158   :  { %v2625_v20 = vmul.f32 %v5124_v40, %v2547_v59  ;;  %v2003_v26 = vmul.f32 1.0614054, %v5171_v3  ;;  %v1848_v28 = vadd.f32 1.0, %v1770_v14  ;;  %v5181_v49 = vadd.f32 %v4457_v34, %v968_v4  ;;  %v3775_v36 = vld [vmem:[%s6621_s0 + $0xf4] sm:$0xf] }
 0x159   :  { %v3092_v54 = vsub.f32 1.0, %v3014_v2  ;;  %v2314_v9 = vmul.f32 %v5141_v47, %v2236_v53  ;;  %v3247_v17 = vadd.f32 1.0, %v3169_v19  ;;  %v5184_v40 = vmul.f32 0.5, %v5074_v32  ;;  %v3589_v41 = vld [vmem:[%s6621_s0 + $0xf8] sm:$0xf0]  ;;  %v970_v19 = vpop.f32.mrf.mxu3 }
 0x15a   :  { %v3015_v8 = vmul.f32 %v3910_v38, %v2625_v20  ;;  %v2081_v57 = vadd.f32 -1.4531521, %v2003_v26  ;;  %v1612_v24 = vsel %vm1534_vm7, 1.0, %v4130_v13  ;;  %3915 = vrcp.f32 %v1848_v28  ;;  %v862_v38 = vpop.f32.mrf.mxu2 }
 0x15b   :  { %v3170_v31 = vmul.f32 %v3092_v54, %v1610_v44  ;;  %v2392_v1 = vadd.f32 -0.28449672, %v2314_v9  ;;  %v2885_v33 = vmul.f32 1.442695, %v2783_v37  ;;  %v5191_v63 = vand.u32 2147483647, %v5177_v62  ;;  %v756_v20 = vpop.f32.mrf.mxu1 }
 0x15c   :  { %v2159_v39 = vmul.f32 %v5171_v3, %v2081_v57  ;;  %v3093_v5 = vsub.f32 1.0, %v3015_v8  ;;  %v2706_v42 = vsub.f32 0.0, %v1692_v35  ;;  %v5195_v32 = vmul.f32 0.70710677, %v5181_v49 }
 0x15d   :  { %v3248_v6 = vadd.f32 1.0, %v3170_v31  ;;  %v2470_v45 = vmul.f32 %v5141_v47, %v2392_v1  ;;  %v3325_v16 = vmul.f32 %v3247_v17, %v5066_v51  ;;  %v1771_v55 = vmul.f32 0.3275911, %v5191_v63  ;;  %v3914_v43 = vpop.eup %3913 }
 0x15e   :  { %v2237_v15 = vadd.f32 1.4214138, %v2159_v39  ;;  %v5201_v25 = vmul.f32 0.5, %v5122_v48  ;;  %vm1535_vm8 = vcmp.ge.f32.partialorder %v5131_v7, 0.0  ;;  %v5205_v50 = vand.u32 2147483647, %v5195_v32  ;;  %v648_v7 = vpop.f32.mrf.mxu0 }
 0x15f   :  { %v3326_v22 = vmul.f32 %v3248_v6, %v5098_v10  ;;  %v2548_v18 = vadd.f32 0.2548296, %v2470_v45  ;;  %3917 = vpow2.f32 %v2885_v33  ;;  %v1849_v51 = vadd.f32 1.0, %v1771_v55  ;;  %v3587_v10 = vld [vmem:[%s6621_s0 + $0xf0] sm:$0xf] }
 0x160   :  { %v2315_v56 = vmul.f32 %v5171_v3, %v2237_v15  ;;  %v5214_v48 = vpop.eup %3915  ;;  %v3171_v4 = vmul.f32 %v3093_v5, %v1611_v12  ;;  %v2784_v11 = vmul.f32 %v2706_v42, %v1692_v35  ;;  %v1772_v30 = vmul.f32 0.3275911, %v5205_v50 }
 0x161   :  { %v3393_v21 = vpack.c.bf16 %v3326_v22, %v3325_v16  ;;  %v2626_v44 = vmul.f32 %v5141_v47, %v2548_v18  ;;  %v5230_v61 = vsel %vm1535_vm8, 1.0, %v4130_v13  ;;  %v2004_v35 = vmul.f32 1.0614054, %v5214_v48 }
 0x162   :  { %v2393_v47 = vadd.f32 -0.28449672, %v2315_v56  ;;  %3919 = vrcp.f32 %v1849_v51  ;;  %vm1536_vm9 = vcmp.ge.f32.partialorder %v5155_v23, 0.0  ;;  %v2707_v12 = vsub.f32 0.0, %v5191_v63 }
 0x163   :  { %3432 = vst [vmem:[%s6623_s3 + $0x50] sm:$0xff] %v3393_v21  ;;  %v3016_v2 = vmul.f32 %v3914_v43, %v2626_v44  ;;  %v1850_v59 = vadd.f32 1.0, %v1772_v30  ;;  %v2082_v37 = vadd.f32 -1.4531521, %v2004_v35  ;;  %v755_v14 = vadd.f32 %v754_v60, %v646_v0 }
 0x164   :  { %v2471_v53 = vmul.f32 %v5171_v3, %v2393_v47  ;;  %v3588_v54 = vor.u32 %v3776_v46, %v3587_v10  ;;  %v3249_v26 = vadd.f32 1.0, %v3171_v4  ;;  %v2887_v28 = vmul.f32 1.442695, %v2784_v11  ;;  %v864_v10 = vpop.f32.mrf.mxu2  ;;  %v972_v46 = vpop.f32.mrf.mxu3 }
 0x165   :  { %v3094_v9 = vsub.f32 1.0, %v3016_v2  ;;  %v3592_v17 = vor.u32 %v3775_v36, %v3589_v41  ;;  %v3918_v31 = vpop.eup %3917  ;;  %v2160_v57 = vmul.f32 %v5214_v48, %v2082_v37  ;;  %3921 = vrcp.f32 %v1850_v59 }
 0x166   :  { %v2549_v8 = vadd.f32 0.2548296, %v2471_v53  ;;  %685 = vmatmul.bf16.gmra.mxu0 %v3588_v54  ;;  %901 = vmatmul.bf16.gmra.mxu2 %v3588_v54  ;;  %v5238_v6 = vmul.f32 0.5, %v5144_v29  ;;  %v971_v0 = vadd.f32 %v970_v19, %v862_v38  ;;  %v757_v60 = vadd.f32 %v756_v20, %v648_v7 }
 0x167   :  { %v3172_v1 = vmul.f32 %v3094_v9, %v1612_v24  ;;  %793 = vmatmul.bf16.gmra.mxu1 %v3592_v17  ;;  %1009 = vmatmul.bf16.gmra.mxu3 %v3592_v17  ;;  %v2238_v5 = vadd.f32 1.4214138, %v2160_v57  ;;  %v2785_v45 = vmul.f32 %v2707_v12, %v5191_v63  ;;  %v1305_v42 = vadd.f32 %v4454_v27, %v755_v14 }
 0x168   :  { %v5240_v39 = vpop.eup %3919  ;;  %v2627_v33 = vmul.f32 %v5171_v3, %v2549_v8  ;;  %v5248_v24 = vsel %vm1536_vm9, 1.0, %v4130_v13  ;;  %v3327_v22 = vmul.f32 %v3249_v26, %v5113_v58  ;;  %3923 = vpow2.f32 %v2887_v28 }
 0x169   :  { %v3250_v16 = vadd.f32 1.0, %v3172_v1  ;;  %v2005_v29 = vmul.f32 1.0614054, %v5240_v39  ;;  %v2316_v15 = vmul.f32 %v5214_v48, %v2238_v5  ;;  %v5253_v55 = vmul.f32 0.70710677, %v1305_v42 }
 0x16a   :  { %v2708_v43 = vsub.f32 0.0, %v5205_v50  ;;  %v3017_v21 = vmul.f32 %v3918_v31, %v2627_v33  ;;  %v2889_v56 = vmul.f32 1.442695, %v2785_v45  ;;  %v5263_v11 = vadd.f32 %v4457_v34, %v971_v0 }
 0x16b   :  { %v3328_v3 = vmul.f32 %v3250_v16, %v5184_v40  ;;  %v2083_v63 = vadd.f32 -1.4531521, %v2005_v29  ;;  %v5257_v18 = vpop.eup %3921  ;;  %v2394_v23 = vadd.f32 -0.28449672, %v2316_v15  ;;  %v1695_v51 = vand.u32 2147483647, %v5253_v55 }
 0x16c   :  { %v2006_v44 = vmul.f32 1.0614054, %v5257_v18  ;;  %v5267_v30 = vmul.f32 0.5, %v5163_v52  ;;  %vm1537_vm10 = vcmp.ge.f32.partialorder %v5177_v62, 0.0  ;;  %v2786_v35 = vmul.f32 %v2708_v43, %v5205_v50 }
 0x16d   :  { %v3394_v58 = vpack.c.bf16 %v3328_v3, %v3327_v22  ;;  %v2161_v4 = vmul.f32 %v5240_v39, %v2083_v63  ;;  %v2472_v40 = vmul.f32 %v5214_v48, %v2394_v23  ;;  %v1773_v36 = vmul.f32 0.3275911, %v1695_v51  ;;  %v651_v23 = vpop.f32.mrf.mxu0 }
 0x16e   :  { %v2084_v47 = vadd.f32 -1.4531521, %v2006_v44  ;;  %v973_v38 = vadd.f32 %v972_v46, %v864_v10  ;;  %v3924_v19 = vpop.eup %3923  ;;  %v3095_v2 = vsub.f32 1.0, %v3017_v21  ;;  %3925 = vpow2.f32 %v2889_v56  ;;  %v759_v56 = vpop.f32.mrf.mxu1 }
 0x16f   :  { %3433 = vst [vmem:[%s6623_s3 + $0x58] sm:$0xff] %v3394_v58  ;;  %v2239_v41 = vadd.f32 1.4214138, %v2161_v4  ;;  %v2550_v12 = vadd.f32 0.2548296, %v2472_v40  ;;  %v1851_v59 = vadd.f32 1.0, %v1773_v36  ;;  %v5280_v14 = vadd.f32 %v4454_v27, %v757_v60 }
 0x170   :  { %v2162_v53 = vmul.f32 %v5257_v18, %v2084_v47  ;;  %v5277_v37 = vmul.f32 0.70710677, %v5263_v11  ;;  %v1615_v50 = vsel %vm1537_vm10, 1.0, %v4130_v13  ;;  %vm1538_vm11 = vcmp.ge.f32.partialorder %v5195_v32, 0.0 }
 0x171   :  { %v2317_v52 = vmul.f32 %v5240_v39, %v2239_v41  ;;  %v2628_v54 = vmul.f32 %v5214_v48, %v2550_v12  ;;  %3927 = vrcp.f32 %v1851_v59  ;;  %v2891_v26 = vmul.f32 1.442695, %v2786_v35 }
 0x172   :  { %v2240_v20 = vadd.f32 1.4214138, %v2162_v53  ;;  %v3173_v9 = vmul.f32 %v3095_v2, %v5230_v61  ;;  %v2709_v17 = vsub.f32 0.0, %v1695_v51  ;;  %v1696_v31 = vand.u32 2147483647, %v5277_v37 }
 0x173   :  { %v2395_v7 = vadd.f32 -0.28449672, %v2317_v52  ;;  %v3018_v28 = vmul.f32 %v3924_v19, %v2628_v54  ;;  %v5291_v48 = vmul.f32 0.5, %v5181_v49  ;;  %v5295_v57 = vmul.f32 0.70710677, %v5280_v14 }
 0x174   :  { %v2318_v62 = vmul.f32 %v5257_v18, %v2240_v20  ;;  %v3926_v32 = vpop.eup %3925  ;;  %v1616_v0 = vsel %vm1538_vm11, 1.0, %v4130_v13  ;;  %v1774_v60 = vmul.f32 0.3275911, %v1696_v31  ;;  %v5299_v61 = vadd.f32 %v4457_v34, %v973_v38  ;;  %v3595_v20 = vld [vmem:[%s6621_s0 + $0x100] sm:$0xf] }
 0x175   :  { %v2473_v8 = vmul.f32 %v5240_v39, %v2395_v7  ;;  %v3096_v1 = vsub.f32 1.0, %v3018_v28  ;;  %3929 = vpow2.f32 %v2891_v26  ;;  %v5301_v45 = vmul.f32 0.5, %v1305_v42  ;;  %v867_v26 = vpop.f32.mrf.mxu2 }
 0x176   :  { %v2396_v5 = vadd.f32 -0.28449672, %v2318_v62  ;;  %v3251_v16 = vadd.f32 1.0, %v3173_v9  ;;  %v2787_v22 = vmul.f32 %v2709_v17, %v1695_v51  ;;  %v1852_v15 = vadd.f32 1.0, %v1774_v60  ;;  %v975_v9 = vpop.f32.mrf.mxu3  ;;  %v3778_v62 = vld [vmem:[%s6621_s0 + $0x104] sm:$0xf0] }
 0x177   :  { %v2551_v33 = vadd.f32 0.2548296, %v2473_v8  ;;  %v5303_v49 = vpop.eup %3927  ;;  %v3174_v29 = vmul.f32 %v3096_v1, %v5248_v24  ;;  %v1697_v21 = vand.u32 2147483647, %v5295_v57  ;;  %vm1539_vm12 = vcmp.ge.f32.partialorder %v5253_v55, 0.0 }
 0x178   :  { %v2474_v63 = vmul.f32 %v5257_v18, %v2396_v5  ;;  %v2007_v43 = vmul.f32 1.0614054, %v5303_v49  ;;  %3931 = vrcp.f32 %v1852_v15  ;;  %v5312_v42 = vmul.f32 0.70710677, %v5299_v61 }
 0x179   :  { %v2629_v3 = vmul.f32 %v5240_v39, %v2551_v33  ;;  %v3252_v10 = vadd.f32 1.0, %v3174_v29  ;;  %v1775_v58 = vmul.f32 0.3275911, %v1697_v21  ;;  %v3329_v39 = vmul.f32 %v3251_v16, %v5201_v25 }
 0x17a   :  { %v2552_v51 = vadd.f32 0.2548296, %v2474_v63  ;;  %v2085_v46 = vadd.f32 -1.4531521, %v2007_v43  ;;  %v2893_v44 = vmul.f32 1.442695, %v2787_v22  ;;  %v760_v40 = vadd.f32 %v759_v56, %v651_v23 }
 0x17b   :  { %v3019_v24 = vmul.f32 %v3926_v32, %v2629_v3  ;;  %v3330_v4 = vmul.f32 %v3252_v10, %v5238_v6  ;;  %v3930_v36 = vpop.eup %3929  ;;  %v1853_v38 = vadd.f32 1.0, %v1775_v58  ;;  %v5321_v2 = vsel %vm1539_vm12, 1.0, %v4130_v13 }
 0x17c   :  { %v2630_v47 = vmul.f32 %v5257_v18, %v2552_v51  ;;  %v2163_v35 = vmul.f32 %v5303_v49, %v2085_v46  ;;  %v2710_v12 = vsub.f32 0.0, %v1696_v31  ;;  %v5324_v25 = vand.u32 2147483647, %v5312_v42 }
 0x17d   :  { %v3097_v41 = vsub.f32 1.0, %v3019_v24  ;;  %v3395_v19 = vpack.c.bf16 %v3330_v4, %v3329_v39  ;;  %3933 = vrcp.f32 %v1853_v38  ;;  %v5332_v18 = vmul.f32 0.5, %v5263_v11  ;;  %v653_v39 = vpop.f32.mrf.mxu0  ;;  %v761_v4 = vpop.f32.mrf.mxu1 }
 0x17e   :  { %v3020_v59 = vmul.f32 %v3930_v36, %v2630_v47  ;;  %v2241_v52 = vadd.f32 1.4214138, %v2163_v35  ;;  %v5326_v53 = vpop.eup %3931  ;;  %vm1540_vm13 = vcmp.ge.f32.partialorder %v5277_v37, 0.0  ;;  %v1776_v55 = vmul.f32 0.3275911, %v5324_v25 }
 0x17f   :  { %v3175_v6 = vmul.f32 %v3097_v41, %v1615_v50  ;;  %3434 = vst [vmem:[%s6623_s3 + $0x60] sm:$0xff] %v3395_v19  ;;  %3935 = vpow2.f32 %v2893_v44  ;;  %v2008_v50 = vmul.f32 1.0614054, %v5326_v53  ;;  %v2788_v28 = vmul.f32 %v2710_v12, %v1696_v31  ;;  %v3777_v37 = vld [vmem:[%s6621_s0 + $0x104] sm:$0xf] }
 0x180   :  { %v3098_v54 = vsub.f32 1.0, %v3020_v59  ;;  %v2319_v7 = vmul.f32 %v5303_v49, %v2241_v52  ;;  %v2711_v17 = vsub.f32 0.0, %v1697_v21  ;;  %v1854_v11 = vadd.f32 1.0, %v1776_v55  ;;  %v869_v52 = vpop.f32.mrf.mxu2  ;;  %v977_v55 = vpop.f32.mrf.mxu3 }
 0x181   :  { %v5342_v8 = vadd.f32 %v4454_v27, %v760_v40  ;;  %v3253_v32 = vadd.f32 1.0, %v3175_v6  ;;  %v2086_v33 = vadd.f32 -1.4531521, %v2008_v50  ;;  %v5350_v5 = vsel %vm1540_vm13, 1.0, %v4130_v13 }
 0x182   :  { %v3176_v1 = vmul.f32 %v3098_v54, %v1616_v0  ;;  %v2397_v60 = vadd.f32 -0.28449672, %v2319_v7  ;;  %v5353_v31 = vmul.f32 0.5, %v5280_v14  ;;  %3937 = vrcp.f32 %v1854_v11  ;;  %v3597_v14 = vld [vmem:[%s6621_s0 + $0x108] sm:$0xf0] }
 0x183   :  { %v5356_v16 = vmul.f32 0.70710677, %v5342_v8  ;;  %v5358_v29 = vpop.eup %3933  ;;  %v2164_v0 = vmul.f32 %v5326_v53, %v2086_v33  ;;  %v3596_v3 = vor.u32 %v3778_v62, %v3595_v20  ;;  %v2895_v63 = vmul.f32 1.442695, %v2788_v28 }
 0x184   :  { %v3254_v22 = vadd.f32 1.0, %v3176_v1  ;;  %v2475_v15 = vmul.f32 %v5303_v49, %v2397_v60  ;;  %v2009_v43 = vmul.f32 1.0614054, %v5358_v29  ;;  %v2789_v23 = vmul.f32 %v2711_v17, %v1697_v21 }
 0x185   :  { %v5370_v56 = vand.u32 2147483647, %v5356_v16  ;;  %v3936_v10 = vpop.eup %3935  ;;  %v3331_v24 = vmul.f32 %v3253_v32, %v5267_v30  ;;  %v2242_v58 = vadd.f32 1.4214138, %v2164_v0  ;;  %690 = vmatmul.bf16.gmra.mxu0 %v3596_v3  ;;  %906 = vmatmul.bf16.gmra.mxu2 %v3596_v3  ;;  %v2712_v40 = vsub.f32 0.0, %v5324_v25 }
 0x186   :  { %v3332_v51 = vmul.f32 %v3254_v22, %v5291_v48  ;;  %v2553_v46 = vadd.f32 0.2548296, %v2475_v15  ;;  %v2087_v44 = vadd.f32 -1.4531521, %v2009_v43  ;;  %v3600_v21 = vor.u32 %v3777_v37, %v3597_v14 }
 0x187   :  { %v1777_v36 = vmul.f32 0.3275911, %v5370_v56  ;;  %v2320_v35 = vmul.f32 %v5326_v53, %v2242_v58  ;;  %v976_v30 = vadd.f32 %v975_v9, %v867_v26  ;;  %3939 = vpow2.f32 %v2895_v63 }
 0x188   :  { %v3396_v41 = vpack.c.bf16 %v3332_v51, %v3331_v24  ;;  %v2631_v47 = vmul.f32 %v5303_v49, %v2553_v46  ;;  %v5378_v38 = vpop.eup %3937  ;;  %v2165_v48 = vmul.f32 %v5358_v29, %v2087_v44  ;;  %798 = vmatmul.bf16.gmra.mxu1 %v3600_v21  ;;  %1014 = vmatmul.bf16.gmra.mxu3 %v3600_v21  ;;  %v2897_v7 = vmul.f32 1.442695, %v2789_v23 }
 0x189   :  { %v1855_v19 = vadd.f32 1.0, %v1777_v36  ;;  %v762_v12 = vadd.f32 %v761_v4, %v653_v39  ;;  %v2398_v59 = vadd.f32 -0.28449672, %v2320_v35  ;;  %v2010_v49 = vmul.f32 1.0614054, %v5378_v38 }
 0x18a   :  { %3435 = vst [vmem:[%s6623_s3 + $0x68] sm:$0xff] %v3396_v41  ;;  %v3021_v6 = vmul.f32 %v3936_v10, %v2631_v47  ;;  %v2243_v54 = vadd.f32 1.4214138, %v2165_v48  ;;  %v2790_v26 = vmul.f32 %v2712_v40, %v5324_v25  ;;  %v5388_v9 = vadd.f32 %v4457_v34, %v976_v30  ;;  %v656_v48 = vpop.f32.mrf.mxu0 }
 0x18b   :  { %3941 = vrcp.f32 %v1855_v19  ;;  %v2476_v50 = vmul.f32 %v5326_v53, %v2398_v59  ;;  %v2088_v20 = vadd.f32 -1.4531521, %v2010_v49  ;;  %vm1541_vm14 = vcmp.ge.f32.partialorder %v5295_v57, 0.0  ;;  %v764_v19 = vpop.f32.mrf.mxu1 }
 0x18c   :  { %v3099_v28 = vsub.f32 1.0, %v3021_v6  ;;  %v2321_v17 = vmul.f32 %v5358_v29, %v2243_v54  ;;  %v978_v11 = vadd.f32 %v977_v55, %v869_v52  ;;  %v5393_v32 = vmul.f32 0.5, %v5299_v61 }
 0x18d   :  { %v2554_v62 = vadd.f32 0.2548296, %v2476_v50  ;;  %v2166_v1 = vmul.f32 %v5378_v38, %v2088_v20  ;;  %v5397_v60 = vadd.f32 %v4454_v27, %v762_v12  ;;  %v3940_v33 = vpop.eup %3939  ;;  %v2713_v22 = vsub.f32 0.0, %v5370_v56 }
 0x18e   :  { %v2399_v25 = vadd.f32 -0.28449672, %v2321_v17  ;;  %v5401_v15 = vmul.f32 0.70710677, %v5388_v9  ;;  %3943 = vpow2.f32 %v2897_v7  ;;  %v2899_v37 = vmul.f32 1.442695, %v2790_v26 }
 0x18f   :  { %v2632_v0 = vmul.f32 %v5326_v53, %v2554_v62  ;;  %v2244_v3 = vadd.f32 1.4214138, %v2166_v1  ;;  %v3177_v61 = vmul.f32 %v3099_v28, %v5321_v2  ;;  %v1619_v63 = vsel %vm1541_vm14, 1.0, %v4130_v13  ;;  %v3603_v1 = vld [vmem:[%s6621_s0 + $0x110] sm:$0xf] }
 0x190   :  { %v2477_v43 = vmul.f32 %v5358_v29, %v2399_v25  ;;  %v5412_v23 = vand.u32 2147483647, %v5401_v15  ;;  %v5417_v51 = vmul.f32 0.70710677, %v5397_v60  ;;  %vm1542_vm15 = vcmp.ge.f32.partialorder %v5312_v42, 0.0 }
 0x191   :  { %v5404_v14 = vpop.eup %3941  ;;  %v3022_v10 = vmul.f32 %v3940_v33, %v2632_v0  ;;  %v2322_v24 = vmul.f32 %v5378_v38, %v2244_v3  ;;  %v2791_v2 = vmul.f32 %v2713_v22, %v5370_v56  ;;  %3945 = vpow2.f32 %v2899_v37 }
 0x192   :  { %v2011_v53 = vmul.f32 1.0614054, %v5404_v14  ;;  %v2555_v46 = vadd.f32 0.2548296, %v2477_v43  ;;  %v1778_v57 = vmul.f32 0.3275911, %v5412_v23  ;;  %v5424_v21 = vadd.f32 %v4457_v34, %v978_v11 }
 0x193   :  { %v3100_v58 = vsub.f32 1.0, %v3022_v10  ;;  %v2400_v39 = vadd.f32 -0.28449672, %v2322_v24  ;;  %v3255_v44 = vadd.f32 1.0, %v3177_v61  ;;  %v5430_v30 = vand.u32 2147483647, %v5417_v51 }
 0x194   :  { %v2089_v4 = vadd.f32 -1.4531521, %v2011_v53  ;;  %v2633_v40 = vmul.f32 %v5358_v29, %v2555_v46  ;;  %v1856_v36 = vadd.f32 1.0, %v1778_v57  ;;  %v3944_v41 = vpop.eup %3943  ;;  %v1620_v29 = vsel %vm1542_vm15, 1.0, %v4130_v13  ;;  %v3605_v61 = vld [vmem:[%s6621_s0 + $0x118] sm:$0xf0]  ;;  %v980_v57 = vpop.f32.mrf.mxu3 }
 0x195   :  { %v3178_v47 = vmul.f32 %v3100_v58, %v5350_v5  ;;  %v2478_v35 = vmul.f32 %v5378_v38, %v2400_v39  ;;  %v2901_v6 = vmul.f32 1.442695, %v2791_v2  ;;  %v5436_v5 = vmul.f32 0.5, %v5342_v8  ;;  %v872_v2 = vpop.f32.mrf.mxu2 }
 0x196   :  { %v2167_v56 = vmul.f32 %v5404_v14, %v2089_v4  ;;  %v3023_v12 = vmul.f32 %v3944_v41, %v2633_v40  ;;  %3947 = vrcp.f32 %v1856_v36  ;;  %vm1543_vm0 = vcmp.ge.f32.partialorder %v5356_v16, 0.0  ;;  %v658_v40 = vpop.f32.mrf.mxu0  ;;  %v766_v36 = vpop.f32.mrf.mxu1 }
 0x197   :  { %v3256_v59 = vadd.f32 1.0, %v3178_v47  ;;  %v2556_v49 = vadd.f32 0.2548296, %v2478_v35  ;;  %v1779_v54 = vmul.f32 0.3275911, %v5430_v30  ;;  %v3946_v50 = vpop.eup %3945  ;;  %v3333_v42 = vmul.f32 %v3255_v44, %v5301_v45 }
 0x198   :  { %v2245_v52 = vadd.f32 1.4214138, %v2167_v56  ;;  %v3101_v55 = vsub.f32 1.0, %v3023_v12  ;;  %v5441_v7 = vmul.f32 0.70710677, %v5424_v21  ;;  %v2714_v17 = vsub.f32 0.0, %v5412_v23 }
 0x199   :  { %v3334_v20 = vmul.f32 %v3256_v59, %v5332_v18  ;;  %v2634_v26 = vmul.f32 %v5378_v38, %v2556_v49  ;;  %v1857_v11 = vadd.f32 1.0, %v1779_v54  ;;  %3949 = vpow2.f32 %v2901_v6  ;;  %v3780_v18 = vld [vmem:[%s6621_s0 + $0x114] sm:$0xf0]  ;;  %v3779_v38 = vld [vmem:[%s6621_s0 + $0x114] sm:$0xf] }
 0x19a   :  { %v2323_v28 = vmul.f32 %v5404_v14, %v2245_v52  ;;  %v3179_v8 = vmul.f32 %v3101_v55, %v1619_v63  ;;  %v5449_v62 = vand.u32 2147483647, %v5441_v7  ;;  %v5465_v0 = vsel %vm1543_vm0, 1.0, %v4130_v13 }
 0x19b   :  { %v3397_v33 = vpack.c.bf16 %v3334_v20, %v3333_v42  ;;  %v3024_v25 = vmul.f32 %v3946_v50, %v2634_v26  ;;  %v5468_v3 = vmul.f32 0.5, %v5388_v9  ;;  %3951 = vrcp.f32 %v1857_v11 }
 0x19c   :  { %v2401_v45 = vadd.f32 -0.28449672, %v2323_v28  ;;  %v5460_v22 = vpop.eup %3947  ;;  %v1780_v37 = vmul.f32 0.3275911, %v5449_v62  ;;  %v5480_v10 = vmul.f32 0.5, %v5397_v60  ;;  %v3257_v9 = vadd.f32 1.0, %v3179_v8 }
 0x19d   :  { %3436 = vst [vmem:[%s6623_s3 + $0x70] sm:$0xff] %v3397_v33  ;;  %v3102_v63 = vsub.f32 1.0, %v3024_v25  ;;  %v2012_v16 = vmul.f32 1.0614054, %v5460_v22  ;;  %v2792_v24 = vmul.f32 %v2714_v17, %v5412_v23  ;;  %v765_v46 = vadd.f32 %v764_v19, %v656_v48 }
 0x19e   :  { %v2479_v43 = vmul.f32 %v5404_v14, %v2401_v45  ;;  %v1858_v53 = vadd.f32 1.0, %v1780_v37  ;;  %v3604_v44 = vor.u32 %v3780_v18, %v3603_v1  ;;  %vm1544_vm1 = vcmp.ge.f32.partialorder %v5401_v15, 0.0 }
 0x19f   :  { %v3180_v58 = vmul.f32 %v3102_v63, %v1620_v29  ;;  %v2090_v4 = vadd.f32 -1.4531521, %v2012_v16  ;;  %v3608_v41 = vor.u32 %v3779_v38, %v3605_v61  ;;  %v3950_v47 = vpop.eup %3949  ;;  %v981_v56 = vadd.f32 %v980_v57, %v872_v2 }
 0x1a0   :  { %v2557_v39 = vadd.f32 0.2548296, %v2479_v43  ;;  %3953 = vrcp.f32 %v1858_v53  ;;  %695 = vmatmul.bf16.gmra.mxu0 %v3604_v44  ;;  %911 = vmatmul.bf16.gmra.mxu2 %v3604_v44  ;;  %v2903_v19 = vmul.f32 1.442695, %v2792_v24  ;;  %v2715_v12 = vsub.f32 0.0, %v5430_v30  ;;  %v982_v44 = vpop.f32.mrf.mxu3 }
 0x1a1   :  { %v3258_v60 = vadd.f32 1.0, %v3180_v58  ;;  %v2168_v23 = vmul.f32 %v5460_v22, %v2090_v4  ;;  %v5486_v48 = vpop.eup %3951  ;;  %v5490_v29 = vadd.f32 %v4454_v27, %v765_v46  ;;  %803 = vmatmul.bf16.gmra.mxu1 %v3608_v41  ;;  %1019 = vmatmul.bf16.gmra.mxu3 %v3608_v41  ;;  %v767_v6 = vadd.f32 %v766_v36, %v658_v40  ;;  %v874_v4 = vpop.f32.mrf.mxu2 }
 0x1a2   :  { %v2635_v35 = vmul.f32 %v5404_v14, %v2557_v39  ;;  %v3335_v59 = vmul.f32 %v3257_v9, %v5353_v31  ;;  %v2013_v52 = vmul.f32 1.0614054, %v5486_v48  ;;  %v2716_v54 = vsub.f32 0.0, %v5449_v62 }
 0x1a3   :  { %v3336_v14 = vmul.f32 %v3258_v60, %v5393_v32  ;;  %v2246_v49 = vadd.f32 1.4214138, %v2168_v23  ;;  %v5497_v50 = vmul.f32 0.70710677, %v5490_v29  ;;  %vm1545_vm2 = vcmp.ge.f32.partialorder %v5417_v51, 0.0  ;;  %v769_v23 = vpop.f32.mrf.mxu1 }
 0x1a4   :  { %v3025_v55 = vmul.f32 %v3950_v47, %v2635_v35  ;;  %v2091_v26 = vadd.f32 -1.4531521, %v2013_v52  ;;  %v2793_v31 = vmul.f32 %v2715_v12, %v5430_v30  ;;  %v5506_v8 = vadd.f32 %v4457_v34, %v981_v56  ;;  %v661_v35 = vpop.f32.mrf.mxu0 }
 0x1a5   :  { %v3398_v42 = vpack.c.bf16 %v3336_v14, %v3335_v59  ;;  %v2324_v20 = vmul.f32 %v5460_v22, %v2246_v49  ;;  %v1703_v32 = vand.u32 2147483647, %v5497_v50  ;;  %v1622_v17 = vsel %vm1544_vm1, 1.0, %v4130_v13 }
 0x1a6   :  { %v5501_v28 = vpop.eup %3953  ;;  %v2169_v1 = vmul.f32 %v5486_v48, %v2091_v26  ;;  %v3103_v25 = vsub.f32 1.0, %v3025_v55  ;;  %3955 = vpow2.f32 %v2903_v19  ;;  %v2794_v30 = vmul.f32 %v2716_v54, %v5449_v62 }
 0x1a7   :  { %3437 = vst [vmem:[%s6623_s3 + $0x78] sm:$0xff] %v3398_v42  ;;  %v2402_v11 = vadd.f32 -0.28449672, %v2324_v20  ;;  %v2014_v33 = vmul.f32 1.0614054, %v5501_v28  ;;  %v5521_v38 = vsel %vm1545_vm2, 1.0, %v4130_v13  ;;  %v5530_v24 = vadd.f32 %v4454_v27, %v767_v6 }
 0x1a8   :  { %v1781_v45 = vmul.f32 0.3275911, %v1703_v32  ;;  %v2247_v37 = vadd.f32 1.4214138, %v2169_v1  ;;  %v2905_v61 = vmul.f32 1.442695, %v2793_v31  ;;  %v3181_v51 = vmul.f32 %v3103_v25, %v5465_v0 }
 0x1a9   :  { %v2480_v18 = vmul.f32 %v5460_v22, %v2402_v11  ;;  %v2092_v15 = vadd.f32 -1.4531521, %v2014_v33  ;;  %vm1546_vm3 = vcmp.ge.f32.partialorder %v5441_v7, 0.0  ;;  %v5525_v43 = vmul.f32 0.70710677, %v5506_v8 }
 0x1aa   :  { %v1859_v63 = vadd.f32 1.0, %v1781_v45  ;;  %v2325_v62 = vmul.f32 %v5486_v48, %v2247_v37  ;;  %v2907_v53 = vmul.f32 1.442695, %v2794_v30  ;;  %v5538_v58 = vmul.f32 0.5, %v5424_v21 }
 0x1ab   :  { %v2558_v16 = vadd.f32 0.2548296, %v2480_v18  ;;  %v2170_v9 = vmul.f32 %v5501_v28, %v2092_v15  ;;  %v5534_v46 = vand.u32 2147483647, %v5525_v43  ;;  %v5543_v0 = vsel %vm1546_vm3, 1.0, %v4130_v13 }
 0x1ac   :  { %3957 = vrcp.f32 %v1859_v63  ;;  %v2403_v57 = vadd.f32 -0.28449672, %v2325_v62  ;;  %v3956_v40 = vpop.eup %3955  ;;  %v2717_v36 = vsub.f32 0.0, %v1703_v32  ;;  %v5549_v21 = vmul.f32 0.70710677, %v5530_v24 }
 0x1ad   :  { %v2636_v2 = vmul.f32 %v5460_v22, %v2558_v16  ;;  %v2248_v39 = vadd.f32 1.4214138, %v2170_v9  ;;  %3959 = vpow2.f32 %v2905_v61  ;;  %v1782_v41 = vmul.f32 0.3275911, %v5534_v46 }
 0x1ae   :  { %v2481_v22 = vmul.f32 %v5486_v48, %v2403_v57  ;;  %v3259_v56 = vadd.f32 1.0, %v3181_v51  ;;  %3961 = vpow2.f32 %v2907_v53  ;;  %v983_v12 = vadd.f32 %v982_v44, %v874_v4 }
 0x1af   :  { %v3026_v47 = vmul.f32 %v3956_v40, %v2636_v2  ;;  %v2326_v60 = vmul.f32 %v5501_v28, %v2248_v39  ;;  %v1860_v19 = vadd.f32 1.0, %v1782_v41  ;;  %v5552_v14 = vmul.f32 0.5, %v5490_v29  ;;  %v3782_v2 = vld [vmem:[%s6621_s0 + $0x124] sm:$0xf0] }
 0x1b0   :  { %v2559_v6 = vadd.f32 0.2548296, %v2481_v22  ;;  %v2795_v52 = vmul.f32 %v2717_v36, %v1703_v32  ;;  %v5557_v55 = vand.u32 2147483647, %v5549_v21  ;;  %v770_v54 = vadd.f32 %v769_v23, %v661_v35  ;;  %v985_v36 = vpop.f32.mrf.mxu3  ;;  %v3781_v35 = vld [vmem:[%s6621_s0 + $0x124] sm:$0xf] }
 0x1b1   :  { %v3104_v7 = vsub.f32 1.0, %v3026_v47  ;;  %v2404_v59 = vadd.f32 -0.28449672, %v2326_v60  ;;  %3963 = vrcp.f32 %v1860_v19  ;;  %v3337_v1 = vmul.f32 %v3259_v56, %v5436_v5 }
 0x1b2   :  { %v5554_v49 = vpop.eup %3957  ;;  %v2637_v20 = vmul.f32 %v5486_v48, %v2559_v6  ;;  %vm1547_vm4 = vcmp.ge.f32.partialorder %v5497_v50, 0.0  ;;  %v1783_v29 = vmul.f32 0.3275911, %v5557_v55  ;;  %v2909_v18 = vmul.f32 1.442695, %v2795_v52 }
 0x1b3   :  { %v3182_v42 = vmul.f32 %v3104_v7, %v1622_v17  ;;  %v2482_v26 = vmul.f32 %v5501_v28, %v2404_v59  ;;  %v2015_v31 = vmul.f32 1.0614054, %v5554_v49  ;;  %v3960_v11 = vpop.eup %3959  ;;  %v5566_v48 = vadd.f32 %v4457_v34, %v983_v12  ;;  %v3613_v12 = vld [vmem:[%s6621_s0 + $0x128] sm:$0xf0] }
 0x1b4   :  { %v3027_v33 = vmul.f32 %v3960_v11, %v2637_v20  ;;  %v3962_v45 = vpop.eup %3961  ;;  %v1861_v17 = vadd.f32 1.0, %v1783_v29  ;;  %vm1548_vm5 = vcmp.ge.f32.partialorder %v5525_v43, 0.0  ;;  %v2718_v16 = vsub.f32 0.0, %v5534_v46 }
 0x1b5   :  { %v3260_v32 = vadd.f32 1.0, %v3182_v42  ;;  %v2560_v25 = vadd.f32 0.2548296, %v2482_v26  ;;  %v2093_v30 = vadd.f32 -1.4531521, %v2015_v31  ;;  %v5588_v57 = vsel %vm1547_vm4, 1.0, %v4130_v13 }
 0x1b6   :  { %v3105_v15 = vsub.f32 1.0, %v3027_v33  ;;  %3965 = vrcp.f32 %v1861_v17  ;;  %v5576_v62 = vmul.f32 0.70710677, %v5566_v48  ;;  %v5591_v39 = vmul.f32 0.5, %v5506_v8  ;;  %v877_v8 = vpop.f32.mrf.mxu2 }
 0x1b7   :  { %v3338_v37 = vmul.f32 %v3260_v32, %v5468_v3  ;;  %v2638_v61 = vmul.f32 %v5501_v28, %v2560_v25  ;;  %v2171_v5 = vmul.f32 %v5554_v49, %v2093_v30  ;;  %v5571_v63 = vpop.eup %3963  ;;  %v3611_v28 = vld [vmem:[%s6621_s0 + $0x120] sm:$0xf]  ;;  %3967 = vpow2.f32 %v2909_v18  ;;  %v663_v25 = vpop.f32.mrf.mxu0 }
 0x1b8   :  { %v3183_v51 = vmul.f32 %v3105_v15, %v5521_v38  ;;  %v2016_v38 = vmul.f32 1.0614054, %v5571_v63  ;;  %v5595_v4 = vand.u32 2147483647, %v5576_v62  ;;  %v5604_v50 = vsel %vm1548_vm5, 1.0, %v4130_v13  ;;  %v771_v30 = vpop.f32.mrf.mxu1 }
 0x1b9   :  { %v3399_v9 = vpack.c.bf16 %v3338_v37, %v3337_v1  ;;  %v3028_v53 = vmul.f32 %v3962_v45, %v2638_v61  ;;  %v2249_v3 = vadd.f32 1.4214138, %v2171_v5  ;;  %v2796_v47 = vmul.f32 %v2718_v16, %v5534_v46 }
 0x1ba   :  { %v2094_v41 = vadd.f32 -1.4531521, %v2016_v38  ;;  %v1784_v22 = vmul.f32 0.3275911, %v5595_v4  ;;  %v5609_v60 = vadd.f32 %v4454_v27, %v770_v54  ;;  %v3261_v23 = vadd.f32 1.0, %v3183_v51 }
 0x1bb   :  { %3438 = vst [vmem:[%s6623_s3 + $0x80] sm:$0xff] %v3399_v9  ;;  %v3106_v44 = vsub.f32 1.0, %v3028_v53  ;;  %v2327_v40 = vmul.f32 %v5554_v49, %v2249_v3  ;;  %v3612_v19 = vor.u32 %v3782_v2, %v3611_v28  ;;  %v5622_v6 = vmul.f32 0.5, %v5530_v24  ;;  %v987_v3 = vpop.f32.mrf.mxu3 }
 0x1bc   :  { %v5618_v7 = vpop.eup %3965  ;;  %v2172_v46 = vmul.f32 %v5571_v63, %v2094_v41  ;;  %v2719_v59 = vsub.f32 0.0, %v5557_v55  ;;  %v1862_v52 = vadd.f32 1.0, %v1784_v22  ;;  %v5628_v20 = vmul.f32 0.70710677, %v5609_v60 }
 0x1bd   :  { %v3184_v56 = vmul.f32 %v3106_v44, %v5543_v0  ;;  %v2405_v43 = vadd.f32 -0.28449672, %v2327_v40  ;;  %v2017_v0 = vmul.f32 1.0614054, %v5618_v7  ;;  %700 = vmatmul.bf16.gmra.mxu0 %v3612_v19  ;;  %916 = vmatmul.bf16.gmra.mxu2 %v3612_v19  ;;  %v2911_v31 = vmul.f32 1.442695, %v2796_v47  ;;  %v3968_v1 = vpop.eup %3967 }
 0x1be   :  { %v2250_v26 = vadd.f32 1.4214138, %v2172_v46  ;;  %3969 = vrcp.f32 %v1862_v52  ;;  %v3616_v11 = vor.u32 %v3781_v35, %v3613_v12  ;;  %v3339_v24 = vmul.f32 %v3261_v23, %v5480_v10  ;;  %v879_v53 = vpop.f32.mrf.mxu2 }
 0x1bf   :  { %v3262_v54 = vadd.f32 1.0, %v3184_v56  ;;  %v2483_v42 = vmul.f32 %v5554_v49, %v2405_v43  ;;  %v2095_v33 = vadd.f32 -1.4531521, %v2017_v0  ;;  %vm1549_vm6 = vcmp.ge.f32.partialorder %v5549_v21, 0.0 }
 0x1c0   :  { %v2328_v45 = vmul.f32 %v5571_v63, %v2250_v26  ;;  %v2797_v18 = vmul.f32 %v2719_v59, %v5557_v55  ;;  %v1707_v17 = vand.u32 2147483647, %v5628_v20  ;;  %808 = vmatmul.bf16.gmra.mxu1 %v3616_v11  ;;  %1024 = vmatmul.bf16.gmra.mxu3 %v3616_v11  ;;  %3971 = vpow2.f32 %v2911_v31 }
 0x1c1   :  { %v3340_v29 = vmul.f32 %v3262_v54, %v5538_v58  ;;  %v2561_v32 = vadd.f32 0.2548296, %v2483_v42  ;;  %v2173_v10 = vmul.f32 %v5618_v7, %v2095_v33  ;;  %v986_v58 = vadd.f32 %v985_v36, %v877_v8 }
 0x1c2   :  { %v2406_v61 = vadd.f32 -0.28449672, %v2328_v45  ;;  %v1785_v5 = vmul.f32 0.3275911, %v1707_v17  ;;  %v772_v16 = vadd.f32 %v771_v30, %v663_v25  ;;  %v2720_v51 = vsub.f32 0.0, %v5595_v4 }
 0x1c3   :  { %v3400_v37 = vpack.c.bf16 %v3340_v29, %v3339_v24  ;;  %v2639_v15 = vmul.f32 %v5554_v49, %v2561_v32  ;;  %v2251_v55 = vadd.f32 1.4214138, %v2173_v10  ;;  %v2913_v2 = vmul.f32 1.442695, %v2797_v18 }
 0x1c4   :  { %v5642_v28 = vpop.eup %3969  ;;  %v2484_v49 = vmul.f32 %v5571_v63, %v2406_v61  ;;  %v1863_v38 = vadd.f32 1.0, %v1785_v5  ;;  %v5648_v36 = vadd.f32 %v4457_v34, %v986_v58  ;;  %v5651_v47 = vadd.f32 %v4454_v27, %v772_v16 }
 0x1c5   :  { %3439 = vst [vmem:[%s6623_s3 + $0x88] sm:$0xff] %v3400_v37  ;;  %v3029_v9 = vmul.f32 %v3968_v1, %v2639_v15  ;;  %v2329_v40 = vmul.f32 %v5618_v7, %v2251_v55  ;;  %v2018_v8 = vmul.f32 1.0614054, %v5642_v28  ;;  %v988_v22 = vadd.f32 %v987_v3, %v879_v53  ;;  %v774_v55 = vpop.f32.mrf.mxu1 }
 0x1c6   :  { %v2562_v41 = vadd.f32 0.2548296, %v2484_v49  ;;  %3973 = vrcp.f32 %v1863_v38  ;;  %v5656_v35 = vsel %vm1549_vm6, 1.0, %v4130_v13  ;;  %v2798_v43 = vmul.f32 %v2720_v51, %v5595_v4  ;;  %v3972_v19 = vpop.eup %3971 }
 0x1c7   :  { %v3107_v44 = vsub.f32 1.0, %v3029_v9  ;;  %v2407_v23 = vadd.f32 -0.28449672, %v2329_v40  ;;  %v2096_v56 = vadd.f32 -1.4531521, %v2018_v8  ;;  %3975 = vpow2.f32 %v2913_v2  ;;  %v666_v9 = vpop.f32.mrf.mxu0 }
 0x1c8   :  { %v2640_v12 = vmul.f32 %v5571_v63, %v2562_v41  ;;  %vm1550_vm7 = vcmp.ge.f32.partialorder %v5576_v62, 0.0  ;;  %v5662_v46 = vmul.f32 0.70710677, %v5648_v36  ;;  %v2721_v54 = vsub.f32 0.0, %v1707_v17  ;;  %v212_v2 = vld [vmem:[%s6621_s0 + $0x130] sm:$0x11] }
 0x1c9   :  { %v3185_v59 = vmul.f32 %v3107_v44, %v5588_v57  ;;  %v2485_v52 = vmul.f32 %v5618_v7, %v2407_v23  ;;  %v2174_v21 = vmul.f32 %v5642_v28, %v2096_v56  ;;  %v5669_v4 = vmul.f32 0.70710677, %v5651_v47 }
 0x1ca   :  { %v3030_v42 = vmul.f32 %v3972_v19, %v2640_v12  ;;  %v1708_v0 = vand.u32 2147483647, %v5662_v46  ;;  %v2915_v31 = vmul.f32 1.442695, %v2798_v43  ;;  %v5674_v1 = vmul.f32 0.5, %v5566_v48 }
 0x1cb   :  { %v2563_v63 = vadd.f32 0.2548296, %v2485_v52  ;;  %v2252_v26 = vadd.f32 1.4214138, %v2174_v21  ;;  %v5677_v57 = vsel %vm1550_vm7, 1.0, %v4130_v13  ;;  %v2799_v25 = vmul.f32 %v2721_v54, %v1707_v17 }
 0x1cc   :  { %v5671_v62 = vpop.eup %3973  ;;  %v3108_v11 = vsub.f32 1.0, %v3030_v42  ;;  %v1786_v24 = vmul.f32 0.3275911, %v1708_v0  ;;  %v3263_v45 = vadd.f32 1.0, %v3185_v59  ;;  %v5684_v15 = vand.u32 2147483647, %v5669_v4 }
 0x1cd   :  { %v2641_v29 = vmul.f32 %v5618_v7, %v2563_v63  ;;  %v2330_v32 = vmul.f32 %v5642_v28, %v2252_v26  ;;  %v2019_v33 = vmul.f32 1.0614054, %v5671_v62  ;;  %v3976_v30 = vpop.eup %3975  ;;  %3977 = vpow2.f32 %v2915_v31  ;;  %v882_v63 = vpop.f32.mrf.mxu2 }
 0x1ce   :  { %v3186_v18 = vmul.f32 %v3108_v11, %v5604_v50  ;;  %v1864_v37 = vadd.f32 1.0, %v1786_v24  ;;  %v1787_v7 = vmul.f32 0.3275911, %v5684_v15  ;;  %v5688_v5 = vadd.f32 %v4457_v34, %v988_v22  ;;  %v990_v26 = vpop.f32.mrf.mxu3 }
 0x1cf   :  { %v3031_v48 = vmul.f32 %v3976_v30, %v2641_v29  ;;  %v2408_v10 = vadd.f32 -0.28449672, %v2330_v32  ;;  %v2097_v58 = vadd.f32 -1.4531521, %v2019_v33  ;;  %vm1551_vm8 = vcmp.ge.f32.partialorder %v5628_v20, 0.0 }
 0x1d0   :  { %v3264_v61 = vadd.f32 1.0, %v3186_v18  ;;  %3979 = vrcp.f32 %v1864_v37  ;;  %v2917_v16 = vmul.f32 1.442695, %v2799_v25  ;;  %v3341_v51 = vmul.f32 %v3263_v45, %v5552_v14 }
 0x1d1   :  { %v2486_v17 = vmul.f32 %v5642_v28, %v2408_v10  ;;  %v2175_v50 = vmul.f32 %v5671_v62, %v2097_v58  ;;  %v3109_v3 = vsub.f32 1.0, %v3031_v48  ;;  %v1865_v49 = vadd.f32 1.0, %v1787_v7 }
 0x1d2   :  { %v3342_v53 = vmul.f32 %v3264_v61, %v5591_v39  ;;  %v5699_v44 = vmul.f32 0.5, %v5609_v60  ;;  %v2722_v8 = vsub.f32 0.0, %v1708_v0  ;;  %v5702_v22 = vmul.f32 0.70710677, %v5688_v5 }
 0x1d3   :  { %v2564_v38 = vadd.f32 0.2548296, %v2486_v17  ;;  %v2253_v40 = vadd.f32 1.4214138, %v2175_v50  ;;  %3981 = vrcp.f32 %v1865_v49  ;;  %v775_v14 = vadd.f32 %v774_v55, %v666_v9  ;;  %v3978_v23 = vpop.eup %3977  ;;  %v668_v49 = vpop.f32.mrf.mxu0 }
 0x1d4   :  { %v3401_v41 = vpack.c.bf16 %v3342_v53, %v3341_v51  ;;  %v5708_v56 = vsel %vm1551_vm8, 1.0, %v4130_v13  ;;  %v5712_v60 = vmul.f32 0.5, %v5648_v36  ;;  %v3187_v12 = vmul.f32 %v3109_v3, %v5656_v35 }
 0x1d5   :  { %v2642_v39 = vmul.f32 %v5642_v28, %v2564_v38  ;;  %v2331_v43 = vmul.f32 %v5671_v62, %v2253_v40  ;;  %v5721_v28 = vand.u32 2147483647, %v5702_v22  ;;  %v360_v59 = vunpack.c.l.b16 %v212_v2 }
 0x1d6   :  { %v5714_v19 = vpop.eup %3979  ;;  %3440 = vst [vmem:[%s6623_s3 + $0x90] sm:$0xff] %v3401_v41  ;;  %3983 = vpow2.f32 %v2917_v16  ;;  %vm1552_vm9 = vcmp.ge.f32.partialorder %v5662_v46, 0.0  ;;  %v2800_v36 = vmul.f32 %v2722_v8, %v1708_v0  ;;  %v2723_v54 = vsub.f32 0.0, %v5684_v15 }
 0x1d7   :  { %v3032_v20 = vmul.f32 %v3978_v23, %v2642_v39  ;;  %v2409_v52 = vadd.f32 -0.28449672, %v2331_v43  ;;  %v2020_v21 = vmul.f32 1.0614054, %v5714_v19  ;;  %v1788_v42 = vmul.f32 0.3275911, %v5721_v28  ;;  %v884_v39 = vpop.f32.mrf.mxu2  ;;  %v992_v43 = vpop.f32.mrf.mxu3 }
 0x1d8   :  { %v5729_v24 = vadd.f32 %v4454_v27, %v775_v14  ;;  %v3265_v32 = vadd.f32 1.0, %v3187_v12  ;;  %v400_v25 = vpack.c.b16 %v360_v59, %v360_v59  ;;  %v361_v30 = vunpack.c.h.b16 %v212_v2  ;;  %v776_v2 = vpop.f32.mrf.mxu1 }
 0x1d9   :  { %v3110_v31 = vsub.f32 1.0, %v3032_v20  ;;  %v2487_v35 = vmul.f32 %v5671_v62, %v2409_v52  ;;  %v2098_v11 = vadd.f32 -1.4531521, %v2020_v21  ;;  %v5731_v29 = vpop.eup %3981  ;;  %v1866_v33 = vadd.f32 1.0, %v1788_v42 }
 0x1da   :  { %v2021_v37 = vmul.f32 1.0614054, %v5731_v29  ;;  %v5739_v48 = vsel %vm1552_vm9, 1.0, %v4130_v13  ;;  %v5742_v10 = vmul.f32 0.5, %v5651_v47  ;;  %v5745_v58 = vmul.f32 0.70710677, %v5729_v24  ;;  %705 = vmatmul.bf16.gmra.mxu0 %v400_v25  ;;  %921 = vmatmul.bf16.gmra.mxu2 %v400_v25 }
 0x1db   :  { %v3188_v0 = vmul.f32 %v3110_v31, %v5677_v57  ;;  %v2565_v45 = vadd.f32 0.2548296, %v2487_v35  ;;  %v2176_v18 = vmul.f32 %v5714_v19, %v2098_v11  ;;  %3985 = vrcp.f32 %v1866_v33 }
 0x1dc   :  { %v3984_v57 = vpop.eup %3983  ;;  %v2099_v50 = vadd.f32 -1.4531521, %v2021_v37  ;;  %v2919_v16 = vmul.f32 1.442695, %v2800_v36  ;;  %v2801_v46 = vmul.f32 %v2723_v54, %v5684_v15  ;;  %v1711_v9 = vand.u32 2147483647, %v5745_v58 }
 0x1dd   :  { %v3266_v61 = vadd.f32 1.0, %v3188_v0  ;;  %v2643_v7 = vmul.f32 %v5671_v62, %v2565_v45  ;;  %v2254_v17 = vadd.f32 1.4214138, %v2176_v18  ;;  %v401_v55 = vpack.c.b16 %v361_v30, %v361_v30 }
 0x1de   :  { %v3343_v47 = vmul.f32 %v3265_v32, %v5622_v6  ;;  %v2177_v3 = vmul.f32 %v5731_v29, %v2099_v50  ;;  %vm1553_vm10 = vcmp.ge.f32.partialorder %v5669_v4, 0.0  ;;  %v2724_v62 = vsub.f32 0.0, %v5721_v28 }
 0x1df   :  { %v3344_v51 = vmul.f32 %v3266_v61, %v5674_v1  ;;  %v2332_v53 = vmul.f32 %v5714_v19, %v2254_v17  ;;  %v1789_v38 = vmul.f32 0.3275911, %v1711_v9  ;;  %813 = vmatmul.bf16.gmra.mxu1 %v401_v55  ;;  %1029 = vmatmul.bf16.gmra.mxu3 %v401_v55  ;;  %v991_v15 = vadd.f32 %v990_v26, %v882_v63  ;;  %v671_v55 = vpop.f32.mrf.mxu0 }
 0x1e0   :  { %v3033_v8 = vmul.f32 %v3984_v57, %v2643_v7  ;;  %v2255_v6 = vadd.f32 1.4214138, %v2177_v3  ;;  %3987 = vpow2.f32 %v2919_v16  ;;  %v777_v23 = vadd.f32 %v776_v2, %v668_v49 }
 0x1e1   :  { %v3402_v40 = vpack.c.bf16 %v3344_v51, %v3343_v47  ;;  %v2410_v41 = vadd.f32 -0.28449672, %v2332_v53  ;;  %v5756_v14 = vpop.eup %3985  ;;  %v1867_v1 = vadd.f32 1.0, %v1789_v38  ;;  %v2921_v20 = vmul.f32 1.442695, %v2801_v46 }
 0x1e2   :  { %v2333_v59 = vmul.f32 %v5731_v29, %v2255_v6  ;;  %v2022_v52 = vmul.f32 1.0614054, %v5756_v14  ;;  %v2802_v21 = vmul.f32 %v2724_v62, %v5721_v28  ;;  %v5766_v36 = vadd.f32 %v4457_v34, %v991_v15 }
 0x1e3   :  { %3441 = vst [vmem:[%s6623_s3 + $0x98] sm:$0xff] %v3402_v40  ;;  %v2488_v12 = vmul.f32 %v5714_v19, %v2410_v41  ;;  %3989 = vrcp.f32 %v1867_v1  ;;  %v3111_v54 = vsub.f32 1.0, %v3033_v8  ;;  %v993_v26 = vadd.f32 %v992_v43, %v884_v39 }
 0x1e4   :  { %v2411_v63 = vadd.f32 -0.28449672, %v2333_v59  ;;  %v5771_v31 = vsel %vm1553_vm10, 1.0, %v4130_v13  ;;  %v2100_v35 = vadd.f32 -1.4531521, %v2022_v52  ;;  %3991 = vpow2.f32 %v2921_v20 }
 0x1e5   :  { %v2566_v42 = vadd.f32 0.2548296, %v2488_v12  ;;  %v5774_v11 = vmul.f32 0.70710677, %v5766_v36  ;;  %v5779_v33 = vadd.f32 %v4454_v27, %v777_v23  ;;  %v2725_v0 = vsub.f32 0.0, %v1711_v9 }
 0x1e6   :  { %v2489_v28 = vmul.f32 %v5731_v29, %v2411_v63  ;;  %v3988_v25 = vpop.eup %3987  ;;  %v2178_v30 = vmul.f32 %v5756_v14, %v2100_v35  ;;  %v3189_v45 = vmul.f32 %v3111_v54, %v5708_v56  ;;  %v2923_v57 = vmul.f32 1.442695, %v2802_v21  ;;  %v779_v56 = vpop.f32.mrf.mxu1 }
 0x1e7   :  { %v2644_v32 = vmul.f32 %v5714_v19, %v2566_v42  ;;  %v5783_v4 = vand.u32 2147483647, %v5774_v11  ;;  %vm1554_vm11 = vcmp.ge.f32.partialorder %v5702_v22, 0.0  ;;  %v5793_v46 = vmul.f32 0.70710677, %v5779_v33 }
 0x1e8   :  { %v2567_v37 = vadd.f32 0.2548296, %v2489_v28  ;;  %v2256_v19 = vadd.f32 1.4214138, %v2178_v30  ;;  %v2803_v51 = vmul.f32 %v2725_v0, %v1711_v9  ;;  %v5797_v3 = vadd.f32 %v4457_v34, %v993_v26  ;;  %v995_v28 = vpop.f32.mrf.mxu3 }
 0x1e9   :  { %v3034_v18 = vmul.f32 %v3988_v25, %v2644_v32  ;;  %v5786_v61 = vpop.eup %3989  ;;  %v1790_v7 = vmul.f32 0.3275911, %v5783_v4  ;;  %v3267_v2 = vadd.f32 1.0, %v3189_v45  ;;  %v1632_v40 = vsel %vm1554_vm11, 1.0, %v4130_v13  ;;  %v887_v32 = vpop.f32.mrf.mxu2 }
 0x1ea   :  { %v2645_v50 = vmul.f32 %v5731_v29, %v2567_v37  ;;  %v2023_v16 = vmul.f32 1.0614054, %v5786_v61  ;;  %v2334_v47 = vmul.f32 %v5756_v14, %v2256_v19  ;;  %v3992_v49 = vpop.eup %3991  ;;  %v5801_v29 = vmul.f32 0.5, %v5688_v5 }
 0x1eb   :  { %v3112_v17 = vsub.f32 1.0, %v3034_v18  ;;  %v1868_v53 = vadd.f32 1.0, %v1790_v7  ;;  %v1713_v6 = vand.u32 2147483647, %v5793_v46  ;;  %vm1555_vm12 = vcmp.ge.f32.partialorder %v5745_v58, 0.0 }
 0x1ec   :  { %v2101_v38 = vadd.f32 -1.4531521, %v2023_v16  ;;  %v3035_v15 = vmul.f32 %v3992_v49, %v2645_v50  ;;  %v2412_v8 = vadd.f32 -0.28449672, %v2334_v47  ;;  %v2925_v5 = vmul.f32 1.442695, %v2803_v51 }
 0x1ed   :  { %v3190_v62 = vmul.f32 %v3112_v17, %v5739_v48  ;;  %3993 = vrcp.f32 %v1868_v53  ;;  %v5811_v48 = vmul.f32 0.70710677, %v5797_v3  ;;  %v3345_v23 = vmul.f32 %v3267_v2, %v5699_v44 }
 0x1ee   :  { %3995 = vpow2.f32 %v2923_v57  ;;  %v2179_v41 = vmul.f32 %v5786_v61, %v2101_v38  ;;  %v2490_v1 = vmul.f32 %v5756_v14, %v2412_v8  ;;  %v1791_v43 = vmul.f32 0.3275911, %v1713_v6  ;;  %v781_v45 = vpop.f32.mrf.mxu1 }
 0x1ef   :  { %v3268_v9 = vadd.f32 1.0, %v3190_v62  ;;  %v3113_v12 = vsub.f32 1.0, %v3035_v15  ;;  %v2726_v20 = vsub.f32 0.0, %v5783_v4  ;;  %v5817_v52 = vand.u32 2147483647, %v5811_v48 }
 0x1f0   :  { %v2257_v39 = vadd.f32 1.4214138, %v2179_v41  ;;  %v2568_v59 = vadd.f32 0.2548296, %v2490_v1  ;;  %v1869_v42 = vadd.f32 1.0, %v1791_v43  ;;  %v780_v63 = vadd.f32 %v779_v56, %v671_v55 }
 0x1f1   :  { %v3346_v22 = vmul.f32 %v3268_v9, %v5712_v60  ;;  %v5824_v60 = vmul.f32 0.5, %v5729_v24  ;;  %3997 = vpow2.f32 %v2925_v5  ;;  %v1792_v35 = vmul.f32 0.3275911, %v5817_v52  ;;  %v673_v24 = vpop.f32.mrf.mxu0 }
 0x1f2   :  { %v2335_v54 = vmul.f32 %v5786_v61, %v2257_v39  ;;  %v2646_v44 = vmul.f32 %v5756_v14, %v2568_v59  ;;  %v5833_v30 = vsel %vm1555_vm12, 1.0, %v4130_v13  ;;  %3999 = vrcp.f32 %v1869_v42 }
 0x1f3   :  { %v3403_v21 = vpack.c.bf16 %v3346_v22, %v3345_v23  ;;  %v5820_v26 = vpop.eup %3993  ;;  %v3191_v18 = vmul.f32 %v3113_v12, %v5771_v31  ;;  %v2804_v57 = vmul.f32 %v2726_v20, %v5783_v4  ;;  %v1870_v19 = vadd.f32 1.0, %v1792_v35 }
 0x1f4   :  { %v3996_v25 = vpop.eup %3995  ;;  %v2413_v0 = vadd.f32 -0.28449672, %v2335_v54  ;;  %v2024_v14 = vmul.f32 1.0614054, %v5820_v26  ;;  %v996_v50 = vadd.f32 %v995_v28, %v887_v32  ;;  %vm1556_vm13 = vcmp.ge.f32.partialorder %v5774_v11, 0.0 }
 0x1f5   :  { %3442 = vst [vmem:[%s6623_s3 + $0xa0] sm:$0xff] %v3403_v21  ;;  %v3036_v37 = vmul.f32 %v3996_v25, %v2646_v44  ;;  %v2727_v58 = vsub.f32 0.0, %v1713_v6  ;;  %v782_v55 = vadd.f32 %v781_v45, %v673_v24  ;;  %4001 = vrcp.f32 %v1870_v19  ;;  %v997_v24 = vpop.f32.mrf.mxu3 }
 0x1f6   :  { %v2491_v7 = vmul.f32 %v5786_v61, %v2413_v0  ;;  %v2102_v17 = vadd.f32 -1.4531521, %v2024_v14  ;;  %v5842_v51 = vadd.f32 %v4454_v27, %v780_v63  ;;  %v3269_v53 = vadd.f32 1.0, %v3191_v18  ;;  %v889_v14 = vpop.f32.mrf.mxu2 }
 0x1f7   :  { %v3114_v16 = vsub.f32 1.0, %v3036_v37  ;;  %v3998_v31 = vpop.eup %3997  ;;  %v2927_v38 = vmul.f32 1.442695, %v2804_v57  ;;  %v5851_v9 = vmul.f32 0.5, %v5766_v36  ;;  %v5855_v1 = vadd.f32 %v4457_v34, %v996_v50 }
 0x1f8   :  { %v2569_v56 = vadd.f32 0.2548296, %v2491_v7  ;;  %v2180_v47 = vmul.f32 %v5820_v26, %v2102_v17  ;;  %v5844_v49 = vpop.eup %3999  ;;  %v5848_v15 = vmul.f32 0.70710677, %v5842_v51  ;;  %v2805_v23 = vmul.f32 %v2727_v58, %v1713_v6 }
 0x1f9   :  { %v3192_v4 = vmul.f32 %v3114_v16, %v1632_v40  ;;  %v2025_v41 = vmul.f32 1.0614054, %v5844_v49  ;;  %v3347_v22 = vmul.f32 %v3269_v53, %v5742_v10  ;;  %v1634_v36 = vsel %vm1556_vm13, 1.0, %v4130_v13 }
 0x1fa   :  { %v2647_v2 = vmul.f32 %v5786_v61, %v2569_v56  ;;  %v2258_v62 = vadd.f32 1.4214138, %v2180_v47  ;;  %v1715_v61 = vand.u32 2147483647, %v5848_v15  ;;  %4003 = vpow2.f32 %v2927_v38 }
 0x1fb   :  { %v3270_v8 = vadd.f32 1.0, %v3192_v4  ;;  %v2103_v43 = vadd.f32 -1.4531521, %v2025_v41  ;;  %v5864_v12 = vpop.eup %4001  ;;  %v2728_v20 = vsub.f32 0.0, %v5817_v52  ;;  %v5870_v10 = vmul.f32 0.70710677, %v5855_v1 }
 0x1fc   :  { %v3037_v5 = vmul.f32 %v3998_v31, %v2647_v2  ;;  %v2336_v40 = vmul.f32 %v5820_v26, %v2258_v62  ;;  %v1793_v21 = vmul.f32 0.3275911, %v1715_v61  ;;  %v2026_v42 = vmul.f32 1.0614054, %v5864_v12 }
 0x1fd   :  { %v3348_v39 = vmul.f32 %v3270_v8, %v5801_v29  ;;  %v2181_v6 = vmul.f32 %v5844_v49, %v2103_v43  ;;  %v2929_v63 = vmul.f32 1.442695, %v2805_v23  ;;  %vm1557_vm14 = vcmp.ge.f32.partialorder %v5793_v46, 0.0 }
 0x1fe   :  { %v2414_v59 = vadd.f32 -0.28449672, %v2336_v40  ;;  %v3115_v29 = vsub.f32 1.0, %v3037_v5  ;;  %v1871_v44 = vadd.f32 1.0, %v1793_v21  ;;  %v2104_v32 = vadd.f32 -1.4531521, %v2026_v42 }
 0x1ff   :  { %v3404_v54 = vpack.c.bf16 %v3348_v39, %v3347_v22  ;;  %v2259_v35 = vadd.f32 1.4214138, %v2181_v6  ;;  %v2806_v25 = vmul.f32 %v2728_v20, %v5817_v52  ;;  %v5879_v0 = vadd.f32 %v4454_v27, %v782_v55  ;;  %v784_v20 = vpop.f32.mrf.mxu1 }
 0x200   :  { %v2492_v11 = vmul.f32 %v5820_v26, %v2414_v59  ;;  %4005 = vrcp.f32 %v1871_v44  ;;  %v5882_v45 = vmul.f32 0.5, %v5779_v33  ;;  %v2182_v37 = vmul.f32 %v5864_v12, %v2104_v32  ;;  %v4004_v19 = vpop.eup %4003  ;;  %v676_v59 = vpop.f32.mrf.mxu0 }
 0x201   :  { %3443 = vst [vmem:[%s6623_s3 + $0xa8] sm:$0xff] %v3404_v54  ;;  %v2337_v18 = vmul.f32 %v5844_v49, %v2259_v35  ;;  %v1716_v57 = vand.u32 2147483647, %v5870_v10  ;;  %v3193_v7 = vmul.f32 %v3115_v29, %v5833_v30  ;;  %v1635_v17 = vsel %vm1557_vm14, 1.0, %v4130_v13 }
 0x202   :  { %v2570_v28 = vadd.f32 0.2548296, %v2492_v11  ;;  %v2729_v50 = vsub.f32 0.0, %v1715_v61  ;;  %v2260_v58 = vadd.f32 1.4214138, %v2182_v37  ;;  %v998_v55 = vadd.f32 %v997_v24, %v889_v14 }
 0x203   :  { %v2415_v16 = vadd.f32 -0.28449672, %v2337_v18  ;;  %v1794_v33 = vmul.f32 0.3275911, %v1716_v57  ;;  %4007 = vpow2.f32 %v2929_v63  ;;  %v2931_v47 = vmul.f32 1.442695, %v2806_v25 }
 0x204   :  { %v2648_v52 = vmul.f32 %v5820_v26, %v2570_v28  ;;  %v5893_v31 = vmul.f32 0.70710677, %v5879_v0  ;;  %v2338_v30 = vmul.f32 %v5864_v12, %v2260_v58  ;;  %v3271_v46 = vadd.f32 1.0, %v3193_v7  ;;  %v892_v58 = vpop.f32.mrf.mxu2 }
 0x205   :  { %v2493_v53 = vmul.f32 %v5844_v49, %v2415_v16  ;;  %v1872_v26 = vadd.f32 1.0, %v1794_v33  ;;  %v2807_v62 = vmul.f32 %v2729_v50, %v1715_v61  ;;  %vm1558_vm15 = vcmp.ge.f32.partialorder %v5811_v48, 0.0  ;;  %v1000_v33 = vpop.f32.mrf.mxu3 }
 0x206   :  { %v3038_v56 = vmul.f32 %v4004_v19, %v2648_v52  ;;  %v5897_v4 = vpop.eup %4005  ;;  %v5900_v38 = vand.u32 2147483647, %v5893_v31  ;;  %v2416_v41 = vadd.f32 -0.28449672, %v2338_v30  ;;  %v2730_v61 = vsub.f32 0.0, %v1716_v57 }
 0x207   :  { %v2571_v8 = vadd.f32 0.2548296, %v2493_v53  ;;  %v2027_v5 = vmul.f32 1.0614054, %v5897_v4  ;;  %4009 = vrcp.f32 %v1872_v26  ;;  %v2933_v6 = vmul.f32 1.442695, %v2807_v62 }
 0x208   :  { %v3116_v2 = vsub.f32 1.0, %v3038_v56  ;;  %4011 = vpow2.f32 %v2931_v47  ;;  %v1795_v23 = vmul.f32 0.3275911, %v5900_v38  ;;  %v2494_v39 = vmul.f32 %v5864_v12, %v2416_v41 }
 0x209   :  { %v2649_v22 = vmul.f32 %v5844_v49, %v2571_v8  ;;  %v2105_v43 = vadd.f32 -1.4531521, %v2027_v5  ;;  %v4008_v21 = vpop.eup %4007  ;;  %v5908_v29 = vadd.f32 %v4457_v34, %v998_v55  ;;  %v785_v32 = vadd.f32 %v784_v20, %v676_v59  ;;  %v678_v20 = vpop.f32.mrf.mxu0 }
 0x20a   :  { %v3194_v40 = vmul.f32 %v3116_v2, %v1634_v36  ;;  %v1873_v42 = vadd.f32 1.0, %v1795_v23  ;;  %v3349_v36 = vmul.f32 %v3271_v46, %v5824_v60  ;;  %v2572_v63 = vadd.f32 0.2548296, %v2494_v39 }
 0x20b   :  { %v3039_v11 = vmul.f32 %v4008_v21, %v2649_v22  ;;  %v2183_v44 = vmul.f32 %v5897_v4, %v2105_v43  ;;  %v5914_v35 = vmul.f32 0.70710677, %v5908_v29  ;;  %v2808_v18 = vmul.f32 %v2730_v61, %v1716_v57  ;;  %v786_v21 = vpop.f32.mrf.mxu1 }
 0x20c   :  { %v3272_v54 = vadd.f32 1.0, %v3194_v40  ;;  %4013 = vrcp.f32 %v1873_v42  ;;  %v2650_v14 = vmul.f32 %v5864_v12, %v2572_v63  ;;  %v1636_v19 = vsel %vm1558_vm15, 1.0, %v4130_v13 }
 0x20d   :  { %v5916_v28 = vpop.eup %4009  ;;  %v3117_v25 = vsub.f32 1.0, %v3039_v11  ;;  %v2261_v24 = vadd.f32 1.4214138, %v2183_v44  ;;  %v1718_v7 = vand.u32 2147483647, %v5914_v35  ;;  %4015 = vpow2.f32 %v2933_v6 }
 0x20e   :  { %v3350_v49 = vmul.f32 %v3272_v54, %v5851_v9  ;;  %v4012_v37 = vpop.eup %4011  ;;  %v2028_v9 = vmul.f32 1.0614054, %v5916_v28  ;;  %v2731_v57 = vsub.f32 0.0, %v5900_v38  ;;  %v2935_v53 = vmul.f32 1.442695, %v2808_v18 }
 0x20f   :  { %v3195_v52 = vmul.f32 %v3117_v25, %v1635_v17  ;;  %v3040_v50 = vmul.f32 %v4012_v37, %v2650_v14  ;;  %v2339_v16 = vmul.f32 %v5897_v4, %v2261_v24  ;;  %v1796_v48 = vmul.f32 0.3275911, %v1718_v7 }
 0x210   :  { %v3405_v60 = vpack.c.bf16 %v3350_v49, %v3349_v36  ;;  %v2106_v12 = vadd.f32 -1.4531521, %v2028_v9  ;;  %v5933_v46 = vadd.f32 %v4454_v27, %v785_v32  ;;  %v1001_v2 = vadd.f32 %v1000_v33, %v892_v58 }
 0x211   :  { %v3273_v55 = vadd.f32 1.0, %v3195_v52  ;;  %v3118_v56 = vsub.f32 1.0, %v3040_v50  ;;  %v2417_v47 = vadd.f32 -0.28449672, %v2339_v16  ;;  %v1874_v26 = vadd.f32 1.0, %v1796_v48  ;;  %v1002_v48 = vpop.f32.mrf.mxu3 }
 0x212   :  { %3444 = vst [vmem:[%s6623_s3 + $0xb0] sm:$0xff] %v3405_v60  ;;  %v5929_v30 = vpop.eup %4013  ;;  %v2184_v17 = vmul.f32 %v5916_v28, %v2106_v12  ;;  %v1402_v62 = vmul.f32 0.5, %v5797_v3  ;;  %v5939_v40 = vmul.f32 0.5, %v5842_v51  ;;  %v2809_v22 = vmul.f32 %v2731_v57, %v5900_v38  ;;  %v894_v57 = vpop.f32.mrf.mxu2 }
 0x213   :  { %v3196_v8 = vmul.f32 %v3118_v56, %v1636_v19  ;;  %v2495_v41 = vmul.f32 %v5897_v4, %v2417_v47  ;;  %v2029_v5 = vmul.f32 1.0614054, %v5929_v30  ;;  %4017 = vrcp.f32 %v1874_v26  ;;  %v4016_v39 = vpop.eup %4015 }
 0x214   :  { %v2262_v23 = vadd.f32 1.4214138, %v2184_v17  ;;  %v3351_v3 = vmul.f32 %v3273_v55, %v5882_v45  ;;  %4019 = vpow2.f32 %v2935_v53  ;;  %v5945_v6 = vmul.f32 0.70710677, %v5933_v46 }
 0x215   :  { %v3274_v43 = vadd.f32 1.0, %v3196_v8  ;;  %v2573_v61 = vadd.f32 0.2548296, %v2495_v41  ;;  %v2107_v59 = vadd.f32 -1.4531521, %v2029_v5  ;;  %v5950_v36 = vadd.f32 %v4457_v34, %v1001_v2 }
 0x216   :  { %v2340_v54 = vmul.f32 %v5916_v28, %v2262_v23  ;;  %v2732_v63 = vsub.f32 0.0, %v1718_v7  ;;  %v1719_v44 = vand.u32 2147483647, %v5945_v6  ;;  %v787_v49 = vadd.f32 %v786_v21, %v678_v20  ;;  %v681_v21 = vpop.f32.mrf.mxu0 }
 0x217   :  { %v3352_v51 = vmul.f32 %v3274_v43, %v1402_v62  ;;  %v2651_v42 = vmul.f32 %v5897_v4, %v2573_v61  ;;  %v2185_v38 = vmul.f32 %v5929_v30, %v2107_v59  ;;  %v2937_v14 = vmul.f32 1.442695, %v2809_v22 }
 0x218   :  { %v2418_v11 = vadd.f32 -0.28449672, %v2340_v54  ;;  %vm1559_vm0 = vcmp.ge.f32.partialorder %v5848_v15, 0.0  ;;  %vm1560_vm1 = vcmp.ge.f32.partialorder %v5870_v10, 0.0  ;;  %v1797_v18 = vmul.f32 0.3275911, %v1719_v44 }
 0x219   :  { %v3406_v45 = vpack.c.bf16 %v3352_v51, %v3351_v3  ;;  %v3041_v32 = vmul.f32 %v4016_v39, %v2651_v42  ;;  %v2263_v25 = vadd.f32 1.4214138, %v2185_v38  ;;  %v5953_v24 = vpop.eup %4017  ;;  %v5964_v9 = vmul.f32 0.70710677, %v5950_v36  ;;  %v789_v3 = vpop.f32.mrf.mxu1 }
 0x21a   :  { %v2496_v4 = vmul.f32 %v5916_v28, %v2418_v11  ;;  %v2030_v19 = vmul.f32 1.0614054, %v5953_v24  ;;  %v4020_v52 = vpop.eup %4019  ;;  %v2810_v15 = vmul.f32 %v2732_v63, %v1718_v7  ;;  %v1875_v16 = vadd.f32 1.0, %v1797_v18 }
 0x21b   :  { %3445 = vst [vmem:[%s6623_s3 + $0xb8] sm:$0xff] %v3406_v45  ;;  %v3119_v37 = vsub.f32 1.0, %v3041_v32  ;;  %v2341_v60 = vmul.f32 %v5929_v30, %v2263_v25  ;;  %v1637_v58 = vsel %vm1559_vm0, 1.0, %v4130_v13  ;;  %4021 = vpow2.f32 %v2937_v14 }
 0x21c   :  { %v2574_v50 = vadd.f32 0.2548296, %v2496_v4  ;;  %v2108_v12 = vadd.f32 -1.4531521, %v2030_v19  ;;  %v1404_v56 = vmul.f32 0.5, %v5855_v1  ;;  %4023 = vrcp.f32 %v1875_v16 }
 0x21d   :  { %v2419_v33 = vadd.f32 -0.28449672, %v2341_v60  ;;  %v3197_v55 = vmul.f32 %v3119_v37, %v1637_v58  ;;  %v1638_v53 = vsel %vm1560_vm1, 1.0, %v4130_v13  ;;  %v1720_v26 = vand.u32 2147483647, %v5964_v9 }
 0x21e   :  { %v2652_v47 = vmul.f32 %v5916_v28, %v2574_v50  ;;  %v2186_v17 = vmul.f32 %v5953_v24, %v2108_v12  ;;  %v2939_v62 = vmul.f32 1.442695, %v2810_v15  ;;  %v5976_v8 = vadd.f32 %v4454_v27, %v787_v49 }
 0x21f   :  { %v2497_v7 = vmul.f32 %v5929_v30, %v2419_v33  ;;  %v1003_v41 = vadd.f32 %v1002_v48, %v894_v57  ;;  %v1798_v28 = vmul.f32 0.3275911, %v1720_v26  ;;  %v3275_v23 = vadd.f32 1.0, %v3197_v55 }
 0x220   :  { %v3042_v2 = vmul.f32 %v4020_v52, %v2652_v47  ;;  %v2264_v5 = vadd.f32 1.4214138, %v2186_v17  ;;  %v2733_v39 = vsub.f32 0.0, %v1719_v44  ;;  %v5979_v10 = vmul.f32 0.70710677, %v5976_v8  ;;  %v897_v17 = vpop.f32.mrf.mxu2 }
 0x221   :  { %v2575_v1 = vadd.f32 0.2548296, %v2497_v7  ;;  %v4022_v43 = vpop.eup %4021  ;;  %v1876_v20 = vadd.f32 1.0, %v1798_v28  ;;  %v5986_v42 = vmul.f32 0.5, %v5879_v0  ;;  %v2734_v38 = vsub.f32 0.0, %v1720_v26 }
 0x222   :  { %v3120_v22 = vsub.f32 1.0, %v3042_v2  ;;  %v2342_v59 = vmul.f32 %v5953_v24, %v2264_v5  ;;  %v5983_v54 = vpop.eup %4023  ;;  %v1721_v11 = vand.u32 2147483647, %v5979_v10  ;;  %v2811_v32 = vmul.f32 %v2733_v39, %v1719_v44 }
 0x223   :  { %v2653_v61 = vmul.f32 %v5929_v30, %v2575_v1  ;;  %v2031_v45 = vmul.f32 1.0614054, %v5983_v54  ;;  %4025 = vrcp.f32 %v1876_v20  ;;  %v3353_v14 = vmul.f32 %v3275_v23, %v5939_v40 }
 0x224   :  { %v3198_v51 = vmul.f32 %v3120_v22, %v1638_v53  ;;  %v2420_v49 = vadd.f32 -0.28449672, %v2342_v59  ;;  %4027 = vpow2.f32 %v2939_v62  ;;  %v1799_v25 = vmul.f32 0.3275911, %v1721_v11  ;;  %v683_v62 = vpop.f32.mrf.mxu0 }
 0x225   :  { %v3043_v63 = vmul.f32 %v4022_v43, %v2653_v61  ;;  %vm1561_vm2 = vcmp.ge.f32.partialorder %v5893_v31, 0.0  ;;  %v2109_v0 = vadd.f32 -1.4531521, %v2031_v45  ;;  %v5994_v19 = vadd.f32 %v4457_v34, %v1003_v41  ;;  %v791_v41 = vpop.f32.mrf.mxu1 }
 0x226   :  { %v3276_v30 = vadd.f32 1.0, %v3198_v51  ;;  %v2498_v4 = vmul.f32 %v5953_v24, %v2420_v49  ;;  %v1877_v60 = vadd.f32 1.0, %v1799_v25  ;;  %vm1562_vm3 = vcmp.ge.f32.partialorder %v5914_v35, 0.0 }
 0x227   :  { %v3121_v37 = vsub.f32 1.0, %v3043_v63  ;;  %v2187_v50 = vmul.f32 %v5983_v54, %v2109_v0  ;;  %v2812_v44 = vmul.f32 %v2734_v38, %v1720_v26  ;;  %v2941_v16 = vmul.f32 1.442695, %v2811_v32  ;;  %v1005_v26 = vpop.f32.mrf.mxu3 }
 0x228   :  { %v3354_v18 = vmul.f32 %v3276_v30, %v1404_v56  ;;  %v2576_v52 = vadd.f32 0.2548296, %v2498_v4  ;;  %4029 = vrcp.f32 %v1877_v60  ;;  %v5999_v40 = vmul.f32 0.70710677, %v5994_v19 }
 0x229   :  { %v6001_v58 = vpop.eup %4025  ;;  %v1639_v33 = vsel %vm1561_vm2, 1.0, %v4130_v13  ;;  %v1406_v12 = vmul.f32 0.5, %v5908_v29  ;;  %v2265_v48 = vadd.f32 1.4214138, %v2187_v50  ;;  %v790_v7 = vadd.f32 %v789_v3, %v681_v21 }
 0x22a   :  { %v3407_v15 = vpack.c.bf16 %v3354_v18, %v3353_v14  ;;  %v2654_v57 = vmul.f32 %v5953_v24, %v2576_v52  ;;  %v4028_v55 = vpop.eup %4027  ;;  %v3199_v56 = vmul.f32 %v3121_v37, %v1639_v33  ;;  %v2032_v47 = vmul.f32 1.0614054, %v6001_v58 }
 0x22b   :  { %v1722_v53 = vand.u32 2147483647, %v5999_v40  ;;  %v1640_v31 = vsel %vm1562_vm3, 1.0, %v4130_v13  ;;  %v2343_v24 = vmul.f32 %v5983_v54, %v2265_v48  ;;  %v2943_v2 = vmul.f32 1.442695, %v2812_v44 }
 0x22c   :  { %3446 = vst [vmem:[%s6623_s3 + $0xc0] sm:$0xff] %v3407_v15  ;;  %v3044_v29 = vmul.f32 %v4028_v55, %v2654_v57  ;;  %4031 = vpow2.f32 %v2941_v16  ;;  %v2110_v1 = vadd.f32 -1.4531521, %v2032_v47  ;;  %v2735_v5 = vsub.f32 0.0, %v1721_v11 }
 0x22d   :  { %v1800_v28 = vmul.f32 0.3275911, %v1722_v53  ;;  %v2421_v22 = vadd.f32 -0.28449672, %v2343_v24  ;;  %v1006_v39 = vadd.f32 %v1005_v26, %v897_v17  ;;  %v3277_v61 = vadd.f32 1.0, %v3199_v56 }
 0x22e   :  { %v3122_v23 = vsub.f32 1.0, %v3044_v29  ;;  %v6017_v43 = vpop.eup %4029  ;;  %v2188_v59 = vmul.f32 %v6001_v58, %v2110_v1  ;;  %v792_v20 = vadd.f32 %v791_v41, %v683_v62  ;;  %v6023_v38 = vadd.f32 %v4454_v27, %v790_v7 }
 0x22f   :  { %v1878_v35 = vadd.f32 1.0, %v1800_v28  ;;  %v2499_v3 = vmul.f32 %v5983_v54, %v2421_v22  ;;  %v2033_v51 = vmul.f32 1.0614054, %v6017_v43  ;;  %v2813_v49 = vmul.f32 %v2735_v5, %v1721_v11  ;;  %v899_v22 = vpop.f32.mrf.mxu2 }
 0x230   :  { %v3200_v21 = vmul.f32 %v3122_v23, %v1640_v31  ;;  %v2266_v63 = vadd.f32 1.4214138, %v2188_v59  ;;  %v2736_v25 = vsub.f32 0.0, %v1722_v53  ;;  %v3355_v4 = vmul.f32 %v3277_v61, %v5986_v42 }
 0x231   :  { %4033 = vrcp.f32 %v1878_v35  ;;  %v2577_v30 = vadd.f32 0.2548296, %v2499_v3  ;;  %v2111_v32 = vadd.f32 -1.4531521, %v2033_v51  ;;  %v6028_v18 = vmul.f32 0.70710677, %v6023_v38 }
 0x232   :  { %v3278_v45 = vadd.f32 1.0, %v3200_v21  ;;  %v4032_v14 = vpop.eup %4031  ;;  %v2344_v0 = vmul.f32 %v6001_v58, %v2266_v63  ;;  %v6031_v37 = vadd.f32 %v4457_v34, %v1006_v39  ;;  %4035 = vpow2.f32 %v2943_v2  ;;  %v1007_v39 = vpop.f32.mrf.mxu3 }
 0x233   :  { %v2655_v52 = vmul.f32 %v5983_v54, %v2577_v30  ;;  %v2189_v11 = vmul.f32 %v6017_v43, %v2111_v32  ;;  %v2945_v44 = vmul.f32 1.442695, %v2813_v49  ;;  %v6036_v15 = vand.u32 2147483647, %v6028_v18 }
 0x234   :  { %v3356_v60 = vmul.f32 %v3278_v45, %v1406_v12  ;;  %v2422_v50 = vadd.f32 -0.28449672, %v2344_v0  ;;  %v2814_v57 = vmul.f32 %v2736_v25, %v1722_v53  ;;  %v1407_v55 = vmul.f32 0.5, %v5933_v46 }
 0x235   :  { %v3045_v16 = vmul.f32 %v4032_v14, %v2655_v52  ;;  %v2267_v33 = vadd.f32 1.4214138, %v2189_v11  ;;  %v1801_v54 = vmul.f32 0.3275911, %v6036_v15  ;;  %v6044_v56 = vmul.f32 0.70710677, %v6031_v37  ;;  %v794_v11 = vpop.f32.mrf.mxu1 }
 0x236   :  { %v3408_v42 = vpack.c.bf16 %v3356_v60, %v3355_v4  ;;  %v2500_v12 = vmul.f32 %v6001_v58, %v2422_v50  ;;  %vm1563_vm4 = vcmp.ge.f32.partialorder %v5945_v6, 0.0  ;;  %vm1564_vm5 = vcmp.ge.f32.partialorder %v5964_v9, 0.0 }
 0x237   :  { %v6038_v48 = vpop.eup %4033  ;;  %v3123_v47 = vsub.f32 1.0, %v3045_v16  ;;  %v2345_v53 = vmul.f32 %v6017_v43, %v2267_v33  ;;  %4037 = vpow2.f32 %v2945_v44  ;;  %v1879_v17 = vadd.f32 1.0, %v1801_v54 }
 0x238   :  { %3447 = vst [vmem:[%s6623_s3 + $0xc8] sm:$0xff] %v3408_v42  ;;  %v2034_v7 = vmul.f32 1.0614054, %v6038_v48  ;;  %v2578_v46 = vadd.f32 0.2548296, %v2500_v12  ;;  %v6054_v24 = vadd.f32 %v4454_v27, %v792_v20  ;;  %v4036_v2 = vpop.eup %4035  ;;  %v1641_v62 = vsel %vm1563_vm4, 1.0, %v4130_v13 }
 0x239   :  { %v2423_v26 = vadd.f32 -0.28449672, %v2345_v53  ;;  %v2947_v29 = vmul.f32 1.442695, %v2814_v57  ;;  %4039 = vrcp.f32 %v1879_v17  ;;  %v1724_v41 = vand.u32 2147483647, %v6044_v56 }
 0x23a   :  { %v2112_v31 = vadd.f32 -1.4531521, %v2034_v7  ;;  %v2656_v6 = vmul.f32 %v6001_v58, %v2578_v46  ;;  %v3201_v1 = vmul.f32 %v3123_v47, %v1641_v62  ;;  %v1408_v5 = vmul.f32 0.5, %v5950_v36 }
 0x23b   :  { %v2501_v28 = vmul.f32 %v6017_v43, %v2423_v26  ;;  %v1642_v61 = vsel %vm1564_vm5, 1.0, %v4130_v13  ;;  %v6066_v35 = vmul.f32 0.5, %v5976_v8  ;;  %v1802_v58 = vmul.f32 0.3275911, %v1724_v41 }
 0x23c   :  { %v2190_v23 = vmul.f32 %v6038_v48, %v2112_v31  ;;  %v3046_v59 = vmul.f32 %v4036_v2, %v2656_v6  ;;  %4041 = vpow2.f32 %v2947_v29  ;;  %v6069_v36 = vmul.f32 0.70710677, %v6054_v24 }
 0x23d   :  { %v2579_v20 = vadd.f32 0.2548296, %v2501_v28  ;;  %v4038_v3 = vpop.eup %4037  ;;  %v2737_v63 = vsub.f32 0.0, %v6036_v15  ;;  %v1880_v49 = vadd.f32 1.0, %v1802_v58  ;;  %v1008_v45 = vadd.f32 %v1007_v39, %v899_v22  ;;  %v902_v22 = vpop.f32.mrf.mxu2 }
 0x23e   :  { %v2268_v21 = vadd.f32 1.4214138, %v2190_v23  ;;  %v3124_v51 = vsub.f32 1.0, %v3046_v59  ;;  %v3279_v30 = vadd.f32 1.0, %v3201_v1  ;;  %v6075_v8 = vand.u32 2147483647, %v6069_v36  ;;  %v1010_v39 = vpop.f32.mrf.mxu3 }
 0x23f   :  { %v2657_v9 = vmul.f32 %v6017_v43, %v2579_v20  ;;  %v6077_v25 = vpop.eup %4039  ;;  %vm1565_vm6 = vcmp.ge.f32.partialorder %v5979_v10, 0.0  ;;  %vm1566_vm7 = vcmp.ge.f32.partialorder %v5999_v40, 0.0  ;;  %4043 = vrcp.f32 %v1880_v49  ;;  %v686_v43 = vpop.f32.mrf.mxu0 }
 0x240   :  { %v2346_v32 = vmul.f32 %v6038_v48, %v2268_v21  ;;  %v3202_v14 = vmul.f32 %v3124_v51, %v1642_v61  ;;  %v2035_v60 = vmul.f32 1.0614054, %v6077_v25  ;;  %v1803_v52 = vmul.f32 0.3275911, %v6075_v8 }
 0x241   :  { %v3047_v4 = vmul.f32 %v4038_v3, %v2657_v9  ;;  %v2815_v44 = vmul.f32 %v2737_v63, %v6036_v15  ;;  %v2738_v42 = vsub.f32 0.0, %v1724_v41  ;;  %v3357_v33 = vmul.f32 %v3279_v30, %v1407_v55 }
 0x242   :  { %v2424_v0 = vadd.f32 -0.28449672, %v2346_v32  ;;  %v3280_v50 = vadd.f32 1.0, %v3202_v14  ;;  %v4042_v16 = vpop.eup %4041  ;;  %v2113_v12 = vadd.f32 -1.4531521, %v2035_v60  ;;  %v1881_v54 = vadd.f32 1.0, %v1803_v52 }
 0x243   :  { %v3125_v53 = vsub.f32 1.0, %v3047_v4  ;;  %v6086_v7 = vadd.f32 %v4457_v34, %v1008_v45  ;;  %v795_v46 = vadd.f32 %v794_v11, %v686_v43  ;;  %v1643_v17 = vsel %vm1565_vm6, 1.0, %v4130_v13 }
 0x244   :  { %v2502_v57 = vmul.f32 %v6038_v48, %v2424_v0  ;;  %v3358_v47 = vmul.f32 %v3280_v50, %v1408_v5  ;;  %v2191_v15 = vmul.f32 %v6077_v25, %v2113_v12  ;;  %4045 = vrcp.f32 %v1881_v54 }
 0x245   :  { %v6092_v31 = vpop.eup %4043  ;;  %v1410_v29 = vmul.f32 0.5, %v5994_v19  ;;  %v2949_v2 = vmul.f32 1.442695, %v2815_v44  ;;  %v6096_v62 = vmul.f32 0.70710677, %v6086_v7  ;;  %v1644_v6 = vsel %vm1566_vm7, 1.0, %v4130_v13 }
 0x246   :  { %v2580_v26 = vadd.f32 0.2548296, %v2502_v57  ;;  %v3409_v55 = vpack.c.bf16 %v3358_v47, %v3357_v33  ;;  %v2269_v1 = vadd.f32 1.4214138, %v2191_v15  ;;  %v2036_v5 = vmul.f32 1.0614054, %v6092_v31 }
 0x247   :  { %v3203_v28 = vmul.f32 %v3125_v53, %v1643_v17  ;;  %v2816_v23 = vmul.f32 %v2738_v42, %v1724_v41  ;;  %v6107_v19 = vand.u32 2147483647, %v6096_v62  ;;  %v6110_v40 = vmul.f32 0.5, %v6023_v38  ;;  %v688_v44 = vpop.f32.mrf.mxu0  ;;  %v796_v42 = vpop.f32.mrf.mxu1 }
 0x248   :  { %v2658_v10 = vmul.f32 %v6038_v48, %v2580_v26  ;;  %3448 = vst [vmem:[%s6623_s3 + $0xd0] sm:$0xff] %v3409_v55  ;;  %v2347_v48 = vmul.f32 %v6077_v25, %v2269_v1  ;;  %v2114_v59 = vadd.f32 -1.4531521, %v2036_v5  ;;  %4047 = vpow2.f32 %v2949_v2 }
 0x249   :  { %v2739_v58 = vsub.f32 0.0, %v6075_v8  ;;  %v1804_v20 = vmul.f32 0.3275911, %v6107_v19  ;;  %v6116_v21 = vadd.f32 %v4454_v27, %v795_v46  ;;  %v1011_v49 = vadd.f32 %v1010_v39, %v902_v22 }
 0x24a   :  { %v3048_v61 = vmul.f32 %v4042_v16, %v2658_v10  ;;  %v6118_v41 = vpop.eup %4045  ;;  %v2425_v51 = vadd.f32 -0.28449672, %v2347_v48  ;;  %v2192_v63 = vmul.f32 %v6092_v31, %v2114_v59  ;;  %v3281_v38 = vadd.f32 1.0, %v3203_v28  ;;  %v904_v59 = vpop.f32.mrf.mxu2 }
 0x24b   :  { %v2951_v45 = vmul.f32 1.442695, %v2816_v23  ;;  %v2037_v30 = vmul.f32 1.0614054, %v6118_v41  ;;  %v1882_v9 = vadd.f32 1.0, %v1804_v20  ;;  %v2817_v52 = vmul.f32 %v2739_v58, %v6075_v8  ;;  %v1012_v58 = vpop.f32.mrf.mxu3 }
 0x24c   :  { %v3126_v3 = vsub.f32 1.0, %v3048_v61  ;;  %v2503_v14 = vmul.f32 %v6077_v25, %v2425_v51  ;;  %v2270_v4 = vadd.f32 1.4214138, %v2192_v63  ;;  %v6124_v0 = vmul.f32 0.70710677, %v6116_v21 }
 0x24d   :  { %v2115_v60 = vadd.f32 -1.4531521, %v2037_v30  ;;  %4049 = vrcp.f32 %v1882_v9  ;;  %vm1567_vm8 = vcmp.ge.f32.partialorder %v6028_v18, 0.0  ;;  %v3359_v33 = vmul.f32 %v3281_v38, %v6066_v35 }
 0x24e   :  { %v3204_v32 = vmul.f32 %v3126_v3, %v1644_v6  ;;  %v2581_v11 = vadd.f32 0.2548296, %v2503_v14  ;;  %v2348_v50 = vmul.f32 %v6092_v31, %v2270_v4  ;;  %v4048_v16 = vpop.eup %4047  ;;  %4051 = vpow2.f32 %v2951_v45 }
 0x24f   :  { %v2193_v57 = vmul.f32 %v6118_v41, %v2115_v60  ;;  %v6132_v12 = vand.u32 2147483647, %v6124_v0  ;;  %v6136_v53 = vadd.f32 %v4457_v34, %v1011_v49  ;;  %v2953_v17 = vmul.f32 1.442695, %v2817_v52 }
 0x250   :  { %v3282_v43 = vadd.f32 1.0, %v3204_v32  ;;  %v2659_v8 = vmul.f32 %v6077_v25, %v2581_v11  ;;  %v2426_v47 = vadd.f32 -0.28449672, %v2348_v50  ;;  %v797_v15 = vadd.f32 %v796_v42, %v688_v44 }
 0x251   :  { %v2271_v46 = vadd.f32 1.4214138, %v2193_v57  ;;  %v1805_v26 = vmul.f32 0.3275911, %v6132_v12  ;;  %v2740_v6 = vsub.f32 0.0, %v6107_v19  ;;  %vm1568_vm9 = vcmp.ge.f32.partialorder %v6044_v56, 0.0  ;;  %v691_v57 = vpop.f32.mrf.mxu0 }
 0x252   :  { %v3360_v54 = vmul.f32 %v3282_v43, %v1410_v29  ;;  %v3049_v35 = vmul.f32 %v4048_v16, %v2659_v8  ;;  %v2504_v2 = vmul.f32 %v6092_v31, %v2426_v47  ;;  %v6146_v1 = vmul.f32 0.70710677, %v6136_v53 }
 0x253   :  { %v6141_v10 = vpop.eup %4049  ;;  %v2349_v25 = vmul.f32 %v6118_v41, %v2271_v46  ;;  %v1883_v29 = vadd.f32 1.0, %v1805_v26  ;;  %v1645_v39 = vsel %vm1567_vm8, 1.0, %v4130_v13  ;;  %v1412_v61 = vmul.f32 0.5, %v6031_v37 }
 0x254   :  { %v3410_v55 = vpack.c.bf16 %v3360_v54, %v3359_v33  ;;  %v3127_v5 = vsub.f32 1.0, %v3049_v35  ;;  %v2582_v28 = vadd.f32 0.2548296, %v2504_v2  ;;  %v2038_v23 = vmul.f32 1.0614054, %v6141_v10  ;;  %v4052_v22 = vpop.eup %4051  ;;  %v799_v54 = vpop.f32.mrf.mxu1 }
 0x255   :  { %v2427_v48 = vadd.f32 -0.28449672, %v2349_v25  ;;  %4053 = vrcp.f32 %v1883_v29  ;;  %v2818_v51 = vmul.f32 %v2740_v6, %v6107_v19  ;;  %v1646_v63 = vsel %vm1568_vm9, 1.0, %v4130_v13 }
 0x256   :  { %3449 = vst [vmem:[%s6623_s3 + $0xd8] sm:$0xff] %v3410_v55  ;;  %v2660_v20 = vmul.f32 %v6092_v31, %v2582_v28  ;;  %4055 = vpow2.f32 %v2953_v17  ;;  %v2116_v3 = vadd.f32 -1.4531521, %v2038_v23  ;;  %v1728_v18 = vand.u32 2147483647, %v6146_v1 }
 0x257   :  { %v2505_v49 = vmul.f32 %v6118_v41, %v2427_v48  ;;  %v6164_v37 = vadd.f32 %v4454_v27, %v797_v15  ;;  %v3205_v38 = vmul.f32 %v3127_v5, %v1645_v39  ;;  %v1013_v31 = vadd.f32 %v1012_v58, %v904_v59 }
 0x258   :  { %v3050_v45 = vmul.f32 %v4052_v22, %v2660_v20  ;;  %v2194_v30 = vmul.f32 %v6141_v10, %v2116_v3  ;;  %v6168_v9 = vmul.f32 0.5, %v6054_v24  ;;  %vm1569_vm10 = vcmp.ge.f32.partialorder %v6069_v36, 0.0 }
 0x259   :  { %v2583_v19 = vadd.f32 0.2548296, %v2505_v49  ;;  %v1806_v56 = vmul.f32 0.3275911, %v1728_v18  ;;  %v2955_v4 = vmul.f32 1.442695, %v2818_v51  ;;  %v6185_v26 = vadd.f32 %v4457_v34, %v1013_v31  ;;  %v1015_v49 = vpop.f32.mrf.mxu3 }
 0x25a   :  { %v3128_v32 = vsub.f32 1.0, %v3050_v45  ;;  %v2272_v14 = vadd.f32 1.4214138, %v2194_v30  ;;  %v2741_v60 = vsub.f32 0.0, %v6132_v12  ;;  %v6176_v50 = vmul.f32 0.70710677, %v6164_v37 }
 0x25b   :  { %v6172_v52 = vpop.eup %4053  ;;  %v2661_v43 = vmul.f32 %v6118_v41, %v2583_v19  ;;  %v1884_v11 = vadd.f32 1.0, %v1806_v56  ;;  %v3283_v24 = vadd.f32 1.0, %v3205_v38  ;;  %v1647_v8 = vsel %vm1569_vm10, 1.0, %v4130_v13 }
 0x25c   :  { %v4056_v44 = vpop.eup %4055  ;;  %v3206_v42 = vmul.f32 %v3128_v32, %v1646_v63  ;;  %v2350_v16 = vmul.f32 %v6141_v10, %v2272_v14  ;;  %v2039_v33 = vmul.f32 1.0614054, %v6172_v52  ;;  %vm1570_vm11 = vcmp.ge.f32.partialorder %v6096_v62, 0.0  ;;  %v801_v32 = vpop.f32.mrf.mxu1 }
 0x25d   :  { %v3051_v47 = vmul.f32 %v4056_v44, %v2661_v43  ;;  %4057 = vrcp.f32 %v1884_v11  ;;  %v2819_v15 = vmul.f32 %v2741_v60, %v6132_v12  ;;  %v6189_v55 = vand.u32 2147483647, %v6176_v50 }
 0x25e   :  { %v3284_v41 = vadd.f32 1.0, %v3206_v42  ;;  %v2428_v46 = vadd.f32 -0.28449672, %v2350_v16  ;;  %v2117_v17 = vadd.f32 -1.4531521, %v2039_v33  ;;  %4059 = vpow2.f32 %v2955_v4 }
 0x25f   :  { %v800_v35 = vadd.f32 %v799_v54, %v691_v57  ;;  %v3361_v36 = vmul.f32 %v3283_v24, %v6110_v40  ;;  %v3129_v29 = vsub.f32 1.0, %v3051_v47  ;;  %v2742_v5 = vsub.f32 0.0, %v1728_v18 }
 0x260   :  { %v3362_v2 = vmul.f32 %v3284_v41, %v1412_v61  ;;  %v2506_v6 = vmul.f32 %v6141_v10, %v2428_v46  ;;  %v2195_v25 = vmul.f32 %v6172_v52, %v2117_v17  ;;  %v1807_v28 = vmul.f32 0.3275911, %v6189_v55 }
 0x261   :  { %v6196_v23 = vmul.f32 0.70710677, %v6185_v26  ;;  %v1414_v59 = vmul.f32 0.5, %v6086_v7  ;;  %v1648_v40 = vsel %vm1570_vm11, 1.0, %v4130_v13  ;;  %v2957_v61 = vmul.f32 1.442695, %v2819_v15  ;;  %v907_v7 = vpop.f32.mrf.mxu2 }
 0x262   :  { %v3411_v22 = vpack.c.bf16 %v3362_v2, %v3361_v36  ;;  %v2584_v12 = vadd.f32 0.2548296, %v2506_v6  ;;  %v2273_v39 = vadd.f32 1.4214138, %v2195_v25  ;;  %v1885_v58 = vadd.f32 1.0, %v1807_v28 }
 0x263   :  { %v6198_v48 = vpop.eup %4057  ;;  %v6209_v3 = vmul.f32 0.5, %v6116_v21  ;;  %v3207_v62 = vmul.f32 %v3129_v29, %v1647_v8  ;;  %v2820_v45 = vmul.f32 %v2742_v5, %v1728_v18  ;;  %v1730_v30 = vand.u32 2147483647, %v6196_v23  ;;  %v693_v21 = vpop.f32.mrf.mxu0 }
 0x264   :  { %3450 = vst [vmem:[%s6623_s3 + $0xe0] sm:$0xff] %v3411_v22  ;;  %v2662_v20 = vmul.f32 %v6141_v10, %v2584_v12  ;;  %v2351_v51 = vmul.f32 %v6172_v52, %v2273_v39  ;;  %v2040_v63 = vmul.f32 1.0614054, %v6198_v48  ;;  %v4060_v38 = vpop.eup %4059  ;;  %4061 = vrcp.f32 %v1885_v58 }
 0x265   :  { %v6215_v10 = vadd.f32 %v4454_v27, %v800_v35  ;;  %vm1571_vm12 = vcmp.ge.f32.partialorder %v6124_v0, 0.0  ;;  %4063 = vpow2.f32 %v2957_v61  ;;  %v1808_v14 = vmul.f32 0.3275911, %v1730_v30 }
 0x266   :  { %v3052_v31 = vmul.f32 %v4060_v38, %v2662_v20  ;;  %v2429_v19 = vadd.f32 -0.28449672, %v2351_v51  ;;  %v2118_v56 = vadd.f32 -1.4531521, %v2040_v63  ;;  %v1016_v4 = vadd.f32 %v1015_v49, %v907_v7  ;;  %v804_v51 = vpop.f32.mrf.mxu1  ;;  %v1017_v38 = vpop.f32.mrf.mxu3 }
 0x267   :  { %v2743_v11 = vsub.f32 0.0, %v6189_v55  ;;  %v3285_v44 = vadd.f32 1.0, %v3207_v62  ;;  %v1886_v24 = vadd.f32 1.0, %v1808_v14  ;;  %v6222_v42 = vmul.f32 0.70710677, %v6215_v10 }
 0x268   :  { %v3130_v60 = vsub.f32 1.0, %v3052_v31  ;;  %v2507_v43 = vmul.f32 %v6172_v52, %v2429_v19  ;;  %v2196_v18 = vmul.f32 %v6198_v48, %v2118_v56  ;;  %v2959_v54 = vmul.f32 1.442695, %v2820_v45 }
 0x269   :  { %4065 = vrcp.f32 %v1886_v24  ;;  %v2744_v47 = vsub.f32 0.0, %v1730_v30  ;;  %v1731_v41 = vand.u32 2147483647, %v6222_v42  ;;  %v802_v46 = vadd.f32 %v801_v32, %v693_v21  ;;  %v909_v49 = vpop.f32.mrf.mxu2 }
 0x26a   :  { %v3208_v16 = vmul.f32 %v3130_v60, %v1648_v40  ;;  %v2585_v33 = vadd.f32 0.2548296, %v2507_v43  ;;  %v2274_v57 = vadd.f32 1.4214138, %v2196_v18  ;;  %v6224_v8 = vpop.eup %4061  ;;  %v3363_v6 = vmul.f32 %v3285_v44, %v6168_v9 }
 0x26b   :  { %v2041_v36 = vmul.f32 1.0614054, %v6224_v8  ;;  %v4064_v2 = vpop.eup %4063  ;;  %vm1572_vm13 = vcmp.ge.f32.partialorder %v6146_v1, 0.0  ;;  %v2821_v25 = vmul.f32 %v2743_v11, %v6189_v55  ;;  %v1809_v29 = vmul.f32 0.3275911, %v1731_v41  ;;  %v696_v20 = vpop.f32.mrf.mxu0 }
 0x26c   :  { %v3286_v17 = vadd.f32 1.0, %v3208_v16  ;;  %v2663_v15 = vmul.f32 %v6172_v52, %v2585_v33  ;;  %v2352_v35 = vmul.f32 %v6198_v48, %v2274_v57  ;;  %4067 = vpow2.f32 %v2959_v54 }
 0x26d   :  { %v2119_v12 = vadd.f32 -1.4531521, %v2041_v36  ;;  %v1887_v39 = vadd.f32 1.0, %v1809_v29  ;;  %v6234_v52 = vadd.f32 %v4457_v34, %v1016_v4  ;;  %v2822_v9 = vmul.f32 %v2744_v47, %v1730_v30 }
 0x26e   :  { %v3364_v5 = vmul.f32 %v3286_v17, %v1414_v59  ;;  %v3053_v28 = vmul.f32 %v4064_v2, %v2663_v15  ;;  %v2430_v22 = vadd.f32 -0.28449672, %v2352_v35  ;;  %v2961_v59 = vmul.f32 1.442695, %v2821_v25  ;;  %v6280_v29 = vpop.f32.mrf.mxu1 }
 0x26f   :  { %v2197_v58 = vmul.f32 %v6224_v8, %v2119_v12  ;;  %v6238_v63 = vpop.eup %4065  ;;  %4069 = vrcp.f32 %v1887_v39  ;;  %v6241_v7 = vmul.f32 0.70710677, %v6234_v52  ;;  %v1649_v62 = vsel %vm1571_vm12, 1.0, %v4130_v13  ;;  %v1020_v39 = vpop.f32.mrf.mxu3 }
 0x270   :  { %v3412_v40 = vpack.c.bf16 %v3364_v5, %v3363_v6  ;;  %v2508_v61 = vmul.f32 %v6198_v48, %v2430_v22  ;;  %v3131_v55 = vsub.f32 1.0, %v3053_v28  ;;  %v6250_v31 = vadd.f32 %v4454_v27, %v802_v46 }
 0x271   :  { %v2275_v30 = vadd.f32 1.4214138, %v2197_v58  ;;  %v1416_v19 = vmul.f32 0.5, %v6136_v53  ;;  %v2042_v56 = vmul.f32 1.0614054, %v6238_v63  ;;  %v2745_v21 = vsub.f32 0.0, %v1731_v41  ;;  %v912_v12 = vpop.f32.mrf.mxu2 }
 0x272   :  { %3451 = vst [vmem:[%s6623_s3 + $0xe8] sm:$0xff] %v3412_v40  ;;  %v2586_v45 = vadd.f32 0.2548296, %v2508_v61  ;;  %v6255_v32 = vand.u32 2147483647, %v6241_v7  ;;  %v1650_v14 = vsel %vm1572_vm13, 1.0, %v4130_v13  ;;  %v4068_v43 = vpop.eup %4067  ;;  %v3209_v18 = vmul.f32 %v3131_v55, %v1649_v62 }
 0x273   :  { %v2353_v4 = vmul.f32 %v6224_v8, %v2275_v30  ;;  %v2963_v60 = vmul.f32 1.442695, %v2822_v9  ;;  %v6263_v11 = vmul.f32 0.5, %v6164_v37  ;;  %v2120_v53 = vadd.f32 -1.4531521, %v2042_v56 }
 0x274   :  { %v2664_v0 = vmul.f32 %v6198_v48, %v2586_v45  ;;  %v1810_v44 = vmul.f32 0.3275911, %v6255_v32  ;;  %4071 = vpow2.f32 %v2961_v59  ;;  %v6267_v33 = vmul.f32 0.70710677, %v6250_v31 }
 0x275   :  { %v2431_v16 = vadd.f32 -0.28449672, %v2353_v4  ;;  %v6269_v1 = vpop.eup %4069  ;;  %v2198_v48 = vmul.f32 %v6238_v63, %v2120_v53  ;;  %v2823_v57 = vmul.f32 %v2745_v21, %v1731_v41  ;;  %v1018_v47 = vadd.f32 %v1017_v38, %v909_v49  ;;  %v6278_v41 = vpop.f32.mrf.mxu0 }
 0x276   :  { %v3054_v24 = vmul.f32 %v4068_v43, %v2664_v0  ;;  %v1888_v54 = vadd.f32 1.0, %v1810_v44  ;;  %4073 = vpow2.f32 %v2963_v60  ;;  %v2043_v17 = vmul.f32 1.0614054, %v6269_v1 }
 0x277   :  { %v2509_v37 = vmul.f32 %v6224_v8, %v2431_v16  ;;  %v3287_v15 = vadd.f32 1.0, %v3209_v18  ;;  %vm1573_vm14 = vcmp.ge.f32.partialorder %v6176_v50, 0.0  ;;  %v2276_v35 = vadd.f32 1.4214138, %v2198_v48 }
 0x278   :  { %v3132_v46 = vsub.f32 1.0, %v3054_v24  ;;  %4075 = vrcp.f32 %v1888_v54  ;;  %v2121_v6 = vadd.f32 -1.4531521, %v2043_v17  ;;  %v6276_v25 = vand.u32 2147483647, %v6267_v33 }
 0x279   :  { %v2587_v2 = vadd.f32 0.2548296, %v2509_v37  ;;  %v2354_v5 = vmul.f32 %v6238_v63, %v2276_v35  ;;  %v2965_v28 = vmul.f32 1.442695, %v2823_v57  ;;  %v805_v22 = vadd.f32 %v804_v51, %v696_v20  ;;  %v6319_v37 = vpop.f32.mrf.mxu1  ;;  %v6324_v35 = vpop.f32.mrf.mxu2 }
 0x27a   :  { %v3210_v36 = vmul.f32 %v3132_v46, %v1650_v14  ;;  %v4072_v40 = vpop.eup %4071  ;;  %v2199_v9 = vmul.f32 %v6269_v1, %v2121_v6  ;;  %v1811_v55 = vmul.f32 0.3275911, %v6276_v25  ;;  %v3365_v59 = vmul.f32 %v3287_v15, %v6209_v3 }
 0x27b   :  { %v2665_v58 = vmul.f32 %v6224_v8, %v2587_v2  ;;  %v2432_v49 = vadd.f32 -0.28449672, %v2354_v5  ;;  %v6288_v38 = vadd.f32 %v4457_v34, %v1018_v47  ;;  %vm1574_vm15 = vcmp.ge.f32.partialorder %v6196_v23, 0.0 }
 0x27c   :  { %v3288_v61 = vadd.f32 1.0, %v3210_v36  ;;  %v4074_v62 = vpop.eup %4073  ;;  %v2277_v20 = vadd.f32 1.4214138, %v2199_v9  ;;  %v1889_v51 = vadd.f32 1.0, %v1811_v55  ;;  %v2746_v21 = vsub.f32 0.0, %v6255_v32  ;;  %v6326_v36 = vpop.f32.mrf.mxu3 }
 0x27d   :  { %v3055_v30 = vmul.f32 %v4072_v40, %v2665_v58  ;;  %v2510_v8 = vmul.f32 %v6238_v63, %v2432_v49  ;;  %v6296_v14 = vmul.f32 0.70710677, %v6288_v38  ;;  %v1651_v0 = vsel %vm1573_vm14, 1.0, %v4130_v13  ;;  %v6317_v46 = vpop.f32.mrf.mxu0 }
 0x27e   :  { %v3366_v45 = vmul.f32 %v3288_v61, %v1416_v19  ;;  %v6290_v56 = vpop.eup %4075  ;;  %v2355_v19 = vmul.f32 %v6269_v1, %v2277_v20  ;;  %v1418_v43 = vmul.f32 0.5, %v6185_v26  ;;  %4077 = vrcp.f32 %v1889_v51 }
 0x27f   :  { %v2044_v4 = vmul.f32 1.0614054, %v6290_v56  ;;  %v3133_v60 = vsub.f32 1.0, %v3055_v30  ;;  %v2588_v23 = vadd.f32 0.2548296, %v2510_v8  ;;  %v1652_v18 = vsel %vm1574_vm15, 1.0, %v4130_v13 }
 0x280   :  { %v3413_v3 = vpack.c.bf16 %v3366_v45, %v3365_v59  ;;  %v2433_v53 = vadd.f32 -0.28449672, %v2355_v19  ;;  %4079 = vpow2.f32 %v2965_v28  ;;  %v2824_v24 = vmul.f32 %v2746_v21, %v6255_v32 }
 0x281   :  { %v2122_v44 = vadd.f32 -1.4531521, %v2044_v4  ;;  %v2666_v50 = vmul.f32 %v6238_v63, %v2588_v23  ;;  %v1734_v16 = vand.u32 2147483647, %v6296_v14  ;;  %v6312_v48 = vadd.f32 %v4454_v27, %v805_v22 }
 0x282   :  { %3452 = vst [vmem:[%s6623_s3 + $0xf0] sm:$0xff] %v3413_v3  ;;  %v2511_v26 = vmul.f32 %v6269_v1, %v2433_v53  ;;  %v2747_v54 = vsub.f32 0.0, %v6276_v25  ;;  %v1021_v47 = vadd.f32 %v1020_v39, %v912_v12  ;;  %v3211_v17 = vmul.f32 %v3133_v60, %v1651_v0 }
 0x283   :  { %v2200_v57 = vmul.f32 %v6290_v56, %v2122_v44  ;;  %v3056_v63 = vmul.f32 %v4074_v62, %v2666_v50  ;;  %v6322_v32 = vmul.f32 0.5, %v6215_v10  ;;  %v1812_v15 = vmul.f32 0.3275911, %v1734_v16  ;;  %v6354_v50 = vpop.f32.mrf.mxu1 }
 0x284   :  { %v2589_v2 = vadd.f32 0.2548296, %v2511_v26  ;;  %v6329_v5 = vmul.f32 0.70710677, %v6312_v48  ;;  %v6331_v28 = vpop.eup %4077  ;;  %v2967_v12 = vmul.f32 1.442695, %v2824_v24  ;;  %v2825_v9 = vmul.f32 %v2747_v54, %v6276_v25  ;;  %v6361_v54 = vpop.f32.mrf.mxu2 }
 0x285   :  { %v2278_v6 = vadd.f32 1.4214138, %v2200_v57  ;;  %v3134_v22 = vsub.f32 1.0, %v3056_v63  ;;  %v1890_v39 = vadd.f32 1.0, %v1812_v15  ;;  %v2045_v58 = vmul.f32 1.0614054, %v6331_v28  ;;  %v6352_v44 = vpop.f32.mrf.mxu0 }
 0x286   :  { %v4080_v40 = vpop.eup %4079  ;;  %v2667_v61 = vmul.f32 %v6269_v1, %v2589_v2  ;;  %v3289_v55 = vadd.f32 1.0, %v3211_v17  ;;  %vm1575_vm0 = vcmp.ge.f32.partialorder %v6222_v42, 0.0  ;;  %v6339_v30 = vand.u32 2147483647, %v6329_v5 }
 0x287   :  { %v2356_v10 = vmul.f32 %v6290_v56, %v2278_v6  ;;  %v3212_v59 = vmul.f32 %v3134_v22, %v1652_v18  ;;  %4081 = vrcp.f32 %v1890_v39  ;;  %v2123_v45 = vadd.f32 -1.4531521, %v2045_v58 }
 0x288   :  { %v3057_v49 = vmul.f32 %v4080_v40, %v2667_v61  ;;  %4083 = vpow2.f32 %v2967_v12  ;;  %v2748_v1 = vsub.f32 0.0, %v1734_v16  ;;  %v6342_v51 = vadd.f32 %v4457_v34, %v1021_v47  ;;  %v6363_v47 = vpop.f32.mrf.mxu3 }
 0x289   :  { %v2434_v62 = vadd.f32 -0.28449672, %v2356_v10  ;;  %v3290_v20 = vadd.f32 1.0, %v3212_v59  ;;  %v2201_v25 = vmul.f32 %v6331_v28, %v2123_v45  ;;  %v2969_v21 = vmul.f32 1.442695, %v2825_v9 }
 0x28a   :  { %v1813_v3 = vmul.f32 0.3275911, %v6339_v30  ;;  %v3367_v0 = vmul.f32 %v3289_v55, %v6263_v11  ;;  %v3135_v4 = vsub.f32 1.0, %v3057_v49  ;;  %v6349_v60 = vmul.f32 0.70710677, %v6342_v51 }
 0x28b   :  { %v2512_v8 = vmul.f32 %v6290_v56, %v2434_v62  ;;  %v3368_v19 = vmul.f32 %v3290_v20, %v1418_v43  ;;  %vm1576_vm1 = vcmp.ge.f32.partialorder %v6241_v7, 0.0  ;;  %v2279_v18 = vadd.f32 1.4214138, %v2201_v25 }
 0x28c   :  { %v1891_v53 = vadd.f32 1.0, %v1813_v3  ;;  %v2826_v57 = vmul.f32 %v2748_v1, %v1734_v16  ;;  %v1736_v11 = vand.u32 2147483647, %v6349_v60  ;;  %v807_v43 = vadd.f32 %v6280_v29, %v6278_v41 }
 0x28d   :  { %v2590_v23 = vadd.f32 0.2548296, %v2512_v8  ;;  %v6356_v24 = vpop.eup %4081  ;;  %v3414_v26 = vpack.c.bf16 %v3368_v19, %v3367_v0  ;;  %v1653_v17 = vsel %vm1575_vm0, 1.0, %v4130_v13  ;;  %v2357_v15 = vmul.f32 %v6331_v28, %v2279_v18  ;;  %v6396_v3 = vpop.f32.mrf.mxu0 }
 0x28e   :  { %v2046_v2 = vmul.f32 1.0614054, %v6356_v24  ;;  %v4084_v16 = vpop.eup %4083  ;;  %v3213_v41 = vmul.f32 %v3135_v4, %v1653_v17  ;;  %v1420_v29 = vmul.f32 0.5, %v6234_v52  ;;  %4085 = vrcp.f32 %v1891_v53 }
 0x28f   :  { %v2668_v63 = vmul.f32 %v6290_v56, %v2590_v23  ;;  %3453 = vst [vmem:[%s6623_s3 + $0xf8] sm:$0xff] %v3414_v26  ;;  %v1814_v6 = vmul.f32 0.3275911, %v1736_v11  ;;  %v1654_v42 = vsel %vm1576_vm1, 1.0, %v4130_v13  ;;  %v2435_v56 = vadd.f32 -0.28449672, %v2357_v15  ;;  %v6407_v23 = vpop.f32.mrf.mxu2 }
 0x290   :  { %v2124_v12 = vadd.f32 -1.4531521, %v2046_v2  ;;  %4087 = vpow2.f32 %v2969_v21  ;;  %v2971_v39 = vmul.f32 1.442695, %v2826_v57  ;;  %v1023_v52 = vadd.f32 %v6326_v36, %v6324_v35 }
 0x291   :  { %v3058_v22 = vmul.f32 %v4084_v16, %v2668_v63  ;;  %v1892_v40 = vadd.f32 1.0, %v1814_v6  ;;  %v2513_v10 = vmul.f32 %v6331_v28, %v2435_v56  ;;  %v3291_v9 = vadd.f32 1.0, %v3213_v41 }
 0x292   :  { %v2202_v58 = vmul.f32 %v6356_v24, %v2124_v12  ;;  %v6383_v55 = vadd.f32 %v4454_v27, %v807_v43  ;;  %v810_v7 = vadd.f32 %v6319_v37, %v6317_v46  ;;  %v2749_v20 = vsub.f32 0.0, %v6339_v30  ;;  %v6398_v46 = vpop.f32.mrf.mxu1 }
 0x293   :  { %v3136_v61 = vsub.f32 1.0, %v3058_v22  ;;  %4089 = vrcp.f32 %v1892_v40  ;;  %v2591_v49 = vadd.f32 0.2548296, %v2513_v10  ;;  %v2750_v1 = vsub.f32 0.0, %v1736_v11 }
 0x294   :  { %v2280_v62 = vadd.f32 1.4214138, %v2202_v58  ;;  %v6387_v45 = vpop.eup %4085  ;;  %v6391_v8 = vmul.f32 0.70710677, %v6383_v55  ;;  %v3369_v0 = vmul.f32 %v3291_v9, %v6322_v32  ;;  %v6405_v4 = vadd.f32 %v4457_v34, %v1023_v52 }
 0x295   :  { %v3214_v59 = vmul.f32 %v3136_v61, %v1654_v42  ;;  %v2669_v36 = vmul.f32 %v6331_v28, %v2591_v49  ;;  %v2047_v21 = vmul.f32 1.0614054, %v6387_v45  ;;  %v6409_v28 = vpop.f32.mrf.mxu3  ;;  %vm1577_vm2 = vcmp.ge.f32.partialorder %v6267_v33, 0.0 }
 0x296   :  { %v2358_v25 = vmul.f32 %v6356_v24, %v2280_v62  ;;  %v4088_v37 = vpop.eup %4087  ;;  %v6402_v19 = vand.u32 2147483647, %v6391_v8  ;;  %4091 = vpow2.f32 %v2971_v39  ;;  %v2827_v32 = vmul.f32 %v2749_v20, %v6339_v30 }
 0x297   :  { %v3292_v35 = vadd.f32 1.0, %v3214_v59  ;;  %v3059_v53 = vmul.f32 %v4088_v37, %v2669_v36  ;;  %v2125_v57 = vadd.f32 -1.4531521, %v2047_v21  ;;  %v2828_v16 = vmul.f32 %v2750_v1, %v1736_v11 }
 0x298   :  { %v2436_v26 = vadd.f32 -0.28449672, %v2358_v25  ;;  %v1815_v17 = vmul.f32 0.3275911, %v6402_v19  ;;  %v6420_v42 = vmul.f32 0.70710677, %v6405_v4  ;;  %v6427_v12 = vadd.f32 %v4454_v27, %v810_v7  ;;  %v6446_v25 = vpop.f32.mrf.mxu2 }
 0x299   :  { %v3370_v18 = vmul.f32 %v3292_v35, %v1420_v29  ;;  %v6411_v43 = vpop.eup %4089  ;;  %v2203_v2 = vmul.f32 %v6387_v45, %v2125_v57  ;;  %v3137_v41 = vsub.f32 1.0, %v3059_v53  ;;  %v1421_v30 = vmul.f32 0.5, %v6250_v31  ;;  %v708_v31 = vpop.f32.mrf.mxu0 }
 0x29a   :  { %v2514_v15 = vmul.f32 %v6356_v24, %v2436_v26  ;;  %v2048_v29 = vmul.f32 1.0614054, %v6411_v43  ;;  %v1893_v6 = vadd.f32 1.0, %v1815_v17  ;;  %vm1578_vm3 = vcmp.ge.f32.partialorder %v6296_v14, 0.0  ;;  %v816_v52 = vpop.f32.mrf.mxu1 }
 0x29b   :  { %v3415_v63 = vpack.c.bf16 %v3370_v18, %v3369_v0  ;;  %v2281_v56 = vadd.f32 1.4214138, %v2203_v2  ;;  %v2973_v11 = vmul.f32 1.442695, %v2827_v32  ;;  %v1655_v40 = vsel %vm1577_vm2, 1.0, %v4130_v13 }
 0x29c   :  { %v2592_v22 = vadd.f32 0.2548296, %v2514_v15  ;;  %v2126_v39 = vadd.f32 -1.4531521, %v2048_v29  ;;  %4093 = vrcp.f32 %v1893_v6  ;;  %v2975_v58 = vmul.f32 1.442695, %v2828_v16  ;;  %v4092_v9 = vpop.eup %4091 }
 0x29d   :  { %3454 = vst [vmem:[%s6623_s3 + $0x100] sm:$0xff] %v3415_v63  ;;  %v2359_v10 = vmul.f32 %v6387_v45, %v2281_v56  ;;  %v3215_v59 = vmul.f32 %v3137_v41, %v1655_v40  ;;  %v1422_v7 = vmul.f32 0.5, %v6288_v38  ;;  %v6438_v49 = vand.u32 2147483647, %v6420_v42  ;;  %v6448_v38 = vpop.f32.mrf.mxu3 }
 0x29e   :  { %v2670_v61 = vmul.f32 %v6356_v24, %v2592_v22  ;;  %v2204_v14 = vmul.f32 %v6411_v43, %v2126_v39  ;;  %v1656_v62 = vsel %vm1578_vm3, 1.0, %v4130_v13  ;;  %v6442_v24 = vmul.f32 0.70710677, %v6427_v12 }
 0x29f   :  { %v2437_v20 = vadd.f32 -0.28449672, %v2359_v10  ;;  %4095 = vpow2.f32 %v2973_v11  ;;  %v2751_v35 = vsub.f32 0.0, %v6402_v19  ;;  %v1816_v36 = vmul.f32 0.3275911, %v6438_v49 }
 0x2a0   :  { %v3060_v33 = vmul.f32 %v4092_v9, %v2670_v61  ;;  %v2282_v1 = vadd.f32 1.4214138, %v2204_v14  ;;  %4097 = vpow2.f32 %v2975_v58  ;;  %v6452_v0 = vand.u32 2147483647, %v6442_v24  ;;  %v924_v52 = vpop.f32.mrf.mxu2 }
 0x2a1   :  { %v2515_v37 = vmul.f32 %v6387_v45, %v2437_v20  ;;  %v3293_v53 = vadd.f32 1.0, %v3215_v59  ;;  %v1894_v57 = vadd.f32 1.0, %v1816_v36  ;;  %v1026_v32 = vadd.f32 %v6363_v47, %v6361_v54 }
 0x2a2   :  { %v3138_v21 = vsub.f32 1.0, %v3060_v33  ;;  %v6454_v18 = vpop.eup %4093  ;;  %v2360_v26 = vmul.f32 %v6411_v43, %v2282_v1  ;;  %v1817_v2 = vmul.f32 0.3275911, %v6452_v0  ;;  %v6462_v16 = vmul.f32 0.5, %v6312_v48 }
 0x2a3   :  { %v2593_v63 = vadd.f32 0.2548296, %v2515_v37  ;;  %v2049_v15 = vmul.f32 1.0614054, %v6454_v18  ;;  %v2829_v29 = vmul.f32 %v2751_v35, %v6402_v19  ;;  %4099 = vrcp.f32 %v1894_v57 }
 0x2a4   :  { %v3216_v17 = vmul.f32 %v3138_v21, %v1656_v62  ;;  %v2438_v41 = vadd.f32 -0.28449672, %v2360_v26  ;;  %v1895_v11 = vadd.f32 1.0, %v1817_v2  ;;  %v3371_v54 = vmul.f32 %v3293_v53, %v1421_v30 }
 0x2a5   :  { %v2671_v22 = vmul.f32 %v6387_v45, %v2593_v63  ;;  %v2127_v56 = vadd.f32 -1.4531521, %v2049_v15  ;;  %v4096_v39 = vpop.eup %4095  ;;  %vm1579_vm4 = vcmp.ge.f32.partialorder %v6329_v5, 0.0  ;;  %v2977_v19 = vmul.f32 1.442695, %v2829_v29  ;;  %v1032_v30 = vpop.f32.mrf.mxu3 }
 0x2a6   :  { %v3294_v6 = vadd.f32 1.0, %v3216_v17  ;;  %v2516_v47 = vmul.f32 %v6411_v43, %v2438_v41  ;;  %v4098_v40 = vpop.eup %4097  ;;  %4101 = vrcp.f32 %v1895_v11  ;;  %v6470_v31 = vadd.f32 %v4457_v34, %v1026_v32 }
 0x2a7   :  { %v3061_v10 = vmul.f32 %v4096_v39, %v2671_v22  ;;  %v2205_v48 = vmul.f32 %v6454_v18, %v2127_v56  ;;  %v812_v45 = vadd.f32 %v6354_v50, %v6352_v44  ;;  %vm1580_vm5 = vcmp.ge.f32.partialorder %v6349_v60, 0.0 }
 0x2a8   :  { %v3372_v61 = vmul.f32 %v3294_v6, %v1422_v7  ;;  %v2594_v58 = vadd.f32 0.2548296, %v2516_v47  ;;  %v1028_v7 = vadd.f32 %v6409_v28, %v6407_v23  ;;  %v2752_v20 = vsub.f32 0.0, %v6438_v49 }
 0x2a9   :  { %v3139_v59 = vsub.f32 1.0, %v3061_v10  ;;  %v2283_v14 = vadd.f32 1.4214138, %v2205_v48  ;;  %v6476_v62 = vpop.eup %4099  ;;  %v6482_v1 = vmul.f32 0.70710677, %v6470_v31  ;;  %v1657_v44 = vsel %vm1579_vm4, 1.0, %v4130_v13 }
 0x2aa   :  { %v3416_v9 = vpack.c.bf16 %v3372_v61, %v3371_v54  ;;  %v2672_v33 = vmul.f32 %v6411_v43, %v2594_v58  ;;  %v2050_v23 = vmul.f32 1.0614054, %v6476_v62  ;;  %v1658_v36 = vsel %vm1580_vm5, 1.0, %v4130_v13 }
 0x2ab   :  { %v2361_v50 = vmul.f32 %v6454_v18, %v2283_v14  ;;  %v3217_v60 = vmul.f32 %v3139_v59, %v1657_v44  ;;  %v6493_v43 = vand.u32 2147483647, %v6482_v1  ;;  %4103 = vpow2.f32 %v2977_v19 }
 0x2ac   :  { %3455 = vst [vmem:[%s6623_s3 + $0x108] sm:$0xff] %v3416_v9  ;;  %v3062_v28 = vmul.f32 %v4098_v40, %v2672_v33  ;;  %v6495_v35 = vpop.eup %4101  ;;  %v2128_v37 = vadd.f32 -1.4531521, %v2050_v23  ;;  %v2830_v5 = vmul.f32 %v2752_v20, %v6438_v49  ;;  %v2753_v63 = vsub.f32 0.0, %v6452_v0 }
 0x2ad   :  { %v2439_v21 = vadd.f32 -0.28449672, %v2361_v50  ;;  %v2051_v26 = vmul.f32 1.0614054, %v6495_v35  ;;  %v1818_v57 = vmul.f32 0.3275911, %v6493_v43  ;;  %v6505_v15 = vadd.f32 %v4454_v27, %v812_v45 }
 0x2ae   :  { %v3140_v53 = vsub.f32 1.0, %v3062_v28  ;;  %v2206_v17 = vmul.f32 %v6476_v62, %v2128_v37  ;;  %v3295_v2 = vadd.f32 1.0, %v3217_v60  ;;  %v1424_v22 = vmul.f32 0.5, %v6342_v51 }
 0x2af   :  { %v2517_v32 = vmul.f32 %v6454_v18, %v2439_v21  ;;  %v2129_v29 = vadd.f32 -1.4531521, %v2051_v26  ;;  %v1896_v6 = vadd.f32 1.0, %v1818_v57  ;;  %v6509_v11 = vadd.f32 %v4457_v34, %v1028_v7  ;;  %v172_v26 = vld [vmem:[#allocation2 + $0x98] sm:$0x3] }
 0x2b0   :  { %v3218_v41 = vmul.f32 %v3140_v53, %v1658_v36  ;;  %v2284_v56 = vadd.f32 1.4214138, %v2206_v17  ;;  %v2979_v54 = vmul.f32 1.442695, %v2830_v5  ;;  %v2831_v48 = vmul.f32 %v2753_v63, %v6452_v0 }
 0x2b1   :  { %v2595_v49 = vadd.f32 0.2548296, %v2517_v32  ;;  %v2207_v47 = vmul.f32 %v6495_v35, %v2129_v29  ;;  %4105 = vrcp.f32 %v1896_v6  ;;  %v4104_v40 = vpop.eup %4103  ;;  %v6516_v58 = vmul.f32 0.70710677, %v6505_v15  ;;  %v173_v6 = vld [vmem:[#allocation2 + $0x110] sm:$0x3] }
 0x2b2   :  { %v3296_v39 = vadd.f32 1.0, %v3218_v41  ;;  %v2362_v10 = vmul.f32 %v6476_v62, %v2284_v56  ;;  %v3373_v51 = vmul.f32 %v3295_v2, %v6462_v16  ;;  %v6520_v52 = vmul.f32 0.70710677, %v6509_v11 }
 0x2b3   :  { %v2673_v61 = vmul.f32 %v6454_v18, %v2595_v49  ;;  %v2285_v45 = vadd.f32 1.4214138, %v2207_v47  ;;  %v1741_v59 = vand.u32 2147483647, %v6516_v58  ;;  %vm1581_vm6 = vcmp.ge.f32.partialorder %v6391_v8, 0.0 }
 0x2b4   :  { %v3374_v19 = vmul.f32 %v3296_v39, %v1424_v22  ;;  %v2440_v9 = vadd.f32 -0.28449672, %v2362_v10  ;;  %4107 = vpow2.f32 %v2979_v54  ;;  %v2981_v7 = vmul.f32 1.442695, %v2831_v48 }
 0x2b5   :  { %v3063_v30 = vmul.f32 %v4104_v40, %v2673_v61  ;;  %v2363_v0 = vmul.f32 %v6495_v35, %v2285_v45  ;;  %v2754_v16 = vsub.f32 0.0, %v6493_v43  ;;  %v1819_v33 = vmul.f32 0.3275911, %v1741_v59 }
 0x2b6   :  { %v3417_v14 = vpack.c.bf16 %v3374_v19, %v3373_v51  ;;  %v2518_v18 = vmul.f32 %v6476_v62, %v2440_v9  ;;  %v6533_v23 = vand.u32 2147483647, %v6520_v52  ;;  %v815_v21 = vadd.f32 %v6398_v46, %v6396_v3 }
 0x2b7   :  { %v6527_v20 = vpop.eup %4105  ;;  %v3141_v44 = vsub.f32 1.0, %v3063_v30  ;;  %v2441_v50 = vadd.f32 -0.28449672, %v2363_v0  ;;  %v1897_v36 = vadd.f32 1.0, %v1819_v33  ;;  %v1659_v37 = vsel %vm1581_vm6, 1.0, %v4130_v13 }
 0x2b8   :  { %3456 = vst [vmem:[%s6623_s3 + $0x110] sm:$0xff] %v3417_v14  ;;  %v2596_v60 = vadd.f32 0.2548296, %v2518_v18  ;;  %v2052_v28 = vmul.f32 1.0614054, %v6527_v20  ;;  %vm1582_vm7 = vcmp.ge.f32.partialorder %v6420_v42, 0.0  ;;  %v2832_v3 = vmul.f32 %v2754_v16, %v6493_v43 }
 0x2b9   :  { %v2519_v53 = vmul.f32 %v6495_v35, %v2441_v50  ;;  %v1820_v5 = vmul.f32 0.3275911, %v6533_v23  ;;  %4109 = vrcp.f32 %v1897_v36  ;;  %v3219_v2 = vmul.f32 %v3141_v44, %v1659_v37 }
 0x2ba   :  { %v2674_v57 = vmul.f32 %v6476_v62, %v2596_v60  ;;  %v2130_v32 = vadd.f32 -1.4531521, %v2052_v28  ;;  %v4108_v17 = vpop.eup %4107  ;;  %4111 = vpow2.f32 %v2981_v7  ;;  %v1110_v29 = vadd.f32 %v815_v21, %v172_v26 }
 0x2bb   :  { %v2597_v63 = vadd.f32 0.2548296, %v2519_v53  ;;  %v1898_v46 = vadd.f32 1.0, %v1820_v5  ;;  %v1031_v22 = vadd.f32 %v6448_v38, %v6446_v25  ;;  %v1660_v43 = vsel %vm1582_vm7, 1.0, %v4130_v13 }
 0x2bc   :  { %v3064_v8 = vmul.f32 %v4108_v17, %v2674_v57  ;;  %v2208_v41 = vmul.f32 %v6527_v20, %v2130_v32  ;;  %1188 = vst [vmem:[#allocation2 + $0x98] sm:$0x3] %v1110_v29  ;;  %v2983_v39 = vmul.f32 1.442695, %v2832_v3  ;;  %v2755_v54 = vsub.f32 0.0, %v1741_v59 }
 0x2bd   :  { %v2675_v62 = vmul.f32 %v6495_v35, %v2597_v63  ;;  %4113 = vrcp.f32 %v1898_v46  ;;  %v1111_v47 = vadd.f32 %v1031_v22, %v173_v6  ;;  %v3297_v61 = vadd.f32 1.0, %v3219_v2 }
 0x2be   :  { %v3142_v49 = vsub.f32 1.0, %v3064_v8  ;;  %v2286_v56 = vadd.f32 1.4214138, %v2208_v41  ;;  %v1425_v38 = vmul.f32 0.5, %v6383_v55  ;;  %v1426_v51 = vmul.f32 0.5, %v6405_v4 }
 0x2bf   :  { %v6553_v40 = vpop.eup %4109  ;;  %1189 = vst [vmem:[#allocation2 + $0x110] sm:$0x3] %v1111_v47  ;;  %4115 = vpow2.f32 %v2983_v39  ;;  %v2833_v9 = vmul.f32 %v2755_v54, %v1741_v59  ;;  %v2756_v14 = vsub.f32 0.0, %v6533_v23  ;;  %vm1583_vm8 = vcmp.ge.f32.partialorder %v6442_v24, 0.0 }
 0x2c0   :  { %v3220_v10 = vmul.f32 %v3142_v49, %v1660_v43  ;;  %v2364_v48 = vmul.f32 %v6527_v20, %v2286_v56  ;;  %v4112_v25 = vpop.eup %4111  ;;  %v2053_v35 = vmul.f32 1.0614054, %v6553_v40  ;;  %v3375_v18 = vmul.f32 %v3297_v61, %v1425_v38 }
 0x2c1   :  { %v3065_v42 = vmul.f32 %v4112_v25, %v2675_v62  ;;  %v2985_v36 = vmul.f32 1.442695, %v2833_v9  ;;  %v2834_v37 = vmul.f32 %v2756_v14, %v6533_v23  ;;  %vm1584_vm9 = vcmp.ge.f32.partialorder %v6482_v1, 0.0 }
 0x2c2   :  { %v3298_v19 = vadd.f32 1.0, %v3220_v10  ;;  %v2442_v45 = vadd.f32 -0.28449672, %v2364_v48  ;;  %v2131_v30 = vadd.f32 -1.4531521, %v2053_v35  ;;  %v1662_v6 = vsel %vm1584_vm9, 1.0, %v4130_v13 }
 0x2c3   :  { %v6560_v0 = vpop.eup %4113  ;;  %v1269_v33 = vld [vmem:[#allocation2 + $0x98] sm:$0x3]  ;;  %v3143_v50 = vsub.f32 1.0, %v3065_v42  ;;  %v2987_v8 = vmul.f32 1.442695, %v2834_v37  ;;  %4117 = vpow2.f32 %v2985_v36  ;;  %v1427_v56 = vmul.f32 0.5, %v6427_v12 }
 0x2c4   :  { %v3376_v7 = vmul.f32 %v3298_v19, %v1426_v51  ;;  %v2520_v16 = vmul.f32 %v6527_v20, %v2442_v45  ;;  %v2209_v55 = vmul.f32 %v6553_v40, %v2131_v30  ;;  %v2054_v4 = vmul.f32 1.0614054, %v6560_v0 }
 0x2c5   :  { %v6567_v59 = vadd.f32 %v4454_v27, %v1269_v33  ;;  %v4116_v57 = vpop.eup %4115  ;;  %v1661_v27 = vsel %vm1583_vm8, 1.0, %v4130_v13  ;;  %4119 = vpow2.f32 %v2987_v8  ;;  %v1428_v54 = vmul.f32 0.5, %v6470_v31 }
 0x2c6   :  { %v3418_v44 = vpack.c.bf16 %v3376_v7, %v3375_v18  ;;  %v2598_v60 = vadd.f32 0.2548296, %v2520_v16  ;;  %v2287_v28 = vadd.f32 1.4214138, %v2209_v55  ;;  %v2132_v21 = vadd.f32 -1.4531521, %v2054_v4 }
 0x2c7   :  { %v6575_v5 = vmul.f32 0.70710677, %v6567_v59  ;;  %v1270_v26 = vld [vmem:[#allocation2 + $0x110] sm:$0x3]  ;;  %v3221_v63 = vmul.f32 %v3143_v50, %v1661_v27  ;;  %vm1585_vm10 = vcmp.ge.f32.partialorder %v6516_v58, 0.0  ;;  %vm1586_vm11 = vcmp.ge.f32.partialorder %v6520_v52, 0.0 }
 0x2c8   :  { %3457 = vst [vmem:[%s6623_s3 + $0x118] sm:$0xff] %v3418_v44  ;;  %v2676_v53 = vmul.f32 %v6527_v20, %v2598_v60  ;;  %v2365_v32 = vmul.f32 %v6553_v40, %v2287_v28  ;;  %v2210_v17 = vmul.f32 %v6560_v0, %v2132_v21  ;;  %v6583_v23 = vadd.f32 %v4457_v34, %v1270_v26 }
 0x2c9   :  { %v1743_v3 = vand.u32 2147483647, %v6575_v5  ;;  %v3299_v49 = vadd.f32 1.0, %v3221_v63  ;;  %v4118_v25 = vpop.eup %4117  ;;  %v1664_v33 = vsel %vm1586_vm11, 1.0, %v4130_v13  ;;  %v1429_v36 = vmul.f32 0.5, %v6505_v15 }
 0x2ca   :  { %v3066_v20 = vmul.f32 %v4116_v57, %v2676_v53  ;;  %v2443_v46 = vadd.f32 -0.28449672, %v2365_v32  ;;  %v2288_v2 = vadd.f32 1.4214138, %v2210_v17  ;;  %v6588_v29 = vmul.f32 0.70710677, %v6583_v23 }
 0x2cb   :  { %v1821_v24 = vmul.f32 0.3275911, %v1743_v3  ;;  %v3377_v38 = vmul.f32 %v3299_v49, %v1427_v56  ;;  %v4120_v30 = vpop.eup %4119  ;;  %v2757_v18 = vsub.f32 0.0, %v1743_v3  ;;  %v1430_v37 = vmul.f32 0.5, %v6509_v11 }
 0x2cc   :  { %v3144_v41 = vsub.f32 1.0, %v3066_v20  ;;  %v2521_v34 = vmul.f32 %v6553_v40, %v2443_v46  ;;  %v2366_v22 = vmul.f32 %v6560_v0, %v2288_v2  ;;  %v1744_v61 = vand.u32 2147483647, %v6588_v29 }
 0x2cd   :  { %v1899_v62 = vadd.f32 1.0, %v1821_v24  ;;  %v2835_v44 = vmul.f32 %v2757_v18, %v1743_v3  ;;  %vm1587_vm12 = vcmp.ge.f32.partialorder %v6575_v5, 0.0  ;;  %vm1588_vm13 = vcmp.ge.f32.partialorder %v6588_v29, 0.0 }
 0x2ce   :  { %v3222_v1 = vmul.f32 %v3144_v41, %v1662_v6  ;;  %v2599_v43 = vadd.f32 0.2548296, %v2521_v34  ;;  %v2444_v39 = vadd.f32 -0.28449672, %v2366_v22  ;;  %v1822_v51 = vmul.f32 0.3275911, %v1744_v61 }
 0x2cf   :  { %4121 = vrcp.f32 %v1899_v62  ;;  %v2758_v21 = vsub.f32 0.0, %v1744_v61  ;;  %v2989_v52 = vmul.f32 1.442695, %v2835_v44 }
 0x2d0   :  { %v3300_v47 = vadd.f32 1.0, %v3222_v1  ;;  %v2677_v10 = vmul.f32 %v6553_v40, %v2599_v43  ;;  %v2522_v48 = vmul.f32 %v6560_v0, %v2444_v39  ;;  %v1900_v45 = vadd.f32 1.0, %v1822_v51 }
 0x2d1   :  { %v1663_v40 = vsel %vm1585_vm10, 1.0, %v4130_v13  ;;  %v2836_v20 = vmul.f32 %v2758_v21, %v1744_v61  ;;  %v1432_v51 = vmul.f32 0.5, %v6583_v23 }
 0x2d2   :  { %v3378_v35 = vmul.f32 %v3300_v47, %v1428_v54  ;;  %v3067_v12 = vmul.f32 %v4118_v25, %v2677_v10  ;;  %v2600_v19 = vadd.f32 0.2548296, %v2522_v48  ;;  %4123 = vrcp.f32 %v1900_v45 }
 0x2d3   :  { %4125 = vpow2.f32 %v2989_v52  ;;  %v2991_v11 = vmul.f32 1.442695, %v2836_v20  ;;  %v1665_v54 = vsel %vm1587_vm12, 1.0, %v4130_v13  ;;  %v1666_v48 = vsel %vm1588_vm13, 1.0, %v4130_v13 }
 0x2d4   :  { %v3419_v42 = vpack.c.bf16 %v3378_v35, %v3377_v38  ;;  %v3145_v31 = vsub.f32 1.0, %v3067_v12  ;;  %v2678_v9 = vmul.f32 %v6560_v0, %v2600_v19  ;;  %v1431_v35 = vmul.f32 0.5, %v6567_v59 }
 0x2d5   :  { %v4122_v14 = vpop.eup %4121  ;;  %4127 = vpow2.f32 %v2991_v11 }
 0x2d6   :  { %3458 = vst [vmem:[%s6623_s3 + $0x120] sm:$0xff] %v3419_v42  ;;  %v3223_v7 = vmul.f32 %v3145_v31, %v1663_v40  ;;  %v3068_v58 = vmul.f32 %v4120_v30, %v2678_v9  ;;  %v2055_v16 = vmul.f32 1.0614054, %v4122_v14 }
 0x2d8   :  { %v3146_v55 = vsub.f32 1.0, %v3068_v58  ;;  %v2133_v4 = vadd.f32 -1.4531521, %v2055_v16  ;;  %v3301_v0 = vadd.f32 1.0, %v3223_v7  ;;  %v4124_v28 = vpop.eup %4123 }
 0x2d9   :  { %v2056_v57 = vmul.f32 1.0614054, %v4124_v28  ;;  %v4126_v22 = vpop.eup %4125 }
 0x2da   :  { %v3224_v50 = vmul.f32 %v3146_v55, %v1664_v33  ;;  %v2211_v60 = vmul.f32 %v4122_v14, %v2133_v4  ;;  %v3379_v27 = vmul.f32 %v3301_v0, %v1429_v36 }
 0x2db   :  { %v2134_v63 = vadd.f32 -1.4531521, %v2056_v57  ;;  %v4128_v39 = vpop.eup %4127 }
 0x2dc   :  { %v3302_v53 = vadd.f32 1.0, %v3224_v50  ;;  %v2289_v26 = vadd.f32 1.4214138, %v2211_v60 }
 0x2dd   :  { %v2212_v2 = vmul.f32 %v4124_v28, %v2134_v63 }
 0x2de   :  { %v3380_v32 = vmul.f32 %v3302_v53, %v1430_v37  ;;  %v2367_v17 = vmul.f32 %v4122_v14, %v2289_v26 }
 0x2df   :  { %v2290_v8 = vadd.f32 1.4214138, %v2212_v2 }
 0x2e0   :  { %v3420_v46 = vpack.c.bf16 %v3380_v32, %v3379_v27  ;;  %v2445_v3 = vadd.f32 -0.28449672, %v2367_v17 }
 0x2e1   :  { %v2368_v24 = vmul.f32 %v4124_v28, %v2290_v8 }
 0x2e2   :  { %3459 = vst [vmem:[%s6623_s3 + $0x128] sm:$0xff] %v3420_v46  ;;  %v2523_v15 = vmul.f32 %v4122_v14, %v2445_v3 }
 0x2e3   :  { %v2446_v34 = vadd.f32 -0.28449672, %v2368_v24 }
 0x2e4   :  { %v2601_v41 = vadd.f32 0.2548296, %v2523_v15 }
 0x2e5   :  { %v2524_v1 = vmul.f32 %v4124_v28, %v2446_v34 }
 0x2e6   :  { %v2679_v6 = vmul.f32 %v4122_v14, %v2601_v41 }
 0x2e7   :  { %v2602_v56 = vadd.f32 0.2548296, %v2524_v1 }
 0x2e8   :  { %v3069_v49 = vmul.f32 %v4126_v22, %v2679_v6 }
 0x2e9   :  { %v2680_v43 = vmul.f32 %v4124_v28, %v2602_v56 }
 0x2ea   :  { %v3147_v62 = vsub.f32 1.0, %v3069_v49 }
 0x2eb   :  { %v3070_v61 = vmul.f32 %v4128_v39, %v2680_v43 }
 0x2ec   :  { %v3225_v47 = vmul.f32 %v3147_v62, %v1665_v54 }
 0x2ed   :  { %v3148_v10 = vsub.f32 1.0, %v3070_v61 }
 0x2ee   :  { %v3303_v25 = vadd.f32 1.0, %v3225_v47 }
 0x2ef   :  { %v3226_v38 = vmul.f32 %v3148_v10, %v1666_v48 }
 0x2f0   :  { %v3381_v12 = vmul.f32 %v3303_v25, %v1431_v35 }
 0x2f1   :  { %v3304_v5 = vadd.f32 1.0, %v3226_v38 }
 0x2f3   :  { %v3382_v19 = vmul.f32 %v3304_v5, %v1432_v51 }
 0x2f5   :  { %v3421_v42 = vpack.c.bf16 %v3382_v19, %v3381_v12 }
 0x2f7   :  { %3460 = vst [vmem:[%s6623_s3 + $0x130] sm:$0x11] %v3421_v42 }

</bundles_post_ra>
